<compile_context>
chip_gen: v6e
topology: v6e:2x2x1
jax: 0.10.0
libtpu: 0.0.40
codegen_flags: <defaults>
</compile_context>

<pallas_src>
import functools

import jax
import jax.numpy as jnp
from jax.experimental import pallas as pl
from jax.experimental.pallas import tpu as pltpu


def _round_up(x, m):
    return ((x + m - 1) // m) * m


def _vmem_limit_bytes(required):
    """Derive vmem_limit_bytes from the actual shapes, capped under physical VMEM."""
    cap = 64 * 1024 * 1024  # conservative default (v7x per-TensorCore)
    try:
        cap = int(getattr(pltpu.get_tpu_info(), "vmem_capacity_bytes", cap))
    except Exception:
        pass
    want = int(required * 1.3) + (4 << 20)          # headroom for Mosaic temps
    return max(min(want, cap - (8 << 20)), 16 << 20)


# --------------------------- Fused encoder kernel -------------------------- #
def _encoder_kernel(x_ref, wx_ref, bx_ref, whh_ref, bhh_ref,
                    out_ref, hid_ref,
                    gi_f, gi_b,
                    *, seq_len, unroll):
    T = seq_len
    Bp, Hp = out_ref.shape[1], out_ref.shape[2]
    H3 = 3 * Hp

    # ---- Phase 1: gate inputs for ALL timesteps, BOTH directions, one MXU
    # pass (Linear layer + b_ih already folded into wx/bx host-side).
    # Lane layout of the 6Hp axis: [f_r, f_z, f_n, b_r, b_z, b_n], each Hp wide.
    gi = (jnp.dot(x_ref[...], wx_ref[...], preferred_element_type=jnp.float32)
          + bx_ref[...])
    gi_f[...] = gi[:, :H3].reshape(T, Bp, H3)
    gi_b[...] = gi[:, H3:].reshape(T, Bp, H3)

    # Hidden biases: broadcast ONCE, outside the recurrence (JAX does not CSE
    # broadcast_in_dim inside loops); a single fused add per step below.
    bhh = jnp.broadcast_to(bhh_ref[...], (Bp, 2 * H3))

    # ---- Phase 2: the recurrence.  Only ONE (Bp, 2Hp) @ (2Hp, 6Hp)
    # block-diagonal matmul per step sits on the serial critical path.
    def body(t, h_cat):
        tb = T - 1 - t
        gh = (jnp.dot(h_cat, whh_ref[...], preferred_element_type=jnp.float32)
              + bhh)                                  # (Bp, 6Hp)
        gif = gi_f[t]                                 # (Bp, 3Hp) forward gates
        gib = gi_b[tb]                                # (Bp, 3Hp) backward gates
        h_f = h_cat[:, :Hp]
        h_b = h_cat[:, Hp:]

        # Forward direction (gate order [r, z, n], PyTorch GRU semantics).
        r_f = jax.nn.sigmoid(gif[:, :Hp] + gh[:, :Hp])
        z_f = jax.nn.sigmoid(gif[:, Hp:2 * Hp] + gh[:, Hp:2 * Hp])
        n_f = jnp.tanh(gif[:, 2 * Hp:] + r_f * gh[:, 2 * Hp:H3])
        hf = (1.0 - z_f) * n_f + z_f * h_f

        # Backward direction.
        r_b = jax.nn.sigmoid(gib[:, :Hp] + gh[:, H3:H3 + Hp])
        z_b = jax.nn.sigmoid(gib[:, Hp:2 * Hp] + gh[:, H3 + Hp:H3 + 2 * Hp])
        n_b = jnp.tanh(gib[:, 2 * Hp:] + r_b * gh[:, H3 + 2 * Hp:])
        hb = (1.0 - z_b) * n_b + z_b * h_b

        out_ref[t] = hf
        # gi_b[tb] is dead after the read above: reuse its first Hp lanes as
        # the backward-output buffer (saves a whole (T, Bp, Hp) f32 scratch).
        gi_b[tb, :, :Hp] = hb
        return jnp.concatenate([hf, hb], axis=-1)

    h_fin = jax.lax.fori_loop(0, T, body,
                              jnp.zeros((Bp, 2 * Hp), jnp.float32),
                              unroll=unroll)

    # ---- Phase 3: fused fwd+bwd sum and final hidden states.
    out_ref[...] = out_ref[...] + gi_b[:, :, :Hp]
    hid_ref[0] = h_fin[:, :Hp]
    hid_ref[1] = h_fin[:, Hp:]


def _encoder_pallas(x2, wx, bx, whh_blk, bhh,
                    *, seq_len, batch_pad, hidden_pad, input_size):
    T, Bp, Hp, I = seq_len, batch_pad, hidden_pad, input_size

    # Unroll heuristic: full unroll only for short sequences; partial unroll
    # otherwise keeps the fwd/bwd chains interleaved without vreg spills.
    if T <= 16:
        unroll = T
    elif Hp >= 512:
        unroll = 2
    else:
        unroll = 8

    f32 = 4
    in_bytes = (T * Bp * I + I * 6 * Hp + 6 * Hp
                + 2 * Hp * 6 * Hp + 6 * Hp) * f32
    out_bytes = (T * Bp * Hp + 2 * Bp * Hp) * f32
    scratch_bytes = 2 * T * Bp * 3 * Hp * f32
    tmp_bytes = T * Bp * 6 * Hp * f32                 # phase-1 "gi" temporary
    vmem_needed = in_bytes + out_bytes + scratch_bytes + tmp_bytes

    cost = pl.CostEstimate(
        flops=2 * T * Bp * I * 6 * Hp + 2 * T * Bp * 2 * Hp * 6 * Hp,
        transcendentals=6 * T * Bp * Hp,
        bytes_accessed=in_bytes + out_bytes)

    return pl.pallas_call(
        functools.partial(_encoder_kernel, seq_len=T, unroll=unroll),
        out_shape=[jax.ShapeDtypeStruct((T, Bp, Hp), jnp.float32),   # outputs
                   jax.ShapeDtypeStruct((2, Bp, Hp), jnp.float32)],  # hidden
        # Single invocation, everything VMEM-resident: x and every weight are
        # DMA'd from HBM exactly once; gate inputs never round-trip HBM.
        scratch_shapes=[pltpu.VMEM((T, Bp, 3 * Hp), jnp.float32),    # fwd gates
                        pltpu.VMEM((T, Bp, 3 * Hp), jnp.float32)],   # bwd gates
        compiler_params=pltpu.CompilerParams(
            vmem_limit_bytes=_vmem_limit_bytes(vmem_needed)),
        cost_estimate=cost,
    )(x2, wx, bx, whh_blk, bhh)


# ------------------------------ Module forward ------------------------------ #
def encoder_rnn_forward(input_seq, params):
    T, B, I = input_seq.shape
    H = params["w_lin"].shape[1]
    Bp = _round_up(B, 8)      # f32 sublane width
    Hp = _round_up(H, 128)    # lane width -> every gate slice is whole-vreg
    dH = Hp - H
    hi = jax.lax.Precision.HIGHEST   # host-side folds in full f32

    x = input_seq
    if Bp != B:
        x = jnp.pad(x, ((0, 0), (0, Bp - B), (0, 0)))
    x2 = x.reshape(T * Bp, I)

    def pad_cols(m):          # (..., H) -> (..., Hp), zero-padded
        return jnp.pad(m, [(0, 0)] * (m.ndim - 1) + [(0, dH)])

    # ---- Fold the Linear layer into the input-to-hidden projection and pack
    # both directions / all gates into a single (I, 6Hp) matrix.  Zero padding
    # provably keeps the padded hidden lanes at 0 through the GRU recurrence.
    def fold_dir(wih, bih):
        w_cols = [pad_cols(jnp.dot(params["w_lin"], wih[g], precision=hi))
                  for g in range(3)]
        b_cols = [pad_cols(jnp.dot(params["b_lin"], wih[g], precision=hi)
                           + bih[g]) for g in range(3)]
        return jnp.concatenate(w_cols, axis=1), jnp.concatenate(b_cols, axis=1)

    wx_f, bx_f = fold_dir(params["wih_f"], params["bih_f"])
    wx_b, bx_b = fold_dir(params["wih_b"], params["bih_b"])
    wx = jnp.concatenate([wx_f, wx_b], axis=1)          # (I, 6Hp)
    bx = jnp.concatenate([bx_f, bx_b], axis=1)          # (1, 6Hp)

    # ---- Block-diagonal hidden-to-hidden weights (2Hp, 6Hp): the whole
    # per-step recurrence (both directions x 3 gates) is ONE MXU matmul.
    def pack_hh(whh):          # (3, H, H) -> (Hp, 3Hp), gate order [r, z, n]
        return jnp.concatenate(
            [jnp.pad(whh[g], ((0, dH), (0, dH))) for g in range(3)], axis=1)

    whh_fp = pack_hh(params["whh_f"])
    whh_bp = pack_hh(params["whh_b"])
    z3 = jnp.zeros((Hp, 3 * Hp), jnp.float32)
    whh_blk = jnp.concatenate(
        [jnp.concatenate([whh_fp, z3], axis=1),
         jnp.concatenate([z3, whh_bp], axis=1)], axis=0)  # (2Hp, 6Hp)

    bhh = jnp.concatenate(
        [pad_cols(params["bhh_f"][g]) for g in range(3)]
        + [pad_cols(params["bhh_b"][g]) for g in range(3)], axis=1)  # (1, 6Hp)

    out_pad, hid_pad = _encoder_pallas(
        x2, wx, bx, whh_blk, bhh,
        seq_len=T, batch_pad=Bp, hidden_pad=Hp, input_size=I)

    outputs = out_pad[:, :B, :H]     # fwd + bwd already summed in-kernel
    hidden = hid_pad[:, :B, :H]      # (2, B, H): [fwd final, bwd final]
    return outputs, hidden


# ---------------------------- Pure-JAX reference ---------------------------- #
def ref_forward(input_seq, params):
    H = params["w_lin"].shape[1]
    lin = input_seq @ params["w_lin"] + params["b_lin"][0]

    def cell(x, h, wih, whh, bih, bhh):
        r = jax.nn.sigmoid(x @ wih[0] + bih[0] + h @ whh[0] + bhh[0])
        z = jax.nn.sigmoid(x @ wih[1] + bih[1] + h @ whh[1] + bhh[1])
        n = jnp.tanh(x @ wih[2] + bih[2] + r * (h @ whh[2] + bhh[2]))
        return (1.0 - z) * n + z * h

    T, B, _ = lin.shape
    hf = jnp.zeros((B, H), jnp.float32)
    hb = jnp.zeros((B, H), jnp.float32)
    out_f = []
    out_b = [None] * T
    for t in range(T):
        hf = cell(lin[t], hf, params["wih_f"], params["whh_f"],
                  params["bih_f"], params["bhh_f"])
        out_f.append(hf)
        tb = T - 1 - t
        hb = cell(lin[tb], hb, params["wih_b"], params["whh_b"],
                  params["bih_b"], params["bhh_b"])
        out_b[tb] = hb
    out_f = jnp.stack(out_f)
    out_b = jnp.stack(out_b)
    return out_f + out_b, jnp.stack([out_f[-1], out_b[0]], axis=0)


# ---------------------------------- Params ---------------------------------- #
def init_params(key, input_size, hidden_size):
    H = hidden_size
    ks = jax.random.split(key, 10)
    lin_bound = 1.0 / jnp.sqrt(jnp.float32(input_size))
    gru_bound = 1.0 / jnp.sqrt(jnp.float32(H))

    def u(k, shape, bound):
        return jax.random.uniform(k, shape, jnp.float32, -bound, bound)

    # GRU weights stored per-gate, gate order [r, z, n], already transposed so
    # the math is x @ W[g] + b[g] / h @ W[g] + b[g].
    return {
        "w_lin": u(ks[0], (input_size, H), lin_bound),
        "b_lin": u(ks[1], (1, H), lin_bound),
        "wih_f": u(ks[2], (3, H, H), gru_bound),
        "whh_f": u(ks[3], (3, H, H), gru_bound),
        "bih_f": u(ks[4], (3, 1, H), gru_bound),
        "bhh_f": u(ks[5], (3, 1, H), gru_bound),
        "wih_b": u(ks[6], (3, H, H), gru_bound),
        "whh_b": u(ks[7], (3, H, H), gru_bound),
        "bih_b": u(ks[8], (3, 1, H), gru_bound),
        "bhh_b": u(ks[9], (3, 1, H), gru_bound),
    }


if __name__ == "__main__":
    key = jax.random.PRNGKey(0)
    k_in, k_par = jax.random.split(key)

    T, B, input_size, hidden_size = 8, 2, 16, 32
    input_seq = jax.random.normal(k_in, (T, B, input_size), jnp.float32)
    params = init_params(k_par, input_size, hidden_size)

    outputs, hidden = jax.jit(encoder_rnn_forward)(input_seq, params)
    jax.block_until_ready((outputs, hidden))

    ref_out, ref_hid = ref_forward(input_seq, params)
    assert outputs.shape == (T, B, hidden_size)
    assert hidden.shape == (2, B, hidden_size)
    # Linear-into-W_ih fold reassociates the f32 matmuls -> small bounded
    # drift vs. the unfused reference; validate at 1e-3 per the review.
    assert jnp.allclose(outputs, ref_out, atol=1e-3, rtol=1e-3)
    assert jnp.allclose(hidden, ref_hid, atol=1e-3, rtol=1e-3)

    print("KERNEL_OK")
</pallas_src>

<mosaic_0001>
module attributes {stable_mosaic.version = 11 : i64} {
  func.func @_encoder_kernel(%arg0: memref<64x16xf32, #tpu.memory_space<vmem>>, %arg1: memref<16x768xf32, #tpu.memory_space<vmem>>, %arg2: memref<1x768xf32, #tpu.memory_space<vmem>>, %arg3: memref<256x768xf32, #tpu.memory_space<vmem>>, %arg4: memref<1x768xf32, #tpu.memory_space<vmem>>, %arg5: memref<8x8x128xf32, #tpu.memory_space<vmem>>, %arg6: memref<2x8x128xf32, #tpu.memory_space<vmem>>, %arg7: memref<8x8x384xf32, #tpu.memory_space<vmem>>, %arg8: memref<8x8x384xf32, #tpu.memory_space<vmem>>) attributes {dimension_semantics = [], scalar_prefetch = 0 : i64, scratch_operands = 2 : i64, tpu.core_type = #tpu.core_type<tc>} {
    %c0 = arith.constant 0 : index
    %c0_0 = arith.constant 0 : index
    %0 = vector.load %arg0[%c0, %c0_0] : memref<64x16xf32, #tpu.memory_space<vmem>>, vector<64x16xf32>
    %c0_1 = arith.constant 0 : index
    %c0_2 = arith.constant 0 : index
    %1 = vector.load %arg1[%c0_1, %c0_2] : memref<16x768xf32, #tpu.memory_space<vmem>>, vector<16x768xf32>
    %cst = arith.constant dense<0.000000e+00> : vector<64x768xf32>
    %2 = tpu.matmul %0, %1, %cst {dimension_numbers = #tpu.dot_dimension_numbers<[1], [0], [0], [1], [0, 0, 1, 1], [], []>} : vector<64x16xf32>, vector<16x768xf32>, vector<64x768xf32> -> vector<64x768xf32>
    %c0_3 = arith.constant 0 : index
    %c0_4 = arith.constant 0 : index
    %3 = vector.load %arg2[%c0_3, %c0_4] : memref<1x768xf32, #tpu.memory_space<vmem>>, vector<1x768xf32>
    %4 = vector.broadcast %3 : vector<1x768xf32> to vector<64x768xf32>
    %5 = arith.addf %2, %4 : vector<64x768xf32>
    %6 = vector.extract_strided_slice %5 {offsets = [0, 0], sizes = [64, 384], strides = [1, 1]} : vector<64x768xf32> to vector<64x384xf32>
    %7 = vector.shape_cast %6 : vector<64x384xf32> to vector<8x8x384xf32>
    %c0_5 = arith.constant 0 : index
    %c0_6 = arith.constant 0 : index
    %c0_7 = arith.constant 0 : index
    %8 = vector.load %arg7[%c0_5, %c0_6, %c0_7] : memref<8x8x384xf32, #tpu.memory_space<vmem>>, vector<8x8x384xf32>
    tpu.vector_store %arg7[%c0_5, %c0_6, %c0_7], %7 {strides = array<i32>} : memref<8x8x384xf32, #tpu.memory_space<vmem>>, vector<8x8x384xf32>,
    %9 = vector.extract_strided_slice %5 {offsets = [0, 384], sizes = [64, 384], strides = [1, 1]} : vector<64x768xf32> to vector<64x384xf32>
    %10 = vector.shape_cast %9 : vector<64x384xf32> to vector<8x8x384xf32>
    %c0_8 = arith.constant 0 : index
    %c0_9 = arith.constant 0 : index
    %c0_10 = arith.constant 0 : index
    %11 = vector.load %arg8[%c0_8, %c0_9, %c0_10] : memref<8x8x384xf32, #tpu.memory_space<vmem>>, vector<8x8x384xf32>
    tpu.vector_store %arg8[%c0_8, %c0_9, %c0_10], %10 {strides = array<i32>} : memref<8x8x384xf32, #tpu.memory_space<vmem>>, vector<8x8x384xf32>,
    %c0_11 = arith.constant 0 : index
    %c0_12 = arith.constant 0 : index
    %12 = vector.load %arg4[%c0_11, %c0_12] : memref<1x768xf32, #tpu.memory_space<vmem>>, vector<1x768xf32>
    %13 = vector.shape_cast %12 : vector<1x768xf32> to vector<1x768xf32>
    %14 = vector.broadcast %13 : vector<1x768xf32> to vector<8x768xf32>
    %cst_13 = arith.constant 0.000000e+00 : f32
    %15 = vector.broadcast %cst_13 : f32 to vector<8x256xf32>
    %c0_i32 = arith.constant 0 : i32
    %c7_i32 = arith.constant 7 : i32
    %16 = arith.subi %c7_i32, %c0_i32 : i32
    %c0_14 = arith.constant 0 : index
    %c0_15 = arith.constant 0 : index
    %17 = vector.load %arg3[%c0_14, %c0_15] : memref<256x768xf32, #tpu.memory_space<vmem>>, vector<256x768xf32>
    %cst_16 = arith.constant dense<0.000000e+00> : vector<8x768xf32>
    %18 = tpu.matmul %15, %17, %cst_16 {dimension_numbers = #tpu.dot_dimension_numbers<[1], [0], [0], [1], [0, 0, 1, 1], [], []>} : vector<8x256xf32>, vector<256x768xf32>, vector<8x768xf32> -> vector<8x768xf32>
    %19 = arith.addf %18, %14 : vector<8x768xf32>
    %20 = arith.index_cast %c0_i32 : i32 to index
    %c0_17 = arith.constant 0 : index
    %c0_18 = arith.constant 0 : index
    %21 = vector.load %arg7[%20, %c0_17, %c0_18] : memref<8x8x384xf32, #tpu.memory_space<vmem>>, vector<1x8x384xf32>
    %22 = vector.shape_cast %21 : vector<1x8x384xf32> to vector<8x384xf32>
    %23 = arith.index_cast %16 : i32 to index
    %c0_19 = arith.constant 0 : index
    %c0_20 = arith.constant 0 : index
    %24 = vector.load %arg8[%23, %c0_19, %c0_20] : memref<8x8x384xf32, #tpu.memory_space<vmem>>, vector<1x8x384xf32>
    %25 = vector.shape_cast %24 : vector<1x8x384xf32> to vector<8x384xf32>
    %26 = vector.extract_strided_slice %15 {offsets = [0, 0], sizes = [8, 128], strides = [1, 1]} : vector<8x256xf32> to vector<8x128xf32>
    %27 = vector.extract_strided_slice %15 {offsets = [0, 128], sizes = [8, 128], strides = [1, 1]} : vector<8x256xf32> to vector<8x128xf32>
    %28 = vector.extract_strided_slice %22 {offsets = [0, 0], sizes = [8, 128], strides = [1, 1]} : vector<8x384xf32> to vector<8x128xf32>
    %29 = vector.extract_strided_slice %19 {offsets = [0, 0], sizes = [8, 128], strides = [1, 1]} : vector<8x768xf32> to vector<8x128xf32>
    %30 = arith.addf %28, %29 : vector<8x128xf32>
    %31 = arith.negf %30 : vector<8x128xf32>
    %32 = math.exp %31 : vector<8x128xf32>
    %cst_21 = arith.constant 1.000000e+00 : f32
    %33 = vector.broadcast %cst_21 : f32 to vector<8x128xf32>
    %34 = arith.addf %33, %32 : vector<8x128xf32>
    %35 = arith.divf %33, %34 : vector<8x128xf32>
    %36 = vector.extract_strided_slice %22 {offsets = [0, 128], sizes = [8, 128], strides = [1, 1]} : vector<8x384xf32> to vector<8x128xf32>
    %37 = vector.extract_strided_slice %19 {offsets = [0, 128], sizes = [8, 128], strides = [1, 1]} : vector<8x768xf32> to vector<8x128xf32>
    %38 = arith.addf %36, %37 : vector<8x128xf32>
    %39 = arith.negf %38 : vector<8x128xf32>
    %40 = math.exp %39 : vector<8x128xf32>
    %cst_22 = arith.constant 1.000000e+00 : f32
    %41 = vector.broadcast %cst_22 : f32 to vector<8x128xf32>
    %42 = arith.addf %41, %40 : vector<8x128xf32>
    %43 = arith.divf %41, %42 : vector<8x128xf32>
    %44 = vector.extract_strided_slice %22 {offsets = [0, 256], sizes = [8, 128], strides = [1, 1]} : vector<8x384xf32> to vector<8x128xf32>
    %45 = vector.extract_strided_slice %19 {offsets = [0, 256], sizes = [8, 128], strides = [1, 1]} : vector<8x768xf32> to vector<8x128xf32>
    %46 = arith.mulf %35, %45 : vector<8x128xf32>
    %47 = arith.addf %44, %46 : vector<8x128xf32>
    %48 = math.tanh %47 : vector<8x128xf32>
    %cst_23 = arith.constant 1.000000e+00 : f32
    %49 = vector.broadcast %cst_23 : f32 to vector<8x128xf32>
    %50 = arith.subf %49, %43 : vector<8x128xf32>
    %51 = arith.mulf %50, %48 : vector<8x128xf32>
    %52 = arith.mulf %43, %26 : vector<8x128xf32>
    %53 = arith.addf %51, %52 : vector<8x128xf32>
    %54 = vector.extract_strided_slice %25 {offsets = [0, 0], sizes = [8, 128], strides = [1, 1]} : vector<8x384xf32> to vector<8x128xf32>
    %55 = vector.extract_strided_slice %19 {offsets = [0, 384], sizes = [8, 128], strides = [1, 1]} : vector<8x768xf32> to vector<8x128xf32>
    %56 = arith.addf %54, %55 : vector<8x128xf32>
    %57 = arith.negf %56 : vector<8x128xf32>
    %58 = math.exp %57 : vector<8x128xf32>
    %cst_24 = arith.constant 1.000000e+00 : f32
    %59 = vector.broadcast %cst_24 : f32 to vector<8x128xf32>
    %60 = arith.addf %59, %58 : vector<8x128xf32>
    %61 = arith.divf %59, %60 : vector<8x128xf32>
    %62 = vector.extract_strided_slice %25 {offsets = [0, 128], sizes = [8, 128], strides = [1, 1]} : vector<8x384xf32> to vector<8x128xf32>
    %63 = vector.extract_strided_slice %19 {offsets = [0, 512], sizes = [8, 128], strides = [1, 1]} : vector<8x768xf32> to vector<8x128xf32>
    %64 = arith.addf %62, %63 : vector<8x128xf32>
    %65 = arith.negf %64 : vector<8x128xf32>
    %66 = math.exp %65 : vector<8x128xf32>
    %cst_25 = arith.constant 1.000000e+00 : f32
    %67 = vector.broadcast %cst_25 : f32 to vector<8x128xf32>
    %68 = arith.addf %67, %66 : vector<8x128xf32>
    %69 = arith.divf %67, %68 : vector<8x128xf32>
    %70 = vector.extract_strided_slice %25 {offsets = [0, 256], sizes = [8, 128], strides = [1, 1]} : vector<8x384xf32> to vector<8x128xf32>
    %71 = vector.extract_strided_slice %19 {offsets = [0, 640], sizes = [8, 128], strides = [1, 1]} : vector<8x768xf32> to vector<8x128xf32>
    %72 = arith.mulf %61, %71 : vector<8x128xf32>
    %73 = arith.addf %70, %72 : vector<8x128xf32>
    %74 = math.tanh %73 : vector<8x128xf32>
    %cst_26 = arith.constant 1.000000e+00 : f32
    %75 = vector.broadcast %cst_26 : f32 to vector<8x128xf32>
    %76 = arith.subf %75, %69 : vector<8x128xf32>
    %77 = arith.mulf %76, %74 : vector<8x128xf32>
    %78 = arith.mulf %69, %27 : vector<8x128xf32>
    %79 = arith.addf %77, %78 : vector<8x128xf32>
    %80 = arith.index_cast %c0_i32 : i32 to index
    %c0_27 = arith.constant 0 : index
    %c0_28 = arith.constant 0 : index
    %81 = vector.load %arg5[%80, %c0_27, %c0_28] : memref<8x8x128xf32, #tpu.memory_space<vmem>>, vector<1x8x128xf32>
    %82 = vector.shape_cast %81 : vector<1x8x128xf32> to vector<8x128xf32>
    %83 = vector.shape_cast %53 : vector<8x128xf32> to vector<1x8x128xf32>
    tpu.vector_store %arg5[%80, %c0_27, %c0_28], %83 {strides = array<i32>} : memref<8x8x128xf32, #tpu.memory_space<vmem>>, vector<1x8x128xf32>,
    %84 = arith.index_cast %16 : i32 to index
    %c0_29 = arith.constant 0 : index
    %c0_30 = arith.constant 0 : index
    %85 = vector.load %arg8[%84, %c0_29, %c0_30] : memref<8x8x384xf32, #tpu.memory_space<vmem>>, vector<1x8x128xf32>
    %86 = vector.shape_cast %85 : vector<1x8x128xf32> to vector<8x128xf32>
    %87 = vector.shape_cast %79 : vector<8x128xf32> to vector<1x8x128xf32>
    tpu.vector_store %arg8[%84, %c0_29, %c0_30], %87 {strides = array<i32>} : memref<8x8x384xf32, #tpu.memory_space<vmem>>, vector<1x8x128xf32>,
    %88 = tpu.concatenate %53, %79 in 1 : vector<8x128xf32>, vector<8x128xf32> -> vector<8x256xf32>
    %c1_i32 = arith.constant 1 : i32
    %c7_i32_31 = arith.constant 7 : i32
    %89 = arith.subi %c7_i32_31, %c1_i32 : i32
    %c0_32 = arith.constant 0 : index
    %c0_33 = arith.constant 0 : index
    %90 = vector.load %arg3[%c0_32, %c0_33] : memref<256x768xf32, #tpu.memory_space<vmem>>, vector<256x768xf32>
    %cst_34 = arith.constant dense<0.000000e+00> : vector<8x768xf32>
    %91 = tpu.matmul %88, %90, %cst_34 {dimension_numbers = #tpu.dot_dimension_numbers<[1], [0], [0], [1], [0, 0, 1, 1], [], []>} : vector<8x256xf32>, vector<256x768xf32>, vector<8x768xf32> -> vector<8x768xf32>
    %92 = arith.addf %91, %14 : vector<8x768xf32>
    %93 = arith.index_cast %c1_i32 : i32 to index
    %c0_35 = arith.constant 0 : index
    %c0_36 = arith.constant 0 : index
    %94 = vector.load %arg7[%93, %c0_35, %c0_36] : memref<8x8x384xf32, #tpu.memory_space<vmem>>, vector<1x8x384xf32>
    %95 = vector.shape_cast %94 : vector<1x8x384xf32> to vector<8x384xf32>
    %96 = arith.index_cast %89 : i32 to index
    %c0_37 = arith.constant 0 : index
    %c0_38 = arith.constant 0 : index
    %97 = vector.load %arg8[%96, %c0_37, %c0_38] : memref<8x8x384xf32, #tpu.memory_space<vmem>>, vector<1x8x384xf32>
    %98 = vector.shape_cast %97 : vector<1x8x384xf32> to vector<8x384xf32>
    %99 = vector.extract_strided_slice %88 {offsets = [0, 0], sizes = [8, 128], strides = [1, 1]} : vector<8x256xf32> to vector<8x128xf32>
    %100 = vector.extract_strided_slice %88 {offsets = [0, 128], sizes = [8, 128], strides = [1, 1]} : vector<8x256xf32> to vector<8x128xf32>
    %101 = vector.extract_strided_slice %95 {offsets = [0, 0], sizes = [8, 128], strides = [1, 1]} : vector<8x384xf32> to vector<8x128xf32>
    %102 = vector.extract_strided_slice %92 {offsets = [0, 0], sizes = [8, 128], strides = [1, 1]} : vector<8x768xf32> to vector<8x128xf32>
    %103 = arith.addf %101, %102 : vector<8x128xf32>
    %104 = arith.negf %103 : vector<8x128xf32>
    %105 = math.exp %104 : vector<8x128xf32>
    %cst_39 = arith.constant 1.000000e+00 : f32
    %106 = vector.broadcast %cst_39 : f32 to vector<8x128xf32>
    %107 = arith.addf %106, %105 : vector<8x128xf32>
    %108 = arith.divf %106, %107 : vector<8x128xf32>
    %109 = vector.extract_strided_slice %95 {offsets = [0, 128], sizes = [8, 128], strides = [1, 1]} : vector<8x384xf32> to vector<8x128xf32>
    %110 = vector.extract_strided_slice %92 {offsets = [0, 128], sizes = [8, 128], strides = [1, 1]} : vector<8x768xf32> to vector<8x128xf32>
    %111 = arith.addf %109, %110 : vector<8x128xf32>
    %112 = arith.negf %111 : vector<8x128xf32>
    %113 = math.exp %112 : vector<8x128xf32>
    %cst_40 = arith.constant 1.000000e+00 : f32
    %114 = vector.broadcast %cst_40 : f32 to vector<8x128xf32>
    %115 = arith.addf %114, %113 : vector<8x128xf32>
    %116 = arith.divf %114, %115 : vector<8x128xf32>
    %117 = vector.extract_strided_slice %95 {offsets = [0, 256], sizes = [8, 128], strides = [1, 1]} : vector<8x384xf32> to vector<8x128xf32>
    %118 = vector.extract_strided_slice %92 {offsets = [0, 256], sizes = [8, 128], strides = [1, 1]} : vector<8x768xf32> to vector<8x128xf32>
    %119 = arith.mulf %108, %118 : vector<8x128xf32>
    %120 = arith.addf %117, %119 : vector<8x128xf32>
    %121 = math.tanh %120 : vector<8x128xf32>
    %cst_41 = arith.constant 1.000000e+00 : f32
    %122 = vector.broadcast %cst_41 : f32 to vector<8x128xf32>
    %123 = arith.subf %122, %116 : vector<8x128xf32>
    %124 = arith.mulf %123, %121 : vector<8x128xf32>
    %125 = arith.mulf %116, %99 : vector<8x128xf32>
    %126 = arith.addf %124, %125 : vector<8x128xf32>
    %127 = vector.extract_strided_slice %98 {offsets = [0, 0], sizes = [8, 128], strides = [1, 1]} : vector<8x384xf32> to vector<8x128xf32>
    %128 = vector.extract_strided_slice %92 {offsets = [0, 384], sizes = [8, 128], strides = [1, 1]} : vector<8x768xf32> to vector<8x128xf32>
    %129 = arith.addf %127, %128 : vector<8x128xf32>
    %130 = arith.negf %129 : vector<8x128xf32>
    %131 = math.exp %130 : vector<8x128xf32>
    %cst_42 = arith.constant 1.000000e+00 : f32
    %132 = vector.broadcast %cst_42 : f32 to vector<8x128xf32>
    %133 = arith.addf %132, %131 : vector<8x128xf32>
    %134 = arith.divf %132, %133 : vector<8x128xf32>
    %135 = vector.extract_strided_slice %98 {offsets = [0, 128], sizes = [8, 128], strides = [1, 1]} : vector<8x384xf32> to vector<8x128xf32>
    %136 = vector.extract_strided_slice %92 {offsets = [0, 512], sizes = [8, 128], strides = [1, 1]} : vector<8x768xf32> to vector<8x128xf32>
    %137 = arith.addf %135, %136 : vector<8x128xf32>
    %138 = arith.negf %137 : vector<8x128xf32>
    %139 = math.exp %138 : vector<8x128xf32>
    %cst_43 = arith.constant 1.000000e+00 : f32
    %140 = vector.broadcast %cst_43 : f32 to vector<8x128xf32>
    %141 = arith.addf %140, %139 : vector<8x128xf32>
    %142 = arith.divf %140, %141 : vector<8x128xf32>
    %143 = vector.extract_strided_slice %98 {offsets = [0, 256], sizes = [8, 128], strides = [1, 1]} : vector<8x384xf32> to vector<8x128xf32>
    %144 = vector.extract_strided_slice %92 {offsets = [0, 640], sizes = [8, 128], strides = [1, 1]} : vector<8x768xf32> to vector<8x128xf32>
    %145 = arith.mulf %134, %144 : vector<8x128xf32>
    %146 = arith.addf %143, %145 : vector<8x128xf32>
    %147 = math.tanh %146 : vector<8x128xf32>
    %cst_44 = arith.constant 1.000000e+00 : f32
    %148 = vector.broadcast %cst_44 : f32 to vector<8x128xf32>
    %149 = arith.subf %148, %142 : vector<8x128xf32>
    %150 = arith.mulf %149, %147 : vector<8x128xf32>
    %151 = arith.mulf %142, %100 : vector<8x128xf32>
    %152 = arith.addf %150, %151 : vector<8x128xf32>
    %153 = arith.index_cast %c1_i32 : i32 to index
    %c0_45 = arith.constant 0 : index
    %c0_46 = arith.constant 0 : index
    %154 = vector.load %arg5[%153, %c0_45, %c0_46] : memref<8x8x128xf32, #tpu.memory_space<vmem>>, vector<1x8x128xf32>
    %155 = vector.shape_cast %154 : vector<1x8x128xf32> to vector<8x128xf32>
    %156 = vector.shape_cast %126 : vector<8x128xf32> to vector<1x8x128xf32>
    tpu.vector_store %arg5[%153, %c0_45, %c0_46], %156 {strides = array<i32>} : memref<8x8x128xf32, #tpu.memory_space<vmem>>, vector<1x8x128xf32>,
    %157 = arith.index_cast %89 : i32 to index
    %c0_47 = arith.constant 0 : index
    %c0_48 = arith.constant 0 : index
    %158 = vector.load %arg8[%157, %c0_47, %c0_48] : memref<8x8x384xf32, #tpu.memory_space<vmem>>, vector<1x8x128xf32>
    %159 = vector.shape_cast %158 : vector<1x8x128xf32> to vector<8x128xf32>
    %160 = vector.shape_cast %152 : vector<8x128xf32> to vector<1x8x128xf32>
    tpu.vector_store %arg8[%157, %c0_47, %c0_48], %160 {strides = array<i32>} : memref<8x8x384xf32, #tpu.memory_space<vmem>>, vector<1x8x128xf32>,
    %161 = tpu.concatenate %126, %152 in 1 : vector<8x128xf32>, vector<8x128xf32> -> vector<8x256xf32>
    %c2_i32 = arith.constant 2 : i32
    %c7_i32_49 = arith.constant 7 : i32
    %162 = arith.subi %c7_i32_49, %c2_i32 : i32
    %c0_50 = arith.constant 0 : index
    %c0_51 = arith.constant 0 : index
    %163 = vector.load %arg3[%c0_50, %c0_51] : memref<256x768xf32, #tpu.memory_space<vmem>>, vector<256x768xf32>
    %cst_52 = arith.constant dense<0.000000e+00> : vector<8x768xf32>
    %164 = tpu.matmul %161, %163, %cst_52 {dimension_numbers = #tpu.dot_dimension_numbers<[1], [0], [0], [1], [0, 0, 1, 1], [], []>} : vector<8x256xf32>, vector<256x768xf32>, vector<8x768xf32> -> vector<8x768xf32>
    %165 = arith.addf %164, %14 : vector<8x768xf32>
    %166 = arith.index_cast %c2_i32 : i32 to index
    %c0_53 = arith.constant 0 : index
    %c0_54 = arith.constant 0 : index
    %167 = vector.load %arg7[%166, %c0_53, %c0_54] : memref<8x8x384xf32, #tpu.memory_space<vmem>>, vector<1x8x384xf32>
    %168 = vector.shape_cast %167 : vector<1x8x384xf32> to vector<8x384xf32>
    %169 = arith.index_cast %162 : i32 to index
    %c0_55 = arith.constant 0 : index
    %c0_56 = arith.constant 0 : index
    %170 = vector.load %arg8[%169, %c0_55, %c0_56] : memref<8x8x384xf32, #tpu.memory_space<vmem>>, vector<1x8x384xf32>
    %171 = vector.shape_cast %170 : vector<1x8x384xf32> to vector<8x384xf32>
    %172 = vector.extract_strided_slice %161 {offsets = [0, 0], sizes = [8, 128], strides = [1, 1]} : vector<8x256xf32> to vector<8x128xf32>
    %173 = vector.extract_strided_slice %161 {offsets = [0, 128], sizes = [8, 128], strides = [1, 1]} : vector<8x256xf32> to vector<8x128xf32>
    %174 = vector.extract_strided_slice %168 {offsets = [0, 0], sizes = [8, 128], strides = [1, 1]} : vector<8x384xf32> to vector<8x128xf32>
    %175 = vector.extract_strided_slice %165 {offsets = [0, 0], sizes = [8, 128], strides = [1, 1]} : vector<8x768xf32> to vector<8x128xf32>
    %176 = arith.addf %174, %175 : vector<8x128xf32>
    %177 = arith.negf %176 : vector<8x128xf32>
    %178 = math.exp %177 : vector<8x128xf32>
    %cst_57 = arith.constant 1.000000e+00 : f32
    %179 = vector.broadcast %cst_57 : f32 to vector<8x128xf32>
    %180 = arith.addf %179, %178 : vector<8x128xf32>
    %181 = arith.divf %179, %180 : vector<8x128xf32>
    %182 = vector.extract_strided_slice %168 {offsets = [0, 128], sizes = [8, 128], strides = [1, 1]} : vector<8x384xf32> to vector<8x128xf32>
    %183 = vector.extract_strided_slice %165 {offsets = [0, 128], sizes = [8, 128], strides = [1, 1]} : vector<8x768xf32> to vector<8x128xf32>
    %184 = arith.addf %182, %183 : vector<8x128xf32>
    %185 = arith.negf %184 : vector<8x128xf32>
    %186 = math.exp %185 : vector<8x128xf32>
    %cst_58 = arith.constant 1.000000e+00 : f32
    %187 = vector.broadcast %cst_58 : f32 to vector<8x128xf32>
    %188 = arith.addf %187, %186 : vector<8x128xf32>
    %189 = arith.divf %187, %188 : vector<8x128xf32>
    %190 = vector.extract_strided_slice %168 {offsets = [0, 256], sizes = [8, 128], strides = [1, 1]} : vector<8x384xf32> to vector<8x128xf32>
    %191 = vector.extract_strided_slice %165 {offsets = [0, 256], sizes = [8, 128], strides = [1, 1]} : vector<8x768xf32> to vector<8x128xf32>
    %192 = arith.mulf %181, %191 : vector<8x128xf32>
    %193 = arith.addf %190, %192 : vector<8x128xf32>
    %194 = math.tanh %193 : vector<8x128xf32>
    %cst_59 = arith.constant 1.000000e+00 : f32
    %195 = vector.broadcast %cst_59 : f32 to vector<8x128xf32>
    %196 = arith.subf %195, %189 : vector<8x128xf32>
    %197 = arith.mulf %196, %194 : vector<8x128xf32>
    %198 = arith.mulf %189, %172 : vector<8x128xf32>
    %199 = arith.addf %197, %198 : vector<8x128xf32>
    %200 = vector.extract_strided_slice %171 {offsets = [0, 0], sizes = [8, 128], strides = [1, 1]} : vector<8x384xf32> to vector<8x128xf32>
    %201 = vector.extract_strided_slice %165 {offsets = [0, 384], sizes = [8, 128], strides = [1, 1]} : vector<8x768xf32> to vector<8x128xf32>
    %202 = arith.addf %200, %201 : vector<8x128xf32>
    %203 = arith.negf %202 : vector<8x128xf32>
    %204 = math.exp %203 : vector<8x128xf32>
    %cst_60 = arith.constant 1.000000e+00 : f32
    %205 = vector.broadcast %cst_60 : f32 to vector<8x128xf32>
    %206 = arith.addf %205, %204 : vector<8x128xf32>
    %207 = arith.divf %205, %206 : vector<8x128xf32>
    %208 = vector.extract_strided_slice %171 {offsets = [0, 128], sizes = [8, 128], strides = [1, 1]} : vector<8x384xf32> to vector<8x128xf32>
    %209 = vector.extract_strided_slice %165 {offsets = [0, 512], sizes = [8, 128], strides = [1, 1]} : vector<8x768xf32> to vector<8x128xf32>
    %210 = arith.addf %208, %209 : vector<8x128xf32>
    %211 = arith.negf %210 : vector<8x128xf32>
    %212 = math.exp %211 : vector<8x128xf32>
    %cst_61 = arith.constant 1.000000e+00 : f32
    %213 = vector.broadcast %cst_61 : f32 to vector<8x128xf32>
    %214 = arith.addf %213, %212 : vector<8x128xf32>
    %215 = arith.divf %213, %214 : vector<8x128xf32>
    %216 = vector.extract_strided_slice %171 {offsets = [0, 256], sizes = [8, 128], strides = [1, 1]} : vector<8x384xf32> to vector<8x128xf32>
    %217 = vector.extract_strided_slice %165 {offsets = [0, 640], sizes = [8, 128], strides = [1, 1]} : vector<8x768xf32> to vector<8x128xf32>
    %218 = arith.mulf %207, %217 : vector<8x128xf32>
    %219 = arith.addf %216, %218 : vector<8x128xf32>
    %220 = math.tanh %219 : vector<8x128xf32>
    %cst_62 = arith.constant 1.000000e+00 : f32
    %221 = vector.broadcast %cst_62 : f32 to vector<8x128xf32>
    %222 = arith.subf %221, %215 : vector<8x128xf32>
    %223 = arith.mulf %222, %220 : vector<8x128xf32>
    %224 = arith.mulf %215, %173 : vector<8x128xf32>
    %225 = arith.addf %223, %224 : vector<8x128xf32>
    %226 = arith.index_cast %c2_i32 : i32 to index
    %c0_63 = arith.constant 0 : index
    %c0_64 = arith.constant 0 : index
    %227 = vector.load %arg5[%226, %c0_63, %c0_64] : memref<8x8x128xf32, #tpu.memory_space<vmem>>, vector<1x8x128xf32>
    %228 = vector.shape_cast %227 : vector<1x8x128xf32> to vector<8x128xf32>
    %229 = vector.shape_cast %199 : vector<8x128xf32> to vector<1x8x128xf32>
    tpu.vector_store %arg5[%226, %c0_63, %c0_64], %229 {strides = array<i32>} : memref<8x8x128xf32, #tpu.memory_space<vmem>>, vector<1x8x128xf32>,
    %230 = arith.index_cast %162 : i32 to index
    %c0_65 = arith.constant 0 : index
    %c0_66 = arith.constant 0 : index
    %231 = vector.load %arg8[%230, %c0_65, %c0_66] : memref<8x8x384xf32, #tpu.memory_space<vmem>>, vector<1x8x128xf32>
    %232 = vector.shape_cast %231 : vector<1x8x128xf32> to vector<8x128xf32>
    %233 = vector.shape_cast %225 : vector<8x128xf32> to vector<1x8x128xf32>
    tpu.vector_store %arg8[%230, %c0_65, %c0_66], %233 {strides = array<i32>} : memref<8x8x384xf32, #tpu.memory_space<vmem>>, vector<1x8x128xf32>,
    %234 = tpu.concatenate %199, %225 in 1 : vector<8x128xf32>, vector<8x128xf32> -> vector<8x256xf32>
    %c3_i32 = arith.constant 3 : i32
    %c7_i32_67 = arith.constant 7 : i32
    %235 = arith.subi %c7_i32_67, %c3_i32 : i32
    %c0_68 = arith.constant 0 : index
    %c0_69 = arith.constant 0 : index
    %236 = vector.load %arg3[%c0_68, %c0_69] : memref<256x768xf32, #tpu.memory_space<vmem>>, vector<256x768xf32>
    %cst_70 = arith.constant dense<0.000000e+00> : vector<8x768xf32>
    %237 = tpu.matmul %234, %236, %cst_70 {dimension_numbers = #tpu.dot_dimension_numbers<[1], [0], [0], [1], [0, 0, 1, 1], [], []>} : vector<8x256xf32>, vector<256x768xf32>, vector<8x768xf32> -> vector<8x768xf32>
    %238 = arith.addf %237, %14 : vector<8x768xf32>
    %239 = arith.index_cast %c3_i32 : i32 to index
    %c0_71 = arith.constant 0 : index
    %c0_72 = arith.constant 0 : index
    %240 = vector.load %arg7[%239, %c0_71, %c0_72] : memref<8x8x384xf32, #tpu.memory_space<vmem>>, vector<1x8x384xf32>
    %241 = vector.shape_cast %240 : vector<1x8x384xf32> to vector<8x384xf32>
    %242 = arith.index_cast %235 : i32 to index
    %c0_73 = arith.constant 0 : index
    %c0_74 = arith.constant 0 : index
    %243 = vector.load %arg8[%242, %c0_73, %c0_74] : memref<8x8x384xf32, #tpu.memory_space<vmem>>, vector<1x8x384xf32>
    %244 = vector.shape_cast %243 : vector<1x8x384xf32> to vector<8x384xf32>
    %245 = vector.extract_strided_slice %234 {offsets = [0, 0], sizes = [8, 128], strides = [1, 1]} : vector<8x256xf32> to vector<8x128xf32>
    %246 = vector.extract_strided_slice %234 {offsets = [0, 128], sizes = [8, 128], strides = [1, 1]} : vector<8x256xf32> to vector<8x128xf32>
    %247 = vector.extract_strided_slice %241 {offsets = [0, 0], sizes = [8, 128], strides = [1, 1]} : vector<8x384xf32> to vector<8x128xf32>
    %248 = vector.extract_strided_slice %238 {offsets = [0, 0], sizes = [8, 128], strides = [1, 1]} : vector<8x768xf32> to vector<8x128xf32>
    %249 = arith.addf %247, %248 : vector<8x128xf32>
    %250 = arith.negf %249 : vector<8x128xf32>
    %251 = math.exp %250 : vector<8x128xf32>
    %cst_75 = arith.constant 1.000000e+00 : f32
    %252 = vector.broadcast %cst_75 : f32 to vector<8x128xf32>
    %253 = arith.addf %252, %251 : vector<8x128xf32>
    %254 = arith.divf %252, %253 : vector<8x128xf32>
    %255 = vector.extract_strided_slice %241 {offsets = [0, 128], sizes = [8, 128], strides = [1, 1]} : vector<8x384xf32> to vector<8x128xf32>
    %256 = vector.extract_strided_slice %238 {offsets = [0, 128], sizes = [8, 128], strides = [1, 1]} : vector<8x768xf32> to vector<8x128xf32>
    %257 = arith.addf %255, %256 : vector<8x128xf32>
    %258 = arith.negf %257 : vector<8x128xf32>
    %259 = math.exp %258 : vector<8x128xf32>
    %cst_76 = arith.constant 1.000000e+00 : f32
    %260 = vector.broadcast %cst_76 : f32 to vector<8x128xf32>
    %261 = arith.addf %260, %259 : vector<8x128xf32>
    %262 = arith.divf %260, %261 : vector<8x128xf32>
    %263 = vector.extract_strided_slice %241 {offsets = [0, 256], sizes = [8, 128], strides = [1, 1]} : vector<8x384xf32> to vector<8x128xf32>
    %264 = vector.extract_strided_slice %238 {offsets = [0, 256], sizes = [8, 128], strides = [1, 1]} : vector<8x768xf32> to vector<8x128xf32>
    %265 = arith.mulf %254, %264 : vector<8x128xf32>
    %266 = arith.addf %263, %265 : vector<8x128xf32>
    %267 = math.tanh %266 : vector<8x128xf32>
    %cst_77 = arith.constant 1.000000e+00 : f32
    %268 = vector.broadcast %cst_77 : f32 to vector<8x128xf32>
    %269 = arith.subf %268, %262 : vector<8x128xf32>
    %270 = arith.mulf %269, %267 : vector<8x128xf32>
    %271 = arith.mulf %262, %245 : vector<8x128xf32>
    %272 = arith.addf %270, %271 : vector<8x128xf32>
    %273 = vector.extract_strided_slice %244 {offsets = [0, 0], sizes = [8, 128], strides = [1, 1]} : vector<8x384xf32> to vector<8x128xf32>
    %274 = vector.extract_strided_slice %238 {offsets = [0, 384], sizes = [8, 128], strides = [1, 1]} : vector<8x768xf32> to vector<8x128xf32>
    %275 = arith.addf %273, %274 : vector<8x128xf32>
    %276 = arith.negf %275 : vector<8x128xf32>
    %277 = math.exp %276 : vector<8x128xf32>
    %cst_78 = arith.constant 1.000000e+00 : f32
    %278 = vector.broadcast %cst_78 : f32 to vector<8x128xf32>
    %279 = arith.addf %278, %277 : vector<8x128xf32>
    %280 = arith.divf %278, %279 : vector<8x128xf32>
    %281 = vector.extract_strided_slice %244 {offsets = [0, 128], sizes = [8, 128], strides = [1, 1]} : vector<8x384xf32> to vector<8x128xf32>
    %282 = vector.extract_strided_slice %238 {offsets = [0, 512], sizes = [8, 128], strides = [1, 1]} : vector<8x768xf32> to vector<8x128xf32>
    %283 = arith.addf %281, %282 : vector<8x128xf32>
    %284 = arith.negf %283 : vector<8x128xf32>
    %285 = math.exp %284 : vector<8x128xf32>
    %cst_79 = arith.constant 1.000000e+00 : f32
    %286 = vector.broadcast %cst_79 : f32 to vector<8x128xf32>
    %287 = arith.addf %286, %285 : vector<8x128xf32>
    %288 = arith.divf %286, %287 : vector<8x128xf32>
    %289 = vector.extract_strided_slice %244 {offsets = [0, 256], sizes = [8, 128], strides = [1, 1]} : vector<8x384xf32> to vector<8x128xf32>
    %290 = vector.extract_strided_slice %238 {offsets = [0, 640], sizes = [8, 128], strides = [1, 1]} : vector<8x768xf32> to vector<8x128xf32>
    %291 = arith.mulf %280, %290 : vector<8x128xf32>
    %292 = arith.addf %289, %291 : vector<8x128xf32>
    %293 = math.tanh %292 : vector<8x128xf32>
    %cst_80 = arith.constant 1.000000e+00 : f32
    %294 = vector.broadcast %cst_80 : f32 to vector<8x128xf32>
    %295 = arith.subf %294, %288 : vector<8x128xf32>
    %296 = arith.mulf %295, %293 : vector<8x128xf32>
    %297 = arith.mulf %288, %246 : vector<8x128xf32>
    %298 = arith.addf %296, %297 : vector<8x128xf32>
    %299 = arith.index_cast %c3_i32 : i32 to index
    %c0_81 = arith.constant 0 : index
    %c0_82 = arith.constant 0 : index
    %300 = vector.load %arg5[%299, %c0_81, %c0_82] : memref<8x8x128xf32, #tpu.memory_space<vmem>>, vector<1x8x128xf32>
    %301 = vector.shape_cast %300 : vector<1x8x128xf32> to vector<8x128xf32>
    %302 = vector.shape_cast %272 : vector<8x128xf32> to vector<1x8x128xf32>
    tpu.vector_store %arg5[%299, %c0_81, %c0_82], %302 {strides = array<i32>} : memref<8x8x128xf32, #tpu.memory_space<vmem>>, vector<1x8x128xf32>,
    %303 = arith.index_cast %235 : i32 to index
    %c0_83 = arith.constant 0 : index
    %c0_84 = arith.constant 0 : index
    %304 = vector.load %arg8[%303, %c0_83, %c0_84] : memref<8x8x384xf32, #tpu.memory_space<vmem>>, vector<1x8x128xf32>
    %305 = vector.shape_cast %304 : vector<1x8x128xf32> to vector<8x128xf32>
    %306 = vector.shape_cast %298 : vector<8x128xf32> to vector<1x8x128xf32>
    tpu.vector_store %arg8[%303, %c0_83, %c0_84], %306 {strides = array<i32>} : memref<8x8x384xf32, #tpu.memory_space<vmem>>, vector<1x8x128xf32>,
    %307 = tpu.concatenate %272, %298 in 1 : vector<8x128xf32>, vector<8x128xf32> -> vector<8x256xf32>
    %c4_i32 = arith.constant 4 : i32
    %c7_i32_85 = arith.constant 7 : i32
    %308 = arith.subi %c7_i32_85, %c4_i32 : i32
    %c0_86 = arith.constant 0 : index
    %c0_87 = arith.constant 0 : index
    %309 = vector.load %arg3[%c0_86, %c0_87] : memref<256x768xf32, #tpu.memory_space<vmem>>, vector<256x768xf32>
    %cst_88 = arith.constant dense<0.000000e+00> : vector<8x768xf32>
    %310 = tpu.matmul %307, %309, %cst_88 {dimension_numbers = #tpu.dot_dimension_numbers<[1], [0], [0], [1], [0, 0, 1, 1], [], []>} : vector<8x256xf32>, vector<256x768xf32>, vector<8x768xf32> -> vector<8x768xf32>
    %311 = arith.addf %310, %14 : vector<8x768xf32>
    %312 = arith.index_cast %c4_i32 : i32 to index
    %c0_89 = arith.constant 0 : index
    %c0_90 = arith.constant 0 : index
    %313 = vector.load %arg7[%312, %c0_89, %c0_90] : memref<8x8x384xf32, #tpu.memory_space<vmem>>, vector<1x8x384xf32>
    %314 = vector.shape_cast %313 : vector<1x8x384xf32> to vector<8x384xf32>
    %315 = arith.index_cast %308 : i32 to index
    %c0_91 = arith.constant 0 : index
    %c0_92 = arith.constant 0 : index
    %316 = vector.load %arg8[%315, %c0_91, %c0_92] : memref<8x8x384xf32, #tpu.memory_space<vmem>>, vector<1x8x384xf32>
    %317 = vector.shape_cast %316 : vector<1x8x384xf32> to vector<8x384xf32>
    %318 = vector.extract_strided_slice %307 {offsets = [0, 0], sizes = [8, 128], strides = [1, 1]} : vector<8x256xf32> to vector<8x128xf32>
    %319 = vector.extract_strided_slice %307 {offsets = [0, 128], sizes = [8, 128], strides = [1, 1]} : vector<8x256xf32> to vector<8x128xf32>
    %320 = vector.extract_strided_slice %314 {offsets = [0, 0], sizes = [8, 128], strides = [1, 1]} : vector<8x384xf32> to vector<8x128xf32>
    %321 = vector.extract_strided_slice %311 {offsets = [0, 0], sizes = [8, 128], strides = [1, 1]} : vector<8x768xf32> to vector<8x128xf32>
    %322 = arith.addf %320, %321 : vector<8x128xf32>
    %323 = arith.negf %322 : vector<8x128xf32>
    %324 = math.exp %323 : vector<8x128xf32>
    %cst_93 = arith.constant 1.000000e+00 : f32
    %325 = vector.broadcast %cst_93 : f32 to vector<8x128xf32>
    %326 = arith.addf %325, %324 : vector<8x128xf32>
    %327 = arith.divf %325, %326 : vector<8x128xf32>
    %328 = vector.extract_strided_slice %314 {offsets = [0, 128], sizes = [8, 128], strides = [1, 1]} : vector<8x384xf32> to vector<8x128xf32>
    %329 = vector.extract_strided_slice %311 {offsets = [0, 128], sizes = [8, 128], strides = [1, 1]} : vector<8x768xf32> to vector<8x128xf32>
    %330 = arith.addf %328, %329 : vector<8x128xf32>
    %331 = arith.negf %330 : vector<8x128xf32>
    %332 = math.exp %331 : vector<8x128xf32>
    %cst_94 = arith.constant 1.000000e+00 : f32
    %333 = vector.broadcast %cst_94 : f32 to vector<8x128xf32>
    %334 = arith.addf %333, %332 : vector<8x128xf32>
    %335 = arith.divf %333, %334 : vector<8x128xf32>
    %336 = vector.extract_strided_slice %314 {offsets = [0, 256], sizes = [8, 128], strides = [1, 1]} : vector<8x384xf32> to vector<8x128xf32>
    %337 = vector.extract_strided_slice %311 {offsets = [0, 256], sizes = [8, 128], strides = [1, 1]} : vector<8x768xf32> to vector<8x128xf32>
    %338 = arith.mulf %327, %337 : vector<8x128xf32>
    %339 = arith.addf %336, %338 : vector<8x128xf32>
    %340 = math.tanh %339 : vector<8x128xf32>
    %cst_95 = arith.constant 1.000000e+00 : f32
    %341 = vector.broadcast %cst_95 : f32 to vector<8x128xf32>
    %342 = arith.subf %341, %335 : vector<8x128xf32>
    %343 = arith.mulf %342, %340 : vector<8x128xf32>
    %344 = arith.mulf %335, %318 : vector<8x128xf32>
    %345 = arith.addf %343, %344 : vector<8x128xf32>
    %346 = vector.extract_strided_slice %317 {offsets = [0, 0], sizes = [8, 128], strides = [1, 1]} : vector<8x384xf32> to vector<8x128xf32>
    %347 = vector.extract_strided_slice %311 {offsets = [0, 384], sizes = [8, 128], strides = [1, 1]} : vector<8x768xf32> to vector<8x128xf32>
    %348 = arith.addf %346, %347 : vector<8x128xf32>
    %349 = arith.negf %348 : vector<8x128xf32>
    %350 = math.exp %349 : vector<8x128xf32>
    %cst_96 = arith.constant 1.000000e+00 : f32
    %351 = vector.broadcast %cst_96 : f32 to vector<8x128xf32>
    %352 = arith.addf %351, %350 : vector<8x128xf32>
    %353 = arith.divf %351, %352 : vector<8x128xf32>
    %354 = vector.extract_strided_slice %317 {offsets = [0, 128], sizes = [8, 128], strides = [1, 1]} : vector<8x384xf32> to vector<8x128xf32>
    %355 = vector.extract_strided_slice %311 {offsets = [0, 512], sizes = [8, 128], strides = [1, 1]} : vector<8x768xf32> to vector<8x128xf32>
    %356 = arith.addf %354, %355 : vector<8x128xf32>
    %357 = arith.negf %356 : vector<8x128xf32>
    %358 = math.exp %357 : vector<8x128xf32>
    %cst_97 = arith.constant 1.000000e+00 : f32
    %359 = vector.broadcast %cst_97 : f32 to vector<8x128xf32>
    %360 = arith.addf %359, %358 : vector<8x128xf32>
    %361 = arith.divf %359, %360 : vector<8x128xf32>
    %362 = vector.extract_strided_slice %317 {offsets = [0, 256], sizes = [8, 128], strides = [1, 1]} : vector<8x384xf32> to vector<8x128xf32>
    %363 = vector.extract_strided_slice %311 {offsets = [0, 640], sizes = [8, 128], strides = [1, 1]} : vector<8x768xf32> to vector<8x128xf32>
    %364 = arith.mulf %353, %363 : vector<8x128xf32>
    %365 = arith.addf %362, %364 : vector<8x128xf32>
    %366 = math.tanh %365 : vector<8x128xf32>
    %cst_98 = arith.constant 1.000000e+00 : f32
    %367 = vector.broadcast %cst_98 : f32 to vector<8x128xf32>
    %368 = arith.subf %367, %361 : vector<8x128xf32>
    %369 = arith.mulf %368, %366 : vector<8x128xf32>
    %370 = arith.mulf %361, %319 : vector<8x128xf32>
    %371 = arith.addf %369, %370 : vector<8x128xf32>
    %372 = arith.index_cast %c4_i32 : i32 to index
    %c0_99 = arith.constant 0 : index
    %c0_100 = arith.constant 0 : index
    %373 = vector.load %arg5[%372, %c0_99, %c0_100] : memref<8x8x128xf32, #tpu.memory_space<vmem>>, vector<1x8x128xf32>
    %374 = vector.shape_cast %373 : vector<1x8x128xf32> to vector<8x128xf32>
    %375 = vector.shape_cast %345 : vector<8x128xf32> to vector<1x8x128xf32>
    tpu.vector_store %arg5[%372, %c0_99, %c0_100], %375 {strides = array<i32>} : memref<8x8x128xf32, #tpu.memory_space<vmem>>, vector<1x8x128xf32>,
    %376 = arith.index_cast %308 : i32 to index
    %c0_101 = arith.constant 0 : index
    %c0_102 = arith.constant 0 : index
    %377 = vector.load %arg8[%376, %c0_101, %c0_102] : memref<8x8x384xf32, #tpu.memory_space<vmem>>, vector<1x8x128xf32>
    %378 = vector.shape_cast %377 : vector<1x8x128xf32> to vector<8x128xf32>
    %379 = vector.shape_cast %371 : vector<8x128xf32> to vector<1x8x128xf32>
    tpu.vector_store %arg8[%376, %c0_101, %c0_102], %379 {strides = array<i32>} : memref<8x8x384xf32, #tpu.memory_space<vmem>>, vector<1x8x128xf32>,
    %380 = tpu.concatenate %345, %371 in 1 : vector<8x128xf32>, vector<8x128xf32> -> vector<8x256xf32>
    %c5_i32 = arith.constant 5 : i32
    %c7_i32_103 = arith.constant 7 : i32
    %381 = arith.subi %c7_i32_103, %c5_i32 : i32
    %c0_104 = arith.constant 0 : index
    %c0_105 = arith.constant 0 : index
    %382 = vector.load %arg3[%c0_104, %c0_105] : memref<256x768xf32, #tpu.memory_space<vmem>>, vector<256x768xf32>
    %cst_106 = arith.constant dense<0.000000e+00> : vector<8x768xf32>
    %383 = tpu.matmul %380, %382, %cst_106 {dimension_numbers = #tpu.dot_dimension_numbers<[1], [0], [0], [1], [0, 0, 1, 1], [], []>} : vector<8x256xf32>, vector<256x768xf32>, vector<8x768xf32> -> vector<8x768xf32>
    %384 = arith.addf %383, %14 : vector<8x768xf32>
    %385 = arith.index_cast %c5_i32 : i32 to index
    %c0_107 = arith.constant 0 : index
    %c0_108 = arith.constant 0 : index
    %386 = vector.load %arg7[%385, %c0_107, %c0_108] : memref<8x8x384xf32, #tpu.memory_space<vmem>>, vector<1x8x384xf32>
    %387 = vector.shape_cast %386 : vector<1x8x384xf32> to vector<8x384xf32>
    %388 = arith.index_cast %381 : i32 to index
    %c0_109 = arith.constant 0 : index
    %c0_110 = arith.constant 0 : index
    %389 = vector.load %arg8[%388, %c0_109, %c0_110] : memref<8x8x384xf32, #tpu.memory_space<vmem>>, vector<1x8x384xf32>
    %390 = vector.shape_cast %389 : vector<1x8x384xf32> to vector<8x384xf32>
    %391 = vector.extract_strided_slice %380 {offsets = [0, 0], sizes = [8, 128], strides = [1, 1]} : vector<8x256xf32> to vector<8x128xf32>
    %392 = vector.extract_strided_slice %380 {offsets = [0, 128], sizes = [8, 128], strides = [1, 1]} : vector<8x256xf32> to vector<8x128xf32>
    %393 = vector.extract_strided_slice %387 {offsets = [0, 0], sizes = [8, 128], strides = [1, 1]} : vector<8x384xf32> to vector<8x128xf32>
    %394 = vector.extract_strided_slice %384 {offsets = [0, 0], sizes = [8, 128], strides = [1, 1]} : vector<8x768xf32> to vector<8x128xf32>
    %395 = arith.addf %393, %394 : vector<8x128xf32>
    %396 = arith.negf %395 : vector<8x128xf32>
    %397 = math.exp %396 : vector<8x128xf32>
    %cst_111 = arith.constant 1.000000e+00 : f32
    %398 = vector.broadcast %cst_111 : f32 to vector<8x128xf32>
    %399 = arith.addf %398, %397 : vector<8x128xf32>
    %400 = arith.divf %398, %399 : vector<8x128xf32>
    %401 = vector.extract_strided_slice %387 {offsets = [0, 128], sizes = [8, 128], strides = [1, 1]} : vector<8x384xf32> to vector<8x128xf32>
    %402 = vector.extract_strided_slice %384 {offsets = [0, 128], sizes = [8, 128], strides = [1, 1]} : vector<8x768xf32> to vector<8x128xf32>
    %403 = arith.addf %401, %402 : vector<8x128xf32>
    %404 = arith.negf %403 : vector<8x128xf32>
    %405 = math.exp %404 : vector<8x128xf32>
    %cst_112 = arith.constant 1.000000e+00 : f32
    %406 = vector.broadcast %cst_112 : f32 to vector<8x128xf32>
    %407 = arith.addf %406, %405 : vector<8x128xf32>
    %408 = arith.divf %406, %407 : vector<8x128xf32>
    %409 = vector.extract_strided_slice %387 {offsets = [0, 256], sizes = [8, 128], strides = [1, 1]} : vector<8x384xf32> to vector<8x128xf32>
    %410 = vector.extract_strided_slice %384 {offsets = [0, 256], sizes = [8, 128], strides = [1, 1]} : vector<8x768xf32> to vector<8x128xf32>
    %411 = arith.mulf %400, %410 : vector<8x128xf32>
    %412 = arith.addf %409, %411 : vector<8x128xf32>
    %413 = math.tanh %412 : vector<8x128xf32>
    %cst_113 = arith.constant 1.000000e+00 : f32
    %414 = vector.broadcast %cst_113 : f32 to vector<8x128xf32>
    %415 = arith.subf %414, %408 : vector<8x128xf32>
    %416 = arith.mulf %415, %413 : vector<8x128xf32>
    %417 = arith.mulf %408, %391 : vector<8x128xf32>
    %418 = arith.addf %416, %417 : vector<8x128xf32>
    %419 = vector.extract_strided_slice %390 {offsets = [0, 0], sizes = [8, 128], strides = [1, 1]} : vector<8x384xf32> to vector<8x128xf32>
    %420 = vector.extract_strided_slice %384 {offsets = [0, 384], sizes = [8, 128], strides = [1, 1]} : vector<8x768xf32> to vector<8x128xf32>
    %421 = arith.addf %419, %420 : vector<8x128xf32>
    %422 = arith.negf %421 : vector<8x128xf32>
    %423 = math.exp %422 : vector<8x128xf32>
    %cst_114 = arith.constant 1.000000e+00 : f32
    %424 = vector.broadcast %cst_114 : f32 to vector<8x128xf32>
    %425 = arith.addf %424, %423 : vector<8x128xf32>
    %426 = arith.divf %424, %425 : vector<8x128xf32>
    %427 = vector.extract_strided_slice %390 {offsets = [0, 128], sizes = [8, 128], strides = [1, 1]} : vector<8x384xf32> to vector<8x128xf32>
    %428 = vector.extract_strided_slice %384 {offsets = [0, 512], sizes = [8, 128], strides = [1, 1]} : vector<8x768xf32> to vector<8x128xf32>
    %429 = arith.addf %427, %428 : vector<8x128xf32>
    %430 = arith.negf %429 : vector<8x128xf32>
    %431 = math.exp %430 : vector<8x128xf32>
    %cst_115 = arith.constant 1.000000e+00 : f32
    %432 = vector.broadcast %cst_115 : f32 to vector<8x128xf32>
    %433 = arith.addf %432, %431 : vector<8x128xf32>
    %434 = arith.divf %432, %433 : vector<8x128xf32>
    %435 = vector.extract_strided_slice %390 {offsets = [0, 256], sizes = [8, 128], strides = [1, 1]} : vector<8x384xf32> to vector<8x128xf32>
    %436 = vector.extract_strided_slice %384 {offsets = [0, 640], sizes = [8, 128], strides = [1, 1]} : vector<8x768xf32> to vector<8x128xf32>
    %437 = arith.mulf %426, %436 : vector<8x128xf32>
    %438 = arith.addf %435, %437 : vector<8x128xf32>
    %439 = math.tanh %438 : vector<8x128xf32>
    %cst_116 = arith.constant 1.000000e+00 : f32
    %440 = vector.broadcast %cst_116 : f32 to vector<8x128xf32>
    %441 = arith.subf %440, %434 : vector<8x128xf32>
    %442 = arith.mulf %441, %439 : vector<8x128xf32>
    %443 = arith.mulf %434, %392 : vector<8x128xf32>
    %444 = arith.addf %442, %443 : vector<8x128xf32>
    %445 = arith.index_cast %c5_i32 : i32 to index
    %c0_117 = arith.constant 0 : index
    %c0_118 = arith.constant 0 : index
    %446 = vector.load %arg5[%445, %c0_117, %c0_118] : memref<8x8x128xf32, #tpu.memory_space<vmem>>, vector<1x8x128xf32>
    %447 = vector.shape_cast %446 : vector<1x8x128xf32> to vector<8x128xf32>
    %448 = vector.shape_cast %418 : vector<8x128xf32> to vector<1x8x128xf32>
    tpu.vector_store %arg5[%445, %c0_117, %c0_118], %448 {strides = array<i32>} : memref<8x8x128xf32, #tpu.memory_space<vmem>>, vector<1x8x128xf32>,
    %449 = arith.index_cast %381 : i32 to index
    %c0_119 = arith.constant 0 : index
    %c0_120 = arith.constant 0 : index
    %450 = vector.load %arg8[%449, %c0_119, %c0_120] : memref<8x8x384xf32, #tpu.memory_space<vmem>>, vector<1x8x128xf32>
    %451 = vector.shape_cast %450 : vector<1x8x128xf32> to vector<8x128xf32>
    %452 = vector.shape_cast %444 : vector<8x128xf32> to vector<1x8x128xf32>
    tpu.vector_store %arg8[%449, %c0_119, %c0_120], %452 {strides = array<i32>} : memref<8x8x384xf32, #tpu.memory_space<vmem>>, vector<1x8x128xf32>,
    %453 = tpu.concatenate %418, %444 in 1 : vector<8x128xf32>, vector<8x128xf32> -> vector<8x256xf32>
    %c6_i32 = arith.constant 6 : i32
    %c7_i32_121 = arith.constant 7 : i32
    %454 = arith.subi %c7_i32_121, %c6_i32 : i32
    %c0_122 = arith.constant 0 : index
    %c0_123 = arith.constant 0 : index
    %455 = vector.load %arg3[%c0_122, %c0_123] : memref<256x768xf32, #tpu.memory_space<vmem>>, vector<256x768xf32>
    %cst_124 = arith.constant dense<0.000000e+00> : vector<8x768xf32>
    %456 = tpu.matmul %453, %455, %cst_124 {dimension_numbers = #tpu.dot_dimension_numbers<[1], [0], [0], [1], [0, 0, 1, 1], [], []>} : vector<8x256xf32>, vector<256x768xf32>, vector<8x768xf32> -> vector<8x768xf32>
    %457 = arith.addf %456, %14 : vector<8x768xf32>
    %458 = arith.index_cast %c6_i32 : i32 to index
    %c0_125 = arith.constant 0 : index
    %c0_126 = arith.constant 0 : index
    %459 = vector.load %arg7[%458, %c0_125, %c0_126] : memref<8x8x384xf32, #tpu.memory_space<vmem>>, vector<1x8x384xf32>
    %460 = vector.shape_cast %459 : vector<1x8x384xf32> to vector<8x384xf32>
    %461 = arith.index_cast %454 : i32 to index
    %c0_127 = arith.constant 0 : index
    %c0_128 = arith.constant 0 : index
    %462 = vector.load %arg8[%461, %c0_127, %c0_128] : memref<8x8x384xf32, #tpu.memory_space<vmem>>, vector<1x8x384xf32>
    %463 = vector.shape_cast %462 : vector<1x8x384xf32> to vector<8x384xf32>
    %464 = vector.extract_strided_slice %453 {offsets = [0, 0], sizes = [8, 128], strides = [1, 1]} : vector<8x256xf32> to vector<8x128xf32>
    %465 = vector.extract_strided_slice %453 {offsets = [0, 128], sizes = [8, 128], strides = [1, 1]} : vector<8x256xf32> to vector<8x128xf32>
    %466 = vector.extract_strided_slice %460 {offsets = [0, 0], sizes = [8, 128], strides = [1, 1]} : vector<8x384xf32> to vector<8x128xf32>
    %467 = vector.extract_strided_slice %457 {offsets = [0, 0], sizes = [8, 128], strides = [1, 1]} : vector<8x768xf32> to vector<8x128xf32>
    %468 = arith.addf %466, %467 : vector<8x128xf32>
    %469 = arith.negf %468 : vector<8x128xf32>
    %470 = math.exp %469 : vector<8x128xf32>
    %cst_129 = arith.constant 1.000000e+00 : f32
    %471 = vector.broadcast %cst_129 : f32 to vector<8x128xf32>
    %472 = arith.addf %471, %470 : vector<8x128xf32>
    %473 = arith.divf %471, %472 : vector<8x128xf32>
    %474 = vector.extract_strided_slice %460 {offsets = [0, 128], sizes = [8, 128], strides = [1, 1]} : vector<8x384xf32> to vector<8x128xf32>
    %475 = vector.extract_strided_slice %457 {offsets = [0, 128], sizes = [8, 128], strides = [1, 1]} : vector<8x768xf32> to vector<8x128xf32>
    %476 = arith.addf %474, %475 : vector<8x128xf32>
    %477 = arith.negf %476 : vector<8x128xf32>
    %478 = math.exp %477 : vector<8x128xf32>
    %cst_130 = arith.constant 1.000000e+00 : f32
    %479 = vector.broadcast %cst_130 : f32 to vector<8x128xf32>
    %480 = arith.addf %479, %478 : vector<8x128xf32>
    %481 = arith.divf %479, %480 : vector<8x128xf32>
    %482 = vector.extract_strided_slice %460 {offsets = [0, 256], sizes = [8, 128], strides = [1, 1]} : vector<8x384xf32> to vector<8x128xf32>
    %483 = vector.extract_strided_slice %457 {offsets = [0, 256], sizes = [8, 128], strides = [1, 1]} : vector<8x768xf32> to vector<8x128xf32>
    %484 = arith.mulf %473, %483 : vector<8x128xf32>
    %485 = arith.addf %482, %484 : vector<8x128xf32>
    %486 = math.tanh %485 : vector<8x128xf32>
    %cst_131 = arith.constant 1.000000e+00 : f32
    %487 = vector.broadcast %cst_131 : f32 to vector<8x128xf32>
    %488 = arith.subf %487, %481 : vector<8x128xf32>
    %489 = arith.mulf %488, %486 : vector<8x128xf32>
    %490 = arith.mulf %481, %464 : vector<8x128xf32>
    %491 = arith.addf %489, %490 : vector<8x128xf32>
    %492 = vector.extract_strided_slice %463 {offsets = [0, 0], sizes = [8, 128], strides = [1, 1]} : vector<8x384xf32> to vector<8x128xf32>
    %493 = vector.extract_strided_slice %457 {offsets = [0, 384], sizes = [8, 128], strides = [1, 1]} : vector<8x768xf32> to vector<8x128xf32>
    %494 = arith.addf %492, %493 : vector<8x128xf32>
    %495 = arith.negf %494 : vector<8x128xf32>
    %496 = math.exp %495 : vector<8x128xf32>
    %cst_132 = arith.constant 1.000000e+00 : f32
    %497 = vector.broadcast %cst_132 : f32 to vector<8x128xf32>
    %498 = arith.addf %497, %496 : vector<8x128xf32>
    %499 = arith.divf %497, %498 : vector<8x128xf32>
    %500 = vector.extract_strided_slice %463 {offsets = [0, 128], sizes = [8, 128], strides = [1, 1]} : vector<8x384xf32> to vector<8x128xf32>
    %501 = vector.extract_strided_slice %457 {offsets = [0, 512], sizes = [8, 128], strides = [1, 1]} : vector<8x768xf32> to vector<8x128xf32>
    %502 = arith.addf %500, %501 : vector<8x128xf32>
    %503 = arith.negf %502 : vector<8x128xf32>
    %504 = math.exp %503 : vector<8x128xf32>
    %cst_133 = arith.constant 1.000000e+00 : f32
    %505 = vector.broadcast %cst_133 : f32 to vector<8x128xf32>
    %506 = arith.addf %505, %504 : vector<8x128xf32>
    %507 = arith.divf %505, %506 : vector<8x128xf32>
    %508 = vector.extract_strided_slice %463 {offsets = [0, 256], sizes = [8, 128], strides = [1, 1]} : vector<8x384xf32> to vector<8x128xf32>
    %509 = vector.extract_strided_slice %457 {offsets = [0, 640], sizes = [8, 128], strides = [1, 1]} : vector<8x768xf32> to vector<8x128xf32>
    %510 = arith.mulf %499, %509 : vector<8x128xf32>
    %511 = arith.addf %508, %510 : vector<8x128xf32>
    %512 = math.tanh %511 : vector<8x128xf32>
    %cst_134 = arith.constant 1.000000e+00 : f32
    %513 = vector.broadcast %cst_134 : f32 to vector<8x128xf32>
    %514 = arith.subf %513, %507 : vector<8x128xf32>
    %515 = arith.mulf %514, %512 : vector<8x128xf32>
    %516 = arith.mulf %507, %465 : vector<8x128xf32>
    %517 = arith.addf %515, %516 : vector<8x128xf32>
    %518 = arith.index_cast %c6_i32 : i32 to index
    %c0_135 = arith.constant 0 : index
    %c0_136 = arith.constant 0 : index
    %519 = vector.load %arg5[%518, %c0_135, %c0_136] : memref<8x8x128xf32, #tpu.memory_space<vmem>>, vector<1x8x128xf32>
    %520 = vector.shape_cast %519 : vector<1x8x128xf32> to vector<8x128xf32>
    %521 = vector.shape_cast %491 : vector<8x128xf32> to vector<1x8x128xf32>
    tpu.vector_store %arg5[%518, %c0_135, %c0_136], %521 {strides = array<i32>} : memref<8x8x128xf32, #tpu.memory_space<vmem>>, vector<1x8x128xf32>,
    %522 = arith.index_cast %454 : i32 to index
    %c0_137 = arith.constant 0 : index
    %c0_138 = arith.constant 0 : index
    %523 = vector.load %arg8[%522, %c0_137, %c0_138] : memref<8x8x384xf32, #tpu.memory_space<vmem>>, vector<1x8x128xf32>
    %524 = vector.shape_cast %523 : vector<1x8x128xf32> to vector<8x128xf32>
    %525 = vector.shape_cast %517 : vector<8x128xf32> to vector<1x8x128xf32>
    tpu.vector_store %arg8[%522, %c0_137, %c0_138], %525 {strides = array<i32>} : memref<8x8x384xf32, #tpu.memory_space<vmem>>, vector<1x8x128xf32>,
    %526 = tpu.concatenate %491, %517 in 1 : vector<8x128xf32>, vector<8x128xf32> -> vector<8x256xf32>
    %c7_i32_139 = arith.constant 7 : i32
    %c7_i32_140 = arith.constant 7 : i32
    %527 = arith.subi %c7_i32_140, %c7_i32_139 : i32
    %c0_141 = arith.constant 0 : index
    %c0_142 = arith.constant 0 : index
    %528 = vector.load %arg3[%c0_141, %c0_142] : memref<256x768xf32, #tpu.memory_space<vmem>>, vector<256x768xf32>
    %cst_143 = arith.constant dense<0.000000e+00> : vector<8x768xf32>
    %529 = tpu.matmul %526, %528, %cst_143 {dimension_numbers = #tpu.dot_dimension_numbers<[1], [0], [0], [1], [0, 0, 1, 1], [], []>} : vector<8x256xf32>, vector<256x768xf32>, vector<8x768xf32> -> vector<8x768xf32>
    %530 = arith.addf %529, %14 : vector<8x768xf32>
    %531 = arith.index_cast %c7_i32_139 : i32 to index
    %c0_144 = arith.constant 0 : index
    %c0_145 = arith.constant 0 : index
    %532 = vector.load %arg7[%531, %c0_144, %c0_145] : memref<8x8x384xf32, #tpu.memory_space<vmem>>, vector<1x8x384xf32>
    %533 = vector.shape_cast %532 : vector<1x8x384xf32> to vector<8x384xf32>
    %534 = arith.index_cast %527 : i32 to index
    %c0_146 = arith.constant 0 : index
    %c0_147 = arith.constant 0 : index
    %535 = vector.load %arg8[%534, %c0_146, %c0_147] : memref<8x8x384xf32, #tpu.memory_space<vmem>>, vector<1x8x384xf32>
    %536 = vector.shape_cast %535 : vector<1x8x384xf32> to vector<8x384xf32>
    %537 = vector.extract_strided_slice %526 {offsets = [0, 0], sizes = [8, 128], strides = [1, 1]} : vector<8x256xf32> to vector<8x128xf32>
    %538 = vector.extract_strided_slice %526 {offsets = [0, 128], sizes = [8, 128], strides = [1, 1]} : vector<8x256xf32> to vector<8x128xf32>
    %539 = vector.extract_strided_slice %533 {offsets = [0, 0], sizes = [8, 128], strides = [1, 1]} : vector<8x384xf32> to vector<8x128xf32>
    %540 = vector.extract_strided_slice %530 {offsets = [0, 0], sizes = [8, 128], strides = [1, 1]} : vector<8x768xf32> to vector<8x128xf32>
    %541 = arith.addf %539, %540 : vector<8x128xf32>
    %542 = arith.negf %541 : vector<8x128xf32>
    %543 = math.exp %542 : vector<8x128xf32>
    %cst_148 = arith.constant 1.000000e+00 : f32
    %544 = vector.broadcast %cst_148 : f32 to vector<8x128xf32>
    %545 = arith.addf %544, %543 : vector<8x128xf32>
    %546 = arith.divf %544, %545 : vector<8x128xf32>
    %547 = vector.extract_strided_slice %533 {offsets = [0, 128], sizes = [8, 128], strides = [1, 1]} : vector<8x384xf32> to vector<8x128xf32>
    %548 = vector.extract_strided_slice %530 {offsets = [0, 128], sizes = [8, 128], strides = [1, 1]} : vector<8x768xf32> to vector<8x128xf32>
    %549 = arith.addf %547, %548 : vector<8x128xf32>
    %550 = arith.negf %549 : vector<8x128xf32>
    %551 = math.exp %550 : vector<8x128xf32>
    %cst_149 = arith.constant 1.000000e+00 : f32
    %552 = vector.broadcast %cst_149 : f32 to vector<8x128xf32>
    %553 = arith.addf %552, %551 : vector<8x128xf32>
    %554 = arith.divf %552, %553 : vector<8x128xf32>
    %555 = vector.extract_strided_slice %533 {offsets = [0, 256], sizes = [8, 128], strides = [1, 1]} : vector<8x384xf32> to vector<8x128xf32>
    %556 = vector.extract_strided_slice %530 {offsets = [0, 256], sizes = [8, 128], strides = [1, 1]} : vector<8x768xf32> to vector<8x128xf32>
    %557 = arith.mulf %546, %556 : vector<8x128xf32>
    %558 = arith.addf %555, %557 : vector<8x128xf32>
    %559 = math.tanh %558 : vector<8x128xf32>
    %cst_150 = arith.constant 1.000000e+00 : f32
    %560 = vector.broadcast %cst_150 : f32 to vector<8x128xf32>
    %561 = arith.subf %560, %554 : vector<8x128xf32>
    %562 = arith.mulf %561, %559 : vector<8x128xf32>
    %563 = arith.mulf %554, %537 : vector<8x128xf32>
    %564 = arith.addf %562, %563 : vector<8x128xf32>
    %565 = vector.extract_strided_slice %536 {offsets = [0, 0], sizes = [8, 128], strides = [1, 1]} : vector<8x384xf32> to vector<8x128xf32>
    %566 = vector.extract_strided_slice %530 {offsets = [0, 384], sizes = [8, 128], strides = [1, 1]} : vector<8x768xf32> to vector<8x128xf32>
    %567 = arith.addf %565, %566 : vector<8x128xf32>
    %568 = arith.negf %567 : vector<8x128xf32>
    %569 = math.exp %568 : vector<8x128xf32>
    %cst_151 = arith.constant 1.000000e+00 : f32
    %570 = vector.broadcast %cst_151 : f32 to vector<8x128xf32>
    %571 = arith.addf %570, %569 : vector<8x128xf32>
    %572 = arith.divf %570, %571 : vector<8x128xf32>
    %573 = vector.extract_strided_slice %536 {offsets = [0, 128], sizes = [8, 128], strides = [1, 1]} : vector<8x384xf32> to vector<8x128xf32>
    %574 = vector.extract_strided_slice %530 {offsets = [0, 512], sizes = [8, 128], strides = [1, 1]} : vector<8x768xf32> to vector<8x128xf32>
    %575 = arith.addf %573, %574 : vector<8x128xf32>
    %576 = arith.negf %575 : vector<8x128xf32>
    %577 = math.exp %576 : vector<8x128xf32>
    %cst_152 = arith.constant 1.000000e+00 : f32
    %578 = vector.broadcast %cst_152 : f32 to vector<8x128xf32>
    %579 = arith.addf %578, %577 : vector<8x128xf32>
    %580 = arith.divf %578, %579 : vector<8x128xf32>
    %581 = vector.extract_strided_slice %536 {offsets = [0, 256], sizes = [8, 128], strides = [1, 1]} : vector<8x384xf32> to vector<8x128xf32>
    %582 = vector.extract_strided_slice %530 {offsets = [0, 640], sizes = [8, 128], strides = [1, 1]} : vector<8x768xf32> to vector<8x128xf32>
    %583 = arith.mulf %572, %582 : vector<8x128xf32>
    %584 = arith.addf %581, %583 : vector<8x128xf32>
    %585 = math.tanh %584 : vector<8x128xf32>
    %cst_153 = arith.constant 1.000000e+00 : f32
    %586 = vector.broadcast %cst_153 : f32 to vector<8x128xf32>
    %587 = arith.subf %586, %580 : vector<8x128xf32>
    %588 = arith.mulf %587, %585 : vector<8x128xf32>
    %589 = arith.mulf %580, %538 : vector<8x128xf32>
    %590 = arith.addf %588, %589 : vector<8x128xf32>
    %591 = arith.index_cast %c7_i32_139 : i32 to index
    %c0_154 = arith.constant 0 : index
    %c0_155 = arith.constant 0 : index
    %592 = vector.load %arg5[%591, %c0_154, %c0_155] : memref<8x8x128xf32, #tpu.memory_space<vmem>>, vector<1x8x128xf32>
    %593 = vector.shape_cast %592 : vector<1x8x128xf32> to vector<8x128xf32>
    %594 = vector.shape_cast %564 : vector<8x128xf32> to vector<1x8x128xf32>
    tpu.vector_store %arg5[%591, %c0_154, %c0_155], %594 {strides = array<i32>} : memref<8x8x128xf32, #tpu.memory_space<vmem>>, vector<1x8x128xf32>,
    %595 = arith.index_cast %527 : i32 to index
    %c0_156 = arith.constant 0 : index
    %c0_157 = arith.constant 0 : index
    %596 = vector.load %arg8[%595, %c0_156, %c0_157] : memref<8x8x384xf32, #tpu.memory_space<vmem>>, vector<1x8x128xf32>
    %597 = vector.shape_cast %596 : vector<1x8x128xf32> to vector<8x128xf32>
    %598 = vector.shape_cast %590 : vector<8x128xf32> to vector<1x8x128xf32>
    tpu.vector_store %arg8[%595, %c0_156, %c0_157], %598 {strides = array<i32>} : memref<8x8x384xf32, #tpu.memory_space<vmem>>, vector<1x8x128xf32>,
    %599 = tpu.concatenate %564, %590 in 1 : vector<8x128xf32>, vector<8x128xf32> -> vector<8x256xf32>
    %c8_i32 = arith.constant 8 : i32
    %c0_158 = arith.constant 0 : index
    %c0_159 = arith.constant 0 : index
    %c0_160 = arith.constant 0 : index
    %600 = vector.load %arg5[%c0_158, %c0_159, %c0_160] : memref<8x8x128xf32, #tpu.memory_space<vmem>>, vector<8x8x128xf32>
    %c0_161 = arith.constant 0 : index
    %c0_162 = arith.constant 0 : index
    %c0_163 = arith.constant 0 : index
    %601 = vector.load %arg8[%c0_161, %c0_162, %c0_163] : memref<8x8x384xf32, #tpu.memory_space<vmem>>, vector<8x8x128xf32>
    %602 = arith.addf %600, %601 : vector<8x8x128xf32>
    %c0_164 = arith.constant 0 : index
    %c0_165 = arith.constant 0 : index
    %c0_166 = arith.constant 0 : index
    %603 = vector.load %arg5[%c0_164, %c0_165, %c0_166] : memref<8x8x128xf32, #tpu.memory_space<vmem>>, vector<8x8x128xf32>
    tpu.vector_store %arg5[%c0_164, %c0_165, %c0_166], %602 {strides = array<i32>} : memref<8x8x128xf32, #tpu.memory_space<vmem>>, vector<8x8x128xf32>,
    %604 = vector.extract_strided_slice %599 {offsets = [0, 0], sizes = [8, 128], strides = [1, 1]} : vector<8x256xf32> to vector<8x128xf32>
    %c0_167 = arith.constant 0 : index
    %c0_168 = arith.constant 0 : index
    %c0_169 = arith.constant 0 : index
    %605 = vector.load %arg6[%c0_167, %c0_168, %c0_169] : memref<2x8x128xf32, #tpu.memory_space<vmem>>, vector<1x8x128xf32>
    %606 = vector.shape_cast %605 : vector<1x8x128xf32> to vector<8x128xf32>
    %607 = vector.shape_cast %604 : vector<8x128xf32> to vector<1x8x128xf32>
    tpu.vector_store %arg6[%c0_167, %c0_168, %c0_169], %607 {strides = array<i32>} : memref<2x8x128xf32, #tpu.memory_space<vmem>>, vector<1x8x128xf32>,
    %608 = vector.extract_strided_slice %599 {offsets = [0, 128], sizes = [8, 128], strides = [1, 1]} : vector<8x256xf32> to vector<8x128xf32>
    %c1 = arith.constant 1 : index
    %c0_170 = arith.constant 0 : index
    %c0_171 = arith.constant 0 : index
    %609 = vector.load %arg6[%c1, %c0_170, %c0_171] : memref<2x8x128xf32, #tpu.memory_space<vmem>>, vector<1x8x128xf32>
    %610 = vector.shape_cast %609 : vector<1x8x128xf32> to vector<8x128xf32>
    %611 = vector.shape_cast %608 : vector<8x128xf32> to vector<1x8x128xf32>
    tpu.vector_store %arg6[%c1, %c0_170, %c0_171], %611 {strides = array<i32>} : memref<2x8x128xf32, #tpu.memory_space<vmem>>, vector<1x8x128xf32>,
    return
  }
}

</mosaic_0001>

<bundles_post_ra>
// kernel: encoder_rnn_forward.1
= control target key start
LH: loop header
LB: loop body
LE: loop exit
PB: predicated region body
PF: predicated region fallthrough
CT: control target
= control target key end

     0   :  { %v4474_v3 = vmov 0.0   ;;  %vm74_vm0 = vcmask 130048   ;;  %s10269_s1 = inlined_call_operand.vmem [shape: f32[16,768], index: 1, kind: input, shape index: {}]   ;;  %s10270_s0 = inlined_call_operand.vmem [shape: f32[64,16], index: 0, kind: input, shape index: {}]   ;;  %s10271_s3 = inlined_call_operand.vmem [shape: f32[256,768], index: 3, kind: input, shape index: {}]   ;;  %s10272_s2 = inlined_call_operand.vmem [shape: f32[1,768], index: 2, kind: input, shape index: {}]   ;;  %s10273_s4 = inlined_call_operand.vmem [shape: f32[1,768], index: 4, kind: input, shape index: {}]   ;;  %s10274_s5 = inlined_call_operand.vmem [shape: f32[8,8,128], index: 5, kind: output, shape index: {0}]   ;;  %s10275_s6 = inlined_call_operand.vmem [shape: f32[2,8,128], index: 6, kind: output, shape index: {1}]  }
   0x1   :  { %v37_v0 = vld [vmem:[%s10269_s1 + $0x38] sm:$0xff]  ;;  %v36_v1 = vld [vmem:[%s10269_s1 + $0x30] sm:$0xff]  ;;  %v31_v2 = vld [vmem:[%s10269_s1 + $0x8] sm:$0xff]  ;;  %163 = vmatprep.mubr.f32.mxu0 %v4474_v3  ;;  %187 = vmatprep.mubr.f32.mxu1 %v4474_v3 }
   0x2   :  { %127 = vmatprep.subr.mxu0 %v37_v0  ;;  %4286 = vmatprep.subr.mxu1 %v37_v0  ;;  %v30_v4 = vld [vmem:[%s10269_s1] sm:$0xff]  ;;  %v39_v7 = vld [vmem:[%s10269_s1 + $0x48] sm:$0xff]  ;;  %v33_v9 = vld [vmem:[%s10269_s1 + $0x18] sm:$0xff] }
   0x3   :  { %128 = vmatpush1.msra.mxu0 %v36_v1  ;;  %4288 = vmatpush1.msra.mxu1 %v36_v1  ;;  %v22_v5 = vld [vmem:[%s10270_s0] sm:$0xff]  ;;  %v41_v10 = vld [vmem:[%s10269_s1 + $0x58] sm:$0xff]  ;;  %v4551_v11 = vld [vmem:[%s10270_s0 + $0x8] sm:$0xff] }
   0x4   :  { %v4530_v6 = vld [vmem:[%s10270_s0 + $0x20] sm:$0xff]  ;;  %129 = vmatprep.subr.mxu0 %v31_v2  ;;  %4287 = vmatprep.subr.mxu1 %v31_v2  ;;  %v4556_v12 = vld [vmem:[%s10270_s0 + $0x28] sm:$0xff]  ;;  %v32_v13 = vld [vmem:[%s10269_s1 + $0x10] sm:$0xff] }
   0x5   :  { %130 = vmatpush1.msra.mxu0 %v30_v4  ;;  %4289 = vmatpush1.msra.mxu1 %v30_v4  ;;  %v38_v8 = vld [vmem:[%s10269_s1 + $0x40] sm:$0xff]  ;;  %v40_v14 = vld [vmem:[%s10269_s1 + $0x50] sm:$0xff]  ;;  %v35_v15 = vld [vmem:[%s10269_s1 + $0x28] sm:$0xff] }
   0x6   :  { %4222 = vmatmul.mubr.msk.f32.vlgmr.msra.gmra.mxu0 %vm74_vm0, %v22_v5  ;;  %4226 = vmatmul.mubr.msk.f32.vlgmr.msra.gmra.mxu1 %vm74_vm0, %v4530_v6  ;;  %v609_v16 = vld [vmem:[%s10271_s3 + $0x2d8] sm:$0xff]  ;;  %v4580_v17 = vld [vmem:[%s10270_s0 + $0x10] sm:$0xff]  ;;  %v34_v19 = vld [vmem:[%s10269_s1 + $0x20] sm:$0xff] }
   0x7   :  { %240 = vmatprep.subr.mxu1 %v39_v7  ;;  %169 = vmatprep.mubr.f32.mxu0 %v4474_v3  ;;  %v4585_v18 = vld [vmem:[%s10270_s0 + $0x30] sm:$0xff]  ;;  %v611_v20 = vld [vmem:[%s10271_s3 + $0x2e8] sm:$0xff]  ;;  %v4602_v21 = vld [vmem:[%s10270_s0 + $0x18] sm:$0xff] }
   0x8   :  { %241 = vmatpush1.msra.mxu1 %v38_v8  ;;  %193 = vmatprep.mubr.f32.mxu1 %v4474_v3  ;;  %v4607_v22 = vld [vmem:[%s10270_s0 + $0x38] sm:$0xff]  ;;  %v608_v23 = vld [vmem:[%s10271_s3 + $0x2d0] sm:$0xff]  ;;  %v610_v24 = vld [vmem:[%s10271_s3 + $0x2e0] sm:$0xff] }
   0x9   :  { %242 = vmatprep.subr.mxu1 %v33_v9  ;;  %353 = vmatprep.subr.mxu0 %v41_v10  ;;  %v603_v25 = vld [vmem:[%s10271_s3 + $0x2a8] sm:$0xff]  ;;  %v605_v26 = vld [vmem:[%s10271_s3 + $0x2b8] sm:$0xff]  ;;  %v602_v27 = vld [vmem:[%s10271_s3 + $0x2a0] sm:$0xff] }
   0xa   :  { %4223 = vmatmul.mubr.msk.f32.gmra.mxu0 %vm74_vm0, %v4551_v11  ;;  %4227 = vmatmul.mubr.msk.f32.gmra.mxu1 %vm74_vm0, %v4556_v12  ;;  %v604_v28 = vld [vmem:[%s10271_s3 + $0x2b0] sm:$0xff]  ;;  %v597_v29 = vld [vmem:[%s10271_s3 + $0x278] sm:$0xff]  ;;  %v599_v30 = vld [vmem:[%s10271_s3 + $0x288] sm:$0xff] }
   0xb   :  { %175 = vmatprep.mubr.f32.mxu0 %v4474_v3  ;;  %199 = vmatprep.mubr.f32.mxu1 %v4474_v3  ;;  %v596_v31 = vld [vmem:[%s10271_s3 + $0x270] sm:$0xff]  ;;  %v598_v32 = vld [vmem:[%s10271_s3 + $0x280] sm:$0xff]  ;;  %v591_v33 = vld [vmem:[%s10271_s3 + $0x248] sm:$0xff] }
   0xc   :  { %243 = vmatpush1.msra.mxu1 %v32_v13  ;;  %354 = vmatpush1.msra.mxu0 %v40_v14  ;;  %v593_v34 = vld [vmem:[%s10271_s3 + $0x258] sm:$0xff]  ;;  %v590_v35 = vld [vmem:[%s10271_s3 + $0x240] sm:$0xff]  ;;  %v592_v36 = vld [vmem:[%s10271_s3 + $0x250] sm:$0xff] }
   0xd   :  { %355 = vmatprep.subr.mxu0 %v35_v15  ;;  %710 = vmatprep.subr.mxu1 %v609_v16  ;;  %v585_v37 = vld [vmem:[%s10271_s3 + $0x218] sm:$0xff]  ;;  %v587_v38 = vld [vmem:[%s10271_s3 + $0x228] sm:$0xff]  ;;  %v584_v39 = vld [vmem:[%s10271_s3 + $0x210] sm:$0xff] }
   0xe   :  { %4224 = vmatmul.mubr.msk.f32.gmra.mxu0 %vm74_vm0, %v4580_v17  ;;  %4228 = vmatmul.mubr.msk.f32.gmra.mxu1 %vm74_vm0, %v4585_v18  ;;  %v586_v40 = vld [vmem:[%s10271_s3 + $0x220] sm:$0xff]  ;;  %v579_v41 = vld [vmem:[%s10271_s3 + $0x1e8] sm:$0xff]  ;;  %v581_v42 = vld [vmem:[%s10271_s3 + $0x1f8] sm:$0xff] }
   0xf   :  { %181 = vmatprep.mubr.f32.mxu0 %v4474_v3  ;;  %205 = vmatprep.mubr.f32.mxu1 %v4474_v3  ;;  %v578_v43 = vld [vmem:[%s10271_s3 + $0x1e0] sm:$0xff]  ;;  %v580_v44 = vld [vmem:[%s10271_s3 + $0x1f0] sm:$0xff]  ;;  %v573_v45 = vld [vmem:[%s10271_s3 + $0x1b8] sm:$0xff] }
  0x10   :  { %356 = vmatpush1.msra.mxu0 %v34_v19  ;;  %v575_v46 = vld [vmem:[%s10271_s3 + $0x1c8] sm:$0xff]  ;;  %v572_v47 = vld [vmem:[%s10271_s3 + $0x1b0] sm:$0xff]  ;;  %v574_v48 = vld [vmem:[%s10271_s3 + $0x1c0] sm:$0xff] }
  0x11   :  { %781 = vmatprep.subr.mxu0 %v611_v20  ;;  %v567_v49 = vld [vmem:[%s10271_s3 + $0x188] sm:$0xff]  ;;  %v569_v50 = vld [vmem:[%s10271_s3 + $0x198] sm:$0xff]  ;;  %v566_v51 = vld [vmem:[%s10271_s3 + $0x180] sm:$0xff] }
  0x12   :  { %4225 = vmatmul.mubr.msk.f32.gmra.mxu0 %vm74_vm0, %v4602_v21  ;;  %4229 = vmatmul.mubr.msk.f32.gmra.mxu1 %vm74_vm0, %v4607_v22  ;;  %v568_v52 = vld [vmem:[%s10271_s3 + $0x190] sm:$0xff]  ;;  %v561_v53 = vld [vmem:[%s10271_s3 + $0x158] sm:$0xff]  ;;  %v563_v54 = vld [vmem:[%s10271_s3 + $0x168] sm:$0xff] }
  0x13   :  { %276 = vmatprep.mubr.f32.mxu1 %v4474_v3  ;;  %389 = vmatprep.mubr.f32.mxu0 %v4474_v3  ;;  %v560_v55 = vld [vmem:[%s10271_s3 + $0x150] sm:$0xff]  ;;  %v562_v56 = vld [vmem:[%s10271_s3 + $0x160] sm:$0xff]  ;;  %v555_v57 = vld [vmem:[%s10271_s3 + $0x128] sm:$0xff] }
  0x14   :  { %v557_v58 = vld [vmem:[%s10271_s3 + $0x138] sm:$0xff]  ;;  %v554_v59 = vld [vmem:[%s10271_s3 + $0x120] sm:$0xff]  ;;  %v556_v60 = vld [vmem:[%s10271_s3 + $0x130] sm:$0xff] }
  0x15   :  { %v549_v61 = vld [vmem:[%s10271_s3 + $0xf8] sm:$0xff]  ;;  %v551_v62 = vld [vmem:[%s10271_s3 + $0x108] sm:$0xff]  ;;  %v548_v63 = vld [vmem:[%s10271_s3 + $0xf0] sm:$0xff] }
  0x16   :  { %4230 = vmatmul.mubr.msk.f32.vlgmr.msra.gmra.mxu1 %vm74_vm0, %v22_v5  ;;  %4238 = vmatmul.mubr.msk.f32.vlgmr.msra.gmra.mxu0 %vm74_vm0, %v22_v5  ;;  %v550_v0 = vld [vmem:[%s10271_s3 + $0x100] sm:$0xff]  ;;  %v543_v1 = vld [vmem:[%s10271_s3 + $0xc8] sm:$0xff]  ;;  %v545_v2 = vld [vmem:[%s10271_s3 + $0xd8] sm:$0xff] }
  0x17   :  { %711 = vmatpush1.msra.mxu1 %v608_v23  ;;  %782 = vmatpush1.msra.mxu0 %v610_v24  ;;  %v542_v4 = vld [vmem:[%s10271_s3 + $0xc0] sm:$0xff]  ;;  %v544_v5 = vld [vmem:[%s10271_s3 + $0xd0] sm:$0xff]  ;;  %v537_v7 = vld [vmem:[%s10271_s3 + $0x98] sm:$0xff] }
  0x18   :  { %712 = vmatprep.subr.mxu1 %v603_v25  ;;  %783 = vmatprep.subr.mxu0 %v605_v26  ;;  %v539_v8 = vld [vmem:[%s10271_s3 + $0xa8] sm:$0xff]  ;;  %v536_v9 = vld [vmem:[%s10271_s3 + $0x90] sm:$0xff]  ;;  %v538_v10 = vld [vmem:[%s10271_s3 + $0xa0] sm:$0xff] }
  0x19   :  { %713 = vmatpush1.msra.mxu1 %v602_v27  ;;  %784 = vmatpush1.msra.mxu0 %v604_v28  ;;  %v531_v13 = vld [vmem:[%s10271_s3 + $0x68] sm:$0xff]  ;;  %v533_v14 = vld [vmem:[%s10271_s3 + $0x78] sm:$0xff]  ;;  %v530_v15 = vld [vmem:[%s10271_s3 + $0x60] sm:$0xff] }
  0x1a   :  { %714 = vmatprep.subr.mxu1 %v597_v29  ;;  %785 = vmatprep.subr.mxu0 %v599_v30  ;;  %v532_v16 = vld [vmem:[%s10271_s3 + $0x70] sm:$0xff]  ;;  %v525_v19 = vld [vmem:[%s10271_s3 + $0x38] sm:$0xff]  ;;  %v527_v20 = vld [vmem:[%s10271_s3 + $0x48] sm:$0xff] }
  0x1b   :  { %715 = vmatpush1.msra.mxu1 %v596_v31  ;;  %786 = vmatpush1.msra.mxu0 %v598_v32  ;;  %v524_v23 = vld [vmem:[%s10271_s3 + $0x30] sm:$0xff]  ;;  %v526_v24 = vld [vmem:[%s10271_s3 + $0x40] sm:$0xff]  ;;  %v519_v25 = vld [vmem:[%s10271_s3 + $0x8] sm:$0xff] }
  0x1c   :  { %716 = vmatprep.subr.mxu1 %v591_v33  ;;  %787 = vmatprep.subr.mxu0 %v593_v34  ;;  %v521_v26 = vld [vmem:[%s10271_s3 + $0x18] sm:$0xff]  ;;  %v518_v27 = vld [vmem:[%s10271_s3] sm:$0xff]  ;;  %v520_v28 = vld [vmem:[%s10271_s3 + $0x10] sm:$0xff] }
  0x1d   :  { %717 = vmatpush1.msra.mxu1 %v590_v35  ;;  %788 = vmatpush1.msra.mxu0 %v592_v36  ;;  %v705_v29 = vld [vmem:[%s10271_s3 + $0x5d8] sm:$0xff]  ;;  %v707_v30 = vld [vmem:[%s10271_s3 + $0x5e8] sm:$0xff]  ;;  %v704_v31 = vld [vmem:[%s10271_s3 + $0x5d0] sm:$0xff] }
  0x1e   :  { %718 = vmatprep.subr.mxu1 %v585_v37  ;;  %789 = vmatprep.subr.mxu0 %v587_v38  ;;  %v706_v32 = vld [vmem:[%s10271_s3 + $0x5e0] sm:$0xff]  ;;  %v699_v33 = vld [vmem:[%s10271_s3 + $0x5a8] sm:$0xff]  ;;  %v701_v34 = vld [vmem:[%s10271_s3 + $0x5b8] sm:$0xff] }
  0x1f   :  { %719 = vmatpush1.msra.mxu1 %v584_v39  ;;  %790 = vmatpush1.msra.mxu0 %v586_v40  ;;  %v698_v35 = vld [vmem:[%s10271_s3 + $0x5a0] sm:$0xff]  ;;  %v700_v36 = vld [vmem:[%s10271_s3 + $0x5b0] sm:$0xff]  ;;  %v693_v37 = vld [vmem:[%s10271_s3 + $0x578] sm:$0xff] }
  0x20   :  { %720 = vmatprep.subr.mxu1 %v579_v41  ;;  %791 = vmatprep.subr.mxu0 %v581_v42  ;;  %v695_v38 = vld [vmem:[%s10271_s3 + $0x588] sm:$0xff]  ;;  %v692_v39 = vld [vmem:[%s10271_s3 + $0x570] sm:$0xff]  ;;  %v694_v40 = vld [vmem:[%s10271_s3 + $0x580] sm:$0xff] }
  0x21   :  { %721 = vmatpush1.msra.mxu1 %v578_v43  ;;  %792 = vmatpush1.msra.mxu0 %v580_v44  ;;  %v687_v41 = vld [vmem:[%s10271_s3 + $0x548] sm:$0xff]  ;;  %v689_v42 = vld [vmem:[%s10271_s3 + $0x558] sm:$0xff]  ;;  %v686_v43 = vld [vmem:[%s10271_s3 + $0x540] sm:$0xff] }
  0x22   :  { %722 = vmatprep.subr.mxu1 %v573_v45  ;;  %793 = vmatprep.subr.mxu0 %v575_v46  ;;  %v681_v44 = vld [vmem:[%s10271_s3 + $0x518] sm:$0xff]  ;;  %v683_v45 = vld [vmem:[%s10271_s3 + $0x528] sm:$0xff]  ;;  %v680_v46 = vld [vmem:[%s10271_s3 + $0x510] sm:$0xff] }
  0x23   :  { %723 = vmatpush1.msra.mxu1 %v572_v47  ;;  %794 = vmatpush1.msra.mxu0 %v574_v48  ;;  %v682_v47 = vld [vmem:[%s10271_s3 + $0x520] sm:$0xff]  ;;  %v675_v48 = vld [vmem:[%s10271_s3 + $0x4e8] sm:$0xff] }
  0x24   :  { %724 = vmatprep.subr.mxu1 %v567_v49  ;;  %795 = vmatprep.subr.mxu0 %v569_v50  ;;  %v677_v49 = vld [vmem:[%s10271_s3 + $0x4f8] sm:$0xff]  ;;  %v674_v50 = vld [vmem:[%s10271_s3 + $0x4e0] sm:$0xff] }
  0x25   :  { %725 = vmatpush1.msra.mxu1 %v566_v51  ;;  %796 = vmatpush1.msra.mxu0 %v568_v52  ;;  %v669_v51 = vld [vmem:[%s10271_s3 + $0x4b8] sm:$0xff]  ;;  %v671_v52 = vld [vmem:[%s10271_s3 + $0x4c8] sm:$0xff] }
  0x26   :  { %726 = vmatprep.subr.mxu1 %v561_v53  ;;  %797 = vmatprep.subr.mxu0 %v563_v54  ;;  %v668_v53 = vld [vmem:[%s10271_s3 + $0x4b0] sm:$0xff]  ;;  %v670_v54 = vld [vmem:[%s10271_s3 + $0x4c0] sm:$0xff] }
  0x27   :  { %727 = vmatpush1.msra.mxu1 %v560_v55  ;;  %798 = vmatpush1.msra.mxu0 %v562_v56  ;;  %v663_v55 = vld [vmem:[%s10271_s3 + $0x488] sm:$0xff]  ;;  %v665_v56 = vld [vmem:[%s10271_s3 + $0x498] sm:$0xff] }
  0x28   :  { %728 = vmatprep.subr.mxu1 %v555_v57  ;;  %799 = vmatprep.subr.mxu0 %v557_v58  ;;  %v662_v57 = vld [vmem:[%s10271_s3 + $0x480] sm:$0xff]  ;;  %v657_v58 = vld [vmem:[%s10271_s3 + $0x458] sm:$0xff] }
  0x29   :  { %729 = vmatpush1.msra.mxu1 %v554_v59  ;;  %800 = vmatpush1.msra.mxu0 %v556_v60  ;;  %v659_v59 = vld [vmem:[%s10271_s3 + $0x468] sm:$0xff]  ;;  %v656_v60 = vld [vmem:[%s10271_s3 + $0x450] sm:$0xff] }
  0x2a   :  { %730 = vmatprep.subr.mxu1 %v549_v61  ;;  %801 = vmatprep.subr.mxu0 %v551_v62  ;;  %v658_v61 = vld [vmem:[%s10271_s3 + $0x460] sm:$0xff]  ;;  %v651_v62 = vld [vmem:[%s10271_s3 + $0x428] sm:$0xff] }
  0x2b   :  { %731 = vmatpush1.msra.mxu1 %v548_v63  ;;  %802 = vmatpush1.msra.mxu0 %v550_v0  ;;  %v653_v63 = vld [vmem:[%s10271_s3 + $0x438] sm:$0xff]  ;;  %v650_v0 = vld [vmem:[%s10271_s3 + $0x420] sm:$0xff] }
  0x2c   :  { %732 = vmatprep.subr.mxu1 %v543_v1  ;;  %803 = vmatprep.subr.mxu0 %v545_v2  ;;  %v645_v1 = vld [vmem:[%s10271_s3 + $0x3f8] sm:$0xff]  ;;  %v647_v2 = vld [vmem:[%s10271_s3 + $0x408] sm:$0xff] }
  0x2d   :  { %733 = vmatpush1.msra.mxu1 %v542_v4  ;;  %804 = vmatpush1.msra.mxu0 %v544_v5  ;;  %v644_v4 = vld [vmem:[%s10271_s3 + $0x3f0] sm:$0xff]  ;;  %v646_v5 = vld [vmem:[%s10271_s3 + $0x400] sm:$0xff] }
  0x2e   :  { %734 = vmatprep.subr.mxu1 %v537_v7  ;;  %805 = vmatprep.subr.mxu0 %v539_v8  ;;  %v639_v7 = vld [vmem:[%s10271_s3 + $0x3c8] sm:$0xff]  ;;  %v641_v8 = vld [vmem:[%s10271_s3 + $0x3d8] sm:$0xff] }
  0x2f   :  { %735 = vmatpush1.msra.mxu1 %v536_v9  ;;  %806 = vmatpush1.msra.mxu0 %v538_v10  ;;  %v44_v9 = vlaneseq  ;;  %v638_v10 = vld [vmem:[%s10271_s3 + $0x3c0] sm:$0xff] }
  0x30   :  { %736 = vmatprep.subr.mxu1 %v531_v13  ;;  %807 = vmatprep.subr.mxu0 %v533_v14  ;;  %v633_v13 = vld [vmem:[%s10271_s3 + $0x398] sm:$0xff]  ;;  %v635_v14 = vld [vmem:[%s10271_s3 + $0x3a8] sm:$0xff] }
  0x31   :  { %737 = vmatpush1.msra.mxu1 %v530_v15  ;;  %808 = vmatpush1.msra.mxu0 %v532_v16  ;;  %v4985_v15 = vshrl.u32 %v44_v9, 7  ;;  %v632_v16 = vld [vmem:[%s10271_s3 + $0x390] sm:$0xff]  ;;  %v691_v9 = vld [vmem:[%s10271_s3 + $0x568] sm:$0xff] }
  0x32   :  { %738 = vmatprep.subr.mxu1 %v525_v19  ;;  %809 = vmatprep.subr.mxu0 %v527_v20  ;;  %v634_v19 = vld [vmem:[%s10271_s3 + $0x3a0] sm:$0xff]  ;;  %v627_v20 = vld [vmem:[%s10271_s3 + $0x368] sm:$0xff] }
  0x33   :  { %739 = vmatpush1.msra.mxu1 %v524_v23  ;;  %810 = vmatpush1.msra.mxu0 %v526_v24  ;;  %v629_v23 = vld [vmem:[%s10271_s3 + $0x378] sm:$0xff]  ;;  %v10277_v24 = vsub.s32 4, %v4985_v15 }
  0x34   :  { %740 = vmatprep.subr.mxu1 %v519_v25  ;;  %811 = vmatprep.subr.mxu0 %v521_v26  ;;  %v10276_v25 = vsub.s32 5, %v4985_v15  ;;  %v5008_v26 = vld [vmem:[%s10272_s2] sm:$0x3f] }
  0x35   :  { %741 = vmatpush1.msra.mxu1 %v518_v27  ;;  %812 = vmatpush1.msra.mxu0 %v520_v28  ;;  %v628_v27 = vld [vmem:[%s10271_s3 + $0x370] sm:$0xff]  ;;  %v5019_v28 = vrot.slane %v5008_v26, %v10277_v24  ;;  %v5612_v24 = vld [vmem:[%s10271_s3 + $0x8] sm:$0xff] }
  0x36   :  { %742 = vmatprep.subr.mxu1 %v705_v29  ;;  %813 = vmatprep.subr.mxu0 %v707_v30  ;;  %v5024_v29 = vrot.slane %v5008_v26, %v10276_v25  ;;  %v621_v30 = vld [vmem:[%s10271_s3 + $0x338] sm:$0xff]  ;;  %v5605_v25 = vld [vmem:[%s10271_s3 + $0x48] sm:$0xff] }
  0x37   :  { %743 = vmatpush2.msra.mxu1 %v704_v31  ;;  %814 = vmatpush2.msra.mxu0 %v706_v32  ;;  %v623_v31 = vld [vmem:[%s10271_s3 + $0x348] sm:$0xff]  ;;  %v620_v32 = vld [vmem:[%s10271_s3 + $0x330] sm:$0xff]  ;;  %10648 = vst [vmem:[#allocation27_spill] sm:$0xff] %v5605_v25 }
  0x38   :  { %744 = vmatprep.subr.mxu1 %v699_v33  ;;  %815 = vmatprep.subr.mxu0 %v701_v34  ;;  %v622_v33 = vld [vmem:[%s10271_s3 + $0x340] sm:$0xff]  ;;  %v615_v34 = vld [vmem:[%s10271_s3 + $0x308] sm:$0xff] }
  0x39   :  { %282 = vmatprep.mubr.f32.mxu1 %v4474_v3  ;;  %395 = vmatprep.mubr.f32.mxu0 %v4474_v3 }
  0x3a   :  { %745 = vmatpush2.msra.mxu1 %v698_v35  ;;  %816 = vmatpush2.msra.mxu0 %v700_v36  ;;  %v617_v35 = vld [vmem:[%s10271_s3 + $0x318] sm:$0xff]  ;;  %v614_v36 = vld [vmem:[%s10271_s3 + $0x300] sm:$0xff] }
  0x3b   :  { %4231 = vmatmul.mubr.msk.f32.gmra.mxu1 %vm74_vm0, %v4551_v11  ;;  %4239 = vmatmul.mubr.msk.f32.gmra.mxu0 %vm74_vm0, %v4551_v11  ;;  %v688_v11 = vld [vmem:[%s10271_s3 + $0x550] sm:$0xff] }
  0x3c   :  { %746 = vmatprep.subr.mxu1 %v693_v37  ;;  %817 = vmatprep.subr.mxu0 %v695_v38  ;;  %v613_v37 = vld [vmem:[%s10271_s3 + $0x2f8] sm:$0xff]  ;;  %v612_v38 = vld [vmem:[%s10271_s3 + $0x2f0] sm:$0xff] }
  0x3d   :  { %747 = vmatpush2.msra.mxu1 %v692_v39  ;;  %818 = vmatpush2.msra.mxu0 %v694_v40  ;;  %v607_v39 = vld [vmem:[%s10271_s3 + $0x2c8] sm:$0xff]  ;;  %v606_v40 = vld [vmem:[%s10271_s3 + $0x2c0] sm:$0xff] }
  0x3e   :  { %748 = vmatprep.subr.mxu1 %v687_v41  ;;  %819 = vmatprep.subr.mxu0 %v689_v42  ;;  %v601_v41 = vld [vmem:[%s10271_s3 + $0x298] sm:$0xff]  ;;  %v600_v42 = vld [vmem:[%s10271_s3 + $0x290] sm:$0xff] }
  0x3f   :  { %288 = vmatprep.mubr.f32.mxu1 %v4474_v3  ;;  %401 = vmatprep.mubr.f32.mxu0 %v4474_v3 }
  0x40   :  { %749 = vmatpush2.msra.mxu1 %v686_v43  ;;  %820 = vmatpush2.msra.mxu0 %v688_v11  ;;  %v595_v43 = vld [vmem:[%s10271_s3 + $0x268] sm:$0xff]  ;;  %v594_v11 = vld [vmem:[%s10271_s3 + $0x260] sm:$0xff] }
  0x41   :  { %4232 = vmatmul.mubr.msk.f32.gmra.mxu1 %vm74_vm0, %v4580_v17  ;;  %4240 = vmatmul.mubr.msk.f32.gmra.mxu0 %vm74_vm0, %v4580_v17  ;;  %v676_v17 = vld [vmem:[%s10271_s3 + $0x4f0] sm:$0xff] }
  0x42   :  { %750 = vmatprep.subr.mxu1 %v681_v44  ;;  %821 = vmatprep.subr.mxu0 %v683_v45  ;;  %v589_v44 = vld [vmem:[%s10271_s3 + $0x238] sm:$0xff]  ;;  %v588_v45 = vld [vmem:[%s10271_s3 + $0x230] sm:$0xff] }
  0x43   :  { %751 = vmatpush2.msra.mxu1 %v680_v46  ;;  %822 = vmatpush2.msra.mxu0 %v682_v47  ;;  %v583_v46 = vld [vmem:[%s10271_s3 + $0x208] sm:$0xff]  ;;  %v582_v47 = vld [vmem:[%s10271_s3 + $0x200] sm:$0xff] }
  0x44   :  { %752 = vmatprep.subr.mxu1 %v675_v48  ;;  %823 = vmatprep.subr.mxu0 %v677_v49  ;;  %v577_v48 = vld [vmem:[%s10271_s3 + $0x1d8] sm:$0xff]  ;;  %v576_v49 = vld [vmem:[%s10271_s3 + $0x1d0] sm:$0xff] }
  0x45   :  { %294 = vmatprep.mubr.f32.mxu1 %v4474_v3  ;;  %407 = vmatprep.mubr.f32.mxu0 %v4474_v3 }
  0x46   :  { %753 = vmatpush2.msra.mxu1 %v674_v50  ;;  %824 = vmatpush2.msra.mxu0 %v676_v17  ;;  %v571_v50 = vld [vmem:[%s10271_s3 + $0x1a8] sm:$0xff]  ;;  %v570_v17 = vld [vmem:[%s10271_s3 + $0x1a0] sm:$0xff] }
  0x47   :  { %4233 = vmatmul.mubr.msk.f32.gmra.mxu1 %vm74_vm0, %v4602_v21  ;;  %4241 = vmatmul.mubr.msk.f32.gmra.mxu0 %vm74_vm0, %v4602_v21  ;;  %v664_v21 = vld [vmem:[%s10271_s3 + $0x490] sm:$0xff] }
  0x48   :  { %754 = vmatprep.subr.mxu1 %v669_v51  ;;  %825 = vmatprep.subr.mxu0 %v671_v52  ;;  %v565_v51 = vld [vmem:[%s10271_s3 + $0x178] sm:$0xff]  ;;  %v564_v52 = vld [vmem:[%s10271_s3 + $0x170] sm:$0xff] }
  0x49   :  { %755 = vmatpush2.msra.mxu1 %v668_v53  ;;  %826 = vmatpush2.msra.mxu0 %v670_v54  ;;  %v559_v53 = vld [vmem:[%s10271_s3 + $0x148] sm:$0xff]  ;;  %v558_v54 = vld [vmem:[%s10271_s3 + $0x140] sm:$0xff] }
  0x4a   :  { %756 = vmatprep.subr.mxu1 %v663_v55  ;;  %827 = vmatprep.subr.mxu0 %v665_v56  ;;  %v553_v55 = vld [vmem:[%s10271_s3 + $0x118] sm:$0xff]  ;;  %v552_v56 = vld [vmem:[%s10271_s3 + $0x110] sm:$0xff] }
  0x4b   :  { %300 = vmatprep.mubr.f32.mxu1 %v4474_v3  ;;  %413 = vmatprep.mubr.f32.mxu0 %v4474_v3 }
  0x4c   :  { %757 = vmatpush2.msra.mxu1 %v662_v57  ;;  %828 = vmatpush2.msra.mxu0 %v664_v21  ;;  %v547_v57 = vld [vmem:[%s10271_s3 + $0xe8] sm:$0xff]  ;;  %v546_v21 = vld [vmem:[%s10271_s3 + $0xe0] sm:$0xff] }
  0x4d   :  { %4234 = vmatmul.mubr.msk.f32.gmra.mxu1 %vm74_vm0, %v4530_v6  ;;  %4242 = vmatmul.mubr.msk.f32.gmra.mxu0 %vm74_vm0, %v4530_v6  ;;  %v652_v6 = vld [vmem:[%s10271_s3 + $0x430] sm:$0xff] }
  0x4e   :  { %758 = vmatprep.subr.mxu1 %v657_v58  ;;  %829 = vmatprep.subr.mxu0 %v659_v59  ;;  %v541_v58 = vld [vmem:[%s10271_s3 + $0xb8] sm:$0xff]  ;;  %v540_v59 = vld [vmem:[%s10271_s3 + $0xb0] sm:$0xff] }
  0x4f   :  { %759 = vmatpush2.msra.mxu1 %v656_v60  ;;  %830 = vmatpush2.msra.mxu0 %v658_v61  ;;  %v535_v60 = vld [vmem:[%s10271_s3 + $0x88] sm:$0xff]  ;;  %v534_v61 = vld [vmem:[%s10271_s3 + $0x80] sm:$0xff] }
  0x50   :  { %760 = vmatprep.subr.mxu1 %v651_v62  ;;  %831 = vmatprep.subr.mxu0 %v653_v63  ;;  %v529_v62 = vld [vmem:[%s10271_s3 + $0x58] sm:$0xff]  ;;  %v528_v63 = vld [vmem:[%s10271_s3 + $0x50] sm:$0xff] }
  0x51   :  { %306 = vmatprep.mubr.f32.mxu1 %v4474_v3  ;;  %419 = vmatprep.mubr.f32.mxu0 %v4474_v3 }
  0x52   :  { %761 = vmatpush2.msra.mxu1 %v650_v0  ;;  %832 = vmatpush2.msra.mxu0 %v652_v6  ;;  %v523_v0 = vld [vmem:[%s10271_s3 + $0x28] sm:$0xff]  ;;  %v522_v6 = vld [vmem:[%s10271_s3 + $0x20] sm:$0xff] }
  0x53   :  { %4235 = vmatmul.mubr.msk.f32.gmra.mxu1 %vm74_vm0, %v4556_v12  ;;  %4243 = vmatmul.mubr.msk.f32.gmra.mxu0 %vm74_vm0, %v4556_v12  ;;  %v640_v12 = vld [vmem:[%s10271_s3 + $0x3d0] sm:$0xff] }
  0x54   :  { %762 = vmatprep.subr.mxu1 %v645_v1  ;;  %833 = vmatprep.subr.mxu0 %v647_v2  ;;  %v709_v1 = vld [vmem:[%s10271_s3 + $0x5f8] sm:$0xff]  ;;  %v708_v2 = vld [vmem:[%s10271_s3 + $0x5f0] sm:$0xff] }
  0x55   :  { %763 = vmatpush2.msra.mxu1 %v644_v4  ;;  %834 = vmatpush2.msra.mxu0 %v646_v5  ;;  %v703_v4 = vld [vmem:[%s10271_s3 + $0x5c8] sm:$0xff]  ;;  %v702_v5 = vld [vmem:[%s10271_s3 + $0x5c0] sm:$0xff] }
  0x56   :  { %764 = vmatprep.subr.mxu1 %v639_v7  ;;  %835 = vmatprep.subr.mxu0 %v641_v8  ;;  %v697_v7 = vld [vmem:[%s10271_s3 + $0x598] sm:$0xff]  ;;  %v696_v8 = vld [vmem:[%s10271_s3 + $0x590] sm:$0xff] }
  0x57   :  { %312 = vmatprep.mubr.f32.mxu1 %v4474_v3  ;;  %425 = vmatprep.mubr.f32.mxu0 %v4474_v3 }
  0x58   :  { %765 = vmatpush2.msra.mxu1 %v638_v10  ;;  %836 = vmatpush2.msra.mxu0 %v640_v12  ;;  %v690_v10 = vld [vmem:[%s10271_s3 + $0x560] sm:$0xff]  ;;  %v685_v12 = vld [vmem:[%s10271_s3 + $0x538] sm:$0xff] }
  0x59   :  { %4236 = vmatmul.mubr.msk.f32.gmra.mxu1 %vm74_vm0, %v4585_v18  ;;  %4244 = vmatmul.mubr.msk.f32.gmra.mxu0 %vm74_vm0, %v4585_v18  ;;  %v626_v18 = vld [vmem:[%s10271_s3 + $0x360] sm:$0xff] }
  0x5a   :  { %766 = vmatprep.subr.mxu1 %v633_v13  ;;  %837 = vmatprep.subr.mxu0 %v635_v14  ;;  %v684_v13 = vld [vmem:[%s10271_s3 + $0x530] sm:$0xff]  ;;  %v679_v14 = vld [vmem:[%s10271_s3 + $0x508] sm:$0xff] }
  0x5b   :  { %767 = vmatpush2.msra.mxu1 %v632_v16  ;;  %838 = vmatpush2.msra.mxu0 %v634_v19  ;;  %v678_v16 = vld [vmem:[%s10271_s3 + $0x500] sm:$0xff]  ;;  %v673_v19 = vld [vmem:[%s10271_s3 + $0x4d8] sm:$0xff] }
  0x5c   :  { %768 = vmatprep.subr.mxu1 %v627_v20  ;;  %839 = vmatprep.subr.mxu0 %v629_v23  ;;  %v672_v20 = vld [vmem:[%s10271_s3 + $0x4d0] sm:$0xff]  ;;  %v667_v23 = vld [vmem:[%s10271_s3 + $0x4a8] sm:$0xff] }
  0x5d   :  { %318 = vmatprep.mubr.f32.mxu1 %v4474_v3  ;;  %431 = vmatprep.mubr.f32.mxu0 %v4474_v3 }
  0x5e   :  { %769 = vmatpush2.msra.mxu1 %v626_v18  ;;  %840 = vmatpush2.msra.mxu0 %v628_v27  ;;  %v666_v18 = vld [vmem:[%s10271_s3 + $0x4a0] sm:$0xff]  ;;  %v661_v27 = vld [vmem:[%s10271_s3 + $0x478] sm:$0xff] }
  0x5f   :  { %4237 = vmatmul.mubr.msk.f32.gmra.mxu1 %vm74_vm0, %v4607_v22  ;;  %4245 = vmatmul.mubr.msk.f32.gmra.mxu0 %vm74_vm0, %v4607_v22  ;;  %v616_v22 = vld [vmem:[%s10271_s3 + $0x310] sm:$0xff] }
  0x60   :  { %770 = vmatprep.subr.mxu1 %v621_v30  ;;  %841 = vmatprep.subr.mxu0 %v623_v31  ;;  %v660_v30 = vld [vmem:[%s10271_s3 + $0x470] sm:$0xff]  ;;  %v655_v31 = vld [vmem:[%s10271_s3 + $0x448] sm:$0xff] }
  0x61   :  { %771 = vmatpush2.msra.mxu1 %v620_v32  ;;  %842 = vmatpush2.msra.mxu0 %v622_v33  ;;  %v654_v32 = vld [vmem:[%s10271_s3 + $0x440] sm:$0xff]  ;;  %v649_v33 = vld [vmem:[%s10271_s3 + $0x418] sm:$0xff] }
  0x62   :  { %772 = vmatprep.subr.mxu1 %v615_v34  ;;  %843 = vmatprep.subr.mxu0 %v617_v35  ;;  %v648_v34 = vld [vmem:[%s10271_s3 + $0x410] sm:$0xff]  ;;  %v643_v35 = vld [vmem:[%s10271_s3 + $0x3e8] sm:$0xff] }
  0x63   :  { %773 = vmatpush2.msra.mxu1 %v614_v36  ;;  %774 = vmatprep.mubr.f32.mxu1 %v4474_v3  ;;  %v642_v36 = vld [vmem:[%s10271_s3 + $0x3e0] sm:$0xff] }
  0x64   :  { %844 = vmatpush2.msra.mxu0 %v616_v22  ;;  %845 = vmatprep.mubr.f32.mxu0 %v4474_v3  ;;  %v637_v22 = vld [vmem:[%s10271_s3 + $0x3b8] sm:$0xff] }
  0x65   :  { %775 = vmatmul.mubr.f32.vlgmr.msra.gmra.mxu1 %v4474_v3  ;;  %846 = vmatmul.mubr.f32.vlgmr.msra.gmra.mxu0 %v4474_v3 }
  0x66   :  { %852 = vmatprep.subr.mxu1 %v613_v37  ;;  %916 = vmatprep.mubr.f32.mxu1 %v4474_v3  ;;  %v636_v37 = vld [vmem:[%s10271_s3 + $0x3b0] sm:$0xff] }
  0x67   :  { %853 = vmatpush1.msra.mxu1 %v612_v38  ;;  %v631_v38 = vld [vmem:[%s10271_s3 + $0x388] sm:$0xff] }
  0x68   :  { %854 = vmatprep.subr.mxu1 %v607_v39  ;;  %v630_v39 = vld [vmem:[%s10271_s3 + $0x380] sm:$0xff] }
  0x69   :  { %855 = vmatpush1.msra.mxu1 %v606_v40  ;;  %v625_v40 = vld [vmem:[%s10271_s3 + $0x358] sm:$0xff] }
  0x6a   :  { %856 = vmatprep.subr.mxu1 %v601_v41  ;;  %v624_v41 = vld [vmem:[%s10271_s3 + $0x350] sm:$0xff] }
  0x6b   :  { %857 = vmatpush1.msra.mxu1 %v600_v42  ;;  %v619_v42 = vld [vmem:[%s10271_s3 + $0x328] sm:$0xff] }
  0x6c   :  { %858 = vmatprep.subr.mxu1 %v595_v43  ;;  %v618_v43 = vld [vmem:[%s10271_s3 + $0x320] sm:$0xff] }
  0x6d   :  { %859 = vmatpush1.msra.mxu1 %v594_v11  ;;  %v10279_v11 = vsub.s32 0, %v4985_v15 }
  0x6e   :  { %860 = vmatprep.subr.mxu1 %v589_v44  ;;  %v10278_v44 = vsub.s32 1, %v4985_v15 }
  0x6f   :  { %861 = vmatpush1.msra.mxu1 %v588_v45  ;;  %v5259_v45 = vrot.slane %v5008_v26, %v10279_v11  ;;  %v5624_v11 = vld [vmem:[%s10271_s3] sm:$0xff] }
  0x70   :  { %862 = vmatprep.subr.mxu1 %v583_v46  ;;  %v5264_v46 = vrot.slane %v5008_v26, %v10278_v44  ;;  %v5617_v44 = vld [vmem:[%s10271_s3 + $0x40] sm:$0xff] }
  0x71   :  { %863 = vmatpush1.msra.mxu1 %v582_v47  ;;  %10649 = vst [vmem:[#allocation28_spill] sm:$0xff] %v5617_v44 }
  0x72   :  { %864 = vmatprep.subr.mxu1 %v577_v48 }
  0x73   :  { %865 = vmatpush1.msra.mxu1 %v576_v49 }
  0x74   :  { %866 = vmatprep.subr.mxu1 %v571_v50 }
  0x75   :  { %867 = vmatpush1.msra.mxu1 %v570_v17 }
  0x76   :  { %868 = vmatprep.subr.mxu1 %v565_v51 }
  0x77   :  { %869 = vmatpush1.msra.mxu1 %v564_v52 }
  0x78   :  { %870 = vmatprep.subr.mxu1 %v559_v53 }
  0x79   :  { %871 = vmatpush1.msra.mxu1 %v558_v54 }
  0x7a   :  { %872 = vmatprep.subr.mxu1 %v553_v55 }
  0x7b   :  { %873 = vmatpush1.msra.mxu1 %v552_v56 }
  0x7c   :  { %874 = vmatprep.subr.mxu1 %v547_v57 }
  0x7d   :  { %875 = vmatpush1.msra.mxu1 %v546_v21 }
  0x7e   :  { %876 = vmatprep.subr.mxu1 %v541_v58 }
  0x7f   :  { %877 = vmatpush1.msra.mxu1 %v540_v59  ;;  %v5291_v59 = vld [vmem:[%s10271_s3 + $0x2d8] sm:$0xff] }
  0x80   :  { %878 = vmatprep.subr.mxu1 %v535_v60  ;;  %v5296_v60 = vld [vmem:[%s10271_s3 + $0x2d0] sm:$0xff]  ;;  %1166 = vmatprep.subr.mxu0 %v5291_v59 }
  0x81   :  { %879 = vmatpush1.msra.mxu1 %v534_v61  ;;  %v1067_v61 = vld [vmem:[%s10271_s3 + $0x2e8] sm:$0xff]  ;;  %1167 = vmatpush1.msra.mxu0 %v5296_v60 }
  0x82   :  { %880 = vmatprep.subr.mxu1 %v529_v62 }
  0x83   :  { %881 = vmatpush1.msra.mxu1 %v528_v63 }
  0x84   :  { %882 = vmatprep.subr.mxu1 %v523_v0  ;;  %v5311_v0 = vld [vmem:[%s10271_s3 + $0x2a8] sm:$0xff] }
  0x85   :  { %883 = vmatpush1.msra.mxu1 %v522_v6  ;;  %v1066_v6 = vld [vmem:[%s10271_s3 + $0x2e0] sm:$0xff]  ;;  %1168 = vmatprep.subr.mxu0 %v5311_v0 }
  0x86   :  { %884 = vmatprep.subr.mxu1 %v709_v1  ;;  %v5319_v1 = vld [vmem:[%s10271_s3 + $0x2a0] sm:$0xff] }
  0x87   :  { %885 = vmatpush2.msra.mxu1 %v708_v2  ;;  %1169 = vmatpush1.msra.mxu0 %v5319_v1 }
  0x88   :  { %886 = vmatprep.subr.mxu1 %v703_v4 }
  0x89   :  { %887 = vmatpush2.msra.mxu1 %v702_v5  ;;  %v1061_v5 = vld [vmem:[%s10271_s3 + $0x2b8] sm:$0xff] }
  0x8a   :  { %888 = vmatprep.subr.mxu1 %v697_v7  ;;  %v5328_v7 = vld [vmem:[%s10271_s3 + $0x278] sm:$0xff] }
  0x8b   :  { %889 = vmatpush2.msra.mxu1 %v696_v8  ;;  %v1060_v8 = vld [vmem:[%s10271_s3 + $0x2b0] sm:$0xff]  ;;  %1170 = vmatprep.subr.mxu0 %v5328_v7 }
  0x8c   :  { %890 = vmatprep.subr.mxu1 %v691_v9 }
  0x8d   :  { %891 = vmatpush2.msra.mxu1 %v690_v10 }
  0x8e   :  { %892 = vmatprep.subr.mxu1 %v685_v12  ;;  %v5343_v12 = vld [vmem:[%s10271_s3 + $0x270] sm:$0xff] }
  0x8f   :  { %893 = vmatpush2.msra.mxu1 %v684_v13  ;;  %v1055_v13 = vld [vmem:[%s10271_s3 + $0x288] sm:$0xff]  ;;  %1171 = vmatpush1.msra.mxu0 %v5343_v12 }
  0x90   :  { %894 = vmatprep.subr.mxu1 %v679_v14 }
  0x91   :  { %895 = vmatpush2.msra.mxu1 %v678_v16 }
  0x92   :  { %896 = vmatprep.subr.mxu1 %v673_v19  ;;  %v5352_v19 = vld [vmem:[%s10271_s3 + $0x248] sm:$0xff] }
  0x93   :  { %897 = vmatpush2.msra.mxu1 %v672_v20  ;;  %v1054_v20 = vld [vmem:[%s10271_s3 + $0x280] sm:$0xff]  ;;  %1172 = vmatprep.subr.mxu0 %v5352_v19 }
  0x94   :  { %898 = vmatprep.subr.mxu1 %v667_v23  ;;  %v1049_v23 = vld [vmem:[%s10271_s3 + $0x258] sm:$0xff] }
  0x95   :  { %899 = vmatpush2.msra.mxu1 %v666_v18 }
  0x96   :  { %900 = vmatprep.subr.mxu1 %v661_v27 }
  0x97   :  { %901 = vmatpush2.msra.mxu1 %v660_v30  ;;  %v5370_v30 = vld [vmem:[%s10271_s3 + $0x240] sm:$0xff] }
  0x98   :  { %902 = vmatprep.subr.mxu1 %v655_v31  ;;  %v1048_v31 = vld [vmem:[%s10271_s3 + $0x250] sm:$0xff]  ;;  %1173 = vmatpush1.msra.mxu0 %v5370_v30 }
  0x99   :  { %903 = vmatpush2.msra.mxu1 %v654_v32 }
  0x9a   :  { %904 = vmatprep.subr.mxu1 %v649_v33 }
  0x9b   :  { %905 = vmatpush2.msra.mxu1 %v648_v34  ;;  %v5379_v34 = vld [vmem:[%s10271_s3 + $0x218] sm:$0xff] }
  0x9c   :  { %906 = vmatprep.subr.mxu1 %v643_v35  ;;  %v1043_v35 = vld [vmem:[%s10271_s3 + $0x228] sm:$0xff]  ;;  %1174 = vmatprep.subr.mxu0 %v5379_v34 }
  0x9d   :  { %907 = vmatpush2.msra.mxu1 %v642_v36 }
  0x9e   :  { %908 = vmatprep.subr.mxu1 %v637_v22 }
  0x9f   :  { %909 = vmatpush2.msra.mxu1 %v636_v37  ;;  %v5394_v37 = vld [vmem:[%s10271_s3 + $0x210] sm:$0xff] }
  0xa0   :  { %910 = vmatprep.subr.mxu1 %v631_v38  ;;  %v1042_v38 = vld [vmem:[%s10271_s3 + $0x220] sm:$0xff]  ;;  %1175 = vmatpush1.msra.mxu0 %v5394_v37 }
  0xa1   :  { %911 = vmatpush2.msra.mxu1 %v630_v39  ;;  %v5403_v39 = vld [vmem:[%s10271_s3 + $0x1e8] sm:$0xff] }
  0xa2   :  { %912 = vmatprep.subr.mxu1 %v625_v40  ;;  %v1037_v40 = vld [vmem:[%s10271_s3 + $0x1f8] sm:$0xff]  ;;  %1176 = vmatprep.subr.mxu0 %v5403_v39 }
  0xa3   :  { %913 = vmatpush2.msra.mxu1 %v624_v41  ;;  %v5412_v41 = vld [vmem:[%s10271_s3 + $0x1e0] sm:$0xff] }
  0xa4   :  { %914 = vmatprep.subr.mxu1 %v619_v42  ;;  %v1036_v42 = vld [vmem:[%s10271_s3 + $0x1f0] sm:$0xff]  ;;  %1177 = vmatpush1.msra.mxu0 %v5412_v41 }
  0xa5   :  { %915 = vmatpush2.msra.mxu1 %v618_v43  ;;  %v5421_v43 = vld [vmem:[%s10271_s3 + $0x1b8] sm:$0xff] }
  0xa6   :  { %917 = vmatmul.mubr.f32.vlgmr.msra.gmra.mxu1 %v4474_v3  ;;  %1237 = vmatprep.subr.mxu1 %v1067_v61  ;;  %v1019_v61 = vld [vmem:[%s10271_s3 + $0x168] sm:$0xff] }
  0xa7   :  { %1238 = vmatpush1.msra.mxu1 %v1066_v6  ;;  %1178 = vmatprep.subr.mxu0 %v5421_v43  ;;  %v5466_v6 = vld [vmem:[%s10271_s3 + $0x150] sm:$0xff] }
  0xa8   :  { %1239 = vmatprep.subr.mxu1 %v1061_v5  ;;  %v1013_v5 = vld [vmem:[%s10271_s3 + $0x138] sm:$0xff] }
  0xa9   :  { %1240 = vmatpush1.msra.mxu1 %v1060_v8  ;;  %v5484_v8 = vld [vmem:[%s10271_s3 + $0x120] sm:$0xff] }
  0xaa   :  { %1241 = vmatprep.subr.mxu1 %v1055_v13  ;;  %v5489_v13 = vld [vmem:[%s10271_s3 + $0x130] sm:$0xff] }
  0xab   :  { %1242 = vmatpush1.msra.mxu1 %v1054_v20  ;;  %10639 = vst [vmem:[#allocation18_spill] sm:$0xff] %v5489_v13  ;;  %v5509_v20 = vld [vmem:[%s10271_s3 + $0x108] sm:$0xff] }
  0xac   :  { %1243 = vmatprep.subr.mxu1 %v1049_v23  ;;  %10640 = vst [vmem:[#allocation19_spill] sm:$0xff] %v5509_v20  ;;  %v5516_v23 = vld [vmem:[%s10271_s3 + $0xc8] sm:$0xff] }
  0xad   :  { %1244 = vmatpush1.msra.mxu1 %v1048_v31  ;;  %v5521_v31 = vld [vmem:[%s10271_s3 + $0x100] sm:$0xff] }
  0xae   :  { %1245 = vmatprep.subr.mxu1 %v1043_v35  ;;  %10641 = vst [vmem:[#allocation20_spill] sm:$0xff] %v5521_v31  ;;  %v5540_v35 = vld [vmem:[%s10271_s3 + $0x98] sm:$0xff] }
  0xaf   :  { %1246 = vmatpush1.msra.mxu1 %v1042_v38  ;;  %v5545_v38 = vld [vmem:[%s10271_s3 + $0xd0] sm:$0xff] }
  0xb0   :  { %1247 = vmatprep.subr.mxu1 %v1037_v40  ;;  %10643 = vst [vmem:[#allocation22_spill] sm:$0xff] %v5545_v38  ;;  %v5552_v40 = vld [vmem:[%s10271_s3 + $0x90] sm:$0xff] }
  0xb1   :  { %1248 = vmatpush1.msra.mxu1 %v1036_v42  ;;  %v5557_v42 = vld [vmem:[%s10271_s3 + $0xa8] sm:$0xff] }
  0xb2   :  { %10644 = vst [vmem:[#allocation23_spill] sm:$0xff] %v5557_v42 }
  0xc6   :  { %v189_v47 = vpop.f32.mrf.mxu1  ;;  %v5266_v48 = vpop.f32.mrf.mxu0 }
  0xc7   :  { %v5269_v49 = vadd.f32 %v189_v47, %v5259_v45  ;;  %v1031_v47 = vld [vmem:[%s10271_s3 + $0x1c8] sm:$0xff] }
  0xc8   :  { %v191_v3 = vpop.f32.mrf.mxu1  ;;  %v5271_v50 = vpop.f32.mrf.mxu0  ;;  %1249 = vmatprep.subr.mxu1 %v1031_v47  ;;  %v5564_v47 = vld [vmem:[%s10271_s3 + $0x68] sm:$0xff] }
  0xc9   :  { %10625 = vst [vmem:[#allocation4_spill] sm:$0xff] %v5269_v49  ;;  %v5274_v17 = vadd.f32 %v191_v3, %v5264_v46  ;;  %v5430_v3 = vld [vmem:[%s10271_s3 + $0x1b0] sm:$0xff]  ;;  %v5672_v49 = vld [vmem:[%s10271_s3 + $0x5a0] sm:$0xff] }
  0xca   :  { %v195_v51 = vpop.f32.mrf.mxu1  ;;  %v171_v52 = vpop.f32.mrf.mxu0  ;;  %1179 = vmatpush1.msra.mxu0 %v5430_v3 }
  0xcb   :  { %10626 = vst [vmem:[#allocation5_spill] sm:$0xff] %v5274_v17  ;;  %v5277_v53 = vadd.f32 %v195_v51, %v5259_v45  ;;  %v5280_v26 = vadd.f32 %v171_v52, %v5259_v45  ;;  %v1030_v51 = vld [vmem:[%s10271_s3 + $0x1c0] sm:$0xff]  ;;  %v5439_v52 = vld [vmem:[%s10271_s3 + $0x188] sm:$0xff] }
  0xcc   :  { %v197_v54 = vpop.f32.mrf.mxu1  ;;  %v173_v55 = vpop.f32.mrf.mxu0  ;;  %1250 = vmatpush1.msra.mxu1 %v1030_v51  ;;  %1180 = vmatprep.subr.mxu0 %v5439_v52  ;;  %v5569_v51 = vld [vmem:[%s10271_s3 + $0xa0] sm:$0xff] }
  0xcd   :  { %10627 = vst [vmem:[#allocation6_spill] sm:$0xff] %v5277_v53  ;;  %10628 = vst [vmem:[#allocation7_spill] sm:$0xff] %v5280_v26  ;;  %v5283_v56 = vadd.f32 %v197_v54, %v5264_v46  ;;  %v5286_v57 = vadd.f32 %v173_v55, %v5264_v46  ;;  %v1025_v54 = vld [vmem:[%s10271_s3 + $0x198] sm:$0xff]  ;;  %v5448_v55 = vld [vmem:[%s10271_s3 + $0x180] sm:$0xff] }
  0xce   :  { %v201_v21 = vpop.f32.mrf.mxu1  ;;  %v177_v58 = vpop.f32.mrf.mxu0  ;;  %1251 = vmatprep.subr.mxu1 %v1025_v54  ;;  %1181 = vmatpush1.msra.mxu0 %v5448_v55  ;;  %10645 = vst [vmem:[#allocation24_spill] sm:$0xff] %v5569_v51  ;;  %v5576_v54 = vld [vmem:[%s10271_s3 + $0x60] sm:$0xff]  ;;  %v5660_v53 = vld [vmem:[%s10271_s3 + $0x5a8] sm:$0xff] }
  0xcf   :  { %10629 = vst [vmem:[#allocation8_spill] sm:$0xff] %v5283_v56  ;;  %10630 = vst [vmem:[#allocation9_spill] sm:$0xff] %v5286_v57  ;;  %v5302_v62 = vadd.f32 %v201_v21, %v5259_v45  ;;  %v5305_v63 = vadd.f32 %v177_v58, %v5259_v45  ;;  %v1024_v21 = vld [vmem:[%s10271_s3 + $0x190] sm:$0xff]  ;;  %v5457_v58 = vld [vmem:[%s10271_s3 + $0x158] sm:$0xff] }
  0xd0   :  { %v203_v2 = vpop.f32.mrf.mxu1  ;;  %v179_v4 = vpop.f32.mrf.mxu0  ;;  %1252 = vmatpush1.msra.mxu1 %v1024_v21  ;;  %1182 = vmatprep.subr.mxu0 %v5457_v58  ;;  %v5581_v21 = vld [vmem:[%s10271_s3 + $0x78] sm:$0xff]  ;;  %v5653_v56 = vld [vmem:[%s10271_s3 + $0x5e8] sm:$0xff]  ;;  %v5665_v17 = vld [vmem:[%s10271_s3 + $0x5e0] sm:$0xff] }
  0xd1   :  { %10631 = vst [vmem:[#allocation10_spill] sm:$0xff] %v5302_v62  ;;  %10632 = vst [vmem:[#allocation11_spill] sm:$0xff] %v5305_v63  ;;  %v5334_v9 = vadd.f32 %v203_v2, %v5264_v46  ;;  %v5337_v10 = vadd.f32 %v179_v4, %v5264_v46  ;;  %v1018_v2 = vld [vmem:[%s10271_s3 + $0x160] sm:$0xff]  ;;  %v5475_v4 = vld [vmem:[%s10271_s3 + $0x128] sm:$0xff]  ;;  %1253 = vmatprep.subr.mxu1 %v1019_v61  ;;  %1183 = vmatpush1.msra.mxu0 %v5466_v6 }
  0xd2   :  { %v207_v14 = vpop.f32.mrf.mxu1  ;;  %v183_v16 = vpop.f32.mrf.mxu0  ;;  %1254 = vmatpush1.msra.mxu1 %v1018_v2  ;;  %1184 = vmatprep.subr.mxu0 %v5475_v4  ;;  %10646 = vst [vmem:[#allocation25_spill] sm:$0xff] %v5581_v21  ;;  %v5588_v61 = vld [vmem:[%s10271_s3 + $0x38] sm:$0xff]  ;;  %v5593_v2 = vld [vmem:[%s10271_s3 + $0x70] sm:$0xff]  ;;  %10652 = vst [vmem:[#allocation31_spill] sm:$0xff] %v5653_v56 }
  0xd3   :  { %10633 = vst [vmem:[#allocation12_spill] sm:$0xff] %v5334_v9  ;;  %10634 = vst [vmem:[#allocation13_spill] sm:$0xff] %v5337_v10  ;;  %v5361_v18 = vadd.f32 %v207_v14, %v5259_v45  ;;  %v5364_v27 = vadd.f32 %v183_v16, %v5259_v45  ;;  %v5495_v14 = vld [vmem:[%s10271_s3 + $0xf8] sm:$0xff]  ;;  %1255 = vmatprep.subr.mxu1 %v1013_v5  ;;  %1185 = vmatpush1.msra.mxu0 %v5484_v8  ;;  %v5504_v16 = vld [vmem:[%s10271_s3 + $0xf0] sm:$0xff] }
  0xd4   :  { %v209_v32 = vpop.f32.mrf.mxu1  ;;  %v185_v33 = vpop.f32.mrf.mxu0  ;;  %1256 = vmatpush1.msra.mxu1 %v5489_v13  ;;  %1186 = vmatprep.subr.mxu0 %v5495_v14  ;;  %10647 = vst [vmem:[#allocation26_spill] sm:$0xff] %v5593_v2  ;;  %v5600_v5 = vld [vmem:[%s10271_s3 + $0x30] sm:$0xff]  ;;  %10653 = vst [vmem:[#allocation32_spill] sm:$0xff] %v5665_v17  ;;  %v5703_v26 = vld [vmem:[%s10271_s3 + $0x588] sm:$0xff] }
  0xd5   :  { %10635 = vst [vmem:[#allocation14_spill] sm:$0xff] %v5361_v18  ;;  %10636 = vst [vmem:[#allocation15_spill] sm:$0xff] %v5364_v27  ;;  %v5385_v36 = vadd.f32 %v209_v32, %v5264_v46  ;;  %v5388_v22 = vadd.f32 %v185_v33, %v5264_v46  ;;  %1187 = vmatpush1.msra.mxu0 %v5504_v16  ;;  %1257 = vmatprep.subr.mxu1 %v5509_v20  ;;  %v5528_v32 = vld [vmem:[%s10271_s3 + $0xc0] sm:$0xff]  ;;  %v5533_v33 = vld [vmem:[%s10271_s3 + $0xd8] sm:$0xff] }
  0xd6   :  { %1188 = vmatprep.subr.mxu0 %v5516_v23  ;;  %1258 = vmatpush1.msra.mxu1 %v5521_v31  ;;  %10642 = vst [vmem:[#allocation21_spill] sm:$0xff] %v5533_v33  ;;  %v5636_v18 = vld [vmem:[%s10271_s3 + $0x5d8] sm:$0xff]  ;;  %v5641_v9 = vld [vmem:[%s10271_s3 + $0x10] sm:$0xff]  ;;  %v5691_v63 = vpop.f32.mrf.mxu1  ;;  %10657 = vst [vmem:[#allocation36_spill] sm:$0xff] %v5703_v26 }
  0xd7   :  { %10637 = vst [vmem:[#allocation16_spill] sm:$0xff] %v5385_v36  ;;  %10638 = vst [vmem:[#allocation17_spill] sm:$0xff] %v5388_v22  ;;  %1189 = vmatpush1.msra.mxu0 %v5528_v32  ;;  %1259 = vmatprep.subr.mxu1 %v5533_v33  ;;  %v5629_v36 = vld [vmem:[%s10271_s3 + $0x18] sm:$0xff]  ;;  %v5648_v62 = vld [vmem:[%s10271_s3 + $0x5d0] sm:$0xff] }
  0xd8   :  { %1190 = vmatprep.subr.mxu0 %v5540_v35  ;;  %1260 = vmatpush1.msra.mxu1 %v5545_v38  ;;  %10650 = vst [vmem:[#allocation29_spill] sm:$0xff] %v5629_v36  ;;  %10651 = vst [vmem:[#allocation30_spill] sm:$0xff] %v5641_v9  ;;  %v5677_v22 = vld [vmem:[%s10271_s3 + $0x5b8] sm:$0xff]  ;;  %v5689_v10 = vld [vmem:[%s10271_s3 + $0x5b0] sm:$0xff] }
  0xd9   :  { %1191 = vmatpush1.msra.mxu0 %v5552_v40  ;;  %1261 = vmatprep.subr.mxu1 %v5557_v42  ;;  %10654 = vst [vmem:[#allocation33_spill] sm:$0xff] %v5677_v22  ;;  %v5684_v27 = vld [vmem:[%s10271_s3 + $0x578] sm:$0xff]  ;;  %10655 = vst [vmem:[#allocation34_spill] sm:$0xff] %v5689_v10  ;;  %v5698_v57 = vld [vmem:[%s10271_s3 + $0x570] sm:$0xff] }
  0xda   :  { %1192 = vmatprep.subr.mxu0 %v5564_v47  ;;  %1262 = vmatpush1.msra.mxu1 %v5569_v51  ;;  %10656 = vst [vmem:[#allocation35_spill] sm:$0xff] %v5698_v57  ;;  %v5810_v51 = vld [vmem:[%s10271_s3 + $0x488] sm:$0xff]  ;;  %v5827_v42 = vld [vmem:[%s10271_s3 + $0x498] sm:$0xff]  ;;  %v5839_v38 = vld [vmem:[%s10271_s3 + $0x490] sm:$0xff] }
  0xdb   :  { %1193 = vmatpush1.msra.mxu0 %v5576_v54  ;;  %1263 = vmatprep.subr.mxu1 %v5581_v21  ;;  %v5805_v21 = vld [vmem:[%s10271_s3 + $0x4c8] sm:$0xff]  ;;  %10677 = vst [vmem:[#allocation56_spill] sm:$0xff] %v5810_v51  ;;  %10680 = vst [vmem:[#allocation59_spill] sm:$0xff] %v5827_v42  ;;  %v5844_v33 = vld [vmem:[%s10271_s3 + $0x450] sm:$0xff] }
  0xdc   :  { %1194 = vmatprep.subr.mxu0 %v5588_v61  ;;  %1264 = vmatpush1.msra.mxu1 %v5593_v2  ;;  %10676 = vst [vmem:[#allocation55_spill] sm:$0xff] %v5805_v21  ;;  %10682 = vst [vmem:[#allocation61_spill] sm:$0xff] %v5839_v38  ;;  %v5856_v31 = vld [vmem:[%s10271_s3 + $0x428] sm:$0xff]  ;;  %v5861_v20 = vld [vmem:[%s10271_s3 + $0x460] sm:$0xff] }
  0xdd   :  { %1195 = vmatpush1.msra.mxu0 %v5600_v5  ;;  %1265 = vmatprep.subr.mxu1 %v5605_v25  ;;  %v5779_v25 = vld [vmem:[%s10271_s3 + $0x4f8] sm:$0xff]  ;;  %10683 = vst [vmem:[#allocation62_spill] sm:$0xff] %v5844_v33  ;;  %10685 = vst [vmem:[#allocation64_spill] sm:$0xff] %v5856_v31 }
  0xde   :  { %1196 = vmatprep.subr.mxu0 %v5612_v24  ;;  %1266 = vmatpush1.msra.mxu1 %v5617_v44  ;;  %10671 = vst [vmem:[#allocation50_spill] sm:$0xff] %v5779_v25  ;;  %10686 = vst [vmem:[#allocation65_spill] sm:$0xff] %v5861_v20 }
  0xdf   :  { %1197 = vmatpush1.msra.mxu0 %v5624_v11  ;;  %1267 = vmatprep.subr.mxu1 %v5629_v36  ;;  %v5753_v36 = vld [vmem:[%s10271_s3 + $0x528] sm:$0xff] }
  0xe0   :  { %1198 = vmatprep.subr.mxu0 %v5636_v18  ;;  %1268 = vmatpush1.msra.mxu1 %v5641_v9  ;;  %v5741_v9 = vpop.f32.mrf.mxu1  ;;  %10666 = vst [vmem:[#allocation45_spill] sm:$0xff] %v5753_v36 }
  0xe1   :  { %1199 = vmatpush2.msra.mxu0 %v5648_v62  ;;  %1269 = vmatprep.subr.mxu1 %v5653_v56  ;;  %v5734_v56 = vld [vmem:[%s10271_s3 + $0x518] sm:$0xff]  ;;  %10664 = vst [vmem:[#allocation43_spill] sm:$0xff] %v5741_v9  ;;  %v5760_v9 = vld [vmem:[%s10271_s3 + $0x4e8] sm:$0xff] }
  0xe2   :  { %1200 = vmatprep.subr.mxu0 %v5660_v53  ;;  %1270 = vmatpush2.msra.mxu1 %v5665_v17  ;;  %v5722_v17 = vld [vmem:[%s10271_s3 + $0x540] sm:$0xff]  ;;  %10662 = vst [vmem:[#allocation41_spill] sm:$0xff] %v5734_v56  ;;  %10667 = vst [vmem:[#allocation46_spill] sm:$0xff] %v5760_v9 }
  0xe3   :  { %1201 = vmatpush2.msra.mxu0 %v5672_v49  ;;  %1271 = vmatprep.subr.mxu1 %v5677_v22  ;;  %v5710_v22 = vld [vmem:[%s10271_s3 + $0x548] sm:$0xff]  ;;  %10660 = vst [vmem:[#allocation39_spill] sm:$0xff] %v5722_v17 }
  0xe4   :  { %1202 = vmatprep.subr.mxu0 %v5684_v27  ;;  %1272 = vmatpush2.msra.mxu1 %v5689_v10  ;;  %10658 = vst [vmem:[#allocation37_spill] sm:$0xff] %v5710_v22  ;;  %v5715_v10 = vld [vmem:[%s10271_s3 + $0x580] sm:$0xff] }
  0xe5   :  { %1203 = vmatpush2.msra.mxu0 %v5698_v57  ;;  %1273 = vmatprep.subr.mxu1 %v5703_v26  ;;  %10659 = vst [vmem:[#allocation38_spill] sm:$0xff] %v5715_v10  ;;  %v5727_v26 = vld [vmem:[%s10271_s3 + $0x558] sm:$0xff] }
  0xe6   :  { %1204 = vmatprep.subr.mxu0 %v5710_v22  ;;  %1274 = vmatpush2.msra.mxu1 %v5715_v10  ;;  %10661 = vst [vmem:[#allocation40_spill] sm:$0xff] %v5727_v26  ;;  %v5739_v10 = vld [vmem:[%s10271_s3 + $0x550] sm:$0xff] }
  0xe7   :  { %1205 = vmatpush2.msra.mxu0 %v5722_v17  ;;  %1275 = vmatprep.subr.mxu1 %v5727_v26  ;;  %10663 = vst [vmem:[#allocation42_spill] sm:$0xff] %v5739_v10  ;;  %v5748_v26 = vld [vmem:[%s10271_s3 + $0x510] sm:$0xff] }
  0xe8   :  { %1206 = vmatprep.subr.mxu0 %v5734_v56  ;;  %1276 = vmatpush2.msra.mxu1 %v5739_v10  ;;  %10665 = vst [vmem:[#allocation44_spill] sm:$0xff] %v5748_v26  ;;  %v5765_v10 = vld [vmem:[%s10271_s3 + $0x520] sm:$0xff] }
  0xe9   :  { %1207 = vmatpush2.msra.mxu0 %v5748_v26  ;;  %1277 = vmatprep.subr.mxu1 %v5753_v36  ;;  %10668 = vst [vmem:[#allocation47_spill] sm:$0xff] %v5765_v10  ;;  %v5774_v36 = vld [vmem:[%s10271_s3 + $0x4e0] sm:$0xff] }
  0xea   :  { %1208 = vmatprep.subr.mxu0 %v5760_v9  ;;  %1278 = vmatpush2.msra.mxu1 %v5765_v10  ;;  %10670 = vst [vmem:[#allocation49_spill] sm:$0xff] %v5774_v36  ;;  %v5791_v10 = vld [vmem:[%s10271_s3 + $0x4f0] sm:$0xff]  ;;  %v168_v9 = vadd.f32 %v5271_v50, %v5264_v46 }
  0xeb   :  { %1209 = vmatpush2.msra.mxu0 %v5774_v36  ;;  %1279 = vmatprep.subr.mxu1 %v5779_v25  ;;  %10673 = vst [vmem:[#allocation52_spill] sm:$0xff] %v5791_v10  ;;  %v5800_v25 = vld [vmem:[%s10271_s3 + $0x4b0] sm:$0xff] }
  0xec   :  { %1280 = vmatpush2.msra.mxu1 %v5791_v10  ;;  %10675 = vst [vmem:[#allocation54_spill] sm:$0xff] %v5800_v25  ;;  %v5822_v10 = vld [vmem:[%s10271_s3 + $0x480] sm:$0xff] }
  0xed   :  { %1281 = vmatprep.subr.mxu1 %v5805_v21  ;;  %10679 = vst [vmem:[#allocation58_spill] sm:$0xff] %v5822_v10  ;;  %v5834_v21 = vld [vmem:[%s10271_s3 + $0x458] sm:$0xff] }
  0xee   :  { %10681 = vst [vmem:[#allocation60_spill] sm:$0xff] %v5834_v21 }
  0xfb   :  { %v5767_v44 = vpop.f32.mrf.mxu1 }
  0xfc   :  { %10669 = vst [vmem:[#allocation48_spill] sm:$0xff] %v5767_v44  ;;  %v5786_v44 = vld [vmem:[%s10271_s3 + $0x4b8] sm:$0xff] }
  0xfd   :  { %10672 = vst [vmem:[#allocation51_spill] sm:$0xff] %v5786_v44  ;;  %v5793_v2 = vpop.f32.mrf.mxu1  ;;  %1210 = vmatprep.subr.mxu0 %v5786_v44 }
  0xfe   :  { %10674 = vst [vmem:[#allocation53_spill] sm:$0xff] %v5793_v2  ;;  %1211 = vmatpush2.msra.mxu0 %v5800_v25  ;;  %v5817_v2 = vld [vmem:[%s10271_s3 + $0x4c0] sm:$0xff] }
  0xff   :  { %10678 = vst [vmem:[#allocation57_spill] sm:$0xff] %v5817_v2  ;;  %1212 = vmatprep.subr.mxu0 %v5810_v51  ;;  %1282 = vmatpush2.msra.mxu1 %v5817_v2  ;;  %v5851_v2 = vld [vmem:[%s10271_s3 + $0x468] sm:$0xff]  ;;  %v5877_v51 = vpop.f32.mrf.mxu0 }
 0x100   :  { %1213 = vmatpush2.msra.mxu0 %v5822_v10  ;;  %1283 = vmatprep.subr.mxu1 %v5827_v42  ;;  %10684 = vst [vmem:[#allocation63_spill] sm:$0xff] %v5851_v2  ;;  %v5870_v42 = vld [vmem:[%s10271_s3 + $0x420] sm:$0xff]  ;;  %v5875_v10 = vld [vmem:[%s10271_s3 + $0x438] sm:$0xff]  ;;  %10690 = vst [vmem:[#allocation69_spill] sm:$0xff] %v5877_v51 }
 0x101   :  { %v5863_v13 = vpop.f32.mrf.mxu1  ;;  %1214 = vmatprep.subr.mxu0 %v5834_v21  ;;  %1284 = vmatpush2.msra.mxu1 %v5839_v38  ;;  %10688 = vst [vmem:[#allocation67_spill] sm:$0xff] %v5870_v42  ;;  %10689 = vst [vmem:[#allocation68_spill] sm:$0xff] %v5875_v10  ;;  %v5889_v38 = vld [vmem:[%s10271_s3 + $0x430] sm:$0xff] }
 0x102   :  { %10687 = vst [vmem:[#allocation66_spill] sm:$0xff] %v5863_v13  ;;  %1215 = vmatpush2.msra.mxu0 %v5844_v33  ;;  %1285 = vmatprep.subr.mxu1 %v5851_v2  ;;  %v5884_v13 = vld [vmem:[%s10271_s3 + $0x3f8] sm:$0xff]  ;;  %10692 = vst [vmem:[#allocation71_spill] sm:$0xff] %v5889_v38  ;;  %v5898_v51 = vld [vmem:[%s10271_s3 + $0x3f0] sm:$0xff] }
 0x103   :  { %10691 = vst [vmem:[#allocation70_spill] sm:$0xff] %v5884_v13  ;;  %v5891_v21 = vpop.f32.mrf.mxu1  ;;  %1216 = vmatprep.subr.mxu0 %v5856_v31  ;;  %1286 = vmatpush2.msra.mxu1 %v5861_v20  ;;  %10694 = vst [vmem:[#allocation73_spill] sm:$0xff] %v5898_v51  ;;  %v5903_v2 = vld [vmem:[%s10271_s3 + $0x408] sm:$0xff]  ;;  %v5915_v20 = vld [vmem:[%s10271_s3 + $0x400] sm:$0xff]  ;;  %v5929_v31 = vpop.f32.mrf.mxu0 }
 0x104   :  { %10693 = vst [vmem:[#allocation72_spill] sm:$0xff] %v5891_v21  ;;  %10695 = vst [vmem:[#allocation74_spill] sm:$0xff] %v5903_v2  ;;  %1217 = vmatpush2.msra.mxu0 %v5870_v42  ;;  %1287 = vmatprep.subr.mxu1 %v5875_v10  ;;  %v5910_v21 = vld [vmem:[%s10271_s3 + $0x3c8] sm:$0xff]  ;;  %v5922_v42 = vld [vmem:[%s10271_s3 + $0x3c0] sm:$0xff] }
 0x105   :  { %10696 = vst [vmem:[#allocation75_spill] sm:$0xff] %v5910_v21  ;;  %10697 = vst [vmem:[#allocation76_spill] sm:$0xff] %v5915_v20  ;;  %1218 = vmatprep.subr.mxu0 %v5884_v13  ;;  %1288 = vmatpush2.msra.mxu1 %v5889_v38  ;;  %v5927_v10 = vld [vmem:[%s10271_s3 + $0x3d8] sm:$0xff]  ;;  %v5941_v13 = vld [vmem:[%s10271_s3 + $0x3d0] sm:$0xff] }
 0x106   :  { %10698 = vst [vmem:[#allocation77_spill] sm:$0xff] %v5922_v42  ;;  %10699 = vst [vmem:[#allocation78_spill] sm:$0xff] %v5927_v10  ;;  %1219 = vmatpush2.msra.mxu0 %v5898_v51  ;;  %1289 = vmatprep.subr.mxu1 %v5903_v2  ;;  %v5936_v38 = vld [vmem:[%s10271_s3 + $0x398] sm:$0xff]  ;;  %v5955_v2 = vld [vmem:[%s10271_s3 + $0x3a8] sm:$0xff]  ;;  %v5983_v51 = vpop.f32.mrf.mxu0 }
 0x107   :  { %10700 = vst [vmem:[#allocation79_spill] sm:$0xff] %v5929_v31  ;;  %10701 = vst [vmem:[#allocation80_spill] sm:$0xff] %v5936_v38  ;;  %v5943_v33 = vpop.f32.mrf.mxu1  ;;  %1220 = vmatprep.subr.mxu0 %v5910_v21  ;;  %1290 = vmatpush2.msra.mxu1 %v5915_v20  ;;  %v5950_v31 = vld [vmem:[%s10271_s3 + $0x390] sm:$0xff]  ;;  %v5967_v20 = vld [vmem:[%s10271_s3 + $0x3a0] sm:$0xff] }
 0x108   :  { %10702 = vst [vmem:[#allocation81_spill] sm:$0xff] %v5941_v13  ;;  %10703 = vst [vmem:[#allocation82_spill] sm:$0xff] %v5943_v33  ;;  %1221 = vmatpush2.msra.mxu0 %v5922_v42  ;;  %1291 = vmatprep.subr.mxu1 %v5927_v10  ;;  %v5962_v33 = vld [vmem:[%s10271_s3 + $0x368] sm:$0xff]  ;;  %v5976_v10 = vld [vmem:[%s10271_s3 + $0x360] sm:$0xff] }
 0x109   :  { %10704 = vst [vmem:[#allocation83_spill] sm:$0xff] %v5950_v31  ;;  %10705 = vst [vmem:[#allocation84_spill] sm:$0xff] %v5955_v2  ;;  %v5969_v21 = vpop.f32.mrf.mxu1  ;;  %1222 = vmatprep.subr.mxu0 %v5936_v38  ;;  %1292 = vmatpush2.msra.mxu1 %v5941_v13  ;;  %v5981_v42 = vld [vmem:[%s10271_s3 + $0x378] sm:$0xff]  ;;  %v5995_v13 = vld [vmem:[%s10271_s3 + $0x370] sm:$0xff]  ;;  %v6035_v38 = vpop.f32.mrf.mxu0 }
 0x10a   :  { %10706 = vst [vmem:[#allocation85_spill] sm:$0xff] %v5962_v33  ;;  %10707 = vst [vmem:[#allocation86_spill] sm:$0xff] %v5967_v20  ;;  %1223 = vmatpush2.msra.mxu0 %v5950_v31  ;;  %1293 = vmatprep.subr.mxu1 %v5955_v2  ;;  %v6007_v2 = vld [vmem:[%s10271_s3 + $0x348] sm:$0xff] }
 0x10b   :  { %10708 = vst [vmem:[#allocation87_spill] sm:$0xff] %v5969_v21  ;;  %10709 = vst [vmem:[#allocation88_spill] sm:$0xff] %v5976_v10  ;;  %v5990_v21 = vld [vmem:[%s10271_s3 + $0x338] sm:$0xff]  ;;  %1224 = vmatprep.subr.mxu0 %v5962_v33  ;;  %1294 = vmatpush2.msra.mxu1 %v5967_v20  ;;  %v6014_v33 = vld [vmem:[%s10271_s3 + $0x308] sm:$0xff] }
 0x10c   :  { %10710 = vst [vmem:[#allocation89_spill] sm:$0xff] %v5981_v42  ;;  %10711 = vst [vmem:[#allocation90_spill] sm:$0xff] %v5983_v51  ;;  %v6002_v51 = vld [vmem:[%s10271_s3 + $0x330] sm:$0xff]  ;;  %1225 = vmatpush2.msra.mxu0 %v5976_v10  ;;  %1295 = vmatprep.subr.mxu1 %v5981_v42  ;;  %v6019_v20 = vld [vmem:[%s10271_s3 + $0x340] sm:$0xff] }
 0x10d   :  { %10712 = vst [vmem:[#allocation91_spill] sm:$0xff] %v5990_v21  ;;  %10713 = vst [vmem:[#allocation92_spill] sm:$0xff] %v5995_v13  ;;  %v6021_v31 = vpop.f32.mrf.mxu1  ;;  %1226 = vmatprep.subr.mxu0 %v5990_v21  ;;  %1296 = vmatpush2.msra.mxu1 %v5995_v13  ;;  %v6028_v42 = vld [vmem:[%s10271_s3 + $0x300] sm:$0xff]  ;;  %v6033_v10 = vld [vmem:[%s10271_s3 + $0x318] sm:$0xff] }
 0x10e   :  { %10714 = vst [vmem:[#allocation93_spill] sm:$0xff] %v6002_v51  ;;  %10715 = vst [vmem:[#allocation94_spill] sm:$0xff] %v6007_v2  ;;  %1227 = vmatpush2.msra.mxu0 %v6002_v51  ;;  %1297 = vmatprep.subr.mxu1 %v6007_v2  ;;  %v6048_v13 = vld [vmem:[%s10271_s3 + $0x310] sm:$0xff] }
 0x10f   :  { %10716 = vst [vmem:[#allocation95_spill] sm:$0xff] %v6014_v33  ;;  %10717 = vst [vmem:[#allocation96_spill] sm:$0xff] %v6019_v20  ;;  %1228 = vmatprep.subr.mxu0 %v6014_v33  ;;  %1298 = vmatpush2.msra.mxu1 %v6019_v20 }
 0x110   :  { %10718 = vst [vmem:[#allocation97_spill] sm:$0xff] %v6021_v31  ;;  %10719 = vst [vmem:[#allocation98_spill] sm:$0xff] %v6028_v42  ;;  %v6039_v31 = vpop.f32.mrf.mxu1  ;;  %1229 = vmatpush2.msra.mxu0 %v6028_v42  ;;  %1299 = vmatprep.subr.mxu1 %v6033_v10 }
 0x111   :  { %10720 = vst [vmem:[#allocation99_spill] sm:$0xff] %v6033_v10  ;;  %10721 = vst [vmem:[#allocation100_spill] sm:$0xff] %v6035_v38  ;;  %v6053_v38 = vld [vmem:[%s10271_s3 + $0x2f8] sm:$0xff]  ;;  %1300 = vmatpush2.msra.mxu1 %v6048_v13 }
 0x112   :  { %10722 = vst [vmem:[#allocation101_spill] sm:$0xff] %v6039_v31  ;;  %10723 = vst [vmem:[#allocation102_spill] sm:$0xff] %v6048_v13  ;;  %1308 = vmatprep.subr.mxu0 %v6053_v38  ;;  %v6057_v31 = vpop.f32.mrf.mxu0  ;;  %1624 = vmatprep.subr.mxu1 %v5291_v59  ;;  %v6079_v59 = vld [vmem:[%s10273_s4] sm:$0x3f] }
 0x113   :  { %10724 = vst [vmem:[#allocation103_spill] sm:$0xff] %v6053_v38  ;;  %10725 = vst [vmem:[#allocation104_spill] sm:$0xff] %v6057_v31  ;;  %v6060_v20 = vpop.f32.mrf.mxu1 }
 0x114   :  { %10726 = vst [vmem:[#allocation105_spill] sm:$0xff] %v6060_v20  ;;  %v6064_v2 = vpop.f32.mrf.mxu0 }
 0x115   :  { %v6062_v10 = vpop.f32.mrf.mxu1  ;;  %10728 = vst [vmem:[#allocation107_spill] sm:$0xff] %v6064_v2  ;;  %v10735_v2 = vsub.s32 0, %v4985_v15 }
 0x116   :  { %10727 = vst [vmem:[#allocation106_spill] sm:$0xff] %v6062_v10  ;;  %v6068_v33 = vpop.f32.mrf.mxu0  ;;  %v166_v10 = vadd.f32 %v5266_v48, %v5259_v45 }
 0x117   :  { %10730 = vst [vmem:[#allocation109_spill] sm:$0xff] %v6068_v33 }
 0x118   :  { %v6072_v21 = vpop.f32.mrf.mxu0 }
 0x119   :  { %v6066_v42 = vpop.f32.mrf.mxu1  ;;  %10732 = vst [vmem:[#allocation111_spill] sm:$0xff] %v6072_v21 }
 0x11a   :  { %10729 = vst [vmem:[#allocation108_spill] sm:$0xff] %v6066_v42  ;;  %v6081_v20 = vpop.f32.mrf.mxu0  ;;  %v6086_v42 = vrot.slane %v6079_v59, %v10735_v2 }
 0x11b   :  { %v6070_v51 = vpop.f32.mrf.mxu1  ;;  %10734 = vst [vmem:[#allocation113_spill] sm:$0xff] %v6081_v20 }
 0x11c   :  { %10731 = vst [vmem:[#allocation110_spill] sm:$0xff] %v6070_v51  ;;  %10736 = vst [vmem:[#allocation114_spill] sm:$0xff] %v6086_v42  ;;  %v6090_v21 = vpop.f32.mrf.mxu0  ;;  %v10738_v51 = vsub.s32 1, %v4985_v15 }
 0x11d   :  { %10737 = vst [vmem:[#allocation115_spill] sm:$0xff] %v6090_v21 }
 0x11e   :  { %v6096_v38 = vrot.slane %v6079_v59, %v10738_v51  ;;  %v6098_v44 = vpop.f32.mrf.mxu0 }
 0x11f   :  { %v6074_v13 = vpop.f32.mrf.mxu1  ;;  %10740 = vst [vmem:[#allocation117_spill] sm:$0xff] %v6098_v44 }
 0x120   :  { %10733 = vst [vmem:[#allocation112_spill] sm:$0xff] %v6074_v13  ;;  %10739 = vst [vmem:[#allocation116_spill] sm:$0xff] %v6096_v38  ;;  %v6103_v45 = vpop.f32.mrf.mxu0 }
 0x121   :  { %v322_v31 = vpop.f32.mrf.mxu1  ;;  %10741 = vst [vmem:[#allocation118_spill] sm:$0xff] %v6103_v45 }
 0x125   :  { %v776_v33 = vpop.f32.mrf.mxu1 }
 0x126   :  { %v777_v13 = vadd.f32 %v776_v33, %v6086_v42  ;;  %v6105_v33 = vpop.f32.mrf.mxu0 }
 0x127   :  { %v778_v25 = vpop.f32.mrf.mxu1  ;;  %10742 = vst [vmem:[#allocation119_spill] sm:$0xff] %v6105_v33 }
 0x128   :  { %v930_v20 = vadd.f32 %v777_v13, %v166_v10  ;;  %v779_v2 = vadd.f32 %v778_v25, %v6096_v38  ;;  %v6107_v42 = vpop.f32.mrf.mxu0  ;;  %v54_v25 = vsub.s32 2, %v4985_v15 }
 0x129   :  { %10743 = vst [vmem:[#allocation120_spill] sm:$0xff] %v6107_v42 }
 0x12a   :  { %v4246_v36 = vmul.f32 -1.442695, %v930_v20  ;;  %v937_v48 = vadd.f32 %v779_v2, %v168_v9  ;;  %v433_v10 = vpop.f32.mrf.mxu0  ;;  %v6111_v44 = vrot.slane %v6079_v59, %v54_v25  ;;  %v58_v9 = vsub.s32 3, %v4985_v15 }
 0x12c   :  { %4291 = vpow2.f32 %v4246_v36  ;;  %v4247_v21 = vmul.f32 -1.442695, %v937_v48  ;;  %v435_v20 = vpop.f32.mrf.mxu0  ;;  %10744 = vst [vmem:[#allocation121_spill] sm:$0xff] %v6111_v44  ;;  %v6115_v36 = vrot.slane %v6079_v59, %v58_v9 }
 0x12e   :  { %4293 = vpow2.f32 %v4247_v21  ;;  %v847_v46 = vpop.f32.mrf.mxu0  ;;  %10745 = vst [vmem:[#allocation122_spill] sm:$0xff] %v6115_v36  ;;  %v4451_v21 = vld [vmem:[%s10272_s2] sm:$0x3f] }
 0x12f   :  { %v6120_v2 = vrot.slane %v4451_v21, %v54_v25  ;;  %v848_v48 = vadd.f32 %v847_v46, %v6111_v44  ;;  %v6123_v42 = vrot.slane %v4451_v21, %v58_v9 }
 0x131   :  { %v279_v38 = vadd.f32 %v5691_v63, %v6120_v2  ;;  %v323_v56 = vadd.f32 %v322_v31, %v6123_v42  ;;  %v10746_v31 = vsub.s32 4, %v4985_v15 }
 0x139   :  { %v4292_v51 = vpop.eup %4291 }
 0x13a   :  { %v934_v13 = vadd.f32 1.0, %v4292_v51 }
 0x13b   :  { %v4294_v50 = vpop.eup %4293 }
 0x13c   :  { %4295 = vrcp.f32 %v934_v13  ;;  %v941_v51 = vadd.f32 1.0, %v4294_v50  ;;  %v849_v13 = vpop.f32.mrf.mxu0 }
 0x13d   :  { %v850_v33 = vadd.f32 %v849_v13, %v6115_v36 }
 0x13e   :  { %4297 = vrcp.f32 %v941_v51 }
 0x13f   :  { %v951_v22 = vadd.f32 %v850_v33, %v323_v56 }
 0x141   :  { %v4248_v25 = vmul.f32 -1.442695, %v951_v22  ;;  %v434_v22 = vadd.f32 %v433_v10, %v5019_v28 }
 0x149   :  { %v4296_v45 = vpop.eup %4295 }
 0x14a   :  { %v944_v26 = vmul.f32 %v4296_v45, %v848_v48  ;;  %v10747_v45 = vsub.s32 5, %v4985_v15 }
 0x14b   :  { %v4298_v46 = vpop.eup %4297 }
 0x14c   :  { %v945_v17 = vadd.f32 %v944_v26, %v279_v38  ;;  %v947_v50 = vsub.f32 1.0, %v4298_v46  ;;  %v949_v9 = vmul.f32 0.0, %v4298_v46  ;;  %v6138_v26 = vrot.slane %v6079_v59, %v10746_v31 }
 0x14d   :  { %v6145_v33 = vrot.slane %v6079_v59, %v10747_v45  ;;  %v436_v46 = vadd.f32 %v435_v20, %v5024_v29  ;;  %v6154_v59 = vld [vmem:[%s10271_s3 + $0x2f0] sm:$0xff]  ;;  %v6161_v20 = vld [vmem:[%s10271_s3 + $0x2c8] sm:$0xff] }
 0x14e   :  { %4299 = vtanh.f32 %v945_v17  ;;  %v6188_v45 = vld [vmem:[%s10271_s3 + $0x268] sm:$0xff] }
 0x14f   :  { %4301 = vpow2.f32 %v4248_v25 }
 0x15b   :  { %v4300_v44 = vpop.eup %4299 }
 0x15c   :  { %v948_v57 = vmul.f32 %v4300_v44, %v947_v50  ;;  %v4302_v63 = vpop.eup %4301 }
 0x15d   :  { %v955_v17 = vadd.f32 1.0, %v4302_v63 }
 0x15e   :  { %v6129_v21 = vadd.f32 %v949_v9, %v948_v57 }
 0x15f   :  { %4303 = vrcp.f32 %v955_v17 }
 0x160   :  { %972 = vst [vmem:[%s10274_s5] sm:$0xff] %v6129_v21 }
 0x166   :  { %v918_v56 = vpop.f32.mrf.mxu1 }
 0x167   :  { %v919_v44 = vadd.f32 %v918_v56, %v6138_v26 }
 0x168   :  { %v920_v48 = vpop.f32.mrf.mxu1 }
 0x169   :  { %v958_v57 = vadd.f32 %v919_v44, %v434_v22  ;;  %v921_v51 = vadd.f32 %v920_v48, %v6145_v33  ;;  %v6168_v44 = vld [vmem:[%s10271_s3 + $0x2c0] sm:$0xff] }
 0x16a   :  { %v6195_v48 = vld [vmem:[%s10271_s3 + $0x260] sm:$0xff] }
 0x16b   :  { %v4249_v38 = vmul.f32 -1.442695, %v958_v57  ;;  %v6175_v57 = vld [vmem:[%s10271_s3 + $0x298] sm:$0xff] }
 0x16c   :  { %v4304_v13 = vpop.eup %4303 }
 0x16d   :  { %4305 = vpow2.f32 %v4249_v38  ;;  %v965_v25 = vmul.f32 %v4304_v13, %v921_v51  ;;  %v6181_v38 = vld [vmem:[%s10271_s3 + $0x290] sm:$0xff]  ;;  %v10753_v51 = vld [vmem:[#allocation35_spill] sm:$0xff]  ;;  %v10755_v13 = vld [vmem:[#allocation37_spill] sm:$0xff] }
 0x16f   :  { %v966_v9 = vadd.f32 %v965_v25, %v436_v46  ;;  %v10757_v25 = vld [vmem:[#allocation39_spill] sm:$0xff] }
 0x170   :  { %v6454_v46 = vld [vmem:[%s10271_s3 + $0x4d8] sm:$0xff] }
 0x171   :  { %10758 = vst [vmem:[#allocation39_spill] sm:$0xff] %v6454_v46 }
 0x17a   :  { %v4306_v50 = vpop.eup %4305 }
 0x17b   :  { %v962_v10 = vadd.f32 1.0, %v4306_v50  ;;  %v10759_v50 = vld [vmem:[#allocation41_spill] sm:$0xff] }
 0x17d   :  { %4307 = vrcp.f32 %v962_v10  ;;  %v6461_v10 = vld [vmem:[%s10271_s3 + $0x4d0] sm:$0xff] }
 0x17e   :  { %4309 = vtanh.f32 %v966_v9  ;;  %10760 = vst [vmem:[#allocation41_spill] sm:$0xff] %v6461_v10  ;;  %v10761_v9 = vld [vmem:[#allocation44_spill] sm:$0xff] }
 0x18a   :  { %v4308_v63 = vpop.eup %4307 }
 0x18b   :  { %v968_v31 = vsub.f32 1.0, %v4308_v63  ;;  %v4310_v17 = vpop.eup %4309  ;;  %v970_v15 = vmul.f32 0.0, %v4308_v63  ;;  %v6468_v63 = vld [vmem:[%s10271_s3 + $0x4a8] sm:$0xff] }
 0x18c   :  { %10762 = vst [vmem:[#allocation44_spill] sm:$0xff] %v6468_v63 }
 0x18d   :  { %v969_v56 = vmul.f32 %v4310_v17, %v968_v31  ;;  %v10763_v31 = vld [vmem:[#allocation46_spill] sm:$0xff]  ;;  %v6475_v17 = vld [vmem:[%s10271_s3 + $0x4a0] sm:$0xff] }
 0x18e   :  { %10764 = vst [vmem:[#allocation46_spill] sm:$0xff] %v6475_v17 }
 0x18f   :  { %v6149_v22 = vadd.f32 %v970_v15, %v969_v56  ;;  %v10765_v56 = vld [vmem:[#allocation49_spill] sm:$0xff]  ;;  %v6482_v15 = vld [vmem:[%s10271_s3 + $0x478] sm:$0xff] }
 0x190   :  { %10766 = vst [vmem:[#allocation49_spill] sm:$0xff] %v6482_v15 }
 0x191   :  { %10748 = vst [vmem:[#allocation123_spill] sm:$0xff] %v6149_v22  ;;  %1230 = vmatprep.mubr.f32.mxu0 %v6149_v22  ;;  %1301 = vmatprep.mubr.f32.mxu1 %v6149_v22 }
 0x192   :  { %1231 = vmatmul.mubr.f32.vlgmr.msra.gmra.mxu0 %v6129_v21  ;;  %1302 = vmatmul.mubr.f32.vlgmr.msra.gmra.mxu1 %v6129_v21 }
 0x193   :  { %1309 = vmatpush1.msra.mxu0 %v6154_v59  ;;  %1372 = vmatprep.mubr.f32.mxu0 %v6149_v22 }
 0x194   :  { %1310 = vmatprep.subr.mxu0 %v6161_v20  ;;  %1625 = vmatpush1.msra.mxu1 %v5296_v60  ;;  %v6202_v60 = vld [vmem:[%s10271_s3 + $0x238] sm:$0xff] }
 0x195   :  { %1311 = vmatpush1.msra.mxu0 %v6168_v44  ;;  %1626 = vmatprep.subr.mxu1 %v5311_v0  ;;  %v6209_v0 = vld [vmem:[%s10271_s3 + $0x230] sm:$0xff] }
 0x196   :  { %1312 = vmatprep.subr.mxu0 %v6175_v57  ;;  %1627 = vmatpush1.msra.mxu1 %v5319_v1  ;;  %v6216_v1 = vld [vmem:[%s10271_s3 + $0x208] sm:$0xff] }
 0x197   :  { %1313 = vmatpush1.msra.mxu0 %v6181_v38  ;;  %1628 = vmatprep.subr.mxu1 %v5328_v7  ;;  %v6223_v7 = vld [vmem:[%s10271_s3 + $0x200] sm:$0xff] }
 0x198   :  { %1314 = vmatprep.subr.mxu0 %v6188_v45  ;;  %1629 = vmatpush1.msra.mxu1 %v5343_v12  ;;  %v6230_v12 = vld [vmem:[%s10271_s3 + $0x1d8] sm:$0xff] }
 0x199   :  { %1315 = vmatpush1.msra.mxu0 %v6195_v48  ;;  %1630 = vmatprep.subr.mxu1 %v5352_v19  ;;  %v6237_v19 = vld [vmem:[%s10271_s3 + $0x1d0] sm:$0xff] }
 0x19a   :  { %1316 = vmatprep.subr.mxu0 %v6202_v60  ;;  %1631 = vmatpush1.msra.mxu1 %v5370_v30  ;;  %v6244_v30 = vld [vmem:[%s10271_s3 + $0x1a8] sm:$0xff] }
 0x19b   :  { %1317 = vmatpush1.msra.mxu0 %v6209_v0  ;;  %1632 = vmatprep.subr.mxu1 %v5379_v34  ;;  %v6251_v34 = vld [vmem:[%s10271_s3 + $0x1a0] sm:$0xff] }
 0x19c   :  { %1318 = vmatprep.subr.mxu0 %v6216_v1  ;;  %1633 = vmatpush1.msra.mxu1 %v5394_v37  ;;  %v6258_v37 = vld [vmem:[%s10271_s3 + $0x178] sm:$0xff] }
 0x19d   :  { %1319 = vmatpush1.msra.mxu0 %v6223_v7  ;;  %1634 = vmatprep.subr.mxu1 %v5403_v39  ;;  %v6265_v39 = vld [vmem:[%s10271_s3 + $0x170] sm:$0xff] }
 0x19e   :  { %1320 = vmatprep.subr.mxu0 %v6230_v12  ;;  %1635 = vmatpush1.msra.mxu1 %v5412_v41  ;;  %v6272_v41 = vld [vmem:[%s10271_s3 + $0x148] sm:$0xff] }
 0x19f   :  { %1321 = vmatpush1.msra.mxu0 %v6237_v19  ;;  %1636 = vmatprep.subr.mxu1 %v5421_v43  ;;  %v6279_v43 = vld [vmem:[%s10271_s3 + $0x140] sm:$0xff] }
 0x1a0   :  { %1322 = vmatprep.subr.mxu0 %v6244_v30  ;;  %1637 = vmatpush1.msra.mxu1 %v5430_v3  ;;  %v6286_v3 = vld [vmem:[%s10271_s3 + $0x118] sm:$0xff] }
 0x1a1   :  { %1323 = vmatpush1.msra.mxu0 %v6251_v34  ;;  %1638 = vmatprep.subr.mxu1 %v5439_v52  ;;  %v6293_v52 = vld [vmem:[%s10271_s3 + $0x110] sm:$0xff] }
 0x1a2   :  { %1324 = vmatprep.subr.mxu0 %v6258_v37  ;;  %1639 = vmatpush1.msra.mxu1 %v5448_v55  ;;  %v6300_v55 = vld [vmem:[%s10271_s3 + $0xe8] sm:$0xff] }
 0x1a3   :  { %1325 = vmatpush1.msra.mxu0 %v6265_v39  ;;  %1640 = vmatprep.subr.mxu1 %v5457_v58  ;;  %v6307_v58 = vld [vmem:[%s10271_s3 + $0xe0] sm:$0xff] }
 0x1a4   :  { %1326 = vmatprep.subr.mxu0 %v6272_v41  ;;  %1641 = vmatpush1.msra.mxu1 %v5466_v6  ;;  %v6314_v6 = vld [vmem:[%s10271_s3 + $0xb8] sm:$0xff] }
 0x1a5   :  { %1327 = vmatpush1.msra.mxu0 %v6279_v43  ;;  %1642 = vmatprep.subr.mxu1 %v5475_v4  ;;  %v6321_v4 = vld [vmem:[%s10271_s3 + $0xb0] sm:$0xff] }
 0x1a6   :  { %1328 = vmatprep.subr.mxu0 %v6286_v3  ;;  %1643 = vmatpush1.msra.mxu1 %v5484_v8  ;;  %v6328_v8 = vld [vmem:[%s10271_s3 + $0x88] sm:$0xff] }
 0x1a7   :  { %1329 = vmatpush1.msra.mxu0 %v6293_v52  ;;  %1644 = vmatprep.subr.mxu1 %v5495_v14  ;;  %v6335_v14 = vld [vmem:[%s10271_s3 + $0x80] sm:$0xff] }
 0x1a8   :  { %1330 = vmatprep.subr.mxu0 %v6300_v55  ;;  %1645 = vmatpush1.msra.mxu1 %v5504_v16  ;;  %v6342_v16 = vld [vmem:[%s10271_s3 + $0x58] sm:$0xff] }
 0x1a9   :  { %1331 = vmatpush1.msra.mxu0 %v6307_v58  ;;  %1646 = vmatprep.subr.mxu1 %v5516_v23  ;;  %v6349_v23 = vld [vmem:[%s10271_s3 + $0x50] sm:$0xff] }
 0x1aa   :  { %1332 = vmatprep.subr.mxu0 %v6314_v6  ;;  %1647 = vmatpush1.msra.mxu1 %v5528_v32  ;;  %v6356_v32 = vld [vmem:[%s10271_s3 + $0x28] sm:$0xff] }
 0x1ab   :  { %1333 = vmatpush1.msra.mxu0 %v6321_v4  ;;  %1648 = vmatprep.subr.mxu1 %v5540_v35  ;;  %v6363_v35 = vld [vmem:[%s10271_s3 + $0x20] sm:$0xff] }
 0x1ac   :  { %1334 = vmatprep.subr.mxu0 %v6328_v8  ;;  %1649 = vmatpush1.msra.mxu1 %v5552_v40  ;;  %v6370_v40 = vld [vmem:[%s10271_s3 + $0x5f8] sm:$0xff] }
 0x1ad   :  { %1335 = vmatpush1.msra.mxu0 %v6335_v14  ;;  %1650 = vmatprep.subr.mxu1 %v5564_v47  ;;  %v6377_v47 = vld [vmem:[%s10271_s3 + $0x5f0] sm:$0xff] }
 0x1ae   :  { %1336 = vmatprep.subr.mxu0 %v6342_v16  ;;  %1651 = vmatpush1.msra.mxu1 %v5576_v54  ;;  %v6384_v54 = vld [vmem:[%s10271_s3 + $0x5c8] sm:$0xff] }
 0x1af   :  { %1337 = vmatpush1.msra.mxu0 %v6349_v23  ;;  %1652 = vmatprep.subr.mxu1 %v5588_v61  ;;  %v6391_v61 = vld [vmem:[%s10271_s3 + $0x5c0] sm:$0xff] }
 0x1b0   :  { %1338 = vmatprep.subr.mxu0 %v6356_v32  ;;  %1653 = vmatpush1.msra.mxu1 %v5600_v5  ;;  %v6398_v5 = vld [vmem:[%s10271_s3 + $0x598] sm:$0xff] }
 0x1b1   :  { %1339 = vmatpush1.msra.mxu0 %v6363_v35  ;;  %1654 = vmatprep.subr.mxu1 %v5612_v24  ;;  %v6405_v24 = vld [vmem:[%s10271_s3 + $0x590] sm:$0xff] }
 0x1b2   :  { %1340 = vmatprep.subr.mxu0 %v6370_v40  ;;  %1655 = vmatpush1.msra.mxu1 %v5624_v11  ;;  %v6412_v11 = vld [vmem:[%s10271_s3 + $0x568] sm:$0xff] }
 0x1b3   :  { %1341 = vmatpush2.msra.mxu0 %v6377_v47  ;;  %1656 = vmatprep.subr.mxu1 %v5636_v18  ;;  %10749 = vst [vmem:[#allocation124_spill] sm:$0xff] %v6412_v11  ;;  %v6419_v18 = vld [vmem:[%s10271_s3 + $0x560] sm:$0xff] }
 0x1b4   :  { %1342 = vmatprep.subr.mxu0 %v6384_v54  ;;  %1657 = vmatpush2.msra.mxu1 %v5648_v62  ;;  %10750 = vst [vmem:[#allocation125_spill] sm:$0xff] %v6419_v18  ;;  %v6426_v62 = vld [vmem:[%s10271_s3 + $0x538] sm:$0xff] }
 0x1b5   :  { %1343 = vmatpush2.msra.mxu0 %v6391_v61  ;;  %1658 = vmatprep.subr.mxu1 %v5660_v53  ;;  %10751 = vst [vmem:[#allocation126_spill] sm:$0xff] %v6426_v62  ;;  %v6433_v53 = vld [vmem:[%s10271_s3 + $0x530] sm:$0xff] }
 0x1b6   :  { %1344 = vmatprep.subr.mxu0 %v6398_v5  ;;  %1659 = vmatpush2.msra.mxu1 %v5672_v49  ;;  %10752 = vst [vmem:[#allocation127_spill] sm:$0xff] %v6433_v53  ;;  %v6440_v49 = vld [vmem:[%s10271_s3 + $0x508] sm:$0xff] }
 0x1b7   :  { %1345 = vmatpush2.msra.mxu0 %v6405_v24  ;;  %1660 = vmatprep.subr.mxu1 %v5684_v27  ;;  %10754 = vst [vmem:[#allocation35_spill] sm:$0xff] %v6440_v49  ;;  %v6447_v27 = vld [vmem:[%s10271_s3 + $0x500] sm:$0xff] }
 0x1b8   :  { %1346 = vmatprep.subr.mxu0 %v6412_v11  ;;  %1661 = vmatpush2.msra.mxu1 %v10753_v51  ;;  %10756 = vst [vmem:[#allocation37_spill] sm:$0xff] %v6447_v27  ;;  %v10767_v51 = vld [vmem:[#allocation51_spill] sm:$0xff] }
 0x1b9   :  { %1347 = vmatpush2.msra.mxu0 %v6419_v18  ;;  %1662 = vmatprep.subr.mxu1 %v10755_v13  ;;  %v6489_v13 = vld [vmem:[%s10271_s3 + $0x470] sm:$0xff] }
 0x1ba   :  { %1348 = vmatprep.subr.mxu0 %v6426_v62  ;;  %1663 = vmatpush2.msra.mxu1 %v10757_v25  ;;  %10768 = vst [vmem:[#allocation51_spill] sm:$0xff] %v6489_v13  ;;  %v10769_v25 = vld [vmem:[#allocation54_spill] sm:$0xff] }
 0x1bb   :  { %1349 = vmatpush2.msra.mxu0 %v6433_v53  ;;  %1664 = vmatprep.subr.mxu1 %v10759_v50  ;;  %v6496_v50 = vld [vmem:[%s10271_s3 + $0x448] sm:$0xff] }
 0x1bc   :  { %1350 = vmatprep.subr.mxu0 %v6440_v49  ;;  %1665 = vmatpush2.msra.mxu1 %v10761_v9  ;;  %10770 = vst [vmem:[#allocation54_spill] sm:$0xff] %v6496_v50  ;;  %v10771_v9 = vld [vmem:[#allocation56_spill] sm:$0xff] }
 0x1bd   :  { %1351 = vmatpush2.msra.mxu0 %v6447_v27  ;;  %1666 = vmatprep.subr.mxu1 %v10763_v31  ;;  %v6503_v31 = vld [vmem:[%s10271_s3 + $0x440] sm:$0xff]  ;;  %v10849_v27 = vld [vmem:[#allocation7_spill] sm:$0xff] }
 0x1be   :  { %1352 = vmatprep.subr.mxu0 %v6454_v46  ;;  %1667 = vmatpush2.msra.mxu1 %v10765_v56  ;;  %10772 = vst [vmem:[#allocation56_spill] sm:$0xff] %v6503_v31  ;;  %v10773_v56 = vld [vmem:[#allocation58_spill] sm:$0xff] }
 0x1bf   :  { %1353 = vmatpush2.msra.mxu0 %v6461_v10  ;;  %1668 = vmatprep.subr.mxu1 %v10767_v51  ;;  %v6510_v51 = vld [vmem:[%s10271_s3 + $0x418] sm:$0xff] }
 0x1c0   :  { %1354 = vmatprep.subr.mxu0 %v6468_v63  ;;  %1669 = vmatpush2.msra.mxu1 %v10769_v25  ;;  %10774 = vst [vmem:[#allocation58_spill] sm:$0xff] %v6510_v51  ;;  %v10775_v25 = vld [vmem:[#allocation60_spill] sm:$0xff]  ;;  %v10811_v63 = vld [vmem:[#allocation26_spill] sm:$0xff]  ;;  %v10812_v10 = vld [vmem:[#allocation27_spill] sm:$0xff] }
 0x1c1   :  { %1355 = vmatpush2.msra.mxu0 %v6475_v17  ;;  %1670 = vmatprep.subr.mxu1 %v10771_v9  ;;  %v6517_v9 = vld [vmem:[%s10271_s3 + $0x410] sm:$0xff]  ;;  %v10809_v17 = vld [vmem:[#allocation24_spill] sm:$0xff] }
 0x1c2   :  { %1356 = vmatprep.subr.mxu0 %v6482_v15  ;;  %1671 = vmatpush2.msra.mxu1 %v10773_v56  ;;  %10776 = vst [vmem:[#allocation60_spill] sm:$0xff] %v6517_v9  ;;  %v10777_v15 = vld [vmem:[#allocation62_spill] sm:$0xff]  ;;  %v6524_v56 = vld [vmem:[%s10271_s3 + $0x3e8] sm:$0xff] }
 0x1c3   :  { %1357 = vmatpush2.msra.mxu0 %v6489_v13  ;;  %1672 = vmatprep.subr.mxu1 %v10775_v25  ;;  %10778 = vst [vmem:[#allocation62_spill] sm:$0xff] %v6524_v56  ;;  %v10779_v13 = vld [vmem:[#allocation64_spill] sm:$0xff] }
 0x1c4   :  { %1358 = vmatprep.subr.mxu0 %v6496_v50  ;;  %1673 = vmatpush2.msra.mxu1 %v10777_v15  ;;  %v6531_v25 = vld [vmem:[%s10271_s3 + $0x3e0] sm:$0xff]  ;;  %v10781_v50 = vld [vmem:[#allocation67_spill] sm:$0xff] }
 0x1c5   :  { %1359 = vmatpush2.msra.mxu0 %v6503_v31  ;;  %1674 = vmatprep.subr.mxu1 %v10779_v13  ;;  %10780 = vst [vmem:[#allocation64_spill] sm:$0xff] %v6531_v25  ;;  %v6538_v15 = vld [vmem:[%s10271_s3 + $0x3b8] sm:$0xff]  ;;  %v10783_v31 = vld [vmem:[#allocation70_spill] sm:$0xff] }
 0x1c6   :  { %1360 = vmatprep.subr.mxu0 %v6510_v51  ;;  %1675 = vmatpush2.msra.mxu1 %v10781_v50  ;;  %10782 = vst [vmem:[#allocation67_spill] sm:$0xff] %v6538_v15  ;;  %v6545_v13 = vld [vmem:[%s10271_s3 + $0x3b0] sm:$0xff]  ;;  %v10785_v51 = vld [vmem:[#allocation73_spill] sm:$0xff] }
 0x1c7   :  { %1361 = vmatpush2.msra.mxu0 %v6517_v9  ;;  %1676 = vmatprep.subr.mxu1 %v10783_v31  ;;  %10784 = vst [vmem:[#allocation70_spill] sm:$0xff] %v6545_v13  ;;  %v6552_v50 = vld [vmem:[%s10271_s3 + $0x388] sm:$0xff]  ;;  %v10787_v9 = vld [vmem:[#allocation75_spill] sm:$0xff]  ;;  %v6559_v31 = vld [vmem:[%s10271_s3 + $0x380] sm:$0xff] }
 0x1c8   :  { %1362 = vmatprep.subr.mxu0 %v6524_v56  ;;  %1677 = vmatpush2.msra.mxu1 %v10785_v51  ;;  %10786 = vst [vmem:[#allocation73_spill] sm:$0xff] %v6552_v50  ;;  %10788 = vst [vmem:[#allocation75_spill] sm:$0xff] %v6559_v31  ;;  %v10789_v56 = vld [vmem:[#allocation77_spill] sm:$0xff]  ;;  %v6566_v51 = vld [vmem:[%s10271_s3 + $0x358] sm:$0xff] }
 0x1c9   :  { %1363 = vmatpush2.msra.mxu0 %v6531_v25  ;;  %1678 = vmatprep.subr.mxu1 %v10787_v9  ;;  %10790 = vst [vmem:[#allocation77_spill] sm:$0xff] %v6566_v51  ;;  %v10791_v25 = vld [vmem:[#allocation80_spill] sm:$0xff]  ;;  %v6573_v9 = vld [vmem:[%s10271_s3 + $0x350] sm:$0xff] }
 0x1ca   :  { %1364 = vmatprep.subr.mxu0 %v6538_v15  ;;  %1679 = vmatpush2.msra.mxu1 %v10789_v56  ;;  %10792 = vst [vmem:[#allocation80_spill] sm:$0xff] %v6573_v9  ;;  %v10793_v15 = vld [vmem:[#allocation83_spill] sm:$0xff]  ;;  %v6580_v56 = vld [vmem:[%s10271_s3 + $0x328] sm:$0xff] }
 0x1cb   :  { %1365 = vmatpush2.msra.mxu0 %v6545_v13  ;;  %1680 = vmatprep.subr.mxu1 %v10791_v25  ;;  %10794 = vst [vmem:[#allocation83_spill] sm:$0xff] %v6580_v56  ;;  %v10795_v13 = vld [vmem:[#allocation85_spill] sm:$0xff]  ;;  %v6587_v25 = vld [vmem:[%s10271_s3 + $0x320] sm:$0xff] }
 0x1cc   :  { %1366 = vmatprep.subr.mxu0 %v6552_v50  ;;  %1681 = vmatpush2.msra.mxu1 %v10793_v15  ;;  %10796 = vst [vmem:[#allocation85_spill] sm:$0xff] %v6587_v25  ;;  %v10797_v50 = vld [vmem:[#allocation88_spill] sm:$0xff]  ;;  %v10798_v15 = vld [vmem:[#allocation91_spill] sm:$0xff] }
 0x1cd   :  { %1367 = vmatpush2.msra.mxu0 %v6559_v31  ;;  %1682 = vmatprep.subr.mxu1 %v10795_v13  ;;  %v10799_v31 = vld [vmem:[#allocation93_spill] sm:$0xff]  ;;  %v10800_v13 = vld [vmem:[#allocation95_spill] sm:$0xff] }
 0x1ce   :  { %1368 = vmatprep.subr.mxu0 %v6566_v51  ;;  %1683 = vmatpush2.msra.mxu1 %v10797_v50  ;;  %v4452_v51 = vld [vmem:[%s10271_s3 + $0x2e8] sm:$0xff]  ;;  %v4453_v50 = vld [vmem:[%s10271_s3 + $0x2e0] sm:$0xff] }
 0x1cf   :  { %1369 = vmatpush2.msra.mxu0 %v6573_v9  ;;  %1684 = vmatprep.subr.mxu1 %v10798_v15  ;;  %v10801_v15 = vld [vmem:[#allocation98_spill] sm:$0xff] }
 0x1d0   :  { %1370 = vmatprep.subr.mxu0 %v6580_v56  ;;  %1685 = vmatpush2.msra.mxu1 %v10799_v31  ;;  %v4454_v31 = vld [vmem:[%s10271_s3 + $0x2b8] sm:$0xff]  ;;  %v10806_v56 = vld [vmem:[#allocation21_spill] sm:$0xff]  ;;  %v10807_v9 = vld [vmem:[#allocation22_spill] sm:$0xff] }
 0x1d1   :  { %1371 = vmatpush2.msra.mxu0 %v6587_v25  ;;  %1686 = vmatprep.subr.mxu1 %v10800_v13  ;;  %v10802_v13 = vld [vmem:[#allocation103_spill] sm:$0xff]  ;;  %v4455_v25 = vld [vmem:[%s10271_s3 + $0x2b0] sm:$0xff] }
 0x1d2   :  { %1373 = vmatmul.mubr.f32.vlgmr.msra.gmra.mxu0 %v6129_v21  ;;  %1695 = vmatprep.subr.mxu0 %v4452_v51  ;;  %v4456_v51 = vld [vmem:[%s10271_s3 + $0x288] sm:$0xff] }
 0x1d3   :  { %1696 = vmatpush1.msra.mxu0 %v4453_v50  ;;  %1687 = vmatpush2.msra.mxu1 %v10801_v15  ;;  %v4457_v50 = vld [vmem:[%s10271_s3 + $0x280] sm:$0xff]  ;;  %v4458_v15 = vld [vmem:[%s10271_s3 + $0x258] sm:$0xff] }
 0x1d4   :  { %1697 = vmatprep.subr.mxu0 %v4454_v31  ;;  %1766 = vmatprep.subr.mxu1 %v10802_v13  ;;  %v4459_v31 = vld [vmem:[%s10271_s3 + $0x250] sm:$0xff]  ;;  %v4461_v13 = vld [vmem:[%s10271_s3 + $0x220] sm:$0xff] }
 0x1d5   :  { %1698 = vmatpush1.msra.mxu0 %v4455_v25  ;;  %v4460_v25 = vld [vmem:[%s10271_s3 + $0x228] sm:$0xff] }
 0x1d6   :  { %1699 = vmatprep.subr.mxu0 %v4456_v51  ;;  %v4462_v51 = vld [vmem:[%s10271_s3 + $0x1f8] sm:$0xff] }
 0x1d7   :  { %1700 = vmatpush1.msra.mxu0 %v4457_v50  ;;  %v4463_v50 = vld [vmem:[%s10271_s3 + $0x1f0] sm:$0xff] }
 0x1d8   :  { %1701 = vmatprep.subr.mxu0 %v4458_v15  ;;  %v4464_v15 = vld [vmem:[%s10271_s3 + $0x1c8] sm:$0xff] }
 0x1d9   :  { %1702 = vmatpush1.msra.mxu0 %v4459_v31  ;;  %v4465_v31 = vld [vmem:[%s10271_s3 + $0x1c0] sm:$0xff] }
 0x1da   :  { %1703 = vmatprep.subr.mxu0 %v4460_v25  ;;  %v4466_v25 = vld [vmem:[%s10271_s3 + $0x198] sm:$0xff] }
 0x1db   :  { %1704 = vmatpush1.msra.mxu0 %v4461_v13  ;;  %v4467_v13 = vld [vmem:[%s10271_s3 + $0x190] sm:$0xff] }
 0x1dc   :  { %1705 = vmatprep.subr.mxu0 %v4462_v51  ;;  %v4468_v51 = vld [vmem:[%s10271_s3 + $0x168] sm:$0xff] }
 0x1dd   :  { %1706 = vmatpush1.msra.mxu0 %v4463_v50  ;;  %v4469_v50 = vld [vmem:[%s10271_s3 + $0x160] sm:$0xff] }
 0x1de   :  { %1707 = vmatprep.subr.mxu0 %v4464_v15  ;;  %v4470_v15 = vld [vmem:[%s10271_s3 + $0x138] sm:$0xff] }
 0x1df   :  { %1708 = vmatpush1.msra.mxu0 %v4465_v31  ;;  %v10803_v31 = vld [vmem:[#allocation18_spill] sm:$0xff] }
 0x1e0   :  { %1709 = vmatprep.subr.mxu0 %v4466_v25  ;;  %v10804_v25 = vld [vmem:[#allocation19_spill] sm:$0xff] }
 0x1e1   :  { %1710 = vmatpush1.msra.mxu0 %v4467_v13  ;;  %v10805_v13 = vld [vmem:[#allocation20_spill] sm:$0xff] }
 0x1e2   :  { %1711 = vmatprep.subr.mxu0 %v4468_v51  ;;  %v10808_v51 = vld [vmem:[#allocation23_spill] sm:$0xff] }
 0x1e3   :  { %1712 = vmatpush1.msra.mxu0 %v4469_v50  ;;  %v10810_v50 = vld [vmem:[#allocation25_spill] sm:$0xff] }
 0x1e4   :  { %1713 = vmatprep.subr.mxu0 %v4470_v15  ;;  %v10813_v15 = vld [vmem:[#allocation28_spill] sm:$0xff] }
 0x1e5   :  { %1714 = vmatpush1.msra.mxu0 %v10803_v31  ;;  %v10814_v31 = vld [vmem:[#allocation29_spill] sm:$0xff] }
 0x1e6   :  { %1715 = vmatprep.subr.mxu0 %v10804_v25  ;;  %v10815_v25 = vld [vmem:[#allocation30_spill] sm:$0xff] }
 0x1e7   :  { %1716 = vmatpush1.msra.mxu0 %v10805_v13  ;;  %v10816_v13 = vld [vmem:[#allocation31_spill] sm:$0xff] }
 0x1e8   :  { %1717 = vmatprep.subr.mxu0 %v10806_v56  ;;  %v10817_v56 = vld [vmem:[#allocation32_spill] sm:$0xff] }
 0x1e9   :  { %1718 = vmatpush1.msra.mxu0 %v10807_v9  ;;  %v10818_v9 = vld [vmem:[#allocation33_spill] sm:$0xff] }
 0x1ea   :  { %1719 = vmatprep.subr.mxu0 %v10808_v51  ;;  %v10819_v51 = vld [vmem:[#allocation34_spill] sm:$0xff] }
 0x1eb   :  { %1720 = vmatpush1.msra.mxu0 %v10809_v17  ;;  %v10820_v17 = vld [vmem:[#allocation36_spill] sm:$0xff] }
 0x1ec   :  { %1721 = vmatprep.subr.mxu0 %v10810_v50  ;;  %v10821_v50 = vld [vmem:[#allocation38_spill] sm:$0xff] }
 0x1ed   :  { %1722 = vmatpush1.msra.mxu0 %v10811_v63  ;;  %v10822_v63 = vld [vmem:[#allocation40_spill] sm:$0xff] }
 0x1ee   :  { %1723 = vmatprep.subr.mxu0 %v10812_v10  ;;  %v10823_v10 = vld [vmem:[#allocation42_spill] sm:$0xff] }
 0x1ef   :  { %1724 = vmatpush1.msra.mxu0 %v10813_v15  ;;  %v10824_v15 = vld [vmem:[#allocation45_spill] sm:$0xff] }
 0x1f0   :  { %1725 = vmatprep.subr.mxu0 %v10814_v31  ;;  %v10825_v31 = vld [vmem:[#allocation47_spill] sm:$0xff] }
 0x1f1   :  { %1726 = vmatpush1.msra.mxu0 %v10815_v25  ;;  %v10826_v25 = vld [vmem:[#allocation50_spill] sm:$0xff] }
 0x1f2   :  { %1727 = vmatprep.subr.mxu0 %v10816_v13  ;;  %v10827_v13 = vld [vmem:[#allocation52_spill] sm:$0xff] }
 0x1f3   :  { %1728 = vmatpush2.msra.mxu0 %v10817_v56  ;;  %v10828_v56 = vld [vmem:[#allocation55_spill] sm:$0xff] }
 0x1f4   :  { %1729 = vmatprep.subr.mxu0 %v10818_v9  ;;  %v10829_v9 = vld [vmem:[#allocation57_spill] sm:$0xff] }
 0x1f5   :  { %1730 = vmatpush2.msra.mxu0 %v10819_v51  ;;  %v10830_v51 = vld [vmem:[#allocation59_spill] sm:$0xff] }
 0x1f6   :  { %1731 = vmatprep.subr.mxu0 %v10820_v17  ;;  %v10831_v17 = vld [vmem:[#allocation61_spill] sm:$0xff] }
 0x1f7   :  { %1732 = vmatpush2.msra.mxu0 %v10821_v50  ;;  %v10832_v50 = vld [vmem:[#allocation63_spill] sm:$0xff] }
 0x1f8   :  { %1733 = vmatprep.subr.mxu0 %v10822_v63  ;;  %v10833_v63 = vld [vmem:[#allocation65_spill] sm:$0xff] }
 0x1f9   :  { %1734 = vmatpush2.msra.mxu0 %v10823_v10  ;;  %v10834_v10 = vld [vmem:[#allocation68_spill] sm:$0xff] }
 0x1fa   :  { %1735 = vmatprep.subr.mxu0 %v10824_v15  ;;  %v10835_v15 = vld [vmem:[#allocation71_spill] sm:$0xff] }
 0x1fb   :  { %1736 = vmatpush2.msra.mxu0 %v10825_v31  ;;  %v10836_v31 = vld [vmem:[#allocation74_spill] sm:$0xff] }
 0x1fc   :  { %1737 = vmatprep.subr.mxu0 %v10826_v25  ;;  %v10837_v25 = vld [vmem:[#allocation76_spill] sm:$0xff] }
 0x1fd   :  { %1738 = vmatpush2.msra.mxu0 %v10827_v13  ;;  %v10838_v13 = vld [vmem:[#allocation78_spill] sm:$0xff] }
 0x1fe   :  { %1739 = vmatprep.subr.mxu0 %v10828_v56  ;;  %v10839_v56 = vld [vmem:[#allocation81_spill] sm:$0xff] }
 0x1ff   :  { %1740 = vmatpush2.msra.mxu0 %v10829_v9  ;;  %v10840_v9 = vld [vmem:[#allocation84_spill] sm:$0xff] }
 0x200   :  { %1741 = vmatprep.subr.mxu0 %v10830_v51  ;;  %v10841_v51 = vld [vmem:[#allocation86_spill] sm:$0xff] }
 0x201   :  { %1742 = vmatpush2.msra.mxu0 %v10831_v17  ;;  %v10842_v17 = vld [vmem:[#allocation89_spill] sm:$0xff] }
 0x202   :  { %1743 = vmatprep.subr.mxu0 %v10832_v50  ;;  %v10843_v50 = vld [vmem:[#allocation92_spill] sm:$0xff] }
 0x203   :  { %1744 = vmatpush2.msra.mxu0 %v10833_v63  ;;  %v10844_v63 = vld [vmem:[#allocation94_spill] sm:$0xff] }
 0x204   :  { %1745 = vmatprep.subr.mxu0 %v10834_v10  ;;  %v10845_v10 = vld [vmem:[#allocation96_spill] sm:$0xff] }
 0x205   :  { %1746 = vmatpush2.msra.mxu0 %v10835_v15  ;;  %v10846_v15 = vld [vmem:[#allocation99_spill] sm:$0xff] }
 0x206   :  { %1747 = vmatprep.subr.mxu0 %v10836_v31  ;;  %v10847_v31 = vld [vmem:[#allocation102_spill] sm:$0xff] }
 0x207   :  { %1748 = vmatpush2.msra.mxu0 %v10837_v25 }
 0x208   :  { %1749 = vmatprep.subr.mxu0 %v10838_v13  ;;  %v10848_v13 = vld [vmem:[#allocation114_spill] sm:$0xff] }
 0x209   :  { %1750 = vmatpush2.msra.mxu0 %v10839_v56 }
 0x20a   :  { %1751 = vmatprep.subr.mxu0 %v10840_v9 }
 0x20b   :  { %1752 = vmatpush2.msra.mxu0 %v10841_v51  ;;  %v10850_v51 = vld [vmem:[#allocation116_spill] sm:$0xff] }
 0x20c   :  { %1753 = vmatprep.subr.mxu0 %v10842_v17  ;;  %v10851_v17 = vld [vmem:[#allocation9_spill] sm:$0xff] }
 0x20d   :  { %1754 = vmatpush2.msra.mxu0 %v10843_v50 }
 0x20e   :  { %1755 = vmatprep.subr.mxu0 %v10844_v63 }
 0x20f   :  { %1756 = vmatpush2.msra.mxu0 %v10845_v10 }
 0x210   :  { %1757 = vmatprep.subr.mxu0 %v10846_v15 }
 0x211   :  { %1758 = vmatpush2.msra.mxu0 %v10847_v31 }
 0x252   :  { %v1232_v25 = vpop.f32.mrf.mxu0  ;;  %v1303_v63 = vpop.f32.mrf.mxu1 }
 0x253   :  { %v1233_v46 = vadd.f32 %v1232_v25, %v10848_v13  ;;  %v10852_v25 = vld [vmem:[#allocation110_spill] sm:$0xff] }
 0x254   :  { %v1234_v56 = vpop.f32.mrf.mxu0  ;;  %v1305_v18 = vpop.f32.mrf.mxu1  ;;  %v317_v13 = vadd.f32 %v10852_v25, %v6123_v42 }
 0x255   :  { %v1387_v9 = vadd.f32 %v1233_v46, %v10849_v27  ;;  %v1235_v53 = vadd.f32 %v1234_v56, %v10850_v51  ;;  %v1306_v31 = vadd.f32 %v1305_v18, %v6115_v36  ;;  %v10853_v56 = vld [vmem:[#allocation121_spill] sm:$0xff] }
 0x257   :  { %v4250_v49 = vmul.f32 -1.442695, %v1387_v9  ;;  %v1394_v50 = vadd.f32 %v1235_v53, %v10851_v17  ;;  %v1408_v11 = vadd.f32 %v1306_v31, %v317_v13  ;;  %v10854_v17 = vld [vmem:[#allocation48_spill] sm:$0xff] }
 0x259   :  { %4311 = vpow2.f32 %v4250_v49  ;;  %v4251_v62 = vmul.f32 -1.442695, %v1394_v50  ;;  %v4252_v46 = vmul.f32 -1.442695, %v1408_v11  ;;  %v1304_v49 = vadd.f32 %v1303_v63, %v10853_v56 }
 0x25b   :  { %4313 = vpow2.f32 %v4251_v62  ;;  %v285_v62 = vadd.f32 %v10854_v17, %v6120_v2 }
 0x266   :  { %v4312_v10 = vpop.eup %4311 }
 0x267   :  { %v1391_v15 = vadd.f32 1.0, %v4312_v10 }
 0x268   :  { %v4314_v27 = vpop.eup %4313 }
 0x269   :  { %4315 = vrcp.f32 %v1391_v15  ;;  %v1398_v9 = vadd.f32 1.0, %v4314_v27  ;;  %v10855_v27 = vld [vmem:[#allocation119_spill] sm:$0xff] }
 0x26a   :  { %4317 = vpow2.f32 %v4252_v46  ;;  %v428_v46 = vadd.f32 %v10855_v27, %v5019_v28 }
 0x26b   :  { %4319 = vrcp.f32 %v1398_v9 }
 0x276   :  { %v4316_v53 = vpop.eup %4315 }
 0x277   :  { %v1401_v50 = vmul.f32 %v4316_v53, %v1304_v49  ;;  %v4318_v15 = vpop.eup %4317 }
 0x278   :  { %v4320_v18 = vpop.eup %4319  ;;  %v1412_v36 = vadd.f32 1.0, %v4318_v15 }
 0x279   :  { %v1402_v10 = vadd.f32 %v1401_v50, %v285_v62  ;;  %v1404_v51 = vsub.f32 1.0, %v4320_v18  ;;  %v1406_v11 = vmul.f32 %v4320_v18, %v6129_v21  ;;  %v10856_v21 = vld [vmem:[#allocation120_spill] sm:$0xff] }
 0x27a   :  { %v430_v17 = vadd.f32 %v10856_v21, %v5024_v29  ;;  %v6888_v21 = vld [vmem:[%s10271_s3 + $0x218] sm:$0xff] }
 0x27b   :  { %4321 = vtanh.f32 %v1402_v10 }
 0x27c   :  { %4323 = vrcp.f32 %v1412_v36 }
 0x288   :  { %v4322_v25 = vpop.eup %4321 }
 0x289   :  { %v1405_v13 = vmul.f32 %v4322_v25, %v1404_v51  ;;  %v4324_v51 = vpop.eup %4323 }
 0x28b   :  { %v6712_v31 = vadd.f32 %v1406_v11, %v1405_v13 }
 0x28d   :  { %4254 = vst [vmem:[%s10274_s5 + $0x8] sm:$0xff] %v6712_v31 }
 0x292   :  { %v1374_v63 = vpop.f32.mrf.mxu0 }
 0x293   :  { %v1375_v9 = vadd.f32 %v1374_v63, %v6138_v26 }
 0x294   :  { %v1376_v49 = vpop.f32.mrf.mxu0 }
 0x295   :  { %v1415_v53 = vadd.f32 %v1375_v9, %v428_v46  ;;  %v1377_v36 = vadd.f32 %v1376_v49, %v6145_v33  ;;  %v6859_v9 = vld [vmem:[%s10271_s3 + $0x248] sm:$0xff]  ;;  %v6864_v49 = vld [vmem:[%s10271_s3 + $0x280] sm:$0xff] }
 0x296   :  { %10888 = vst [vmem:[#allocation103_spill] sm:$0xff] %v6864_v49 }
 0x297   :  { %v4253_v62 = vmul.f32 -1.442695, %v1415_v53  ;;  %v1422_v50 = vmul.f32 %v4324_v51, %v1377_v36  ;;  %v6869_v53 = vld [vmem:[%s10271_s3 + $0x258] sm:$0xff]  ;;  %v6876_v36 = vld [vmem:[%s10271_s3 + $0x240] sm:$0xff]  ;;  %v6881_v51 = vld [vmem:[%s10271_s3 + $0x250] sm:$0xff] }
 0x298   :  { %10889 = vst [vmem:[#allocation18_spill] sm:$0xff] %v6869_v53  ;;  %10890 = vst [vmem:[#allocation19_spill] sm:$0xff] %v6881_v51 }
 0x299   :  { %4325 = vpow2.f32 %v4253_v62  ;;  %v1423_v10 = vadd.f32 %v1422_v50, %v430_v17  ;;  %v6893_v17 = vld [vmem:[%s10271_s3 + $0x228] sm:$0xff]  ;;  %v6900_v62 = vld [vmem:[%s10271_s3 + $0x210] sm:$0xff]  ;;  %v6905_v50 = vld [vmem:[%s10271_s3 + $0x220] sm:$0xff] }
 0x29a   :  { %10891 = vst [vmem:[#allocation20_spill] sm:$0xff] %v6893_v17  ;;  %10892 = vst [vmem:[#allocation21_spill] sm:$0xff] %v6905_v50 }
 0x2a6   :  { %v4326_v15 = vpop.eup %4325 }
 0x2a7   :  { %v1419_v18 = vadd.f32 1.0, %v4326_v15  ;;  %v6917_v15 = vld [vmem:[%s10271_s3 + $0x1f8] sm:$0xff] }
 0x2a8   :  { %10893 = vst [vmem:[#allocation22_spill] sm:$0xff] %v6917_v15 }
 0x2a9   :  { %4327 = vrcp.f32 %v1419_v18  ;;  %v6924_v18 = vld [vmem:[%s10271_s3 + $0x1e0] sm:$0xff] }
 0x2aa   :  { %4329 = vtanh.f32 %v1423_v10  ;;  %v6912_v10 = vld [vmem:[%s10271_s3 + $0x1e8] sm:$0xff] }
 0x2b6   :  { %v4328_v25 = vpop.eup %4327 }
 0x2b7   :  { %v1425_v13 = vsub.f32 1.0, %v4328_v25  ;;  %v4330_v11 = vpop.eup %4329  ;;  %v1427_v27 = vmul.f32 %v4328_v25, %v6149_v22  ;;  %v6929_v25 = vld [vmem:[%s10271_s3 + $0x1f0] sm:$0xff]  ;;  %v7126_v22 = vld [vmem:[%s10271_s3 + $0x38] sm:$0xff] }
 0x2b8   :  { %10894 = vst [vmem:[#allocation23_spill] sm:$0xff] %v6929_v25 }
 0x2b9   :  { %v1426_v63 = vmul.f32 %v4330_v11, %v1425_v13  ;;  %v6936_v13 = vld [vmem:[%s10271_s3 + $0x1b8] sm:$0xff]  ;;  %v6941_v11 = vld [vmem:[%s10271_s3 + $0x1c8] sm:$0xff] }
 0x2ba   :  { %10895 = vst [vmem:[#allocation24_spill] sm:$0xff] %v6941_v11 }
 0x2bb   :  { %v6725_v46 = vadd.f32 %v1427_v27, %v1426_v63  ;;  %v6948_v63 = vld [vmem:[%s10271_s3 + $0x1b0] sm:$0xff]  ;;  %v6953_v27 = vld [vmem:[%s10271_s3 + $0x1c0] sm:$0xff] }
 0x2bc   :  { %10896 = vst [vmem:[#allocation25_spill] sm:$0xff] %v6953_v27 }
 0x2bd   :  { %10857 = vst [vmem:[#allocation88_spill] sm:$0xff] %v6725_v46  ;;  %1688 = vmatprep.mubr.f32.mxu1 %v6725_v46  ;;  %1759 = vmatprep.mubr.f32.mxu0 %v6725_v46 }
 0x2be   :  { %1689 = vmatmul.mubr.f32.vlgmr.msra.gmra.mxu1 %v6712_v31  ;;  %1760 = vmatmul.mubr.f32.vlgmr.msra.gmra.mxu0 %v6712_v31 }
 0x2bf   :  { %1767 = vmatpush1.msra.mxu1 %v6154_v59  ;;  %1830 = vmatprep.mubr.f32.mxu1 %v6725_v46  ;;  %v10858_v59 = vld [vmem:[#allocation124_spill] sm:$0xff] }
 0x2c0   :  { %1768 = vmatprep.subr.mxu1 %v6161_v20  ;;  %v10859_v20 = vld [vmem:[#allocation125_spill] sm:$0xff] }
 0x2c1   :  { %1769 = vmatpush1.msra.mxu1 %v6168_v44  ;;  %v10860_v44 = vld [vmem:[#allocation126_spill] sm:$0xff] }
 0x2c2   :  { %1770 = vmatprep.subr.mxu1 %v6175_v57  ;;  %v10861_v57 = vld [vmem:[#allocation127_spill] sm:$0xff] }
 0x2c3   :  { %1771 = vmatpush1.msra.mxu1 %v6181_v38  ;;  %v10862_v38 = vld [vmem:[#allocation35_spill] sm:$0xff] }
 0x2c4   :  { %1772 = vmatprep.subr.mxu1 %v6188_v45  ;;  %v10863_v45 = vld [vmem:[#allocation37_spill] sm:$0xff] }
 0x2c5   :  { %1773 = vmatpush1.msra.mxu1 %v6195_v48  ;;  %v10864_v48 = vld [vmem:[#allocation39_spill] sm:$0xff] }
 0x2c6   :  { %1774 = vmatprep.subr.mxu1 %v6202_v60  ;;  %v10865_v60 = vld [vmem:[#allocation41_spill] sm:$0xff] }
 0x2c7   :  { %1775 = vmatpush1.msra.mxu1 %v6209_v0  ;;  %v10866_v0 = vld [vmem:[#allocation44_spill] sm:$0xff] }
 0x2c8   :  { %1776 = vmatprep.subr.mxu1 %v6216_v1  ;;  %v10867_v1 = vld [vmem:[#allocation46_spill] sm:$0xff] }
 0x2c9   :  { %1777 = vmatpush1.msra.mxu1 %v6223_v7  ;;  %v10868_v7 = vld [vmem:[#allocation49_spill] sm:$0xff] }
 0x2ca   :  { %1778 = vmatprep.subr.mxu1 %v6230_v12  ;;  %v10869_v12 = vld [vmem:[#allocation51_spill] sm:$0xff] }
 0x2cb   :  { %1779 = vmatpush1.msra.mxu1 %v6237_v19  ;;  %v10870_v19 = vld [vmem:[#allocation54_spill] sm:$0xff] }
 0x2cc   :  { %1780 = vmatprep.subr.mxu1 %v6244_v30  ;;  %v10871_v30 = vld [vmem:[#allocation56_spill] sm:$0xff] }
 0x2cd   :  { %1781 = vmatpush1.msra.mxu1 %v6251_v34  ;;  %v10872_v34 = vld [vmem:[#allocation58_spill] sm:$0xff] }
 0x2ce   :  { %1782 = vmatprep.subr.mxu1 %v6258_v37  ;;  %v10873_v37 = vld [vmem:[#allocation60_spill] sm:$0xff] }
 0x2cf   :  { %1783 = vmatpush1.msra.mxu1 %v6265_v39  ;;  %v10874_v39 = vld [vmem:[#allocation62_spill] sm:$0xff] }
 0x2d0   :  { %1784 = vmatprep.subr.mxu1 %v6272_v41  ;;  %v10875_v41 = vld [vmem:[#allocation64_spill] sm:$0xff] }
 0x2d1   :  { %1785 = vmatpush1.msra.mxu1 %v6279_v43  ;;  %v10876_v43 = vld [vmem:[#allocation67_spill] sm:$0xff] }
 0x2d2   :  { %1786 = vmatprep.subr.mxu1 %v6286_v3  ;;  %v10877_v3 = vld [vmem:[#allocation70_spill] sm:$0xff] }
 0x2d3   :  { %1787 = vmatpush1.msra.mxu1 %v6293_v52  ;;  %v10878_v52 = vld [vmem:[#allocation73_spill] sm:$0xff] }
 0x2d4   :  { %1788 = vmatprep.subr.mxu1 %v6300_v55  ;;  %v10879_v55 = vld [vmem:[#allocation75_spill] sm:$0xff] }
 0x2d5   :  { %1789 = vmatpush1.msra.mxu1 %v6307_v58  ;;  %v10880_v58 = vld [vmem:[#allocation77_spill] sm:$0xff] }
 0x2d6   :  { %1790 = vmatprep.subr.mxu1 %v6314_v6  ;;  %v10881_v6 = vld [vmem:[#allocation80_spill] sm:$0xff] }
 0x2d7   :  { %1791 = vmatpush1.msra.mxu1 %v6321_v4  ;;  %v10882_v4 = vld [vmem:[#allocation83_spill] sm:$0xff] }
 0x2d8   :  { %1792 = vmatprep.subr.mxu1 %v6328_v8  ;;  %v10883_v8 = vld [vmem:[#allocation85_spill] sm:$0xff] }
 0x2d9   :  { %1793 = vmatpush1.msra.mxu1 %v6335_v14  ;;  %v6799_v14 = vld [vmem:[%s10271_s3 + $0x2d8] sm:$0xff] }
 0x2da   :  { %1794 = vmatprep.subr.mxu1 %v6342_v16  ;;  %v6804_v16 = vld [vmem:[%s10271_s3 + $0x2d0] sm:$0xff]  ;;  %2082 = vmatprep.subr.mxu0 %v6799_v14 }
 0x2db   :  { %1795 = vmatpush1.msra.mxu1 %v6349_v23  ;;  %v1983_v23 = vld [vmem:[%s10271_s3 + $0x2e8] sm:$0xff]  ;;  %2083 = vmatpush1.msra.mxu0 %v6804_v16 }
 0x2dc   :  { %1796 = vmatprep.subr.mxu1 %v6356_v32  ;;  %v6813_v32 = vld [vmem:[%s10271_s3 + $0x2a8] sm:$0xff] }
 0x2dd   :  { %1797 = vmatpush1.msra.mxu1 %v6363_v35  ;;  %v6818_v35 = vld [vmem:[%s10271_s3 + $0x2e0] sm:$0xff]  ;;  %2084 = vmatprep.subr.mxu0 %v6813_v32 }
 0x2de   :  { %1798 = vmatprep.subr.mxu1 %v6370_v40  ;;  %10884 = vst [vmem:[#allocation91_spill] sm:$0xff] %v6818_v35  ;;  %v6823_v40 = vld [vmem:[%s10271_s3 + $0x2a0] sm:$0xff] }
 0x2df   :  { %1799 = vmatpush2.msra.mxu1 %v6377_v47  ;;  %v6830_v47 = vld [vmem:[%s10271_s3 + $0x2b8] sm:$0xff]  ;;  %2085 = vmatpush1.msra.mxu0 %v6823_v40 }
 0x2e0   :  { %1800 = vmatprep.subr.mxu1 %v6384_v54  ;;  %10885 = vst [vmem:[#allocation93_spill] sm:$0xff] %v6830_v47  ;;  %v6835_v54 = vld [vmem:[%s10271_s3 + $0x278] sm:$0xff] }
 0x2e1   :  { %1801 = vmatpush2.msra.mxu1 %v6391_v61  ;;  %v6840_v61 = vld [vmem:[%s10271_s3 + $0x2b0] sm:$0xff]  ;;  %2086 = vmatprep.subr.mxu0 %v6835_v54 }
 0x2e2   :  { %1802 = vmatprep.subr.mxu1 %v6398_v5  ;;  %10886 = vst [vmem:[#allocation95_spill] sm:$0xff] %v6840_v61  ;;  %v6847_v5 = vld [vmem:[%s10271_s3 + $0x270] sm:$0xff] }
 0x2e3   :  { %1803 = vmatpush2.msra.mxu1 %v6405_v24  ;;  %v6852_v24 = vld [vmem:[%s10271_s3 + $0x288] sm:$0xff]  ;;  %2087 = vmatpush1.msra.mxu0 %v6847_v5 }
 0x2e4   :  { %1804 = vmatprep.subr.mxu1 %v10858_v59  ;;  %10887 = vst [vmem:[#allocation98_spill] sm:$0xff] %v6852_v24  ;;  %2088 = vmatprep.subr.mxu0 %v6859_v9  ;;  %v6960_v59 = vld [vmem:[%s10271_s3 + $0x188] sm:$0xff] }
 0x2e5   :  { %1805 = vmatpush2.msra.mxu1 %v10859_v20  ;;  %2089 = vmatpush1.msra.mxu0 %v6876_v36  ;;  %v6965_v20 = vld [vmem:[%s10271_s3 + $0x198] sm:$0xff] }
 0x2e6   :  { %1806 = vmatprep.subr.mxu1 %v10860_v44  ;;  %2090 = vmatprep.subr.mxu0 %v6888_v21  ;;  %10897 = vst [vmem:[#allocation26_spill] sm:$0xff] %v6965_v20  ;;  %v6972_v44 = vld [vmem:[%s10271_s3 + $0x180] sm:$0xff] }
 0x2e7   :  { %1807 = vmatpush2.msra.mxu1 %v10861_v57  ;;  %2091 = vmatpush1.msra.mxu0 %v6900_v62  ;;  %v6977_v57 = vld [vmem:[%s10271_s3 + $0x190] sm:$0xff] }
 0x2e8   :  { %1808 = vmatprep.subr.mxu1 %v10862_v38  ;;  %2092 = vmatprep.subr.mxu0 %v6912_v10  ;;  %10898 = vst [vmem:[#allocation27_spill] sm:$0xff] %v6977_v57  ;;  %v6984_v38 = vld [vmem:[%s10271_s3 + $0x158] sm:$0xff] }
 0x2e9   :  { %1809 = vmatpush2.msra.mxu1 %v10863_v45  ;;  %2093 = vmatpush1.msra.mxu0 %v6924_v18  ;;  %v6989_v45 = vld [vmem:[%s10271_s3 + $0x168] sm:$0xff] }
 0x2ea   :  { %1810 = vmatprep.subr.mxu1 %v10864_v48  ;;  %2094 = vmatprep.subr.mxu0 %v6936_v13  ;;  %10899 = vst [vmem:[#allocation28_spill] sm:$0xff] %v6989_v45  ;;  %v6996_v48 = vld [vmem:[%s10271_s3 + $0x150] sm:$0xff] }
 0x2eb   :  { %1811 = vmatpush2.msra.mxu1 %v10865_v60  ;;  %2095 = vmatpush1.msra.mxu0 %v6948_v63  ;;  %v7001_v60 = vld [vmem:[%s10271_s3 + $0x160] sm:$0xff] }
 0x2ec   :  { %1812 = vmatprep.subr.mxu1 %v10866_v0  ;;  %2096 = vmatprep.subr.mxu0 %v6960_v59  ;;  %10900 = vst [vmem:[#allocation29_spill] sm:$0xff] %v7001_v60  ;;  %v7008_v0 = vld [vmem:[%s10271_s3 + $0x128] sm:$0xff] }
 0x2ed   :  { %1813 = vmatpush2.msra.mxu1 %v10867_v1  ;;  %2097 = vmatpush1.msra.mxu0 %v6972_v44  ;;  %v7013_v1 = vld [vmem:[%s10271_s3 + $0x138] sm:$0xff] }
 0x2ee   :  { %1814 = vmatprep.subr.mxu1 %v10868_v7  ;;  %10901 = vst [vmem:[#allocation30_spill] sm:$0xff] %v7013_v1  ;;  %2098 = vmatprep.subr.mxu0 %v6984_v38  ;;  %v7020_v7 = vld [vmem:[%s10271_s3 + $0x120] sm:$0xff] }
 0x2ef   :  { %1815 = vmatpush2.msra.mxu1 %v10869_v12  ;;  %v7025_v12 = vld [vmem:[%s10271_s3 + $0x130] sm:$0xff]  ;;  %2099 = vmatpush1.msra.mxu0 %v6996_v48 }
 0x2f0   :  { %1816 = vmatprep.subr.mxu1 %v10870_v19  ;;  %10902 = vst [vmem:[#allocation31_spill] sm:$0xff] %v7025_v12  ;;  %v7032_v19 = vld [vmem:[%s10271_s3 + $0xf8] sm:$0xff]  ;;  %2100 = vmatprep.subr.mxu0 %v7008_v0 }
 0x2f1   :  { %1817 = vmatpush2.msra.mxu1 %v10871_v30  ;;  %2101 = vmatpush1.msra.mxu0 %v7020_v7  ;;  %v7042_v30 = vld [vmem:[%s10271_s3 + $0xf0] sm:$0xff] }
 0x2f2   :  { %1818 = vmatprep.subr.mxu1 %v10872_v34  ;;  %2102 = vmatprep.subr.mxu0 %v7032_v19  ;;  %v7047_v34 = vld [vmem:[%s10271_s3 + $0x108] sm:$0xff] }
 0x2f3   :  { %1819 = vmatpush2.msra.mxu1 %v10873_v37  ;;  %10903 = vst [vmem:[#allocation32_spill] sm:$0xff] %v7047_v34  ;;  %2103 = vmatpush1.msra.mxu0 %v7042_v30  ;;  %v7054_v37 = vld [vmem:[%s10271_s3 + $0xc8] sm:$0xff] }
 0x2f4   :  { %1820 = vmatprep.subr.mxu1 %v10874_v39  ;;  %v7059_v39 = vld [vmem:[%s10271_s3 + $0x100] sm:$0xff]  ;;  %2104 = vmatprep.subr.mxu0 %v7054_v37 }
 0x2f5   :  { %1821 = vmatpush2.msra.mxu1 %v10875_v41  ;;  %10904 = vst [vmem:[#allocation33_spill] sm:$0xff] %v7059_v39  ;;  %v7066_v41 = vld [vmem:[%s10271_s3 + $0xc0] sm:$0xff] }
 0x2f6   :  { %1822 = vmatprep.subr.mxu1 %v10876_v43  ;;  %v7071_v43 = vld [vmem:[%s10271_s3 + $0xd8] sm:$0xff]  ;;  %2105 = vmatpush1.msra.mxu0 %v7066_v41 }
 0x2f7   :  { %1823 = vmatpush2.msra.mxu1 %v10877_v3  ;;  %10905 = vst [vmem:[#allocation34_spill] sm:$0xff] %v7071_v43  ;;  %v7078_v3 = vld [vmem:[%s10271_s3 + $0x98] sm:$0xff] }
 0x2f8   :  { %1824 = vmatprep.subr.mxu1 %v10878_v52  ;;  %v7083_v52 = vld [vmem:[%s10271_s3 + $0xd0] sm:$0xff]  ;;  %2106 = vmatprep.subr.mxu0 %v7078_v3 }
 0x2f9   :  { %1825 = vmatpush2.msra.mxu1 %v10879_v55  ;;  %10906 = vst [vmem:[#allocation36_spill] sm:$0xff] %v7083_v52  ;;  %v7090_v55 = vld [vmem:[%s10271_s3 + $0x90] sm:$0xff] }
 0x2fa   :  { %1826 = vmatprep.subr.mxu1 %v10880_v58  ;;  %v7095_v58 = vld [vmem:[%s10271_s3 + $0xa8] sm:$0xff]  ;;  %2107 = vmatpush1.msra.mxu0 %v7090_v55 }
 0x2fb   :  { %1827 = vmatpush2.msra.mxu1 %v10881_v6  ;;  %10907 = vst [vmem:[#allocation38_spill] sm:$0xff] %v7095_v58  ;;  %v7102_v6 = vld [vmem:[%s10271_s3 + $0x68] sm:$0xff] }
 0x2fc   :  { %1828 = vmatprep.subr.mxu1 %v10882_v4  ;;  %v7107_v4 = vld [vmem:[%s10271_s3 + $0xa0] sm:$0xff]  ;;  %2108 = vmatprep.subr.mxu0 %v7102_v6 }
 0x2fd   :  { %1829 = vmatpush2.msra.mxu1 %v10883_v8  ;;  %10908 = vst [vmem:[#allocation40_spill] sm:$0xff] %v7107_v4  ;;  %v7114_v8 = vld [vmem:[%s10271_s3 + $0x60] sm:$0xff] }
 0x2fe   :  { %1831 = vmatmul.mubr.f32.vlgmr.msra.gmra.mxu1 %v6712_v31  ;;  %2153 = vmatprep.subr.mxu1 %v1983_v23  ;;  %v7119_v23 = vld [vmem:[%s10271_s3 + $0x78] sm:$0xff] }
 0x2ff   :  { %2154 = vmatpush1.msra.mxu1 %v6818_v35  ;;  %10909 = vst [vmem:[#allocation42_spill] sm:$0xff] %v7119_v23  ;;  %2109 = vmatpush1.msra.mxu0 %v7114_v8  ;;  %v7391_v35 = vld [vmem:[%s10271_s3 + $0x460] sm:$0xff] }
 0x300   :  { %2155 = vmatprep.subr.mxu1 %v6830_v47  ;;  %2110 = vmatprep.subr.mxu0 %v7126_v22  ;;  %v7386_v47 = vld [vmem:[%s10271_s3 + $0x428] sm:$0xff]  ;;  %10946 = vst [vmem:[#allocation37_spill] sm:$0xff] %v7391_v35 }
 0x301   :  { %2156 = vmatpush1.msra.mxu1 %v6840_v61  ;;  %v7374_v61 = vld [vmem:[%s10271_s3 + $0x450] sm:$0xff]  ;;  %10945 = vst [vmem:[#allocation35_spill] sm:$0xff] %v7386_v47 }
 0x302   :  { %2157 = vmatprep.subr.mxu1 %v6852_v24  ;;  %v7369_v24 = vld [vmem:[%s10271_s3 + $0x490] sm:$0xff]  ;;  %10943 = vst [vmem:[#allocation126_spill] sm:$0xff] %v7374_v61 }
 0x303   :  { %2158 = vmatpush1.msra.mxu1 %v6864_v49  ;;  %v7357_v49 = vld [vmem:[%s10271_s3 + $0x498] sm:$0xff]  ;;  %10942 = vst [vmem:[#allocation125_spill] sm:$0xff] %v7369_v24 }
 0x304   :  { %2159 = vmatprep.subr.mxu1 %v6869_v53  ;;  %v7352_v53 = vld [vmem:[%s10271_s3 + $0x480] sm:$0xff]  ;;  %10940 = vst [vmem:[#allocation120_spill] sm:$0xff] %v7357_v49 }
 0x305   :  { %2160 = vmatpush1.msra.mxu1 %v6881_v51  ;;  %v7340_v51 = vld [vmem:[%s10271_s3 + $0x488] sm:$0xff]  ;;  %10939 = vst [vmem:[#allocation119_spill] sm:$0xff] %v7352_v53 }
 0x306   :  { %2161 = vmatprep.subr.mxu1 %v6893_v17  ;;  %v7330_v17 = vld [vmem:[%s10271_s3 + $0x4b0] sm:$0xff]  ;;  %10937 = vst [vmem:[#allocation121_spill] sm:$0xff] %v7340_v51 }
 0x307   :  { %2162 = vmatpush1.msra.mxu1 %v6905_v50  ;;  %v7318_v50 = vld [vmem:[%s10271_s3 + $0x4b8] sm:$0xff]  ;;  %10935 = vst [vmem:[#allocation9_spill] sm:$0xff] %v7330_v17 }
 0x308   :  { %2163 = vmatprep.subr.mxu1 %v6917_v15  ;;  %v7306_v15 = vld [vmem:[%s10271_s3 + $0x4e0] sm:$0xff]  ;;  %10933 = vst [vmem:[#allocation102_spill] sm:$0xff] %v7318_v50 }
 0x309   :  { %2164 = vmatpush1.msra.mxu1 %v6929_v25  ;;  %v7294_v25 = vld [vmem:[%s10271_s3 + $0x4e8] sm:$0xff]  ;;  %10931 = vst [vmem:[#allocation96_spill] sm:$0xff] %v7306_v15 }
 0x30a   :  { %2165 = vmatprep.subr.mxu1 %v6941_v11  ;;  %v7282_v11 = vld [vmem:[%s10271_s3 + $0x510] sm:$0xff]  ;;  %10929 = vst [vmem:[#allocation92_spill] sm:$0xff] %v7294_v25 }
 0x30b   :  { %2166 = vmatpush1.msra.mxu1 %v6953_v27  ;;  %v7270_v27 = vld [vmem:[%s10271_s3 + $0x518] sm:$0xff]  ;;  %10927 = vst [vmem:[#allocation86_spill] sm:$0xff] %v7282_v11 }
 0x30c   :  { %2167 = vmatprep.subr.mxu1 %v6965_v20  ;;  %v7258_v20 = vld [vmem:[%s10271_s3 + $0x540] sm:$0xff]  ;;  %10925 = vst [vmem:[#allocation81_spill] sm:$0xff] %v7270_v27 }
 0x30d   :  { %2168 = vmatpush1.msra.mxu1 %v6977_v57  ;;  %v7246_v57 = vld [vmem:[%s10271_s3 + $0x548] sm:$0xff]  ;;  %10923 = vst [vmem:[#allocation76_spill] sm:$0xff] %v7258_v20 }
 0x30e   :  { %2169 = vmatprep.subr.mxu1 %v6989_v45  ;;  %v7234_v45 = vld [vmem:[%s10271_s3 + $0x570] sm:$0xff]  ;;  %10921 = vst [vmem:[#allocation71_spill] sm:$0xff] %v7246_v57 }
 0x30f   :  { %2170 = vmatpush1.msra.mxu1 %v7001_v60  ;;  %v7222_v60 = vld [vmem:[%s10271_s3 + $0x578] sm:$0xff]  ;;  %10919 = vst [vmem:[#allocation65_spill] sm:$0xff] %v7234_v45 }
 0x310   :  { %2171 = vmatprep.subr.mxu1 %v7013_v1  ;;  %v7210_v1 = vld [vmem:[%s10271_s3 + $0x5a0] sm:$0xff] }
 0x311   :  { %2172 = vmatpush1.msra.mxu1 %v7025_v12  ;;  %v7198_v12 = vld [vmem:[%s10271_s3 + $0x5a8] sm:$0xff] }
 0x312   :  { %2173 = vmatprep.subr.mxu1 %v7047_v34  ;;  %v7186_v34 = vld [vmem:[%s10271_s3 + $0x5d0] sm:$0xff] }
 0x313   :  { %2174 = vmatpush1.msra.mxu1 %v7059_v39  ;;  %v7174_v39 = vld [vmem:[%s10271_s3 + $0x5d8] sm:$0xff] }
 0x314   :  { %2175 = vmatprep.subr.mxu1 %v7071_v43  ;;  %v7162_v43 = vld [vmem:[%s10271_s3] sm:$0xff] }
 0x315   :  { %2176 = vmatpush1.msra.mxu1 %v7083_v52  ;;  %v7150_v52 = vld [vmem:[%s10271_s3 + $0x8] sm:$0xff] }
 0x316   :  { %2177 = vmatprep.subr.mxu1 %v7095_v58  ;;  %v7138_v58 = vld [vmem:[%s10271_s3 + $0x30] sm:$0xff] }
 0x317   :  { %2178 = vmatpush1.msra.mxu1 %v7107_v4  ;;  %v7131_v4 = vld [vmem:[%s10271_s3 + $0x70] sm:$0xff]  ;;  %2111 = vmatpush1.msra.mxu0 %v7138_v58 }
 0x318   :  { %2179 = vmatprep.subr.mxu1 %v7119_v23  ;;  %10910 = vst [vmem:[#allocation45_spill] sm:$0xff] %v7131_v4  ;;  %v7143_v23 = vld [vmem:[%s10271_s3 + $0x48] sm:$0xff]  ;;  %2112 = vmatprep.subr.mxu0 %v7150_v52 }
 0x319   :  { %2180 = vmatpush1.msra.mxu1 %v7131_v4  ;;  %10911 = vst [vmem:[#allocation47_spill] sm:$0xff] %v7143_v23  ;;  %v7155_v4 = vld [vmem:[%s10271_s3 + $0x40] sm:$0xff]  ;;  %2113 = vmatpush1.msra.mxu0 %v7162_v43 }
 0x31a   :  { %2181 = vmatprep.subr.mxu1 %v7143_v23  ;;  %10912 = vst [vmem:[#allocation50_spill] sm:$0xff] %v7155_v4  ;;  %v7167_v23 = vld [vmem:[%s10271_s3 + $0x18] sm:$0xff]  ;;  %2114 = vmatprep.subr.mxu0 %v7174_v39 }
 0x31b   :  { %2182 = vmatpush1.msra.mxu1 %v7155_v4  ;;  %10913 = vst [vmem:[#allocation52_spill] sm:$0xff] %v7167_v23  ;;  %v7179_v4 = vld [vmem:[%s10271_s3 + $0x10] sm:$0xff]  ;;  %2115 = vmatpush2.msra.mxu0 %v7186_v34 }
 0x31c   :  { %2183 = vmatprep.subr.mxu1 %v7167_v23  ;;  %10914 = vst [vmem:[#allocation55_spill] sm:$0xff] %v7179_v4  ;;  %v7191_v23 = vld [vmem:[%s10271_s3 + $0x5e8] sm:$0xff]  ;;  %2116 = vmatprep.subr.mxu0 %v7198_v12 }
 0x31d   :  { %2184 = vmatpush1.msra.mxu1 %v7179_v4  ;;  %10915 = vst [vmem:[#allocation57_spill] sm:$0xff] %v7191_v23  ;;  %v7203_v4 = vld [vmem:[%s10271_s3 + $0x5e0] sm:$0xff]  ;;  %2117 = vmatpush2.msra.mxu0 %v7210_v1 }
 0x31e   :  { %2185 = vmatprep.subr.mxu1 %v7191_v23  ;;  %10916 = vst [vmem:[#allocation59_spill] sm:$0xff] %v7203_v4  ;;  %v7215_v23 = vld [vmem:[%s10271_s3 + $0x5b8] sm:$0xff]  ;;  %2118 = vmatprep.subr.mxu0 %v7222_v60 }
 0x31f   :  { %2186 = vmatpush2.msra.mxu1 %v7203_v4  ;;  %10917 = vst [vmem:[#allocation61_spill] sm:$0xff] %v7215_v23  ;;  %v7227_v4 = vld [vmem:[%s10271_s3 + $0x5b0] sm:$0xff]  ;;  %2119 = vmatpush2.msra.mxu0 %v7234_v45 }
 0x320   :  { %2187 = vmatprep.subr.mxu1 %v7215_v23  ;;  %10918 = vst [vmem:[#allocation63_spill] sm:$0xff] %v7227_v4  ;;  %v7239_v23 = vld [vmem:[%s10271_s3 + $0x588] sm:$0xff]  ;;  %2120 = vmatprep.subr.mxu0 %v7246_v57 }
 0x321   :  { %2188 = vmatpush2.msra.mxu1 %v7227_v4  ;;  %10920 = vst [vmem:[#allocation68_spill] sm:$0xff] %v7239_v23  ;;  %v7251_v4 = vld [vmem:[%s10271_s3 + $0x580] sm:$0xff]  ;;  %2121 = vmatpush2.msra.mxu0 %v7258_v20 }
 0x322   :  { %2189 = vmatprep.subr.mxu1 %v7239_v23  ;;  %10922 = vst [vmem:[#allocation74_spill] sm:$0xff] %v7251_v4  ;;  %v7263_v23 = vld [vmem:[%s10271_s3 + $0x558] sm:$0xff]  ;;  %2122 = vmatprep.subr.mxu0 %v7270_v27 }
 0x323   :  { %2190 = vmatpush2.msra.mxu1 %v7251_v4  ;;  %10924 = vst [vmem:[#allocation78_spill] sm:$0xff] %v7263_v23  ;;  %v7275_v4 = vld [vmem:[%s10271_s3 + $0x550] sm:$0xff]  ;;  %2123 = vmatpush2.msra.mxu0 %v7282_v11 }
 0x324   :  { %2191 = vmatprep.subr.mxu1 %v7263_v23  ;;  %10926 = vst [vmem:[#allocation84_spill] sm:$0xff] %v7275_v4  ;;  %v7287_v23 = vld [vmem:[%s10271_s3 + $0x528] sm:$0xff]  ;;  %2124 = vmatprep.subr.mxu0 %v7294_v25 }
 0x325   :  { %2192 = vmatpush2.msra.mxu1 %v7275_v4  ;;  %10928 = vst [vmem:[#allocation89_spill] sm:$0xff] %v7287_v23  ;;  %v7299_v4 = vld [vmem:[%s10271_s3 + $0x520] sm:$0xff]  ;;  %2125 = vmatpush2.msra.mxu0 %v7306_v15  ;;  %v10978_v15 = vld [vmem:[#allocation13_spill] sm:$0xff] }
 0x326   :  { %2193 = vmatprep.subr.mxu1 %v7287_v23  ;;  %10930 = vst [vmem:[#allocation94_spill] sm:$0xff] %v7299_v4  ;;  %v7311_v23 = vld [vmem:[%s10271_s3 + $0x4f8] sm:$0xff]  ;;  %2126 = vmatprep.subr.mxu0 %v7318_v50 }
 0x327   :  { %2194 = vmatpush2.msra.mxu1 %v7299_v4  ;;  %10932 = vst [vmem:[#allocation99_spill] sm:$0xff] %v7311_v23  ;;  %v7323_v4 = vld [vmem:[%s10271_s3 + $0x4f0] sm:$0xff]  ;;  %2127 = vmatpush2.msra.mxu0 %v7330_v17  ;;  %v10977_v17 = vld [vmem:[#allocation116_spill] sm:$0xff] }
 0x328   :  { %2195 = vmatprep.subr.mxu1 %v7311_v23  ;;  %10934 = vst [vmem:[#allocation7_spill] sm:$0xff] %v7323_v4  ;;  %v7335_v23 = vld [vmem:[%s10271_s3 + $0x4c8] sm:$0xff]  ;;  %2128 = vmatprep.subr.mxu0 %v7340_v51 }
 0x329   :  { %2196 = vmatpush2.msra.mxu1 %v7323_v4  ;;  %10936 = vst [vmem:[#allocation110_spill] sm:$0xff] %v7335_v23  ;;  %v7347_v4 = vld [vmem:[%s10271_s3 + $0x4c0] sm:$0xff]  ;;  %2129 = vmatpush2.msra.mxu0 %v7352_v53  ;;  %v7403_v53 = vld [vmem:[%s10271_s3 + $0x438] sm:$0xff] }
 0x32a   :  { %2197 = vmatprep.subr.mxu1 %v7335_v23  ;;  %10938 = vst [vmem:[#allocation48_spill] sm:$0xff] %v7347_v4  ;;  %v7364_v23 = vld [vmem:[%s10271_s3 + $0x458] sm:$0xff]  ;;  %10948 = vst [vmem:[#allocation41_spill] sm:$0xff] %v7403_v53 }
 0x32b   :  { %2198 = vmatpush2.msra.mxu1 %v7347_v4  ;;  %10941 = vst [vmem:[#allocation124_spill] sm:$0xff] %v7364_v23  ;;  %v7381_v4 = vld [vmem:[%s10271_s3 + $0x468] sm:$0xff]  ;;  %2130 = vmatprep.subr.mxu0 %v7364_v23  ;;  %v7410_v23 = vld [vmem:[%s10271_s3 + $0x3f8] sm:$0xff] }
 0x32c   :  { %2199 = vmatprep.subr.mxu1 %v7357_v49  ;;  %10944 = vst [vmem:[#allocation127_spill] sm:$0xff] %v7381_v4  ;;  %v7398_v49 = vld [vmem:[%s10271_s3 + $0x420] sm:$0xff]  ;;  %2131 = vmatpush2.msra.mxu0 %v7374_v61  ;;  %10949 = vst [vmem:[#allocation44_spill] sm:$0xff] %v7410_v23  ;;  %v7422_v61 = vld [vmem:[%s10271_s3 + $0x3f0] sm:$0xff] }
 0x32d   :  { %2200 = vmatpush2.msra.mxu1 %v7369_v24  ;;  %10947 = vst [vmem:[#allocation39_spill] sm:$0xff] %v7398_v49  ;;  %v7415_v24 = vld [vmem:[%s10271_s3 + $0x430] sm:$0xff]  ;;  %2132 = vmatprep.subr.mxu0 %v7386_v47  ;;  %10951 = vst [vmem:[#allocation49_spill] sm:$0xff] %v7422_v61  ;;  %v7434_v47 = vld [vmem:[%s10271_s3 + $0x3c8] sm:$0xff] }
 0x32e   :  { %2201 = vmatprep.subr.mxu1 %v7381_v4  ;;  %10950 = vst [vmem:[#allocation46_spill] sm:$0xff] %v7415_v24  ;;  %v7427_v4 = vld [vmem:[%s10271_s3 + $0x408] sm:$0xff]  ;;  %2133 = vmatpush2.msra.mxu0 %v7398_v49  ;;  %10953 = vst [vmem:[#allocation54_spill] sm:$0xff] %v7434_v47  ;;  %v7446_v49 = vld [vmem:[%s10271_s3 + $0x3c0] sm:$0xff] }
 0x32f   :  { %2202 = vmatpush2.msra.mxu1 %v7391_v35  ;;  %10952 = vst [vmem:[#allocation51_spill] sm:$0xff] %v7427_v4  ;;  %v7439_v35 = vld [vmem:[%s10271_s3 + $0x400] sm:$0xff]  ;;  %2134 = vmatprep.subr.mxu0 %v7410_v23  ;;  %10955 = vst [vmem:[#allocation58_spill] sm:$0xff] %v7446_v49  ;;  %v7458_v23 = vld [vmem:[%s10271_s3 + $0x398] sm:$0xff] }
 0x330   :  { %2203 = vmatprep.subr.mxu1 %v7403_v53  ;;  %10954 = vst [vmem:[#allocation56_spill] sm:$0xff] %v7439_v35  ;;  %v7451_v53 = vld [vmem:[%s10271_s3 + $0x3d8] sm:$0xff]  ;;  %2135 = vmatpush2.msra.mxu0 %v7422_v61  ;;  %10957 = vst [vmem:[#allocation62_spill] sm:$0xff] %v7458_v23  ;;  %v7470_v61 = vld [vmem:[%s10271_s3 + $0x390] sm:$0xff] }
 0x331   :  { %2204 = vmatpush2.msra.mxu1 %v7415_v24  ;;  %10956 = vst [vmem:[#allocation60_spill] sm:$0xff] %v7451_v53  ;;  %v7463_v24 = vld [vmem:[%s10271_s3 + $0x3d0] sm:$0xff]  ;;  %2136 = vmatprep.subr.mxu0 %v7434_v47  ;;  %10959 = vst [vmem:[#allocation67_spill] sm:$0xff] %v7470_v61  ;;  %v7482_v47 = vld [vmem:[%s10271_s3 + $0x368] sm:$0xff] }
 0x332   :  { %2205 = vmatprep.subr.mxu1 %v7427_v4  ;;  %10958 = vst [vmem:[#allocation64_spill] sm:$0xff] %v7463_v24  ;;  %v7475_v4 = vld [vmem:[%s10271_s3 + $0x3a8] sm:$0xff]  ;;  %2137 = vmatpush2.msra.mxu0 %v7446_v49  ;;  %10961 = vst [vmem:[#allocation73_spill] sm:$0xff] %v7482_v47  ;;  %v7494_v49 = vld [vmem:[%s10271_s3 + $0x360] sm:$0xff] }
 0x333   :  { %2206 = vmatpush2.msra.mxu1 %v7439_v35  ;;  %10960 = vst [vmem:[#allocation70_spill] sm:$0xff] %v7475_v4  ;;  %v7487_v35 = vld [vmem:[%s10271_s3 + $0x3a0] sm:$0xff]  ;;  %2138 = vmatprep.subr.mxu0 %v7458_v23  ;;  %10963 = vst [vmem:[#allocation77_spill] sm:$0xff] %v7494_v49  ;;  %v7506_v23 = vld [vmem:[%s10271_s3 + $0x338] sm:$0xff] }
 0x334   :  { %2207 = vmatprep.subr.mxu1 %v7451_v53  ;;  %10962 = vst [vmem:[#allocation75_spill] sm:$0xff] %v7487_v35  ;;  %v7499_v53 = vld [vmem:[%s10271_s3 + $0x378] sm:$0xff]  ;;  %2139 = vmatpush2.msra.mxu0 %v7470_v61  ;;  %10965 = vst [vmem:[#allocation83_spill] sm:$0xff] %v7506_v23  ;;  %v7518_v61 = vld [vmem:[%s10271_s3 + $0x330] sm:$0xff] }
 0x335   :  { %2208 = vmatpush2.msra.mxu1 %v7463_v24  ;;  %10964 = vst [vmem:[#allocation80_spill] sm:$0xff] %v7499_v53  ;;  %v7511_v24 = vld [vmem:[%s10271_s3 + $0x370] sm:$0xff]  ;;  %2140 = vmatprep.subr.mxu0 %v7482_v47  ;;  %10967 = vst [vmem:[#allocation128_spill] sm:$0xff] %v7518_v61  ;;  %v7530_v47 = vld [vmem:[%s10271_s3 + $0x308] sm:$0xff] }
 0x336   :  { %2209 = vmatprep.subr.mxu1 %v7475_v4  ;;  %10966 = vst [vmem:[#allocation85_spill] sm:$0xff] %v7511_v24  ;;  %v7523_v4 = vld [vmem:[%s10271_s3 + $0x348] sm:$0xff]  ;;  %2141 = vmatpush2.msra.mxu0 %v7494_v49  ;;  %10969 = vst [vmem:[#allocation130_spill] sm:$0xff] %v7530_v47  ;;  %v7542_v49 = vld [vmem:[%s10271_s3 + $0x300] sm:$0xff] }
 0x337   :  { %2210 = vmatpush2.msra.mxu1 %v7487_v35  ;;  %10968 = vst [vmem:[#allocation129_spill] sm:$0xff] %v7523_v4  ;;  %v7535_v35 = vld [vmem:[%s10271_s3 + $0x340] sm:$0xff]  ;;  %2142 = vmatprep.subr.mxu0 %v7506_v23  ;;  %10971 = vst [vmem:[#allocation132_spill] sm:$0xff] %v7542_v49  ;;  %v7563_v23 = vld [vmem:[%s10271_s3 + $0x2f8] sm:$0xff] }
 0x338   :  { %2211 = vmatprep.subr.mxu1 %v7499_v53  ;;  %10970 = vst [vmem:[#allocation131_spill] sm:$0xff] %v7535_v35  ;;  %v7547_v53 = vld [vmem:[%s10271_s3 + $0x318] sm:$0xff]  ;;  %2143 = vmatpush2.msra.mxu0 %v7518_v61  ;;  %10974 = vst [vmem:[#allocation135_spill] sm:$0xff] %v7563_v23 }
 0x339   :  { %2212 = vmatpush2.msra.mxu1 %v7511_v24  ;;  %10972 = vst [vmem:[#allocation133_spill] sm:$0xff] %v7547_v53  ;;  %2144 = vmatprep.subr.mxu0 %v7530_v47  ;;  %v7558_v24 = vld [vmem:[%s10271_s3 + $0x310] sm:$0xff]  ;;  %v10976_v47 = vld [vmem:[#allocation11_spill] sm:$0xff] }
 0x33a   :  { %2213 = vmatprep.subr.mxu1 %v7523_v4  ;;  %2145 = vmatpush2.msra.mxu0 %v7542_v49  ;;  %10973 = vst [vmem:[#allocation134_spill] sm:$0xff] %v7558_v24  ;;  %v10975_v4 = vld [vmem:[#allocation114_spill] sm:$0xff] }
 0x33b   :  { %2214 = vmatpush2.msra.mxu1 %v7535_v35  ;;  %2224 = vmatprep.subr.mxu0 %v7563_v23 }
 0x33c   :  { %2215 = vmatprep.subr.mxu1 %v7547_v53 }
 0x33d   :  { %2216 = vmatpush2.msra.mxu1 %v7558_v24 }
 0x33e   :  { %2540 = vmatprep.subr.mxu1 %v6799_v14  ;;  %v10979_v14 = vld [vmem:[#allocation122_spill] sm:$0xff] }
 0x37e   :  { %v1690_v35 = vpop.f32.mrf.mxu1  ;;  %v1761_v27 = vpop.f32.mrf.mxu0 }
 0x37f   :  { %v1691_v49 = vadd.f32 %v1690_v35, %v10975_v4  ;;  %v10980_v35 = vld [vmem:[#allocation106_spill] sm:$0xff] }
 0x380   :  { %v1692_v53 = vpop.f32.mrf.mxu1  ;;  %v1763_v20 = vpop.f32.mrf.mxu0  ;;  %v311_v4 = vadd.f32 %v10980_v35, %v6123_v42 }
 0x381   :  { %v1845_v61 = vadd.f32 %v1691_v49, %v10976_v47  ;;  %v1693_v50 = vadd.f32 %v1692_v53, %v10977_v17  ;;  %v1764_v57 = vadd.f32 %v1763_v20, %v10979_v14  ;;  %v1762_v53 = vadd.f32 %v1761_v27, %v10853_v56 }
 0x383   :  { %v4255_v51 = vmul.f32 -1.442695, %v1845_v61  ;;  %v1852_v25 = vadd.f32 %v1693_v50, %v10978_v15  ;;  %v1866_v45 = vadd.f32 %v1764_v57, %v311_v4  ;;  %v10981_v50 = vld [vmem:[#allocation66_spill] sm:$0xff] }
 0x384   :  { %v291_v15 = vadd.f32 %v10981_v50, %v6120_v2 }
 0x385   :  { %4331 = vpow2.f32 %v4255_v51  ;;  %v4256_v11 = vmul.f32 -1.442695, %v1852_v25  ;;  %v4257_v61 = vmul.f32 -1.442695, %v1866_v45 }
 0x387   :  { %4333 = vpow2.f32 %v4256_v11 }
 0x392   :  { %v4332_v24 = vpop.eup %4331 }
 0x393   :  { %v1849_v23 = vadd.f32 1.0, %v4332_v24 }
 0x394   :  { %v4334_v47 = vpop.eup %4333 }
 0x395   :  { %4335 = vrcp.f32 %v1849_v23  ;;  %v1856_v49 = vadd.f32 1.0, %v4334_v47  ;;  %v10982_v47 = vld [vmem:[#allocation117_spill] sm:$0xff] }
 0x396   :  { %4337 = vpow2.f32 %v4257_v61  ;;  %v422_v61 = vadd.f32 %v10982_v47, %v5019_v28 }
 0x397   :  { %4339 = vrcp.f32 %v1856_v49 }
 0x3a2   :  { %v4336_v51 = vpop.eup %4335 }
 0x3a3   :  { %v1859_v25 = vmul.f32 %v4336_v51, %v1762_v53  ;;  %v4338_v11 = vpop.eup %4337 }
 0x3a4   :  { %v4340_v20 = vpop.eup %4339  ;;  %v1870_v23 = vadd.f32 1.0, %v4338_v11 }
 0x3a5   :  { %v1860_v24 = vadd.f32 %v1859_v25, %v291_v15  ;;  %v1862_v14 = vsub.f32 1.0, %v4340_v20  ;;  %v1864_v45 = vmul.f32 %v4340_v20, %v6712_v31  ;;  %v10983_v31 = vld [vmem:[#allocation118_spill] sm:$0xff] }
 0x3a6   :  { %v424_v15 = vadd.f32 %v10983_v31, %v5024_v29  ;;  %v7631_v31 = vld [vmem:[%s10271_s3 + $0x268] sm:$0xff] }
 0x3a7   :  { %4341 = vtanh.f32 %v1860_v24 }
 0x3a8   :  { %4343 = vrcp.f32 %v1870_v23 }
 0x3b4   :  { %v4342_v35 = vpop.eup %4341 }
 0x3b5   :  { %v1863_v57 = vmul.f32 %v4342_v35, %v1862_v14  ;;  %v4344_v14 = vpop.eup %4343 }
 0x3b7   :  { %v7579_v4 = vadd.f32 %v1864_v45, %v1863_v57 }
 0x3b9   :  { %4259 = vst [vmem:[%s10274_s5 + $0x10] sm:$0xff] %v7579_v4 }
 0x3be   :  { %v1832_v27 = vpop.f32.mrf.mxu1 }
 0x3bf   :  { %v1833_v49 = vadd.f32 %v1832_v27, %v6138_v26 }
 0x3c0   :  { %v1834_v53 = vpop.f32.mrf.mxu1 }
 0x3c1   :  { %v1873_v51 = vadd.f32 %v1833_v49, %v422_v61  ;;  %v1835_v50 = vadd.f32 %v1834_v53, %v6145_v33  ;;  %v7597_v49 = vld [vmem:[%s10271_s3 + $0x2f0] sm:$0xff]  ;;  %v7604_v53 = vld [vmem:[%s10271_s3 + $0x2c8] sm:$0xff] }
 0x3c3   :  { %v4258_v25 = vmul.f32 -1.442695, %v1873_v51  ;;  %v1880_v24 = vmul.f32 %v4344_v14, %v1835_v50  ;;  %v7611_v51 = vld [vmem:[%s10271_s3 + $0x2c0] sm:$0xff]  ;;  %v7618_v50 = vld [vmem:[%s10271_s3 + $0x298] sm:$0xff]  ;;  %v7624_v14 = vld [vmem:[%s10271_s3 + $0x290] sm:$0xff] }
 0x3c5   :  { %4345 = vpow2.f32 %v4258_v25  ;;  %v1881_v11 = vadd.f32 %v1880_v24, %v424_v15  ;;  %v7638_v15 = vld [vmem:[%s10271_s3 + $0x260] sm:$0xff]  ;;  %v10990_v25 = vld [vmem:[#allocation65_spill] sm:$0xff]  ;;  %v10992_v24 = vld [vmem:[#allocation71_spill] sm:$0xff] }
 0x3d2   :  { %v4346_v20 = vpop.eup %4345 }
 0x3d3   :  { %v1877_v23 = vadd.f32 1.0, %v4346_v20  ;;  %v7897_v20 = vld [vmem:[%s10271_s3 + $0x4d8] sm:$0xff] }
 0x3d4   :  { %10995 = vst [vmem:[#allocation71_spill] sm:$0xff] %v7897_v20 }
 0x3d5   :  { %4347 = vrcp.f32 %v1877_v23  ;;  %v10996_v23 = vld [vmem:[#allocation81_spill] sm:$0xff] }
 0x3d6   :  { %4349 = vtanh.f32 %v1881_v11  ;;  %v10994_v11 = vld [vmem:[#allocation76_spill] sm:$0xff] }
 0x3e2   :  { %v4348_v35 = vpop.eup %4347 }
 0x3e3   :  { %v1883_v57 = vsub.f32 1.0, %v4348_v35  ;;  %v4350_v45 = vpop.eup %4349  ;;  %v1885_v47 = vmul.f32 %v4348_v35, %v6725_v46  ;;  %v7904_v35 = vld [vmem:[%s10271_s3 + $0x4d0] sm:$0xff]  ;;  %v11010_v46 = vld [vmem:[#allocation119_spill] sm:$0xff] }
 0x3e4   :  { %10997 = vst [vmem:[#allocation76_spill] sm:$0xff] %v7904_v35 }
 0x3e5   :  { %v1884_v27 = vmul.f32 %v4350_v45, %v1883_v57  ;;  %v10998_v57 = vld [vmem:[#allocation86_spill] sm:$0xff]  ;;  %v7911_v45 = vld [vmem:[%s10271_s3 + $0x4a8] sm:$0xff] }
 0x3e6   :  { %10999 = vst [vmem:[#allocation81_spill] sm:$0xff] %v7911_v45 }
 0x3e7   :  { %v7592_v61 = vadd.f32 %v1885_v47, %v1884_v27  ;;  %v11000_v27 = vld [vmem:[#allocation92_spill] sm:$0xff] }
 0x3e8   :  { %v7918_v47 = vld [vmem:[%s10271_s3 + $0x4a0] sm:$0xff] }
 0x3e9   :  { %10984 = vst [vmem:[#allocation11_spill] sm:$0xff] %v7592_v61  ;;  %2146 = vmatprep.mubr.f32.mxu0 %v7592_v61  ;;  %2217 = vmatprep.mubr.f32.mxu1 %v7592_v61  ;;  %11001 = vst [vmem:[#allocation86_spill] sm:$0xff] %v7918_v47 }
 0x3ea   :  { %2147 = vmatmul.mubr.f32.vlgmr.msra.gmra.mxu0 %v7579_v4  ;;  %2218 = vmatmul.mubr.f32.vlgmr.msra.gmra.mxu1 %v7579_v4 }
 0x3eb   :  { %2225 = vmatpush1.msra.mxu0 %v7597_v49  ;;  %2288 = vmatprep.mubr.f32.mxu0 %v7592_v61 }
 0x3ec   :  { %2226 = vmatprep.subr.mxu0 %v7604_v53  ;;  %2541 = vmatpush1.msra.mxu1 %v6804_v16  ;;  %v7645_v16 = vld [vmem:[%s10271_s3 + $0x238] sm:$0xff] }
 0x3ed   :  { %2227 = vmatpush1.msra.mxu0 %v7611_v51  ;;  %2542 = vmatprep.subr.mxu1 %v6813_v32  ;;  %v7652_v32 = vld [vmem:[%s10271_s3 + $0x230] sm:$0xff] }
 0x3ee   :  { %2228 = vmatprep.subr.mxu0 %v7618_v50  ;;  %2543 = vmatpush1.msra.mxu1 %v6823_v40  ;;  %v7659_v40 = vld [vmem:[%s10271_s3 + $0x208] sm:$0xff] }
 0x3ef   :  { %2229 = vmatpush1.msra.mxu0 %v7624_v14  ;;  %2544 = vmatprep.subr.mxu1 %v6835_v54  ;;  %v7666_v54 = vld [vmem:[%s10271_s3 + $0x200] sm:$0xff] }
 0x3f0   :  { %2230 = vmatprep.subr.mxu0 %v7631_v31  ;;  %2545 = vmatpush1.msra.mxu1 %v6847_v5  ;;  %v7673_v5 = vld [vmem:[%s10271_s3 + $0x1d8] sm:$0xff] }
 0x3f1   :  { %2231 = vmatpush1.msra.mxu0 %v7638_v15  ;;  %2546 = vmatprep.subr.mxu1 %v6859_v9  ;;  %v7680_v9 = vld [vmem:[%s10271_s3 + $0x1d0] sm:$0xff] }
 0x3f2   :  { %2232 = vmatprep.subr.mxu0 %v7645_v16  ;;  %2547 = vmatpush1.msra.mxu1 %v6876_v36  ;;  %v7687_v36 = vld [vmem:[%s10271_s3 + $0x1a8] sm:$0xff] }
 0x3f3   :  { %2233 = vmatpush1.msra.mxu0 %v7652_v32  ;;  %2548 = vmatprep.subr.mxu1 %v6888_v21  ;;  %v7694_v21 = vld [vmem:[%s10271_s3 + $0x1a0] sm:$0xff] }
 0x3f4   :  { %2234 = vmatprep.subr.mxu0 %v7659_v40  ;;  %2549 = vmatpush1.msra.mxu1 %v6900_v62  ;;  %v7701_v62 = vld [vmem:[%s10271_s3 + $0x178] sm:$0xff] }
 0x3f5   :  { %2235 = vmatpush1.msra.mxu0 %v7666_v54  ;;  %2550 = vmatprep.subr.mxu1 %v6912_v10  ;;  %v7708_v10 = vld [vmem:[%s10271_s3 + $0x170] sm:$0xff] }
 0x3f6   :  { %2236 = vmatprep.subr.mxu0 %v7673_v5  ;;  %2551 = vmatpush1.msra.mxu1 %v6924_v18  ;;  %v7715_v18 = vld [vmem:[%s10271_s3 + $0x148] sm:$0xff] }
 0x3f7   :  { %2237 = vmatpush1.msra.mxu0 %v7680_v9  ;;  %2552 = vmatprep.subr.mxu1 %v6936_v13  ;;  %v7722_v13 = vld [vmem:[%s10271_s3 + $0x140] sm:$0xff] }
 0x3f8   :  { %2238 = vmatprep.subr.mxu0 %v7687_v36  ;;  %2553 = vmatpush1.msra.mxu1 %v6948_v63  ;;  %v7729_v63 = vld [vmem:[%s10271_s3 + $0x118] sm:$0xff] }
 0x3f9   :  { %2239 = vmatpush1.msra.mxu0 %v7694_v21  ;;  %2554 = vmatprep.subr.mxu1 %v6960_v59  ;;  %v7736_v59 = vld [vmem:[%s10271_s3 + $0x110] sm:$0xff] }
 0x3fa   :  { %2240 = vmatprep.subr.mxu0 %v7701_v62  ;;  %2555 = vmatpush1.msra.mxu1 %v6972_v44  ;;  %v7743_v44 = vld [vmem:[%s10271_s3 + $0xe8] sm:$0xff] }
 0x3fb   :  { %2241 = vmatpush1.msra.mxu0 %v7708_v10  ;;  %2556 = vmatprep.subr.mxu1 %v6984_v38  ;;  %v7750_v38 = vld [vmem:[%s10271_s3 + $0xe0] sm:$0xff] }
 0x3fc   :  { %2242 = vmatprep.subr.mxu0 %v7715_v18  ;;  %2557 = vmatpush1.msra.mxu1 %v6996_v48  ;;  %v7757_v48 = vld [vmem:[%s10271_s3 + $0xb8] sm:$0xff] }
 0x3fd   :  { %2243 = vmatpush1.msra.mxu0 %v7722_v13  ;;  %2558 = vmatprep.subr.mxu1 %v7008_v0  ;;  %v7764_v0 = vld [vmem:[%s10271_s3 + $0xb0] sm:$0xff] }
 0x3fe   :  { %2244 = vmatprep.subr.mxu0 %v7729_v63  ;;  %2559 = vmatpush1.msra.mxu1 %v7020_v7  ;;  %v7771_v7 = vld [vmem:[%s10271_s3 + $0x88] sm:$0xff] }
 0x3ff   :  { %2245 = vmatpush1.msra.mxu0 %v7736_v59  ;;  %2560 = vmatprep.subr.mxu1 %v7032_v19  ;;  %v7778_v19 = vld [vmem:[%s10271_s3 + $0x80] sm:$0xff] }
 0x400   :  { %2246 = vmatprep.subr.mxu0 %v7743_v44  ;;  %2561 = vmatpush1.msra.mxu1 %v7042_v30  ;;  %v7785_v30 = vld [vmem:[%s10271_s3 + $0x58] sm:$0xff] }
 0x401   :  { %2247 = vmatpush1.msra.mxu0 %v7750_v38  ;;  %2562 = vmatprep.subr.mxu1 %v7054_v37  ;;  %v7792_v37 = vld [vmem:[%s10271_s3 + $0x50] sm:$0xff] }
 0x402   :  { %2248 = vmatprep.subr.mxu0 %v7757_v48  ;;  %2563 = vmatpush1.msra.mxu1 %v7066_v41  ;;  %v7799_v41 = vld [vmem:[%s10271_s3 + $0x28] sm:$0xff] }
 0x403   :  { %2249 = vmatpush1.msra.mxu0 %v7764_v0  ;;  %2564 = vmatprep.subr.mxu1 %v7078_v3  ;;  %v7806_v3 = vld [vmem:[%s10271_s3 + $0x20] sm:$0xff] }
 0x404   :  { %2250 = vmatprep.subr.mxu0 %v7771_v7  ;;  %2565 = vmatpush1.msra.mxu1 %v7090_v55  ;;  %v7813_v55 = vld [vmem:[%s10271_s3 + $0x5f8] sm:$0xff] }
 0x405   :  { %2251 = vmatpush1.msra.mxu0 %v7778_v19  ;;  %2566 = vmatprep.subr.mxu1 %v7102_v6  ;;  %v7820_v6 = vld [vmem:[%s10271_s3 + $0x5f0] sm:$0xff] }
 0x406   :  { %2252 = vmatprep.subr.mxu0 %v7785_v30  ;;  %2567 = vmatpush1.msra.mxu1 %v7114_v8  ;;  %v7827_v8 = vld [vmem:[%s10271_s3 + $0x5c8] sm:$0xff] }
 0x407   :  { %2253 = vmatpush1.msra.mxu0 %v7792_v37  ;;  %2568 = vmatprep.subr.mxu1 %v7126_v22  ;;  %v7834_v22 = vld [vmem:[%s10271_s3 + $0x5c0] sm:$0xff] }
 0x408   :  { %2254 = vmatprep.subr.mxu0 %v7799_v41  ;;  %2569 = vmatpush1.msra.mxu1 %v7138_v58  ;;  %v7841_v58 = vld [vmem:[%s10271_s3 + $0x598] sm:$0xff] }
 0x409   :  { %2255 = vmatpush1.msra.mxu0 %v7806_v3  ;;  %2570 = vmatprep.subr.mxu1 %v7150_v52  ;;  %v7848_v52 = vld [vmem:[%s10271_s3 + $0x590] sm:$0xff] }
 0x40a   :  { %2256 = vmatprep.subr.mxu0 %v7813_v55  ;;  %2571 = vmatpush1.msra.mxu1 %v7162_v43  ;;  %10985 = vst [vmem:[#allocation116_spill] sm:$0xff] %v7848_v52  ;;  %v7855_v43 = vld [vmem:[%s10271_s3 + $0x568] sm:$0xff] }
 0x40b   :  { %2257 = vmatpush2.msra.mxu0 %v7820_v6  ;;  %2572 = vmatprep.subr.mxu1 %v7174_v39  ;;  %10986 = vst [vmem:[#allocation13_spill] sm:$0xff] %v7855_v43  ;;  %v7862_v39 = vld [vmem:[%s10271_s3 + $0x560] sm:$0xff] }
 0x40c   :  { %2258 = vmatprep.subr.mxu0 %v7827_v8  ;;  %2573 = vmatpush2.msra.mxu1 %v7186_v34  ;;  %10987 = vst [vmem:[#allocation106_spill] sm:$0xff] %v7862_v39  ;;  %v7869_v34 = vld [vmem:[%s10271_s3 + $0x538] sm:$0xff] }
 0x40d   :  { %2259 = vmatpush2.msra.mxu0 %v7834_v22  ;;  %2574 = vmatprep.subr.mxu1 %v7198_v12  ;;  %10988 = vst [vmem:[#allocation66_spill] sm:$0xff] %v7869_v34  ;;  %v7876_v12 = vld [vmem:[%s10271_s3 + $0x530] sm:$0xff] }
 0x40e   :  { %2260 = vmatprep.subr.mxu0 %v7841_v58  ;;  %2575 = vmatpush2.msra.mxu1 %v7210_v1  ;;  %10989 = vst [vmem:[#allocation117_spill] sm:$0xff] %v7876_v12  ;;  %v7883_v1 = vld [vmem:[%s10271_s3 + $0x508] sm:$0xff] }
 0x40f   :  { %2261 = vmatpush2.msra.mxu0 %v7848_v52  ;;  %2576 = vmatprep.subr.mxu1 %v7222_v60  ;;  %10991 = vst [vmem:[#allocation118_spill] sm:$0xff] %v7883_v1  ;;  %v7890_v60 = vld [vmem:[%s10271_s3 + $0x500] sm:$0xff] }
 0x410   :  { %2262 = vmatprep.subr.mxu0 %v7855_v43  ;;  %2577 = vmatpush2.msra.mxu1 %v10990_v25  ;;  %10993 = vst [vmem:[#allocation65_spill] sm:$0xff] %v7890_v60  ;;  %v11002_v25 = vld [vmem:[#allocation96_spill] sm:$0xff] }
 0x411   :  { %2263 = vmatpush2.msra.mxu0 %v7862_v39  ;;  %2578 = vmatprep.subr.mxu1 %v10992_v24  ;;  %v7925_v24 = vld [vmem:[%s10271_s3 + $0x478] sm:$0xff] }
 0x412   :  { %2264 = vmatprep.subr.mxu0 %v7869_v34  ;;  %2579 = vmatpush2.msra.mxu1 %v10994_v11  ;;  %11003 = vst [vmem:[#allocation92_spill] sm:$0xff] %v7925_v24  ;;  %v11004_v11 = vld [vmem:[#allocation102_spill] sm:$0xff] }
 0x413   :  { %2265 = vmatpush2.msra.mxu0 %v7876_v12  ;;  %2580 = vmatprep.subr.mxu1 %v10996_v23  ;;  %v7932_v23 = vld [vmem:[%s10271_s3 + $0x470] sm:$0xff] }
 0x414   :  { %2266 = vmatprep.subr.mxu0 %v7883_v1  ;;  %2581 = vmatpush2.msra.mxu1 %v10998_v57  ;;  %11005 = vst [vmem:[#allocation96_spill] sm:$0xff] %v7932_v23  ;;  %v11006_v57 = vld [vmem:[#allocation9_spill] sm:$0xff]  ;;  %v11104_v1 = vld [vmem:[#allocation15_spill] sm:$0xff] }
 0x415   :  { %2267 = vmatpush2.msra.mxu0 %v7890_v60  ;;  %2582 = vmatprep.subr.mxu1 %v11000_v27  ;;  %v7939_v27 = vld [vmem:[%s10271_s3 + $0x448] sm:$0xff] }
 0x416   :  { %2268 = vmatprep.subr.mxu0 %v7897_v20  ;;  %2583 = vmatpush2.msra.mxu1 %v11002_v25  ;;  %11007 = vst [vmem:[#allocation102_spill] sm:$0xff] %v7939_v27  ;;  %v11008_v25 = vld [vmem:[#allocation121_spill] sm:$0xff]  ;;  %v11047_v20 = vld [vmem:[#allocation20_spill] sm:$0xff] }
 0x417   :  { %2269 = vmatpush2.msra.mxu0 %v7904_v35  ;;  %2584 = vmatprep.subr.mxu1 %v11004_v11  ;;  %v7946_v11 = vld [vmem:[%s10271_s3 + $0x440] sm:$0xff]  ;;  %v11046_v35 = vld [vmem:[#allocation19_spill] sm:$0xff] }
 0x418   :  { %2270 = vmatprep.subr.mxu0 %v7911_v45  ;;  %2585 = vmatpush2.msra.mxu1 %v11006_v57  ;;  %11009 = vst [vmem:[#allocation9_spill] sm:$0xff] %v7946_v11  ;;  %v7953_v57 = vld [vmem:[%s10271_s3 + $0x418] sm:$0xff]  ;;  %v11045_v45 = vld [vmem:[#allocation18_spill] sm:$0xff] }
 0x419   :  { %2271 = vmatpush2.msra.mxu0 %v7918_v47  ;;  %2586 = vmatprep.subr.mxu1 %v11008_v25  ;;  %11011 = vst [vmem:[#allocation121_spill] sm:$0xff] %v7953_v57  ;;  %v11012_v47 = vld [vmem:[#allocation124_spill] sm:$0xff]  ;;  %v7960_v25 = vld [vmem:[%s10271_s3 + $0x410] sm:$0xff] }
 0x41a   :  { %2272 = vmatprep.subr.mxu0 %v7925_v24  ;;  %2587 = vmatpush2.msra.mxu1 %v11010_v46  ;;  %11013 = vst [vmem:[#allocation119_spill] sm:$0xff] %v7960_v25  ;;  %v11014_v24 = vld [vmem:[#allocation126_spill] sm:$0xff]  ;;  %v7967_v46 = vld [vmem:[%s10271_s3 + $0x3e8] sm:$0xff] }
 0x41b   :  { %2273 = vmatpush2.msra.mxu0 %v7932_v23  ;;  %2588 = vmatprep.subr.mxu1 %v11012_v47  ;;  %11015 = vst [vmem:[#allocation124_spill] sm:$0xff] %v7967_v46  ;;  %v11016_v23 = vld [vmem:[#allocation35_spill] sm:$0xff]  ;;  %v7974_v47 = vld [vmem:[%s10271_s3 + $0x3e0] sm:$0xff] }
 0x41c   :  { %2274 = vmatprep.subr.mxu0 %v7939_v27  ;;  %2589 = vmatpush2.msra.mxu1 %v11014_v24  ;;  %11017 = vst [vmem:[#allocation126_spill] sm:$0xff] %v7974_v47  ;;  %v11018_v27 = vld [vmem:[#allocation39_spill] sm:$0xff] }
 0x41d   :  { %2275 = vmatpush2.msra.mxu0 %v7946_v11  ;;  %2590 = vmatprep.subr.mxu1 %v11016_v23  ;;  %v7981_v24 = vld [vmem:[%s10271_s3 + $0x3b8] sm:$0xff]  ;;  %v11020_v11 = vld [vmem:[#allocation44_spill] sm:$0xff]  ;;  %v7988_v23 = vld [vmem:[%s10271_s3 + $0x3b0] sm:$0xff] }
 0x41e   :  { %2276 = vmatprep.subr.mxu0 %v7953_v57  ;;  %2591 = vmatpush2.msra.mxu1 %v11018_v27  ;;  %11019 = vst [vmem:[#allocation35_spill] sm:$0xff] %v7981_v24  ;;  %11021 = vst [vmem:[#allocation39_spill] sm:$0xff] %v7988_v23  ;;  %v11022_v57 = vld [vmem:[#allocation49_spill] sm:$0xff] }
 0x41f   :  { %2277 = vmatpush2.msra.mxu0 %v7960_v25  ;;  %2592 = vmatprep.subr.mxu1 %v11020_v11  ;;  %v7995_v27 = vld [vmem:[%s10271_s3 + $0x388] sm:$0xff]  ;;  %v11024_v25 = vld [vmem:[#allocation54_spill] sm:$0xff]  ;;  %v8002_v11 = vld [vmem:[%s10271_s3 + $0x380] sm:$0xff] }
 0x420   :  { %2278 = vmatprep.subr.mxu0 %v7967_v46  ;;  %2593 = vmatpush2.msra.mxu1 %v11022_v57  ;;  %11023 = vst [vmem:[#allocation44_spill] sm:$0xff] %v7995_v27  ;;  %11025 = vst [vmem:[#allocation49_spill] sm:$0xff] %v8002_v11  ;;  %v11026_v46 = vld [vmem:[#allocation58_spill] sm:$0xff]  ;;  %v8009_v57 = vld [vmem:[%s10271_s3 + $0x358] sm:$0xff] }
 0x421   :  { %2279 = vmatpush2.msra.mxu0 %v7974_v47  ;;  %2594 = vmatprep.subr.mxu1 %v11024_v25  ;;  %11027 = vst [vmem:[#allocation54_spill] sm:$0xff] %v8009_v57  ;;  %v11028_v47 = vld [vmem:[#allocation62_spill] sm:$0xff] }
 0x422   :  { %2280 = vmatprep.subr.mxu0 %v7981_v24  ;;  %2595 = vmatpush2.msra.mxu1 %v11026_v46  ;;  %v8016_v25 = vld [vmem:[%s10271_s3 + $0x350] sm:$0xff]  ;;  %v11030_v24 = vld [vmem:[#allocation67_spill] sm:$0xff]  ;;  %v8023_v46 = vld [vmem:[%s10271_s3 + $0x328] sm:$0xff] }
 0x423   :  { %2281 = vmatpush2.msra.mxu0 %v7988_v23  ;;  %2596 = vmatprep.subr.mxu1 %v11028_v47  ;;  %11029 = vst [vmem:[#allocation58_spill] sm:$0xff] %v8016_v25  ;;  %11031 = vst [vmem:[#allocation62_spill] sm:$0xff] %v8023_v46  ;;  %v11032_v23 = vld [vmem:[#allocation73_spill] sm:$0xff]  ;;  %v8030_v47 = vld [vmem:[%s10271_s3 + $0x320] sm:$0xff] }
 0x424   :  { %2282 = vmatprep.subr.mxu0 %v7995_v27  ;;  %2597 = vmatpush2.msra.mxu1 %v11030_v24  ;;  %11033 = vst [vmem:[#allocation67_spill] sm:$0xff] %v8030_v47  ;;  %v11034_v27 = vld [vmem:[#allocation77_spill] sm:$0xff]  ;;  %v11035_v24 = vld [vmem:[#allocation83_spill] sm:$0xff] }
 0x425   :  { %2283 = vmatpush2.msra.mxu0 %v8002_v11  ;;  %2598 = vmatprep.subr.mxu1 %v11032_v23  ;;  %v11036_v11 = vld [vmem:[#allocation128_spill] sm:$0xff]  ;;  %v11037_v23 = vld [vmem:[#allocation130_spill] sm:$0xff] }
 0x426   :  { %2284 = vmatprep.subr.mxu0 %v8009_v57  ;;  %2599 = vmatpush2.msra.mxu1 %v11034_v27  ;;  %v4471_v57 = vld [vmem:[%s10271_s3 + $0x2e8] sm:$0xff]  ;;  %v11038_v27 = vld [vmem:[#allocation91_spill] sm:$0xff] }
 0x427   :  { %2285 = vmatpush2.msra.mxu0 %v8016_v25  ;;  %2600 = vmatprep.subr.mxu1 %v11035_v24  ;;  %v11039_v25 = vld [vmem:[#allocation132_spill] sm:$0xff]  ;;  %v11040_v24 = vld [vmem:[#allocation93_spill] sm:$0xff] }
 0x428   :  { %2286 = vmatprep.subr.mxu0 %v8023_v46  ;;  %2601 = vmatpush2.msra.mxu1 %v11036_v11  ;;  %v11041_v46 = vld [vmem:[#allocation135_spill] sm:$0xff] }
 0x429   :  { %2287 = vmatpush2.msra.mxu0 %v8030_v47  ;;  %2602 = vmatprep.subr.mxu1 %v11037_v23  ;;  %v11042_v11 = vld [vmem:[#allocation95_spill] sm:$0xff]  ;;  %v11043_v47 = vld [vmem:[#allocation98_spill] sm:$0xff] }
 0x42a   :  { %2289 = vmatmul.mubr.f32.vlgmr.msra.gmra.mxu0 %v7579_v4  ;;  %2611 = vmatprep.subr.mxu0 %v4471_v57  ;;  %v11044_v23 = vld [vmem:[#allocation103_spill] sm:$0xff]  ;;  %v11048_v57 = vld [vmem:[#allocation21_spill] sm:$0xff] }
 0x42b   :  { %2612 = vmatpush1.msra.mxu0 %v11038_v27  ;;  %2603 = vmatpush2.msra.mxu1 %v11039_v25  ;;  %v11049_v27 = vld [vmem:[#allocation22_spill] sm:$0xff]  ;;  %v11050_v25 = vld [vmem:[#allocation23_spill] sm:$0xff] }
 0x42c   :  { %2613 = vmatprep.subr.mxu0 %v11040_v24  ;;  %2682 = vmatprep.subr.mxu1 %v11041_v46  ;;  %v11051_v24 = vld [vmem:[#allocation24_spill] sm:$0xff]  ;;  %v11052_v46 = vld [vmem:[#allocation25_spill] sm:$0xff] }
 0x42d   :  { %2614 = vmatpush1.msra.mxu0 %v11042_v11  ;;  %v11053_v11 = vld [vmem:[#allocation26_spill] sm:$0xff] }
 0x42e   :  { %2615 = vmatprep.subr.mxu0 %v11043_v47  ;;  %v11054_v47 = vld [vmem:[#allocation27_spill] sm:$0xff] }
 0x42f   :  { %2616 = vmatpush1.msra.mxu0 %v11044_v23  ;;  %v11055_v23 = vld [vmem:[#allocation28_spill] sm:$0xff] }
 0x430   :  { %2617 = vmatprep.subr.mxu0 %v11045_v45  ;;  %v11056_v45 = vld [vmem:[#allocation29_spill] sm:$0xff] }
 0x431   :  { %2618 = vmatpush1.msra.mxu0 %v11046_v35  ;;  %v11057_v35 = vld [vmem:[#allocation30_spill] sm:$0xff] }
 0x432   :  { %2619 = vmatprep.subr.mxu0 %v11047_v20  ;;  %v11058_v20 = vld [vmem:[#allocation31_spill] sm:$0xff] }
 0x433   :  { %2620 = vmatpush1.msra.mxu0 %v11048_v57  ;;  %v11059_v57 = vld [vmem:[#allocation32_spill] sm:$0xff] }
 0x434   :  { %2621 = vmatprep.subr.mxu0 %v11049_v27  ;;  %v11060_v27 = vld [vmem:[#allocation33_spill] sm:$0xff] }
 0x435   :  { %2622 = vmatpush1.msra.mxu0 %v11050_v25  ;;  %v11061_v25 = vld [vmem:[#allocation34_spill] sm:$0xff] }
 0x436   :  { %2623 = vmatprep.subr.mxu0 %v11051_v24  ;;  %v11062_v24 = vld [vmem:[#allocation36_spill] sm:$0xff] }
 0x437   :  { %2624 = vmatpush1.msra.mxu0 %v11052_v46  ;;  %v11063_v46 = vld [vmem:[#allocation38_spill] sm:$0xff] }
 0x438   :  { %2625 = vmatprep.subr.mxu0 %v11053_v11  ;;  %v11064_v11 = vld [vmem:[#allocation40_spill] sm:$0xff] }
 0x439   :  { %2626 = vmatpush1.msra.mxu0 %v11054_v47  ;;  %v11065_v47 = vld [vmem:[#allocation42_spill] sm:$0xff] }
 0x43a   :  { %2627 = vmatprep.subr.mxu0 %v11055_v23  ;;  %v11066_v23 = vld [vmem:[#allocation45_spill] sm:$0xff] }
 0x43b   :  { %2628 = vmatpush1.msra.mxu0 %v11056_v45  ;;  %v11067_v45 = vld [vmem:[#allocation47_spill] sm:$0xff] }
 0x43c   :  { %2629 = vmatprep.subr.mxu0 %v11057_v35  ;;  %v11068_v35 = vld [vmem:[#allocation50_spill] sm:$0xff] }
 0x43d   :  { %2630 = vmatpush1.msra.mxu0 %v11058_v20  ;;  %v11069_v20 = vld [vmem:[#allocation52_spill] sm:$0xff] }
 0x43e   :  { %2631 = vmatprep.subr.mxu0 %v11059_v57  ;;  %v11070_v57 = vld [vmem:[#allocation55_spill] sm:$0xff] }
 0x43f   :  { %2632 = vmatpush1.msra.mxu0 %v11060_v27  ;;  %v11071_v27 = vld [vmem:[#allocation57_spill] sm:$0xff] }
 0x440   :  { %2633 = vmatprep.subr.mxu0 %v11061_v25  ;;  %v11072_v25 = vld [vmem:[#allocation59_spill] sm:$0xff] }
 0x441   :  { %2634 = vmatpush1.msra.mxu0 %v11062_v24  ;;  %v11073_v24 = vld [vmem:[#allocation61_spill] sm:$0xff] }
 0x442   :  { %2635 = vmatprep.subr.mxu0 %v11063_v46  ;;  %v11074_v46 = vld [vmem:[#allocation63_spill] sm:$0xff] }
 0x443   :  { %2636 = vmatpush1.msra.mxu0 %v11064_v11  ;;  %v11075_v11 = vld [vmem:[#allocation68_spill] sm:$0xff] }
 0x444   :  { %2637 = vmatprep.subr.mxu0 %v11065_v47  ;;  %v11076_v47 = vld [vmem:[#allocation74_spill] sm:$0xff] }
 0x445   :  { %2638 = vmatpush1.msra.mxu0 %v11066_v23  ;;  %v11077_v23 = vld [vmem:[#allocation78_spill] sm:$0xff] }
 0x446   :  { %2639 = vmatprep.subr.mxu0 %v11067_v45  ;;  %v11078_v45 = vld [vmem:[#allocation84_spill] sm:$0xff] }
 0x447   :  { %2640 = vmatpush1.msra.mxu0 %v11068_v35  ;;  %v11079_v35 = vld [vmem:[#allocation89_spill] sm:$0xff] }
 0x448   :  { %2641 = vmatprep.subr.mxu0 %v11069_v20  ;;  %v11080_v20 = vld [vmem:[#allocation94_spill] sm:$0xff] }
 0x449   :  { %2642 = vmatpush1.msra.mxu0 %v11070_v57  ;;  %v11081_v57 = vld [vmem:[#allocation99_spill] sm:$0xff] }
 0x44a   :  { %2643 = vmatprep.subr.mxu0 %v11071_v27  ;;  %v11082_v27 = vld [vmem:[#allocation7_spill] sm:$0xff] }
 0x44b   :  { %2644 = vmatpush2.msra.mxu0 %v11072_v25  ;;  %v11083_v25 = vld [vmem:[#allocation110_spill] sm:$0xff] }
 0x44c   :  { %2645 = vmatprep.subr.mxu0 %v11073_v24  ;;  %v11084_v24 = vld [vmem:[#allocation48_spill] sm:$0xff] }
 0x44d   :  { %2646 = vmatpush2.msra.mxu0 %v11074_v46  ;;  %v11085_v46 = vld [vmem:[#allocation120_spill] sm:$0xff] }
 0x44e   :  { %2647 = vmatprep.subr.mxu0 %v11075_v11  ;;  %v11086_v11 = vld [vmem:[#allocation125_spill] sm:$0xff] }
 0x44f   :  { %2648 = vmatpush2.msra.mxu0 %v11076_v47  ;;  %v11087_v47 = vld [vmem:[#allocation127_spill] sm:$0xff] }
 0x450   :  { %2649 = vmatprep.subr.mxu0 %v11077_v23  ;;  %v11088_v23 = vld [vmem:[#allocation37_spill] sm:$0xff] }
 0x451   :  { %2650 = vmatpush2.msra.mxu0 %v11078_v45  ;;  %v11089_v45 = vld [vmem:[#allocation41_spill] sm:$0xff] }
 0x452   :  { %2651 = vmatprep.subr.mxu0 %v11079_v35  ;;  %v11090_v35 = vld [vmem:[#allocation46_spill] sm:$0xff] }
 0x453   :  { %2652 = vmatpush2.msra.mxu0 %v11080_v20  ;;  %v11091_v20 = vld [vmem:[#allocation51_spill] sm:$0xff] }
 0x454   :  { %2653 = vmatprep.subr.mxu0 %v11081_v57  ;;  %v11092_v57 = vld [vmem:[#allocation56_spill] sm:$0xff] }
 0x455   :  { %2654 = vmatpush2.msra.mxu0 %v11082_v27  ;;  %v11093_v27 = vld [vmem:[#allocation60_spill] sm:$0xff] }
 0x456   :  { %2655 = vmatprep.subr.mxu0 %v11083_v25  ;;  %v11094_v25 = vld [vmem:[#allocation64_spill] sm:$0xff] }
 0x457   :  { %2656 = vmatpush2.msra.mxu0 %v11084_v24  ;;  %v11095_v24 = vld [vmem:[#allocation70_spill] sm:$0xff] }
 0x458   :  { %2657 = vmatprep.subr.mxu0 %v11085_v46  ;;  %v11096_v46 = vld [vmem:[#allocation75_spill] sm:$0xff] }
 0x459   :  { %2658 = vmatpush2.msra.mxu0 %v11086_v11  ;;  %v11097_v11 = vld [vmem:[#allocation80_spill] sm:$0xff] }
 0x45a   :  { %2659 = vmatprep.subr.mxu0 %v11087_v47  ;;  %v11098_v47 = vld [vmem:[#allocation85_spill] sm:$0xff] }
 0x45b   :  { %2660 = vmatpush2.msra.mxu0 %v11088_v23  ;;  %v11099_v23 = vld [vmem:[#allocation129_spill] sm:$0xff] }
 0x45c   :  { %2661 = vmatprep.subr.mxu0 %v11089_v45  ;;  %v11100_v45 = vld [vmem:[#allocation131_spill] sm:$0xff] }
 0x45d   :  { %2662 = vmatpush2.msra.mxu0 %v11090_v35  ;;  %v11101_v35 = vld [vmem:[#allocation133_spill] sm:$0xff] }
 0x45e   :  { %2663 = vmatprep.subr.mxu0 %v11091_v20  ;;  %v11102_v20 = vld [vmem:[#allocation134_spill] sm:$0xff] }
 0x45f   :  { %2664 = vmatpush2.msra.mxu0 %v11092_v57 }
 0x460   :  { %2665 = vmatprep.subr.mxu0 %v11093_v27  ;;  %v11103_v27 = vld [vmem:[#allocation114_spill] sm:$0xff] }
 0x461   :  { %2666 = vmatpush2.msra.mxu0 %v11094_v25 }
 0x462   :  { %2667 = vmatprep.subr.mxu0 %v11095_v24 }
 0x463   :  { %2668 = vmatpush2.msra.mxu0 %v11096_v46 }
 0x464   :  { %2669 = vmatprep.subr.mxu0 %v11097_v11  ;;  %v11105_v11 = vld [vmem:[#allocation17_spill] sm:$0xff] }
 0x465   :  { %2670 = vmatpush2.msra.mxu0 %v11098_v47 }
 0x466   :  { %2671 = vmatprep.subr.mxu0 %v11099_v23 }
 0x467   :  { %2672 = vmatpush2.msra.mxu0 %v11100_v45 }
 0x468   :  { %2673 = vmatprep.subr.mxu0 %v11101_v35 }
 0x469   :  { %2674 = vmatpush2.msra.mxu0 %v11102_v20  ;;  %v11106_v20 = vld [vmem:[#allocation122_spill] sm:$0xff] }
 0x4aa   :  { %v2148_v57 = vpop.f32.mrf.mxu0  ;;  %v2219_v23 = vpop.f32.mrf.mxu1 }
 0x4ab   :  { %v2149_v60 = vadd.f32 %v2148_v57, %v11103_v27  ;;  %v11107_v57 = vld [vmem:[#allocation101_spill] sm:$0xff] }
 0x4ac   :  { %v2150_v25 = vpop.f32.mrf.mxu0  ;;  %v2221_v39 = vpop.f32.mrf.mxu1  ;;  %v305_v27 = vadd.f32 %v11107_v57, %v6123_v42 }
 0x4ad   :  { %v2303_v24 = vadd.f32 %v2149_v60, %v11104_v1  ;;  %v2151_v46 = vadd.f32 %v2150_v25, %v10977_v17  ;;  %v2222_v43 = vadd.f32 %v2221_v39, %v11106_v20 }
 0x4af   :  { %v4260_v12 = vmul.f32 -1.442695, %v2303_v24  ;;  %v2310_v47 = vadd.f32 %v2151_v46, %v11105_v11  ;;  %v2324_v52 = vadd.f32 %v2222_v43, %v305_v27  ;;  %v11108_v46 = vld [vmem:[#allocation82_spill] sm:$0xff] }
 0x4b1   :  { %4351 = vpow2.f32 %v4260_v12  ;;  %v4261_v34 = vmul.f32 -1.442695, %v2310_v47  ;;  %v4262_v60 = vmul.f32 -1.442695, %v2324_v52  ;;  %v2220_v12 = vadd.f32 %v2219_v23, %v10853_v56 }
 0x4b3   :  { %4353 = vpow2.f32 %v4261_v34  ;;  %v297_v34 = vadd.f32 %v11108_v46, %v6120_v2 }
 0x4be   :  { %v4352_v45 = vpop.eup %4351 }
 0x4bf   :  { %v2307_v35 = vadd.f32 1.0, %v4352_v45 }
 0x4c0   :  { %v4354_v1 = vpop.eup %4353 }
 0x4c1   :  { %4355 = vrcp.f32 %v2307_v35  ;;  %v2314_v24 = vadd.f32 1.0, %v4354_v1  ;;  %v11109_v1 = vld [vmem:[#allocation113_spill] sm:$0xff] }
 0x4c2   :  { %4357 = vpow2.f32 %v4262_v60  ;;  %v416_v60 = vadd.f32 %v11109_v1, %v5019_v28 }
 0x4c3   :  { %4359 = vrcp.f32 %v2314_v24 }
 0x4ce   :  { %v4356_v25 = vpop.eup %4355 }
 0x4cf   :  { %v2317_v11 = vmul.f32 %v4356_v25, %v2220_v12  ;;  %v4358_v45 = vpop.eup %4357 }
 0x4d0   :  { %v4360_v39 = vpop.eup %4359  ;;  %v2328_v35 = vadd.f32 1.0, %v4358_v45 }
 0x4d1   :  { %v2318_v47 = vadd.f32 %v2317_v11, %v297_v34  ;;  %v2320_v20 = vsub.f32 1.0, %v4360_v39  ;;  %v2322_v52 = vmul.f32 %v4360_v39, %v7579_v4  ;;  %v11110_v11 = vld [vmem:[#allocation115_spill] sm:$0xff] }
 0x4d3   :  { %4361 = vtanh.f32 %v2318_v47  ;;  %v418_v47 = vadd.f32 %v11110_v11, %v5024_v29  ;;  %v8276_v11 = vld [vmem:[%s10271_s3 + $0x240] sm:$0xff] }
 0x4d4   :  { %4363 = vrcp.f32 %v2328_v35 }
 0x4e0   :  { %v4362_v57 = vpop.eup %4361 }
 0x4e1   :  { %v2321_v43 = vmul.f32 %v4362_v57, %v2320_v20  ;;  %v4364_v34 = vpop.eup %4363 }
 0x4e3   :  { %v8119_v27 = vadd.f32 %v2322_v52, %v2321_v43 }
 0x4ea   :  { %v2290_v23 = vpop.f32.mrf.mxu0 }
 0x4eb   :  { %v2291_v12 = vadd.f32 %v2290_v23, %v6138_v26 }
 0x4ec   :  { %v2292_v24 = vpop.f32.mrf.mxu0 }
 0x4ed   :  { %v2331_v25 = vadd.f32 %v2291_v12, %v416_v60  ;;  %v2293_v46 = vadd.f32 %v2292_v24, %v6145_v33  ;;  %v8247_v12 = vld [vmem:[%s10271_s3 + $0x270] sm:$0xff]  ;;  %v8252_v24 = vld [vmem:[%s10271_s3 + $0x288] sm:$0xff] }
 0x4ee   :  { %11140 = vst [vmem:[#allocation83_spill] sm:$0xff] %v8252_v24 }
 0x4ef   :  { %v4263_v45 = vmul.f32 -1.442695, %v2331_v25  ;;  %v2338_v20 = vmul.f32 %v4364_v34, %v2293_v46  ;;  %v8259_v25 = vld [vmem:[%s10271_s3 + $0x248] sm:$0xff]  ;;  %v8264_v46 = vld [vmem:[%s10271_s3 + $0x280] sm:$0xff]  ;;  %v8269_v34 = vld [vmem:[%s10271_s3 + $0x258] sm:$0xff] }
 0x4f0   :  { %11141 = vst [vmem:[#allocation128_spill] sm:$0xff] %v8264_v46  ;;  %11142 = vst [vmem:[#allocation130_spill] sm:$0xff] %v8269_v34 }
 0x4f1   :  { %4365 = vpow2.f32 %v4263_v45  ;;  %v2339_v4 = vadd.f32 %v2338_v20, %v418_v47  ;;  %v8281_v47 = vld [vmem:[%s10271_s3 + $0x250] sm:$0xff]  ;;  %v8288_v45 = vld [vmem:[%s10271_s3 + $0x218] sm:$0xff]  ;;  %v8293_v20 = vld [vmem:[%s10271_s3 + $0x228] sm:$0xff] }
 0x4f2   :  { %11143 = vst [vmem:[#allocation91_spill] sm:$0xff] %v8281_v47  ;;  %11144 = vst [vmem:[#allocation132_spill] sm:$0xff] %v8293_v20 }
 0x4fe   :  { %v4366_v39 = vpop.eup %4365 }
 0x4ff   :  { %v2335_v35 = vadd.f32 1.0, %v4366_v39  ;;  %v8305_v39 = vld [vmem:[%s10271_s3 + $0x220] sm:$0xff] }
 0x500   :  { %11145 = vst [vmem:[#allocation93_spill] sm:$0xff] %v8305_v39 }
 0x501   :  { %4367 = vrcp.f32 %v2335_v35  ;;  %v8312_v35 = vld [vmem:[%s10271_s3 + $0x1e8] sm:$0xff] }
 0x502   :  { %4369 = vtanh.f32 %v2339_v4  ;;  %v8300_v4 = vld [vmem:[%s10271_s3 + $0x210] sm:$0xff] }
 0x50e   :  { %v4368_v57 = vpop.eup %4367 }
 0x50f   :  { %v2341_v43 = vsub.f32 1.0, %v4368_v57  ;;  %v4370_v52 = vpop.eup %4369  ;;  %v2343_v1 = vmul.f32 %v4368_v57, %v7592_v61  ;;  %v8317_v57 = vld [vmem:[%s10271_s3 + $0x1f8] sm:$0xff] }
 0x510   :  { %11146 = vst [vmem:[#allocation135_spill] sm:$0xff] %v8317_v57  ;;  %v8526_v61 = vld [vmem:[%s10271_s3 + $0x38] sm:$0xff] }
 0x511   :  { %v2342_v23 = vmul.f32 %v4370_v52, %v2341_v43  ;;  %v8324_v43 = vld [vmem:[%s10271_s3 + $0x1e0] sm:$0xff]  ;;  %v8329_v52 = vld [vmem:[%s10271_s3 + $0x1f0] sm:$0xff] }
 0x512   :  { %11147 = vst [vmem:[#allocation95_spill] sm:$0xff] %v8329_v52 }
 0x513   :  { %v8128_v60 = vadd.f32 %v2343_v1, %v2342_v23  ;;  %v8336_v23 = vld [vmem:[%s10271_s3 + $0x1b8] sm:$0xff]  ;;  %v8341_v1 = vld [vmem:[%s10271_s3 + $0x1c8] sm:$0xff] }
 0x514   :  { %11148 = vst [vmem:[#allocation98_spill] sm:$0xff] %v8341_v1 }
 0x515   :  { %2604 = vmatprep.mubr.f32.mxu1 %v8128_v60  ;;  %2675 = vmatprep.mubr.f32.mxu0 %v8128_v60 }
 0x516   :  { %2605 = vmatmul.mubr.f32.vlgmr.msra.gmra.mxu1 %v8119_v27  ;;  %2676 = vmatmul.mubr.f32.vlgmr.msra.gmra.mxu0 %v8119_v27 }
 0x517   :  { %2683 = vmatpush1.msra.mxu1 %v7597_v49  ;;  %2746 = vmatprep.mubr.f32.mxu1 %v8128_v60  ;;  %v11111_v49 = vld [vmem:[#allocation116_spill] sm:$0xff] }
 0x518   :  { %2684 = vmatprep.subr.mxu1 %v7604_v53  ;;  %v11112_v53 = vld [vmem:[#allocation13_spill] sm:$0xff] }
 0x519   :  { %2685 = vmatpush1.msra.mxu1 %v7611_v51  ;;  %v11113_v51 = vld [vmem:[#allocation106_spill] sm:$0xff] }
 0x51a   :  { %2686 = vmatprep.subr.mxu1 %v7618_v50  ;;  %v11114_v50 = vld [vmem:[#allocation66_spill] sm:$0xff] }
 0x51b   :  { %2687 = vmatpush1.msra.mxu1 %v7624_v14  ;;  %v11115_v14 = vld [vmem:[#allocation117_spill] sm:$0xff] }
 0x51c   :  { %2688 = vmatprep.subr.mxu1 %v7631_v31  ;;  %v11116_v31 = vld [vmem:[#allocation118_spill] sm:$0xff] }
 0x51d   :  { %2689 = vmatpush1.msra.mxu1 %v7638_v15  ;;  %v11117_v15 = vld [vmem:[#allocation65_spill] sm:$0xff] }
 0x51e   :  { %2690 = vmatprep.subr.mxu1 %v7645_v16  ;;  %v11118_v16 = vld [vmem:[#allocation71_spill] sm:$0xff] }
 0x51f   :  { %2691 = vmatpush1.msra.mxu1 %v7652_v32  ;;  %v11119_v32 = vld [vmem:[#allocation76_spill] sm:$0xff] }
 0x520   :  { %2692 = vmatprep.subr.mxu1 %v7659_v40  ;;  %v11120_v40 = vld [vmem:[#allocation81_spill] sm:$0xff] }
 0x521   :  { %2693 = vmatpush1.msra.mxu1 %v7666_v54  ;;  %v11121_v54 = vld [vmem:[#allocation86_spill] sm:$0xff] }
 0x522   :  { %2694 = vmatprep.subr.mxu1 %v7673_v5  ;;  %v11122_v5 = vld [vmem:[#allocation92_spill] sm:$0xff] }
 0x523   :  { %2695 = vmatpush1.msra.mxu1 %v7680_v9  ;;  %v11123_v9 = vld [vmem:[#allocation96_spill] sm:$0xff] }
 0x524   :  { %2696 = vmatprep.subr.mxu1 %v7687_v36  ;;  %v11124_v36 = vld [vmem:[#allocation102_spill] sm:$0xff] }
 0x525   :  { %2697 = vmatpush1.msra.mxu1 %v7694_v21  ;;  %v11125_v21 = vld [vmem:[#allocation9_spill] sm:$0xff] }
 0x526   :  { %2698 = vmatprep.subr.mxu1 %v7701_v62  ;;  %v11126_v62 = vld [vmem:[#allocation121_spill] sm:$0xff] }
 0x527   :  { %2699 = vmatpush1.msra.mxu1 %v7708_v10  ;;  %v11127_v10 = vld [vmem:[#allocation119_spill] sm:$0xff] }
 0x528   :  { %2700 = vmatprep.subr.mxu1 %v7715_v18  ;;  %v11128_v18 = vld [vmem:[#allocation124_spill] sm:$0xff] }
 0x529   :  { %2701 = vmatpush1.msra.mxu1 %v7722_v13  ;;  %v11129_v13 = vld [vmem:[#allocation126_spill] sm:$0xff] }
 0x52a   :  { %2702 = vmatprep.subr.mxu1 %v7729_v63  ;;  %v11130_v63 = vld [vmem:[#allocation35_spill] sm:$0xff] }
 0x52b   :  { %2703 = vmatpush1.msra.mxu1 %v7736_v59  ;;  %v11131_v59 = vld [vmem:[#allocation39_spill] sm:$0xff] }
 0x52c   :  { %2704 = vmatprep.subr.mxu1 %v7743_v44  ;;  %v11132_v44 = vld [vmem:[#allocation44_spill] sm:$0xff] }
 0x52d   :  { %2705 = vmatpush1.msra.mxu1 %v7750_v38  ;;  %v11133_v38 = vld [vmem:[#allocation49_spill] sm:$0xff] }
 0x52e   :  { %2706 = vmatprep.subr.mxu1 %v7757_v48  ;;  %v11134_v48 = vld [vmem:[#allocation54_spill] sm:$0xff] }
 0x52f   :  { %2707 = vmatpush1.msra.mxu1 %v7764_v0  ;;  %v11135_v0 = vld [vmem:[#allocation58_spill] sm:$0xff] }
 0x530   :  { %2708 = vmatprep.subr.mxu1 %v7771_v7  ;;  %v11136_v7 = vld [vmem:[#allocation62_spill] sm:$0xff] }
 0x531   :  { %2709 = vmatpush1.msra.mxu1 %v7778_v19  ;;  %v11137_v19 = vld [vmem:[#allocation67_spill] sm:$0xff] }
 0x532   :  { %2710 = vmatprep.subr.mxu1 %v7785_v30  ;;  %v8202_v30 = vld [vmem:[%s10271_s3 + $0x2d8] sm:$0xff] }
 0x533   :  { %2711 = vmatpush1.msra.mxu1 %v7792_v37  ;;  %v8207_v37 = vld [vmem:[%s10271_s3 + $0x2d0] sm:$0xff]  ;;  %2998 = vmatprep.subr.mxu0 %v8202_v30 }
 0x534   :  { %2712 = vmatprep.subr.mxu1 %v7799_v41  ;;  %v2899_v41 = vld [vmem:[%s10271_s3 + $0x2e8] sm:$0xff]  ;;  %2999 = vmatpush1.msra.mxu0 %v8207_v37 }
 0x535   :  { %2713 = vmatpush1.msra.mxu1 %v7806_v3  ;;  %v8216_v3 = vld [vmem:[%s10271_s3 + $0x2a8] sm:$0xff] }
 0x536   :  { %2714 = vmatprep.subr.mxu1 %v7813_v55  ;;  %v2898_v55 = vld [vmem:[%s10271_s3 + $0x2e0] sm:$0xff]  ;;  %3000 = vmatprep.subr.mxu0 %v8216_v3 }
 0x537   :  { %2715 = vmatpush2.msra.mxu1 %v7820_v6  ;;  %v8224_v6 = vld [vmem:[%s10271_s3 + $0x2a0] sm:$0xff] }
 0x538   :  { %2716 = vmatprep.subr.mxu1 %v7827_v8  ;;  %v8230_v8 = vld [vmem:[%s10271_s3 + $0x2b8] sm:$0xff]  ;;  %3001 = vmatpush1.msra.mxu0 %v8224_v6 }
 0x539   :  { %2717 = vmatpush2.msra.mxu1 %v7834_v22  ;;  %11138 = vst [vmem:[#allocation73_spill] sm:$0xff] %v8230_v8  ;;  %v8235_v22 = vld [vmem:[%s10271_s3 + $0x278] sm:$0xff] }
 0x53a   :  { %2718 = vmatprep.subr.mxu1 %v7841_v58  ;;  %v8240_v58 = vld [vmem:[%s10271_s3 + $0x2b0] sm:$0xff]  ;;  %3002 = vmatprep.subr.mxu0 %v8235_v22 }
 0x53b   :  { %2719 = vmatpush2.msra.mxu1 %v11111_v49  ;;  %11139 = vst [vmem:[#allocation77_spill] sm:$0xff] %v8240_v58  ;;  %3003 = vmatpush1.msra.mxu0 %v8247_v12  ;;  %v8348_v49 = vld [vmem:[%s10271_s3 + $0x1b0] sm:$0xff] }
 0x53c   :  { %2720 = vmatprep.subr.mxu1 %v11112_v53  ;;  %3004 = vmatprep.subr.mxu0 %v8259_v25  ;;  %v8353_v53 = vld [vmem:[%s10271_s3 + $0x1c0] sm:$0xff] }
 0x53d   :  { %2721 = vmatpush2.msra.mxu1 %v11113_v51  ;;  %3005 = vmatpush1.msra.mxu0 %v8276_v11  ;;  %11149 = vst [vmem:[#allocation103_spill] sm:$0xff] %v8353_v53  ;;  %v8360_v51 = vld [vmem:[%s10271_s3 + $0x188] sm:$0xff] }
 0x53e   :  { %2722 = vmatprep.subr.mxu1 %v11114_v50  ;;  %3006 = vmatprep.subr.mxu0 %v8288_v45  ;;  %v8365_v50 = vld [vmem:[%s10271_s3 + $0x198] sm:$0xff] }
 0x53f   :  { %2723 = vmatpush2.msra.mxu1 %v11115_v14  ;;  %3007 = vmatpush1.msra.mxu0 %v8300_v4  ;;  %11150 = vst [vmem:[#allocation18_spill] sm:$0xff] %v8365_v50  ;;  %v8372_v14 = vld [vmem:[%s10271_s3 + $0x180] sm:$0xff] }
 0x540   :  { %2724 = vmatprep.subr.mxu1 %v11116_v31  ;;  %3008 = vmatprep.subr.mxu0 %v8312_v35  ;;  %v8377_v31 = vld [vmem:[%s10271_s3 + $0x190] sm:$0xff] }
 0x541   :  { %2725 = vmatpush2.msra.mxu1 %v11117_v15  ;;  %3009 = vmatpush1.msra.mxu0 %v8324_v43  ;;  %11151 = vst [vmem:[#allocation19_spill] sm:$0xff] %v8377_v31  ;;  %v8384_v15 = vld [vmem:[%s10271_s3 + $0x158] sm:$0xff] }
 0x542   :  { %2726 = vmatprep.subr.mxu1 %v11118_v16  ;;  %3010 = vmatprep.subr.mxu0 %v8336_v23  ;;  %v8389_v16 = vld [vmem:[%s10271_s3 + $0x168] sm:$0xff] }
 0x543   :  { %2727 = vmatpush2.msra.mxu1 %v11119_v32  ;;  %3011 = vmatpush1.msra.mxu0 %v8348_v49  ;;  %11152 = vst [vmem:[#allocation20_spill] sm:$0xff] %v8389_v16  ;;  %v8396_v32 = vld [vmem:[%s10271_s3 + $0x150] sm:$0xff] }
 0x544   :  { %2728 = vmatprep.subr.mxu1 %v11120_v40  ;;  %3012 = vmatprep.subr.mxu0 %v8360_v51  ;;  %v8401_v40 = vld [vmem:[%s10271_s3 + $0x160] sm:$0xff] }
 0x545   :  { %2729 = vmatpush2.msra.mxu1 %v11121_v54  ;;  %11153 = vst [vmem:[#allocation21_spill] sm:$0xff] %v8401_v40  ;;  %3013 = vmatpush1.msra.mxu0 %v8372_v14  ;;  %v8408_v54 = vld [vmem:[%s10271_s3 + $0x128] sm:$0xff] }
 0x546   :  { %2730 = vmatprep.subr.mxu1 %v11122_v5  ;;  %v8413_v5 = vld [vmem:[%s10271_s3 + $0x138] sm:$0xff]  ;;  %3014 = vmatprep.subr.mxu0 %v8384_v15 }
 0x547   :  { %2731 = vmatpush2.msra.mxu1 %v11123_v9  ;;  %11154 = vst [vmem:[#allocation22_spill] sm:$0xff] %v8413_v5  ;;  %v8420_v9 = vld [vmem:[%s10271_s3 + $0x120] sm:$0xff]  ;;  %3015 = vmatpush1.msra.mxu0 %v8396_v32 }
 0x548   :  { %2732 = vmatprep.subr.mxu1 %v11124_v36  ;;  %v8425_v36 = vld [vmem:[%s10271_s3 + $0x130] sm:$0xff]  ;;  %3016 = vmatprep.subr.mxu0 %v8408_v54 }
 0x549   :  { %2733 = vmatpush2.msra.mxu1 %v11125_v21  ;;  %11155 = vst [vmem:[#allocation23_spill] sm:$0xff] %v8425_v36  ;;  %v8432_v21 = vld [vmem:[%s10271_s3 + $0xf8] sm:$0xff]  ;;  %3017 = vmatpush1.msra.mxu0 %v8420_v9 }
 0x54a   :  { %2734 = vmatprep.subr.mxu1 %v11126_v62  ;;  %3018 = vmatprep.subr.mxu0 %v8432_v21  ;;  %v8442_v62 = vld [vmem:[%s10271_s3 + $0xf0] sm:$0xff] }
 0x54b   :  { %2735 = vmatpush2.msra.mxu1 %v11127_v10  ;;  %v8447_v10 = vld [vmem:[%s10271_s3 + $0x108] sm:$0xff]  ;;  %3019 = vmatpush1.msra.mxu0 %v8442_v62 }
 0x54c   :  { %2736 = vmatprep.subr.mxu1 %v11128_v18  ;;  %11156 = vst [vmem:[#allocation24_spill] sm:$0xff] %v8447_v10  ;;  %v8454_v18 = vld [vmem:[%s10271_s3 + $0xc8] sm:$0xff] }
 0x54d   :  { %2737 = vmatpush2.msra.mxu1 %v11129_v13  ;;  %v8459_v13 = vld [vmem:[%s10271_s3 + $0x100] sm:$0xff]  ;;  %3020 = vmatprep.subr.mxu0 %v8454_v18 }
 0x54e   :  { %2738 = vmatprep.subr.mxu1 %v11130_v63  ;;  %11157 = vst [vmem:[#allocation25_spill] sm:$0xff] %v8459_v13  ;;  %v8466_v63 = vld [vmem:[%s10271_s3 + $0xc0] sm:$0xff] }
 0x54f   :  { %2739 = vmatpush2.msra.mxu1 %v11131_v59  ;;  %v8471_v59 = vld [vmem:[%s10271_s3 + $0xd8] sm:$0xff]  ;;  %3021 = vmatpush1.msra.mxu0 %v8466_v63 }
 0x550   :  { %2740 = vmatprep.subr.mxu1 %v11132_v44  ;;  %11158 = vst [vmem:[#allocation26_spill] sm:$0xff] %v8471_v59  ;;  %v8478_v44 = vld [vmem:[%s10271_s3 + $0x98] sm:$0xff] }
 0x551   :  { %2741 = vmatpush2.msra.mxu1 %v11133_v38  ;;  %v8483_v38 = vld [vmem:[%s10271_s3 + $0xd0] sm:$0xff]  ;;  %3022 = vmatprep.subr.mxu0 %v8478_v44 }
 0x552   :  { %2742 = vmatprep.subr.mxu1 %v11134_v48  ;;  %11159 = vst [vmem:[#allocation27_spill] sm:$0xff] %v8483_v38  ;;  %v8490_v48 = vld [vmem:[%s10271_s3 + $0x90] sm:$0xff] }
 0x553   :  { %2743 = vmatpush2.msra.mxu1 %v11135_v0  ;;  %v8495_v0 = vld [vmem:[%s10271_s3 + $0xa8] sm:$0xff]  ;;  %3023 = vmatpush1.msra.mxu0 %v8490_v48 }
 0x554   :  { %2744 = vmatprep.subr.mxu1 %v11136_v7  ;;  %11160 = vst [vmem:[#allocation28_spill] sm:$0xff] %v8495_v0  ;;  %v8502_v7 = vld [vmem:[%s10271_s3 + $0x68] sm:$0xff] }
 0x555   :  { %2745 = vmatpush2.msra.mxu1 %v11137_v19  ;;  %v8507_v19 = vld [vmem:[%s10271_s3 + $0xa0] sm:$0xff]  ;;  %3024 = vmatprep.subr.mxu0 %v8502_v7 }
 0x556   :  { %2747 = vmatmul.mubr.f32.vlgmr.msra.gmra.mxu1 %v8119_v27  ;;  %3069 = vmatprep.subr.mxu1 %v2899_v41  ;;  %11161 = vst [vmem:[#allocation29_spill] sm:$0xff] %v8507_v19  ;;  %v8514_v41 = vld [vmem:[%s10271_s3 + $0x60] sm:$0xff] }
 0x557   :  { %3070 = vmatpush1.msra.mxu1 %v2898_v55  ;;  %v8519_v55 = vld [vmem:[%s10271_s3 + $0x78] sm:$0xff]  ;;  %3025 = vmatpush1.msra.mxu0 %v8514_v41 }
 0x558   :  { %3071 = vmatprep.subr.mxu1 %v8230_v8  ;;  %11162 = vst [vmem:[#allocation30_spill] sm:$0xff] %v8519_v55  ;;  %3026 = vmatprep.subr.mxu0 %v8526_v61  ;;  %v8786_v8 = vld [vmem:[%s10271_s3 + $0x428] sm:$0xff] }
 0x559   :  { %3072 = vmatpush1.msra.mxu1 %v8240_v58  ;;  %v8774_v58 = vld [vmem:[%s10271_s3 + $0x450] sm:$0xff]  ;;  %11198 = vst [vmem:[#allocation60_spill] sm:$0xff] %v8786_v8 }
 0x55a   :  { %3073 = vmatprep.subr.mxu1 %v8252_v24  ;;  %v8769_v24 = vld [vmem:[%s10271_s3 + $0x490] sm:$0xff]  ;;  %11196 = vst [vmem:[#allocation51_spill] sm:$0xff] %v8774_v58 }
 0x55b   :  { %3074 = vmatpush1.msra.mxu1 %v8264_v46  ;;  %v8757_v46 = vld [vmem:[%s10271_s3 + $0x498] sm:$0xff]  ;;  %11195 = vst [vmem:[#allocation46_spill] sm:$0xff] %v8769_v24 }
 0x55c   :  { %3075 = vmatprep.subr.mxu1 %v8269_v34  ;;  %v8752_v34 = vld [vmem:[%s10271_s3 + $0x480] sm:$0xff]  ;;  %11193 = vst [vmem:[#allocation37_spill] sm:$0xff] %v8757_v46 }
 0x55d   :  { %3076 = vmatpush1.msra.mxu1 %v8281_v47  ;;  %v8740_v47 = vld [vmem:[%s10271_s3 + $0x488] sm:$0xff]  ;;  %11192 = vst [vmem:[#allocation127_spill] sm:$0xff] %v8752_v34 }
 0x55e   :  { %3077 = vmatprep.subr.mxu1 %v8293_v20  ;;  %v8730_v20 = vld [vmem:[%s10271_s3 + $0x4b0] sm:$0xff]  ;;  %11190 = vst [vmem:[#allocation120_spill] sm:$0xff] %v8740_v47 }
 0x55f   :  { %3078 = vmatpush1.msra.mxu1 %v8305_v39  ;;  %v8718_v39 = vld [vmem:[%s10271_s3 + $0x4b8] sm:$0xff]  ;;  %11188 = vst [vmem:[#allocation110_spill] sm:$0xff] %v8730_v20 }
 0x560   :  { %3079 = vmatprep.subr.mxu1 %v8317_v57  ;;  %v8706_v57 = vld [vmem:[%s10271_s3 + $0x4e0] sm:$0xff]  ;;  %11186 = vst [vmem:[#allocation99_spill] sm:$0xff] %v8718_v39 }
 0x561   :  { %3080 = vmatpush1.msra.mxu1 %v8329_v52  ;;  %v8694_v52 = vld [vmem:[%s10271_s3 + $0x4e8] sm:$0xff]  ;;  %11184 = vst [vmem:[#allocation89_spill] sm:$0xff] %v8706_v57 }
 0x562   :  { %3081 = vmatprep.subr.mxu1 %v8341_v1  ;;  %v8682_v1 = vld [vmem:[%s10271_s3 + $0x510] sm:$0xff]  ;;  %11182 = vst [vmem:[#allocation78_spill] sm:$0xff] %v8694_v52 }
 0x563   :  { %3082 = vmatpush1.msra.mxu1 %v8353_v53  ;;  %v8670_v53 = vld [vmem:[%s10271_s3 + $0x518] sm:$0xff]  ;;  %11180 = vst [vmem:[#allocation68_spill] sm:$0xff] %v8682_v1 }
 0x564   :  { %3083 = vmatprep.subr.mxu1 %v8365_v50  ;;  %v8658_v50 = vld [vmem:[%s10271_s3 + $0x540] sm:$0xff]  ;;  %11178 = vst [vmem:[#allocation61_spill] sm:$0xff] %v8670_v53 }
 0x565   :  { %3084 = vmatpush1.msra.mxu1 %v8377_v31  ;;  %v8646_v31 = vld [vmem:[%s10271_s3 + $0x548] sm:$0xff]  ;;  %11176 = vst [vmem:[#allocation57_spill] sm:$0xff] %v8658_v50 }
 0x566   :  { %3085 = vmatprep.subr.mxu1 %v8389_v16  ;;  %v8634_v16 = vld [vmem:[%s10271_s3 + $0x570] sm:$0xff]  ;;  %11174 = vst [vmem:[#allocation52_spill] sm:$0xff] %v8646_v31 }
 0x567   :  { %3086 = vmatpush1.msra.mxu1 %v8401_v40  ;;  %v8622_v40 = vld [vmem:[%s10271_s3 + $0x578] sm:$0xff]  ;;  %11172 = vst [vmem:[#allocation47_spill] sm:$0xff] %v8634_v16 }
 0x568   :  { %3087 = vmatprep.subr.mxu1 %v8413_v5  ;;  %v8610_v5 = vld [vmem:[%s10271_s3 + $0x5a0] sm:$0xff] }
 0x569   :  { %3088 = vmatpush1.msra.mxu1 %v8425_v36  ;;  %v8598_v36 = vld [vmem:[%s10271_s3 + $0x5a8] sm:$0xff] }
 0x56a   :  { %3089 = vmatprep.subr.mxu1 %v8447_v10  ;;  %v8586_v10 = vld [vmem:[%s10271_s3 + $0x5d0] sm:$0xff] }
 0x56b   :  { %3090 = vmatpush1.msra.mxu1 %v8459_v13  ;;  %v8574_v13 = vld [vmem:[%s10271_s3 + $0x5d8] sm:$0xff] }
 0x56c   :  { %3091 = vmatprep.subr.mxu1 %v8471_v59  ;;  %v8562_v59 = vld [vmem:[%s10271_s3] sm:$0xff] }
 0x56d   :  { %3092 = vmatpush1.msra.mxu1 %v8483_v38  ;;  %v8550_v38 = vld [vmem:[%s10271_s3 + $0x8] sm:$0xff] }
 0x56e   :  { %3093 = vmatprep.subr.mxu1 %v8495_v0  ;;  %v8538_v0 = vld [vmem:[%s10271_s3 + $0x30] sm:$0xff] }
 0x56f   :  { %3094 = vmatpush1.msra.mxu1 %v8507_v19  ;;  %v8531_v19 = vld [vmem:[%s10271_s3 + $0x70] sm:$0xff]  ;;  %3027 = vmatpush1.msra.mxu0 %v8538_v0 }
 0x570   :  { %3095 = vmatprep.subr.mxu1 %v8519_v55  ;;  %11163 = vst [vmem:[#allocation31_spill] sm:$0xff] %v8531_v19  ;;  %v8543_v55 = vld [vmem:[%s10271_s3 + $0x48] sm:$0xff]  ;;  %3028 = vmatprep.subr.mxu0 %v8550_v38 }
 0x571   :  { %3096 = vmatpush1.msra.mxu1 %v8531_v19  ;;  %11164 = vst [vmem:[#allocation32_spill] sm:$0xff] %v8543_v55  ;;  %v8555_v19 = vld [vmem:[%s10271_s3 + $0x40] sm:$0xff]  ;;  %3029 = vmatpush1.msra.mxu0 %v8562_v59 }
 0x572   :  { %3097 = vmatprep.subr.mxu1 %v8543_v55  ;;  %11165 = vst [vmem:[#allocation33_spill] sm:$0xff] %v8555_v19  ;;  %v8567_v55 = vld [vmem:[%s10271_s3 + $0x18] sm:$0xff]  ;;  %3030 = vmatprep.subr.mxu0 %v8574_v13 }
 0x573   :  { %3098 = vmatpush1.msra.mxu1 %v8555_v19  ;;  %11166 = vst [vmem:[#allocation34_spill] sm:$0xff] %v8567_v55  ;;  %v8579_v19 = vld [vmem:[%s10271_s3 + $0x10] sm:$0xff]  ;;  %3031 = vmatpush2.msra.mxu0 %v8586_v10 }
 0x574   :  { %3099 = vmatprep.subr.mxu1 %v8567_v55  ;;  %11167 = vst [vmem:[#allocation36_spill] sm:$0xff] %v8579_v19  ;;  %v8591_v55 = vld [vmem:[%s10271_s3 + $0x5e8] sm:$0xff]  ;;  %3032 = vmatprep.subr.mxu0 %v8598_v36 }
 0x575   :  { %3100 = vmatpush1.msra.mxu1 %v8579_v19  ;;  %11168 = vst [vmem:[#allocation38_spill] sm:$0xff] %v8591_v55  ;;  %v8603_v19 = vld [vmem:[%s10271_s3 + $0x5e0] sm:$0xff]  ;;  %3033 = vmatpush2.msra.mxu0 %v8610_v5 }
 0x576   :  { %3101 = vmatprep.subr.mxu1 %v8591_v55  ;;  %11169 = vst [vmem:[#allocation40_spill] sm:$0xff] %v8603_v19  ;;  %v8615_v55 = vld [vmem:[%s10271_s3 + $0x5b8] sm:$0xff]  ;;  %3034 = vmatprep.subr.mxu0 %v8622_v40 }
 0x577   :  { %3102 = vmatpush2.msra.mxu1 %v8603_v19  ;;  %11170 = vst [vmem:[#allocation42_spill] sm:$0xff] %v8615_v55  ;;  %v8627_v19 = vld [vmem:[%s10271_s3 + $0x5b0] sm:$0xff]  ;;  %3035 = vmatpush2.msra.mxu0 %v8634_v16 }
 0x578   :  { %3103 = vmatprep.subr.mxu1 %v8615_v55  ;;  %11171 = vst [vmem:[#allocation45_spill] sm:$0xff] %v8627_v19  ;;  %v8639_v55 = vld [vmem:[%s10271_s3 + $0x588] sm:$0xff]  ;;  %3036 = vmatprep.subr.mxu0 %v8646_v31 }
 0x579   :  { %3104 = vmatpush2.msra.mxu1 %v8627_v19  ;;  %11173 = vst [vmem:[#allocation50_spill] sm:$0xff] %v8639_v55  ;;  %v8651_v19 = vld [vmem:[%s10271_s3 + $0x580] sm:$0xff]  ;;  %3037 = vmatpush2.msra.mxu0 %v8658_v50 }
 0x57a   :  { %3105 = vmatprep.subr.mxu1 %v8639_v55  ;;  %11175 = vst [vmem:[#allocation55_spill] sm:$0xff] %v8651_v19  ;;  %v8663_v55 = vld [vmem:[%s10271_s3 + $0x558] sm:$0xff]  ;;  %3038 = vmatprep.subr.mxu0 %v8670_v53 }
 0x57b   :  { %3106 = vmatpush2.msra.mxu1 %v8651_v19  ;;  %11177 = vst [vmem:[#allocation59_spill] sm:$0xff] %v8663_v55  ;;  %v8675_v19 = vld [vmem:[%s10271_s3 + $0x550] sm:$0xff]  ;;  %3039 = vmatpush2.msra.mxu0 %v8682_v1 }
 0x57c   :  { %3107 = vmatprep.subr.mxu1 %v8663_v55  ;;  %11179 = vst [vmem:[#allocation63_spill] sm:$0xff] %v8675_v19  ;;  %v8687_v55 = vld [vmem:[%s10271_s3 + $0x528] sm:$0xff]  ;;  %3040 = vmatprep.subr.mxu0 %v8694_v52 }
 0x57d   :  { %3108 = vmatpush2.msra.mxu1 %v8675_v19  ;;  %11181 = vst [vmem:[#allocation74_spill] sm:$0xff] %v8687_v55  ;;  %v8699_v19 = vld [vmem:[%s10271_s3 + $0x520] sm:$0xff]  ;;  %3041 = vmatpush2.msra.mxu0 %v8706_v57  ;;  %v11230_v57 = vld [vmem:[#allocation5_spill] sm:$0xff] }
 0x57e   :  { %3109 = vmatprep.subr.mxu1 %v8687_v55  ;;  %11183 = vst [vmem:[#allocation84_spill] sm:$0xff] %v8699_v19  ;;  %v8711_v55 = vld [vmem:[%s10271_s3 + $0x4f8] sm:$0xff]  ;;  %3042 = vmatprep.subr.mxu0 %v8718_v39 }
 0x57f   :  { %3110 = vmatpush2.msra.mxu1 %v8699_v19  ;;  %11185 = vst [vmem:[#allocation94_spill] sm:$0xff] %v8711_v55  ;;  %v8723_v19 = vld [vmem:[%s10271_s3 + $0x4f0] sm:$0xff]  ;;  %3043 = vmatpush2.msra.mxu0 %v8730_v20 }
 0x580   :  { %3111 = vmatprep.subr.mxu1 %v8711_v55  ;;  %11187 = vst [vmem:[#allocation7_spill] sm:$0xff] %v8723_v19  ;;  %v8735_v55 = vld [vmem:[%s10271_s3 + $0x4c8] sm:$0xff]  ;;  %3044 = vmatprep.subr.mxu0 %v8740_v47  ;;  %v8791_v47 = vld [vmem:[%s10271_s3 + $0x460] sm:$0xff] }
 0x581   :  { %3112 = vmatpush2.msra.mxu1 %v8723_v19  ;;  %11189 = vst [vmem:[#allocation48_spill] sm:$0xff] %v8735_v55  ;;  %v8747_v19 = vld [vmem:[%s10271_s3 + $0x4c0] sm:$0xff]  ;;  %3045 = vmatpush2.msra.mxu0 %v8752_v34  ;;  %11199 = vst [vmem:[#allocation64_spill] sm:$0xff] %v8791_v47  ;;  %v8803_v34 = vld [vmem:[%s10271_s3 + $0x438] sm:$0xff] }
 0x582   :  { %3113 = vmatprep.subr.mxu1 %v8735_v55  ;;  %11191 = vst [vmem:[#allocation125_spill] sm:$0xff] %v8747_v19  ;;  %v8764_v55 = vld [vmem:[%s10271_s3 + $0x458] sm:$0xff]  ;;  %11201 = vst [vmem:[#allocation75_spill] sm:$0xff] %v8803_v34 }
 0x583   :  { %3114 = vmatpush2.msra.mxu1 %v8747_v19  ;;  %11194 = vst [vmem:[#allocation41_spill] sm:$0xff] %v8764_v55  ;;  %v8781_v19 = vld [vmem:[%s10271_s3 + $0x468] sm:$0xff]  ;;  %3046 = vmatprep.subr.mxu0 %v8764_v55  ;;  %v8810_v55 = vld [vmem:[%s10271_s3 + $0x3f8] sm:$0xff] }
 0x584   :  { %3115 = vmatprep.subr.mxu1 %v8757_v46  ;;  %11197 = vst [vmem:[#allocation56_spill] sm:$0xff] %v8781_v19  ;;  %v8798_v46 = vld [vmem:[%s10271_s3 + $0x420] sm:$0xff]  ;;  %3047 = vmatpush2.msra.mxu0 %v8774_v58  ;;  %11202 = vst [vmem:[#allocation80_spill] sm:$0xff] %v8810_v55  ;;  %v8822_v58 = vld [vmem:[%s10271_s3 + $0x3f0] sm:$0xff] }
 0x585   :  { %3116 = vmatpush2.msra.mxu1 %v8769_v24  ;;  %11200 = vst [vmem:[#allocation70_spill] sm:$0xff] %v8798_v46  ;;  %v8815_v24 = vld [vmem:[%s10271_s3 + $0x430] sm:$0xff]  ;;  %3048 = vmatprep.subr.mxu0 %v8786_v8  ;;  %11204 = vst [vmem:[#allocation129_spill] sm:$0xff] %v8822_v58  ;;  %v8834_v8 = vld [vmem:[%s10271_s3 + $0x3c8] sm:$0xff] }
 0x586   :  { %3117 = vmatprep.subr.mxu1 %v8781_v19  ;;  %11203 = vst [vmem:[#allocation85_spill] sm:$0xff] %v8815_v24  ;;  %v8827_v19 = vld [vmem:[%s10271_s3 + $0x408] sm:$0xff]  ;;  %3049 = vmatpush2.msra.mxu0 %v8798_v46  ;;  %11206 = vst [vmem:[#allocation133_spill] sm:$0xff] %v8834_v8  ;;  %v8846_v46 = vld [vmem:[%s10271_s3 + $0x3c0] sm:$0xff] }
 0x587   :  { %3118 = vmatpush2.msra.mxu1 %v8791_v47  ;;  %11205 = vst [vmem:[#allocation131_spill] sm:$0xff] %v8827_v19  ;;  %v8839_v47 = vld [vmem:[%s10271_s3 + $0x400] sm:$0xff]  ;;  %3050 = vmatprep.subr.mxu0 %v8810_v55  ;;  %11208 = vst [vmem:[#allocation15_spill] sm:$0xff] %v8846_v46  ;;  %v8858_v55 = vld [vmem:[%s10271_s3 + $0x398] sm:$0xff] }
 0x588   :  { %3119 = vmatprep.subr.mxu1 %v8803_v34  ;;  %11207 = vst [vmem:[#allocation134_spill] sm:$0xff] %v8839_v47  ;;  %v8851_v34 = vld [vmem:[%s10271_s3 + $0x3d8] sm:$0xff]  ;;  %3051 = vmatpush2.msra.mxu0 %v8822_v58  ;;  %11210 = vst [vmem:[#allocation101_spill] sm:$0xff] %v8858_v55  ;;  %v8870_v58 = vld [vmem:[%s10271_s3 + $0x390] sm:$0xff] }
 0x589   :  { %3120 = vmatpush2.msra.mxu1 %v8815_v24  ;;  %11209 = vst [vmem:[#allocation17_spill] sm:$0xff] %v8851_v34  ;;  %v8863_v24 = vld [vmem:[%s10271_s3 + $0x3d0] sm:$0xff]  ;;  %3052 = vmatprep.subr.mxu0 %v8834_v8  ;;  %11212 = vst [vmem:[#allocation113_spill] sm:$0xff] %v8870_v58  ;;  %v8882_v8 = vld [vmem:[%s10271_s3 + $0x368] sm:$0xff] }
 0x58a   :  { %3121 = vmatprep.subr.mxu1 %v8827_v19  ;;  %11211 = vst [vmem:[#allocation82_spill] sm:$0xff] %v8863_v24  ;;  %v8875_v19 = vld [vmem:[%s10271_s3 + $0x3a8] sm:$0xff]  ;;  %3053 = vmatpush2.msra.mxu0 %v8846_v46  ;;  %11214 = vst [vmem:[#allocation116_spill] sm:$0xff] %v8882_v8  ;;  %v8894_v46 = vld [vmem:[%s10271_s3 + $0x360] sm:$0xff] }
 0x58b   :  { %3122 = vmatpush2.msra.mxu1 %v8839_v47  ;;  %11213 = vst [vmem:[#allocation115_spill] sm:$0xff] %v8875_v19  ;;  %v8887_v47 = vld [vmem:[%s10271_s3 + $0x3a0] sm:$0xff]  ;;  %3054 = vmatprep.subr.mxu0 %v8858_v55  ;;  %11216 = vst [vmem:[#allocation106_spill] sm:$0xff] %v8894_v46  ;;  %v8906_v55 = vld [vmem:[%s10271_s3 + $0x338] sm:$0xff] }
 0x58c   :  { %3123 = vmatprep.subr.mxu1 %v8851_v34  ;;  %11215 = vst [vmem:[#allocation13_spill] sm:$0xff] %v8887_v47  ;;  %v8899_v34 = vld [vmem:[%s10271_s3 + $0x378] sm:$0xff]  ;;  %3055 = vmatpush2.msra.mxu0 %v8870_v58  ;;  %11218 = vst [vmem:[#allocation117_spill] sm:$0xff] %v8906_v55  ;;  %v8918_v58 = vld [vmem:[%s10271_s3 + $0x330] sm:$0xff] }
 0x58d   :  { %3124 = vmatpush2.msra.mxu1 %v8863_v24  ;;  %11217 = vst [vmem:[#allocation66_spill] sm:$0xff] %v8899_v34  ;;  %v8911_v24 = vld [vmem:[%s10271_s3 + $0x370] sm:$0xff]  ;;  %3056 = vmatprep.subr.mxu0 %v8882_v8  ;;  %11220 = vst [vmem:[#allocation65_spill] sm:$0xff] %v8918_v58  ;;  %v8930_v8 = vld [vmem:[%s10271_s3 + $0x308] sm:$0xff] }
 0x58e   :  { %3125 = vmatprep.subr.mxu1 %v8875_v19  ;;  %11219 = vst [vmem:[#allocation118_spill] sm:$0xff] %v8911_v24  ;;  %v8923_v19 = vld [vmem:[%s10271_s3 + $0x348] sm:$0xff]  ;;  %3057 = vmatpush2.msra.mxu0 %v8894_v46  ;;  %11222 = vst [vmem:[#allocation76_spill] sm:$0xff] %v8930_v8  ;;  %v8942_v46 = vld [vmem:[%s10271_s3 + $0x300] sm:$0xff] }
 0x58f   :  { %3126 = vmatpush2.msra.mxu1 %v8887_v47  ;;  %11221 = vst [vmem:[#allocation71_spill] sm:$0xff] %v8923_v19  ;;  %v8935_v47 = vld [vmem:[%s10271_s3 + $0x340] sm:$0xff]  ;;  %3058 = vmatprep.subr.mxu0 %v8906_v55  ;;  %11224 = vst [vmem:[#allocation86_spill] sm:$0xff] %v8942_v46  ;;  %v8963_v55 = vld [vmem:[%s10271_s3 + $0x2f8] sm:$0xff] }
 0x590   :  { %3127 = vmatprep.subr.mxu1 %v8899_v34  ;;  %11223 = vst [vmem:[#allocation81_spill] sm:$0xff] %v8935_v47  ;;  %v8947_v34 = vld [vmem:[%s10271_s3 + $0x318] sm:$0xff]  ;;  %3059 = vmatpush2.msra.mxu0 %v8918_v58  ;;  %11227 = vst [vmem:[#allocation102_spill] sm:$0xff] %v8963_v55 }
 0x591   :  { %3128 = vmatpush2.msra.mxu1 %v8911_v24  ;;  %11225 = vst [vmem:[#allocation92_spill] sm:$0xff] %v8947_v34  ;;  %3060 = vmatprep.subr.mxu0 %v8930_v8  ;;  %v8958_v24 = vld [vmem:[%s10271_s3 + $0x310] sm:$0xff]  ;;  %v11229_v8 = vld [vmem:[#allocation4_spill] sm:$0xff] }
 0x592   :  { %3129 = vmatprep.subr.mxu1 %v8923_v19  ;;  %3061 = vmatpush2.msra.mxu0 %v8942_v46  ;;  %11226 = vst [vmem:[#allocation96_spill] sm:$0xff] %v8958_v24  ;;  %v11228_v19 = vld [vmem:[#allocation114_spill] sm:$0xff] }
 0x593   :  { %3130 = vmatpush2.msra.mxu1 %v8935_v47  ;;  %3140 = vmatprep.subr.mxu0 %v8963_v55 }
 0x594   :  { %3131 = vmatprep.subr.mxu1 %v8947_v34 }
 0x595   :  { %3132 = vmatpush2.msra.mxu1 %v8958_v24 }
 0x596   :  { %3456 = vmatprep.subr.mxu1 %v8202_v30  ;;  %v11231_v30 = vld [vmem:[#allocation122_spill] sm:$0xff] }
 0x5d6   :  { %v2606_v47 = vpop.f32.mrf.mxu1  ;;  %v2677_v53 = vpop.f32.mrf.mxu0 }
 0x5d7   :  { %v2607_v46 = vadd.f32 %v2606_v47, %v11228_v19  ;;  %v11232_v47 = vld [vmem:[#allocation87_spill] sm:$0xff] }
 0x5d8   :  { %v2608_v34 = vpop.f32.mrf.mxu1  ;;  %v2679_v50 = vpop.f32.mrf.mxu0  ;;  %v299_v19 = vadd.f32 %v11232_v47, %v6123_v42 }
 0x5d9   :  { %v2761_v58 = vadd.f32 %v2607_v46, %v11229_v8  ;;  %v2609_v39 = vadd.f32 %v2608_v34, %v10977_v17  ;;  %v2680_v31 = vadd.f32 %v2679_v50, %v11231_v30  ;;  %v2678_v34 = vadd.f32 %v2677_v53, %v10853_v56 }
 0x5db   :  { %v4265_v20 = vmul.f32 -1.442695, %v2761_v58  ;;  %v2768_v52 = vadd.f32 %v2609_v39, %v11230_v57  ;;  %v2782_v16 = vadd.f32 %v2680_v31, %v299_v19  ;;  %v11233_v39 = vld [vmem:[#allocation97_spill] sm:$0xff] }
 0x5dc   :  { %v303_v57 = vadd.f32 %v11233_v39, %v6120_v2 }
 0x5dd   :  { %4371 = vpow2.f32 %v4265_v20  ;;  %v4266_v1 = vmul.f32 -1.442695, %v2768_v52  ;;  %v4267_v58 = vmul.f32 -1.442695, %v2782_v16 }
 0x5df   :  { %4373 = vpow2.f32 %v4266_v1 }
 0x5ea   :  { %v4372_v24 = vpop.eup %4371 }
 0x5eb   :  { %v2765_v55 = vadd.f32 1.0, %v4372_v24 }
 0x5ec   :  { %v4374_v8 = vpop.eup %4373 }
 0x5ed   :  { %4375 = vrcp.f32 %v2765_v55  ;;  %v2772_v46 = vadd.f32 1.0, %v4374_v8 }
 0x5ee   :  { %4377 = vpow2.f32 %v4267_v58  ;;  %v11234_v58 = vld [vmem:[#allocation109_spill] sm:$0xff] }
 0x5ef   :  { %4379 = vrcp.f32 %v2772_v46  ;;  %v410_v46 = vadd.f32 %v11234_v58, %v5019_v28 }
 0x5fa   :  { %v4376_v20 = vpop.eup %4375 }
 0x5fb   :  { %v2775_v52 = vmul.f32 %v4376_v20, %v2678_v34  ;;  %v4378_v1 = vpop.eup %4377 }
 0x5fc   :  { %v4380_v50 = vpop.eup %4379  ;;  %v2786_v55 = vadd.f32 1.0, %v4378_v1 }
 0x5fd   :  { %v2776_v24 = vadd.f32 %v2775_v52, %v303_v57  ;;  %v2778_v30 = vsub.f32 1.0, %v4380_v50  ;;  %v2780_v16 = vmul.f32 %v4380_v50, %v8119_v27  ;;  %v11235_v52 = vld [vmem:[#allocation111_spill] sm:$0xff] }
 0x5ff   :  { %4381 = vtanh.f32 %v2776_v24  ;;  %v412_v24 = vadd.f32 %v11235_v52, %v5024_v29  ;;  %v9037_v52 = vld [vmem:[%s10271_s3 + $0x268] sm:$0xff] }
 0x600   :  { %4383 = vrcp.f32 %v2786_v55 }
 0x60c   :  { %v4382_v47 = vpop.eup %4381 }
 0x60d   :  { %v2779_v31 = vmul.f32 %v4382_v47, %v2778_v30  ;;  %v4384_v57 = vpop.eup %4383 }
 0x60f   :  { %v8979_v19 = vadd.f32 %v2780_v16, %v2779_v31 }
 0x611   :  { %v4199_v53 = vadd.f32 %v8979_v19, %v8128_v60 }
 0x613   :  { %4207 = vst [vmem:[%s10274_s5 + $0x20] sm:$0xff] %v4199_v53 }
 0x616   :  { %v2748_v8 = vpop.f32.mrf.mxu1 }
 0x617   :  { %v2749_v34 = vadd.f32 %v2748_v8, %v6138_v26 }
 0x618   :  { %v2750_v20 = vpop.f32.mrf.mxu1 }
 0x619   :  { %v2789_v39 = vadd.f32 %v2749_v34, %v410_v46  ;;  %v2751_v30 = vadd.f32 %v2750_v20, %v6145_v33  ;;  %v8998_v20 = vld [vmem:[%s10271_s3 + $0x2f0] sm:$0xff] }
 0x61b   :  { %v4268_v1 = vmul.f32 -1.442695, %v2789_v39  ;;  %v2796_v50 = vmul.f32 %v4384_v57, %v2751_v30  ;;  %v9007_v30 = vld [vmem:[%s10271_s3 + $0x2c8] sm:$0xff]  ;;  %v9030_v57 = vld [vmem:[%s10271_s3 + $0x290] sm:$0xff] }
 0x61d   :  { %4385 = vpow2.f32 %v4268_v1  ;;  %v2797_v55 = vadd.f32 %v2796_v50, %v412_v24  ;;  %v9044_v24 = vld [vmem:[%s10271_s3 + $0x260] sm:$0xff]  ;;  %v11241_v1 = vld [vmem:[#allocation47_spill] sm:$0xff] }
 0x61e   :  { %v11243_v50 = vld [vmem:[#allocation52_spill] sm:$0xff] }
 0x62a   :  { %v4386_v47 = vpop.eup %4385 }
 0x62b   :  { %v2793_v31 = vadd.f32 1.0, %v4386_v47  ;;  %v9303_v47 = vld [vmem:[%s10271_s3 + $0x4d8] sm:$0xff] }
 0x62c   :  { %11246 = vst [vmem:[#allocation44_spill] sm:$0xff] %v9303_v47 }
 0x62d   :  { %4387 = vrcp.f32 %v2793_v31  ;;  %v11247_v31 = vld [vmem:[#allocation61_spill] sm:$0xff] }
 0x62e   :  { %4389 = vtanh.f32 %v2797_v55  ;;  %v11245_v55 = vld [vmem:[#allocation57_spill] sm:$0xff] }
 0x63a   :  { %v4388_v16 = vpop.eup %4387 }
 0x63b   :  { %v2799_v53 = vsub.f32 1.0, %v4388_v16  ;;  %v4390_v58 = vpop.eup %4389  ;;  %v2801_v46 = vmul.f32 %v4388_v16, %v8128_v60  ;;  %v9014_v60 = vld [vmem:[%s10271_s3 + $0x2c0] sm:$0xff]  ;;  %v9310_v16 = vld [vmem:[%s10271_s3 + $0x4d0] sm:$0xff] }
 0x63c   :  { %11248 = vst [vmem:[#allocation49_spill] sm:$0xff] %v9310_v16 }
 0x63d   :  { %v2800_v8 = vmul.f32 %v4390_v58, %v2799_v53  ;;  %v11249_v53 = vld [vmem:[#allocation68_spill] sm:$0xff]  ;;  %v9317_v58 = vld [vmem:[%s10271_s3 + $0x4a8] sm:$0xff] }
 0x63e   :  { %11250 = vst [vmem:[#allocation54_spill] sm:$0xff] %v9317_v58 }
 0x63f   :  { %v8993_v34 = vadd.f32 %v2801_v46, %v2800_v8  ;;  %v11251_v8 = vld [vmem:[#allocation78_spill] sm:$0xff]  ;;  %v9324_v46 = vld [vmem:[%s10271_s3 + $0x4a0] sm:$0xff] }
 0x640   :  { %11252 = vst [vmem:[#allocation58_spill] sm:$0xff] %v9324_v46 }
 0x641   :  { %3062 = vmatprep.mubr.f32.mxu0 %v8993_v34  ;;  %v4198_v39 = vadd.f32 %v8993_v34, %v8119_v27  ;;  %3133 = vmatprep.mubr.f32.mxu1 %v8993_v34  ;;  %v9024_v27 = vld [vmem:[%s10271_s3 + $0x298] sm:$0xff] }
 0x642   :  { %3063 = vmatmul.mubr.f32.vlgmr.msra.gmra.mxu0 %v8979_v19  ;;  %3134 = vmatmul.mubr.f32.vlgmr.msra.gmra.mxu1 %v8979_v19 }
 0x643   :  { %4206 = vst [vmem:[%s10274_s5 + $0x18] sm:$0xff] %v4198_v39  ;;  %3141 = vmatpush1.msra.mxu0 %v8998_v20  ;;  %3204 = vmatprep.mubr.f32.mxu0 %v8993_v34  ;;  %v11253_v39 = vld [vmem:[#allocation89_spill] sm:$0xff] }
 0x644   :  { %3142 = vmatprep.subr.mxu0 %v9007_v30  ;;  %3457 = vmatpush1.msra.mxu1 %v8207_v37  ;;  %v9051_v37 = vld [vmem:[%s10271_s3 + $0x238] sm:$0xff] }
 0x645   :  { %3143 = vmatpush1.msra.mxu0 %v9014_v60  ;;  %3458 = vmatprep.subr.mxu1 %v8216_v3  ;;  %v9058_v3 = vld [vmem:[%s10271_s3 + $0x230] sm:$0xff] }
 0x646   :  { %3144 = vmatprep.subr.mxu0 %v9024_v27  ;;  %3459 = vmatpush1.msra.mxu1 %v8224_v6  ;;  %v9065_v6 = vld [vmem:[%s10271_s3 + $0x208] sm:$0xff] }
 0x647   :  { %3145 = vmatpush1.msra.mxu0 %v9030_v57  ;;  %3460 = vmatprep.subr.mxu1 %v8235_v22  ;;  %v9072_v22 = vld [vmem:[%s10271_s3 + $0x200] sm:$0xff] }
 0x648   :  { %3146 = vmatprep.subr.mxu0 %v9037_v52  ;;  %3461 = vmatpush1.msra.mxu1 %v8247_v12  ;;  %v9079_v12 = vld [vmem:[%s10271_s3 + $0x1d8] sm:$0xff] }
 0x649   :  { %3147 = vmatpush1.msra.mxu0 %v9044_v24  ;;  %3462 = vmatprep.subr.mxu1 %v8259_v25  ;;  %v9086_v25 = vld [vmem:[%s10271_s3 + $0x1d0] sm:$0xff] }
 0x64a   :  { %3148 = vmatprep.subr.mxu0 %v9051_v37  ;;  %3463 = vmatpush1.msra.mxu1 %v8276_v11  ;;  %v9093_v11 = vld [vmem:[%s10271_s3 + $0x1a8] sm:$0xff] }
 0x64b   :  { %3149 = vmatpush1.msra.mxu0 %v9058_v3  ;;  %3464 = vmatprep.subr.mxu1 %v8288_v45  ;;  %v9100_v45 = vld [vmem:[%s10271_s3 + $0x1a0] sm:$0xff] }
 0x64c   :  { %3150 = vmatprep.subr.mxu0 %v9065_v6  ;;  %3465 = vmatpush1.msra.mxu1 %v8300_v4  ;;  %v9107_v4 = vld [vmem:[%s10271_s3 + $0x178] sm:$0xff] }
 0x64d   :  { %3151 = vmatpush1.msra.mxu0 %v9072_v22  ;;  %3466 = vmatprep.subr.mxu1 %v8312_v35  ;;  %v9114_v35 = vld [vmem:[%s10271_s3 + $0x170] sm:$0xff] }
 0x64e   :  { %3152 = vmatprep.subr.mxu0 %v9079_v12  ;;  %3467 = vmatpush1.msra.mxu1 %v8324_v43  ;;  %v9121_v43 = vld [vmem:[%s10271_s3 + $0x148] sm:$0xff] }
 0x64f   :  { %3153 = vmatpush1.msra.mxu0 %v9086_v25  ;;  %3468 = vmatprep.subr.mxu1 %v8336_v23  ;;  %v9128_v23 = vld [vmem:[%s10271_s3 + $0x140] sm:$0xff] }
 0x650   :  { %3154 = vmatprep.subr.mxu0 %v9093_v11  ;;  %3469 = vmatpush1.msra.mxu1 %v8348_v49  ;;  %v9135_v49 = vld [vmem:[%s10271_s3 + $0x118] sm:$0xff] }
 0x651   :  { %3155 = vmatpush1.msra.mxu0 %v9100_v45  ;;  %3470 = vmatprep.subr.mxu1 %v8360_v51  ;;  %v9142_v51 = vld [vmem:[%s10271_s3 + $0x110] sm:$0xff] }
 0x652   :  { %3156 = vmatprep.subr.mxu0 %v9107_v4  ;;  %3471 = vmatpush1.msra.mxu1 %v8372_v14  ;;  %v9149_v14 = vld [vmem:[%s10271_s3 + $0xe8] sm:$0xff] }
 0x653   :  { %3157 = vmatpush1.msra.mxu0 %v9114_v35  ;;  %3472 = vmatprep.subr.mxu1 %v8384_v15  ;;  %v9156_v15 = vld [vmem:[%s10271_s3 + $0xe0] sm:$0xff] }
 0x654   :  { %3158 = vmatprep.subr.mxu0 %v9121_v43  ;;  %3473 = vmatpush1.msra.mxu1 %v8396_v32  ;;  %v9163_v32 = vld [vmem:[%s10271_s3 + $0xb8] sm:$0xff] }
 0x655   :  { %3159 = vmatpush1.msra.mxu0 %v9128_v23  ;;  %3474 = vmatprep.subr.mxu1 %v8408_v54  ;;  %v9170_v54 = vld [vmem:[%s10271_s3 + $0xb0] sm:$0xff] }
 0x656   :  { %3160 = vmatprep.subr.mxu0 %v9135_v49  ;;  %3475 = vmatpush1.msra.mxu1 %v8420_v9  ;;  %v9177_v9 = vld [vmem:[%s10271_s3 + $0x88] sm:$0xff] }
 0x657   :  { %3161 = vmatpush1.msra.mxu0 %v9142_v51  ;;  %3476 = vmatprep.subr.mxu1 %v8432_v21  ;;  %v9184_v21 = vld [vmem:[%s10271_s3 + $0x80] sm:$0xff] }
 0x658   :  { %3162 = vmatprep.subr.mxu0 %v9149_v14  ;;  %3477 = vmatpush1.msra.mxu1 %v8442_v62  ;;  %v9191_v62 = vld [vmem:[%s10271_s3 + $0x58] sm:$0xff] }
 0x659   :  { %3163 = vmatpush1.msra.mxu0 %v9156_v15  ;;  %3478 = vmatprep.subr.mxu1 %v8454_v18  ;;  %v9198_v18 = vld [vmem:[%s10271_s3 + $0x50] sm:$0xff] }
 0x65a   :  { %3164 = vmatprep.subr.mxu0 %v9163_v32  ;;  %3479 = vmatpush1.msra.mxu1 %v8466_v63  ;;  %v9205_v63 = vld [vmem:[%s10271_s3 + $0x28] sm:$0xff] }
 0x65b   :  { %3165 = vmatpush1.msra.mxu0 %v9170_v54  ;;  %3480 = vmatprep.subr.mxu1 %v8478_v44  ;;  %v9212_v44 = vld [vmem:[%s10271_s3 + $0x20] sm:$0xff] }
 0x65c   :  { %3166 = vmatprep.subr.mxu0 %v9177_v9  ;;  %3481 = vmatpush1.msra.mxu1 %v8490_v48  ;;  %v9219_v48 = vld [vmem:[%s10271_s3 + $0x5f8] sm:$0xff] }
 0x65d   :  { %3167 = vmatpush1.msra.mxu0 %v9184_v21  ;;  %3482 = vmatprep.subr.mxu1 %v8502_v7  ;;  %v9226_v7 = vld [vmem:[%s10271_s3 + $0x5f0] sm:$0xff] }
 0x65e   :  { %3168 = vmatprep.subr.mxu0 %v9191_v62  ;;  %3483 = vmatpush1.msra.mxu1 %v8514_v41  ;;  %v9233_v41 = vld [vmem:[%s10271_s3 + $0x5c8] sm:$0xff] }
 0x65f   :  { %3169 = vmatpush1.msra.mxu0 %v9198_v18  ;;  %3484 = vmatprep.subr.mxu1 %v8526_v61  ;;  %v9240_v61 = vld [vmem:[%s10271_s3 + $0x5c0] sm:$0xff] }
 0x660   :  { %3170 = vmatprep.subr.mxu0 %v9205_v63  ;;  %3485 = vmatpush1.msra.mxu1 %v8538_v0  ;;  %v9247_v0 = vld [vmem:[%s10271_s3 + $0x598] sm:$0xff] }
 0x661   :  { %3171 = vmatpush1.msra.mxu0 %v9212_v44  ;;  %3486 = vmatprep.subr.mxu1 %v8550_v38  ;;  %v9254_v38 = vld [vmem:[%s10271_s3 + $0x590] sm:$0xff] }
 0x662   :  { %3172 = vmatprep.subr.mxu0 %v9219_v48  ;;  %3487 = vmatpush1.msra.mxu1 %v8562_v59  ;;  %11236 = vst [vmem:[#allocation9_spill] sm:$0xff] %v9254_v38  ;;  %v9261_v59 = vld [vmem:[%s10271_s3 + $0x568] sm:$0xff] }
 0x663   :  { %3173 = vmatpush2.msra.mxu0 %v9226_v7  ;;  %3488 = vmatprep.subr.mxu1 %v8574_v13  ;;  %11237 = vst [vmem:[#allocation121_spill] sm:$0xff] %v9261_v59  ;;  %v9268_v13 = vld [vmem:[%s10271_s3 + $0x560] sm:$0xff] }
 0x664   :  { %3174 = vmatprep.subr.mxu0 %v9233_v41  ;;  %3489 = vmatpush2.msra.mxu1 %v8586_v10  ;;  %11238 = vst [vmem:[#allocation119_spill] sm:$0xff] %v9268_v13  ;;  %v9275_v10 = vld [vmem:[%s10271_s3 + $0x538] sm:$0xff] }
 0x665   :  { %3175 = vmatpush2.msra.mxu0 %v9240_v61  ;;  %3490 = vmatprep.subr.mxu1 %v8598_v36  ;;  %11239 = vst [vmem:[#allocation124_spill] sm:$0xff] %v9275_v10  ;;  %v9282_v36 = vld [vmem:[%s10271_s3 + $0x530] sm:$0xff] }
 0x666   :  { %3176 = vmatprep.subr.mxu0 %v9247_v0  ;;  %3491 = vmatpush2.msra.mxu1 %v8610_v5  ;;  %11240 = vst [vmem:[#allocation126_spill] sm:$0xff] %v9282_v36  ;;  %v9289_v5 = vld [vmem:[%s10271_s3 + $0x508] sm:$0xff] }
 0x667   :  { %3177 = vmatpush2.msra.mxu0 %v9254_v38  ;;  %3492 = vmatprep.subr.mxu1 %v8622_v40  ;;  %11242 = vst [vmem:[#allocation35_spill] sm:$0xff] %v9289_v5  ;;  %v9296_v40 = vld [vmem:[%s10271_s3 + $0x500] sm:$0xff] }
 0x668   :  { %3178 = vmatprep.subr.mxu0 %v9261_v59  ;;  %3493 = vmatpush2.msra.mxu1 %v11241_v1  ;;  %11244 = vst [vmem:[#allocation39_spill] sm:$0xff] %v9296_v40  ;;  %v9331_v1 = vld [vmem:[%s10271_s3 + $0x478] sm:$0xff] }
 0x669   :  { %3179 = vmatpush2.msra.mxu0 %v9268_v13  ;;  %3494 = vmatprep.subr.mxu1 %v11243_v50  ;;  %11254 = vst [vmem:[#allocation62_spill] sm:$0xff] %v9331_v1  ;;  %v11255_v50 = vld [vmem:[#allocation99_spill] sm:$0xff] }
 0x66a   :  { %3180 = vmatprep.subr.mxu0 %v9275_v10  ;;  %3495 = vmatpush2.msra.mxu1 %v11245_v55  ;;  %v9338_v55 = vld [vmem:[%s10271_s3 + $0x470] sm:$0xff] }
 0x66b   :  { %3181 = vmatpush2.msra.mxu0 %v9282_v36  ;;  %3496 = vmatprep.subr.mxu1 %v11247_v31  ;;  %11256 = vst [vmem:[#allocation67_spill] sm:$0xff] %v9338_v55  ;;  %v11257_v31 = vld [vmem:[#allocation110_spill] sm:$0xff] }
 0x66c   :  { %3182 = vmatprep.subr.mxu0 %v9289_v5  ;;  %3497 = vmatpush2.msra.mxu1 %v11249_v53  ;;  %v9345_v53 = vld [vmem:[%s10271_s3 + $0x448] sm:$0xff]  ;;  %v11354_v5 = vld [vmem:[#allocation6_spill] sm:$0xff] }
 0x66d   :  { %3183 = vmatpush2.msra.mxu0 %v9296_v40  ;;  %3498 = vmatprep.subr.mxu1 %v11251_v8  ;;  %11258 = vst [vmem:[#allocation4_spill] sm:$0xff] %v9345_v53  ;;  %v11259_v8 = vld [vmem:[#allocation120_spill] sm:$0xff] }
 0x66e   :  { %3184 = vmatprep.subr.mxu0 %v9303_v47  ;;  %3499 = vmatpush2.msra.mxu1 %v11253_v39  ;;  %v9352_v39 = vld [vmem:[%s10271_s3 + $0x440] sm:$0xff]  ;;  %v11298_v47 = vld [vmem:[#allocation93_spill] sm:$0xff] }
 0x66f   :  { %3185 = vmatpush2.msra.mxu0 %v9310_v16  ;;  %3500 = vmatprep.subr.mxu1 %v11255_v50  ;;  %11260 = vst [vmem:[#allocation5_spill] sm:$0xff] %v9352_v39  ;;  %v11261_v50 = vld [vmem:[#allocation127_spill] sm:$0xff]  ;;  %v11297_v16 = vld [vmem:[#allocation132_spill] sm:$0xff] }
 0x670   :  { %3186 = vmatprep.subr.mxu0 %v9317_v58  ;;  %3501 = vmatpush2.msra.mxu1 %v11257_v31  ;;  %v9359_v31 = vld [vmem:[%s10271_s3 + $0x418] sm:$0xff]  ;;  %v11295_v58 = vld [vmem:[#allocation130_spill] sm:$0xff] }
 0x671   :  { %3187 = vmatpush2.msra.mxu0 %v9324_v46  ;;  %3502 = vmatprep.subr.mxu1 %v11259_v8  ;;  %11262 = vst [vmem:[#allocation87_spill] sm:$0xff] %v9359_v31  ;;  %v11263_v46 = vld [vmem:[#allocation41_spill] sm:$0xff]  ;;  %v9366_v8 = vld [vmem:[%s10271_s3 + $0x410] sm:$0xff] }
 0x672   :  { %3188 = vmatprep.subr.mxu0 %v9331_v1  ;;  %3503 = vmatpush2.msra.mxu1 %v11261_v50  ;;  %11264 = vst [vmem:[#allocation97_spill] sm:$0xff] %v9366_v8  ;;  %v11265_v1 = vld [vmem:[#allocation51_spill] sm:$0xff]  ;;  %v9373_v50 = vld [vmem:[%s10271_s3 + $0x3e8] sm:$0xff] }
 0x673   :  { %3189 = vmatpush2.msra.mxu0 %v9338_v55  ;;  %3504 = vmatprep.subr.mxu1 %v11263_v46  ;;  %11266 = vst [vmem:[#allocation109_spill] sm:$0xff] %v9373_v50  ;;  %v11267_v55 = vld [vmem:[#allocation60_spill] sm:$0xff] }
 0x674   :  { %3190 = vmatprep.subr.mxu0 %v9345_v53  ;;  %3505 = vmatpush2.msra.mxu1 %v11265_v1  ;;  %v9380_v46 = vld [vmem:[%s10271_s3 + $0x3e0] sm:$0xff]  ;;  %v11269_v53 = vld [vmem:[#allocation70_spill] sm:$0xff]  ;;  %v9387_v1 = vld [vmem:[%s10271_s3 + $0x3b8] sm:$0xff] }
 0x675   :  { %3191 = vmatpush2.msra.mxu0 %v9352_v39  ;;  %3506 = vmatprep.subr.mxu1 %v11267_v55  ;;  %11268 = vst [vmem:[#allocation111_spill] sm:$0xff] %v9380_v46  ;;  %11270 = vst [vmem:[#allocation47_spill] sm:$0xff] %v9387_v1  ;;  %v11271_v39 = vld [vmem:[#allocation80_spill] sm:$0xff]  ;;  %v9394_v55 = vld [vmem:[%s10271_s3 + $0x3b0] sm:$0xff] }
 0x676   :  { %3192 = vmatprep.subr.mxu0 %v9359_v31  ;;  %3507 = vmatpush2.msra.mxu1 %v11269_v53  ;;  %11272 = vst [vmem:[#allocation52_spill] sm:$0xff] %v9394_v55  ;;  %v11273_v31 = vld [vmem:[#allocation129_spill] sm:$0xff] }
 0x677   :  { %3193 = vmatpush2.msra.mxu0 %v9366_v8  ;;  %3508 = vmatprep.subr.mxu1 %v11271_v39  ;;  %v9401_v53 = vld [vmem:[%s10271_s3 + $0x388] sm:$0xff]  ;;  %v9408_v39 = vld [vmem:[%s10271_s3 + $0x380] sm:$0xff] }
 0x678   :  { %3194 = vmatprep.subr.mxu0 %v9373_v50  ;;  %3509 = vmatpush2.msra.mxu1 %v11273_v31  ;;  %11274 = vst [vmem:[#allocation57_spill] sm:$0xff] %v9401_v53  ;;  %v11275_v8 = vld [vmem:[#allocation133_spill] sm:$0xff]  ;;  %11276 = vst [vmem:[#allocation61_spill] sm:$0xff] %v9408_v39  ;;  %v11277_v50 = vld [vmem:[#allocation15_spill] sm:$0xff] }
 0x679   :  { %3195 = vmatpush2.msra.mxu0 %v9380_v46  ;;  %3510 = vmatprep.subr.mxu1 %v11275_v8  ;;  %v9415_v31 = vld [vmem:[%s10271_s3 + $0x358] sm:$0xff]  ;;  %v11279_v46 = vld [vmem:[#allocation101_spill] sm:$0xff]  ;;  %v9422_v8 = vld [vmem:[%s10271_s3 + $0x350] sm:$0xff] }
 0x67a   :  { %3196 = vmatprep.subr.mxu0 %v9387_v1  ;;  %3511 = vmatpush2.msra.mxu1 %v11277_v50  ;;  %11278 = vst [vmem:[#allocation68_spill] sm:$0xff] %v9415_v31  ;;  %11280 = vst [vmem:[#allocation78_spill] sm:$0xff] %v9422_v8  ;;  %v11281_v1 = vld [vmem:[#allocation113_spill] sm:$0xff] }
 0x67b   :  { %3197 = vmatpush2.msra.mxu0 %v9394_v55  ;;  %3512 = vmatprep.subr.mxu1 %v11279_v46  ;;  %v9429_v50 = vld [vmem:[%s10271_s3 + $0x328] sm:$0xff]  ;;  %v11283_v55 = vld [vmem:[#allocation116_spill] sm:$0xff] }
 0x67c   :  { %3198 = vmatprep.subr.mxu0 %v9401_v53  ;;  %3513 = vmatpush2.msra.mxu1 %v11281_v1  ;;  %11282 = vst [vmem:[#allocation89_spill] sm:$0xff] %v9429_v50  ;;  %v9436_v46 = vld [vmem:[%s10271_s3 + $0x320] sm:$0xff]  ;;  %v11285_v53 = vld [vmem:[#allocation106_spill] sm:$0xff]  ;;  %v11286_v1 = vld [vmem:[#allocation117_spill] sm:$0xff] }
 0x67d   :  { %3199 = vmatpush2.msra.mxu0 %v9408_v39  ;;  %3514 = vmatprep.subr.mxu1 %v11283_v55  ;;  %11284 = vst [vmem:[#allocation99_spill] sm:$0xff] %v9436_v46  ;;  %v11287_v39 = vld [vmem:[#allocation65_spill] sm:$0xff]  ;;  %v11288_v55 = vld [vmem:[#allocation76_spill] sm:$0xff] }
 0x67e   :  { %3200 = vmatprep.subr.mxu0 %v9415_v31  ;;  %3515 = vmatpush2.msra.mxu1 %v11285_v53  ;;  %v4472_v31 = vld [vmem:[%s10271_s3 + $0x2e8] sm:$0xff]  ;;  %v4473_v53 = vld [vmem:[%s10271_s3 + $0x2e0] sm:$0xff] }
 0x67f   :  { %3201 = vmatpush2.msra.mxu0 %v9422_v8  ;;  %3516 = vmatprep.subr.mxu1 %v11286_v1  ;;  %v11289_v1 = vld [vmem:[#allocation86_spill] sm:$0xff]  ;;  %v11294_v8 = vld [vmem:[#allocation128_spill] sm:$0xff] }
 0x680   :  { %3202 = vmatprep.subr.mxu0 %v9429_v50  ;;  %3517 = vmatpush2.msra.mxu1 %v11287_v39  ;;  %v11290_v50 = vld [vmem:[#allocation73_spill] sm:$0xff]  ;;  %v11291_v39 = vld [vmem:[#allocation102_spill] sm:$0xff] }
 0x681   :  { %3203 = vmatpush2.msra.mxu0 %v9436_v46  ;;  %3518 = vmatprep.subr.mxu1 %v11288_v55  ;;  %v11292_v46 = vld [vmem:[#allocation77_spill] sm:$0xff]  ;;  %v11293_v55 = vld [vmem:[#allocation83_spill] sm:$0xff] }
 0x682   :  { %3205 = vmatmul.mubr.f32.vlgmr.msra.gmra.mxu0 %v8979_v19  ;;  %3527 = vmatprep.subr.mxu0 %v4472_v31  ;;  %v11296_v31 = vld [vmem:[#allocation91_spill] sm:$0xff] }
 0x683   :  { %3528 = vmatpush1.msra.mxu0 %v4473_v53  ;;  %3519 = vmatpush2.msra.mxu1 %v11289_v1  ;;  %v11299_v53 = vld [vmem:[#allocation135_spill] sm:$0xff] }
 0x684   :  { %3529 = vmatprep.subr.mxu0 %v11290_v50  ;;  %3598 = vmatprep.subr.mxu1 %v11291_v39  ;;  %v11300_v1 = vld [vmem:[#allocation95_spill] sm:$0xff]  ;;  %v11301_v50 = vld [vmem:[#allocation98_spill] sm:$0xff] }
 0x685   :  { %3530 = vmatpush1.msra.mxu0 %v11292_v46  ;;  %v11302_v39 = vld [vmem:[#allocation103_spill] sm:$0xff]  ;;  %v11303_v46 = vld [vmem:[#allocation18_spill] sm:$0xff] }
 0x686   :  { %3531 = vmatprep.subr.mxu0 %v11293_v55  ;;  %v11304_v55 = vld [vmem:[#allocation19_spill] sm:$0xff] }
 0x687   :  { %3532 = vmatpush1.msra.mxu0 %v11294_v8  ;;  %v11305_v8 = vld [vmem:[#allocation20_spill] sm:$0xff] }
 0x688   :  { %3533 = vmatprep.subr.mxu0 %v11295_v58  ;;  %v11306_v58 = vld [vmem:[#allocation21_spill] sm:$0xff] }
 0x689   :  { %3534 = vmatpush1.msra.mxu0 %v11296_v31  ;;  %v11307_v31 = vld [vmem:[#allocation22_spill] sm:$0xff] }
 0x68a   :  { %3535 = vmatprep.subr.mxu0 %v11297_v16  ;;  %v11308_v16 = vld [vmem:[#allocation23_spill] sm:$0xff] }
 0x68b   :  { %3536 = vmatpush1.msra.mxu0 %v11298_v47  ;;  %v11309_v47 = vld [vmem:[#allocation24_spill] sm:$0xff] }
 0x68c   :  { %3537 = vmatprep.subr.mxu0 %v11299_v53  ;;  %v11310_v53 = vld [vmem:[#allocation25_spill] sm:$0xff] }
 0x68d   :  { %3538 = vmatpush1.msra.mxu0 %v11300_v1  ;;  %v11311_v1 = vld [vmem:[#allocation26_spill] sm:$0xff] }
 0x68e   :  { %3539 = vmatprep.subr.mxu0 %v11301_v50  ;;  %v11312_v50 = vld [vmem:[#allocation27_spill] sm:$0xff] }
 0x68f   :  { %3540 = vmatpush1.msra.mxu0 %v11302_v39  ;;  %v11313_v39 = vld [vmem:[#allocation28_spill] sm:$0xff] }
 0x690   :  { %3541 = vmatprep.subr.mxu0 %v11303_v46  ;;  %v11314_v46 = vld [vmem:[#allocation29_spill] sm:$0xff] }
 0x691   :  { %3542 = vmatpush1.msra.mxu0 %v11304_v55  ;;  %v11315_v55 = vld [vmem:[#allocation30_spill] sm:$0xff] }
 0x692   :  { %3543 = vmatprep.subr.mxu0 %v11305_v8  ;;  %v11316_v8 = vld [vmem:[#allocation31_spill] sm:$0xff] }
 0x693   :  { %3544 = vmatpush1.msra.mxu0 %v11306_v58  ;;  %v11317_v58 = vld [vmem:[#allocation32_spill] sm:$0xff] }
 0x694   :  { %3545 = vmatprep.subr.mxu0 %v11307_v31  ;;  %v11318_v31 = vld [vmem:[#allocation33_spill] sm:$0xff] }
 0x695   :  { %3546 = vmatpush1.msra.mxu0 %v11308_v16  ;;  %v11319_v16 = vld [vmem:[#allocation34_spill] sm:$0xff] }
 0x696   :  { %3547 = vmatprep.subr.mxu0 %v11309_v47  ;;  %v11320_v47 = vld [vmem:[#allocation36_spill] sm:$0xff] }
 0x697   :  { %3548 = vmatpush1.msra.mxu0 %v11310_v53  ;;  %v11321_v53 = vld [vmem:[#allocation38_spill] sm:$0xff] }
 0x698   :  { %3549 = vmatprep.subr.mxu0 %v11311_v1  ;;  %v11322_v1 = vld [vmem:[#allocation40_spill] sm:$0xff] }
 0x699   :  { %3550 = vmatpush1.msra.mxu0 %v11312_v50  ;;  %v11323_v50 = vld [vmem:[#allocation42_spill] sm:$0xff] }
 0x69a   :  { %3551 = vmatprep.subr.mxu0 %v11313_v39  ;;  %v11324_v39 = vld [vmem:[#allocation45_spill] sm:$0xff] }
 0x69b   :  { %3552 = vmatpush1.msra.mxu0 %v11314_v46  ;;  %v11325_v46 = vld [vmem:[#allocation50_spill] sm:$0xff] }
 0x69c   :  { %3553 = vmatprep.subr.mxu0 %v11315_v55  ;;  %v11326_v55 = vld [vmem:[#allocation55_spill] sm:$0xff] }
 0x69d   :  { %3554 = vmatpush1.msra.mxu0 %v11316_v8  ;;  %v11327_v8 = vld [vmem:[#allocation59_spill] sm:$0xff] }
 0x69e   :  { %3555 = vmatprep.subr.mxu0 %v11317_v58  ;;  %v11328_v58 = vld [vmem:[#allocation63_spill] sm:$0xff] }
 0x69f   :  { %3556 = vmatpush1.msra.mxu0 %v11318_v31  ;;  %v11329_v31 = vld [vmem:[#allocation74_spill] sm:$0xff] }
 0x6a0   :  { %3557 = vmatprep.subr.mxu0 %v11319_v16  ;;  %v11330_v16 = vld [vmem:[#allocation84_spill] sm:$0xff] }
 0x6a1   :  { %3558 = vmatpush1.msra.mxu0 %v11320_v47  ;;  %v11331_v47 = vld [vmem:[#allocation94_spill] sm:$0xff] }
 0x6a2   :  { %3559 = vmatprep.subr.mxu0 %v11321_v53  ;;  %v11332_v53 = vld [vmem:[#allocation7_spill] sm:$0xff] }
 0x6a3   :  { %3560 = vmatpush2.msra.mxu0 %v11322_v1  ;;  %v11333_v1 = vld [vmem:[#allocation48_spill] sm:$0xff] }
 0x6a4   :  { %3561 = vmatprep.subr.mxu0 %v11323_v50  ;;  %v11334_v50 = vld [vmem:[#allocation125_spill] sm:$0xff] }
 0x6a5   :  { %3562 = vmatpush2.msra.mxu0 %v11324_v39  ;;  %v11335_v39 = vld [vmem:[#allocation37_spill] sm:$0xff] }
 0x6a6   :  { %3563 = vmatprep.subr.mxu0 %v11325_v46  ;;  %v11336_v46 = vld [vmem:[#allocation46_spill] sm:$0xff] }
 0x6a7   :  { %3564 = vmatpush2.msra.mxu0 %v11326_v55  ;;  %v11337_v55 = vld [vmem:[#allocation56_spill] sm:$0xff] }
 0x6a8   :  { %3565 = vmatprep.subr.mxu0 %v11327_v8  ;;  %v11338_v8 = vld [vmem:[#allocation64_spill] sm:$0xff] }
 0x6a9   :  { %3566 = vmatpush2.msra.mxu0 %v11328_v58  ;;  %v11339_v58 = vld [vmem:[#allocation75_spill] sm:$0xff] }
 0x6aa   :  { %3567 = vmatprep.subr.mxu0 %v11329_v31  ;;  %v11340_v31 = vld [vmem:[#allocation85_spill] sm:$0xff] }
 0x6ab   :  { %3568 = vmatpush2.msra.mxu0 %v11330_v16  ;;  %v11341_v16 = vld [vmem:[#allocation131_spill] sm:$0xff] }
 0x6ac   :  { %3569 = vmatprep.subr.mxu0 %v11331_v47  ;;  %v11342_v47 = vld [vmem:[#allocation134_spill] sm:$0xff] }
 0x6ad   :  { %3570 = vmatpush2.msra.mxu0 %v11332_v53  ;;  %v11343_v53 = vld [vmem:[#allocation17_spill] sm:$0xff] }
 0x6ae   :  { %3571 = vmatprep.subr.mxu0 %v11333_v1  ;;  %v11344_v1 = vld [vmem:[#allocation82_spill] sm:$0xff] }
 0x6af   :  { %3572 = vmatpush2.msra.mxu0 %v11334_v50  ;;  %v11345_v50 = vld [vmem:[#allocation115_spill] sm:$0xff] }
 0x6b0   :  { %3573 = vmatprep.subr.mxu0 %v11335_v39  ;;  %v11346_v39 = vld [vmem:[#allocation13_spill] sm:$0xff] }
 0x6b1   :  { %3574 = vmatpush2.msra.mxu0 %v11336_v46  ;;  %v11347_v46 = vld [vmem:[#allocation66_spill] sm:$0xff] }
 0x6b2   :  { %3575 = vmatprep.subr.mxu0 %v11337_v55  ;;  %v11348_v55 = vld [vmem:[#allocation118_spill] sm:$0xff] }
 0x6b3   :  { %3576 = vmatpush2.msra.mxu0 %v11338_v8  ;;  %v11349_v8 = vld [vmem:[#allocation71_spill] sm:$0xff] }
 0x6b4   :  { %3577 = vmatprep.subr.mxu0 %v11339_v58  ;;  %v11350_v58 = vld [vmem:[#allocation81_spill] sm:$0xff] }
 0x6b5   :  { %3578 = vmatpush2.msra.mxu0 %v11340_v31  ;;  %v11351_v31 = vld [vmem:[#allocation92_spill] sm:$0xff] }
 0x6b6   :  { %3579 = vmatprep.subr.mxu0 %v11341_v16  ;;  %v11352_v16 = vld [vmem:[#allocation96_spill] sm:$0xff] }
 0x6b7   :  { %3580 = vmatpush2.msra.mxu0 %v11342_v47 }
 0x6b8   :  { %3581 = vmatprep.subr.mxu0 %v11343_v53  ;;  %v11353_v53 = vld [vmem:[#allocation114_spill] sm:$0xff] }
 0x6b9   :  { %3582 = vmatpush2.msra.mxu0 %v11344_v1 }
 0x6ba   :  { %3583 = vmatprep.subr.mxu0 %v11345_v50 }
 0x6bb   :  { %3584 = vmatpush2.msra.mxu0 %v11346_v39 }
 0x6bc   :  { %3585 = vmatprep.subr.mxu0 %v11347_v46  ;;  %v11355_v46 = vld [vmem:[#allocation8_spill] sm:$0xff] }
 0x6bd   :  { %3586 = vmatpush2.msra.mxu0 %v11348_v55 }
 0x6be   :  { %3587 = vmatprep.subr.mxu0 %v11349_v8 }
 0x6bf   :  { %3588 = vmatpush2.msra.mxu0 %v11350_v58 }
 0x6c0   :  { %3589 = vmatprep.subr.mxu0 %v11351_v31 }
 0x6c1   :  { %3590 = vmatpush2.msra.mxu0 %v11352_v16  ;;  %v11356_v16 = vld [vmem:[#allocation122_spill] sm:$0xff] }
 0x702   :  { %v3064_v47 = vpop.f32.mrf.mxu0  ;;  %v3135_v8 = vpop.f32.mrf.mxu1 }
 0x703   :  { %v3065_v40 = vadd.f32 %v3064_v47, %v11353_v53  ;;  %v11357_v47 = vld [vmem:[#allocation72_spill] sm:$0xff] }
 0x704   :  { %v3066_v1 = vpop.f32.mrf.mxu0  ;;  %v3137_v13 = vpop.f32.mrf.mxu1  ;;  %v293_v53 = vadd.f32 %v11357_v47, %v6123_v42 }
 0x705   :  { %v3219_v50 = vadd.f32 %v3065_v40, %v11354_v5  ;;  %v3067_v39 = vadd.f32 %v3066_v1, %v10977_v17  ;;  %v3138_v59 = vadd.f32 %v3137_v13, %v11356_v16 }
 0x707   :  { %v4270_v36 = vmul.f32 -1.442695, %v3219_v50  ;;  %v3226_v55 = vadd.f32 %v3067_v39, %v11355_v46  ;;  %v3240_v38 = vadd.f32 %v3138_v59, %v293_v53  ;;  %v11358_v39 = vld [vmem:[#allocation105_spill] sm:$0xff] }
 0x709   :  { %4391 = vpow2.f32 %v4270_v36  ;;  %v4271_v10 = vmul.f32 -1.442695, %v3226_v55  ;;  %v4272_v40 = vmul.f32 -1.442695, %v3240_v38  ;;  %v3136_v36 = vadd.f32 %v3135_v8, %v10853_v56  ;;  %v11359_v8 = vld [vmem:[#allocation11_spill] sm:$0xff] }
 0x70b   :  { %4393 = vpow2.f32 %v4271_v10  ;;  %v309_v10 = vadd.f32 %v11358_v39, %v6120_v2 }
 0x716   :  { %v4392_v58 = vpop.eup %4391 }
 0x717   :  { %v3223_v31 = vadd.f32 1.0, %v4392_v58 }
 0x718   :  { %v4394_v5 = vpop.eup %4393 }
 0x719   :  { %4395 = vrcp.f32 %v3223_v31  ;;  %v3230_v50 = vadd.f32 1.0, %v4394_v5 }
 0x71a   :  { %4397 = vpow2.f32 %v4272_v40 }
 0x71b   :  { %4399 = vrcp.f32 %v3230_v50  ;;  %v11360_v50 = vld [vmem:[#allocation104_spill] sm:$0xff] }
 0x726   :  { %v4396_v1 = vpop.eup %4395 }
 0x727   :  { %v3233_v46 = vmul.f32 %v4396_v1, %v3136_v36  ;;  %v4398_v58 = vpop.eup %4397  ;;  %v404_v36 = vadd.f32 %v11360_v50, %v5019_v28 }
 0x728   :  { %v4400_v13 = vpop.eup %4399  ;;  %v3244_v31 = vadd.f32 1.0, %v4398_v58 }
 0x729   :  { %v3234_v55 = vadd.f32 %v3233_v46, %v309_v10  ;;  %v3236_v16 = vsub.f32 1.0, %v4400_v13  ;;  %v3238_v38 = vmul.f32 %v4400_v13, %v8979_v19  ;;  %v11361_v46 = vld [vmem:[#allocation107_spill] sm:$0xff] }
 0x72b   :  { %4401 = vtanh.f32 %v3234_v55  ;;  %v406_v55 = vadd.f32 %v11361_v46, %v5024_v29  ;;  %v3797_v46 = vld [vmem:[%s10271_s3 + $0x258] sm:$0xff] }
 0x72c   :  { %4403 = vrcp.f32 %v3244_v31 }
 0x738   :  { %v4402_v47 = vpop.eup %4401 }
 0x739   :  { %v3237_v59 = vmul.f32 %v4402_v47, %v3236_v16  ;;  %v4404_v19 = vpop.eup %4403 }
 0x73b   :  { %v9527_v53 = vadd.f32 %v3238_v38, %v3237_v59 }
 0x73d   :  { %v4200_v5 = vadd.f32 %v9527_v53, %v11359_v8 }
 0x73f   :  { %4208 = vst [vmem:[%s10274_s5 + $0x28] sm:$0xff] %v4200_v5 }
 0x742   :  { %v3206_v40 = vpop.f32.mrf.mxu0 }
 0x743   :  { %v3207_v1 = vadd.f32 %v3206_v40, %v6138_v26 }
 0x744   :  { %v3208_v39 = vpop.f32.mrf.mxu0 }
 0x745   :  { %v3247_v10 = vadd.f32 %v3207_v1, %v404_v36  ;;  %v3209_v16 = vadd.f32 %v3208_v39, %v6145_v33  ;;  %v4181_v1 = vld [vmem:[%s10274_s5 + $0x10] sm:$0xff] }
 0x747   :  { %v4273_v58 = vmul.f32 -1.442695, %v3247_v10  ;;  %v3254_v13 = vmul.f32 %v4404_v19, %v3209_v16  ;;  %v3803_v10 = vld [vmem:[%s10271_s3 + $0x288] sm:$0xff]  ;;  %v3802_v19 = vld [vmem:[%s10271_s3 + $0x280] sm:$0xff] }
 0x748   :  { %v3795_v16 = vld [vmem:[%s10271_s3 + $0x248] sm:$0xff] }
 0x749   :  { %4405 = vpow2.f32 %v4273_v58  ;;  %v3255_v31 = vadd.f32 %v3254_v13, %v406_v55  ;;  %v3794_v55 = vld [vmem:[%s10271_s3 + $0x240] sm:$0xff]  ;;  %v3796_v58 = vld [vmem:[%s10271_s3 + $0x250] sm:$0xff]  ;;  %v3789_v13 = vld [vmem:[%s10271_s3 + $0x218] sm:$0xff] }
 0x756   :  { %v4406_v47 = vpop.eup %4405 }
 0x757   :  { %v3251_v59 = vadd.f32 1.0, %v4406_v47  ;;  %v3788_v47 = vld [vmem:[%s10271_s3 + $0x210] sm:$0xff] }
 0x759   :  { %4407 = vrcp.f32 %v3251_v59  ;;  %v3790_v59 = vld [vmem:[%s10271_s3 + $0x220] sm:$0xff] }
 0x75a   :  { %4409 = vtanh.f32 %v3255_v31  ;;  %v3791_v31 = vld [vmem:[%s10271_s3 + $0x228] sm:$0xff] }
 0x766   :  { %v4408_v38 = vpop.eup %4407 }
 0x767   :  { %v3257_v8 = vsub.f32 1.0, %v4408_v38  ;;  %v4410_v5 = vpop.eup %4409  ;;  %v3259_v50 = vmul.f32 %v4408_v38, %v8993_v34  ;;  %v11362_v34 = vld [vmem:[#allocation9_spill] sm:$0xff] }
 0x768   :  { %v3783_v38 = vld [vmem:[%s10271_s3 + $0x1e8] sm:$0xff] }
 0x769   :  { %v3258_v40 = vmul.f32 %v4410_v5, %v3257_v8  ;;  %v3785_v8 = vld [vmem:[%s10271_s3 + $0x1f8] sm:$0xff]  ;;  %v3782_v5 = vld [vmem:[%s10271_s3 + $0x1e0] sm:$0xff] }
 0x76b   :  { %v9541_v36 = vadd.f32 %v3259_v50, %v3258_v40  ;;  %v3784_v40 = vld [vmem:[%s10271_s3 + $0x1f0] sm:$0xff]  ;;  %v3777_v50 = vld [vmem:[%s10271_s3 + $0x1b8] sm:$0xff] }
 0x76d   :  { %3520 = vmatprep.mubr.f32.mxu1 %v9541_v36  ;;  %v4197_v39 = vadd.f32 %v4181_v1, %v9541_v36  ;;  %3591 = vmatprep.mubr.f32.mxu0 %v9541_v36  ;;  %v3779_v1 = vld [vmem:[%s10271_s3 + $0x1c8] sm:$0xff] }
 0x76e   :  { %3521 = vmatmul.mubr.f32.vlgmr.msra.gmra.mxu1 %v9527_v53  ;;  %3592 = vmatmul.mubr.f32.vlgmr.msra.gmra.mxu0 %v9527_v53 }
 0x76f   :  { %4205 = vst [vmem:[%s10274_s5 + $0x10] sm:$0xff] %v4197_v39  ;;  %3599 = vmatpush1.msra.mxu1 %v8998_v20  ;;  %3662 = vmatprep.mubr.f32.mxu1 %v9541_v36  ;;  %v11363_v20 = vld [vmem:[#allocation121_spill] sm:$0xff]  ;;  %v3776_v39 = vld [vmem:[%s10271_s3 + $0x1b0] sm:$0xff] }
 0x770   :  { %3600 = vmatprep.subr.mxu1 %v9007_v30  ;;  %v11364_v30 = vld [vmem:[#allocation119_spill] sm:$0xff] }
 0x771   :  { %3601 = vmatpush1.msra.mxu1 %v9014_v60  ;;  %v11365_v60 = vld [vmem:[#allocation124_spill] sm:$0xff] }
 0x772   :  { %3602 = vmatprep.subr.mxu1 %v9024_v27  ;;  %v11366_v27 = vld [vmem:[#allocation126_spill] sm:$0xff] }
 0x773   :  { %3603 = vmatpush1.msra.mxu1 %v9030_v57  ;;  %v11367_v57 = vld [vmem:[#allocation35_spill] sm:$0xff] }
 0x774   :  { %3604 = vmatprep.subr.mxu1 %v9037_v52  ;;  %v11368_v52 = vld [vmem:[#allocation39_spill] sm:$0xff] }
 0x775   :  { %3605 = vmatpush1.msra.mxu1 %v9044_v24  ;;  %v11369_v24 = vld [vmem:[#allocation44_spill] sm:$0xff] }
 0x776   :  { %3606 = vmatprep.subr.mxu1 %v9051_v37  ;;  %v11370_v37 = vld [vmem:[#allocation49_spill] sm:$0xff] }
 0x777   :  { %3607 = vmatpush1.msra.mxu1 %v9058_v3  ;;  %v11371_v3 = vld [vmem:[#allocation54_spill] sm:$0xff] }
 0x778   :  { %3608 = vmatprep.subr.mxu1 %v9065_v6  ;;  %v11372_v6 = vld [vmem:[#allocation58_spill] sm:$0xff] }
 0x779   :  { %3609 = vmatpush1.msra.mxu1 %v9072_v22  ;;  %v11373_v22 = vld [vmem:[#allocation62_spill] sm:$0xff] }
 0x77a   :  { %3610 = vmatprep.subr.mxu1 %v9079_v12  ;;  %v11374_v12 = vld [vmem:[#allocation67_spill] sm:$0xff] }
 0x77b   :  { %3611 = vmatpush1.msra.mxu1 %v9086_v25  ;;  %v11375_v25 = vld [vmem:[#allocation4_spill] sm:$0xff] }
 0x77c   :  { %3612 = vmatprep.subr.mxu1 %v9093_v11  ;;  %v11376_v11 = vld [vmem:[#allocation5_spill] sm:$0xff] }
 0x77d   :  { %3613 = vmatpush1.msra.mxu1 %v9100_v45  ;;  %v11377_v45 = vld [vmem:[#allocation87_spill] sm:$0xff] }
 0x77e   :  { %3614 = vmatprep.subr.mxu1 %v9107_v4  ;;  %v11378_v4 = vld [vmem:[#allocation97_spill] sm:$0xff] }
 0x77f   :  { %3615 = vmatpush1.msra.mxu1 %v9114_v35  ;;  %v11379_v35 = vld [vmem:[#allocation109_spill] sm:$0xff] }
 0x780   :  { %3616 = vmatprep.subr.mxu1 %v9121_v43  ;;  %v11380_v43 = vld [vmem:[#allocation111_spill] sm:$0xff] }
 0x781   :  { %3617 = vmatpush1.msra.mxu1 %v9128_v23  ;;  %v11381_v23 = vld [vmem:[#allocation47_spill] sm:$0xff] }
 0x782   :  { %3618 = vmatprep.subr.mxu1 %v9135_v49  ;;  %v11382_v49 = vld [vmem:[#allocation52_spill] sm:$0xff] }
 0x783   :  { %3619 = vmatpush1.msra.mxu1 %v9142_v51  ;;  %v11383_v51 = vld [vmem:[#allocation57_spill] sm:$0xff] }
 0x784   :  { %3620 = vmatprep.subr.mxu1 %v9149_v14  ;;  %v11384_v14 = vld [vmem:[#allocation61_spill] sm:$0xff] }
 0x785   :  { %3621 = vmatpush1.msra.mxu1 %v9156_v15  ;;  %v11385_v15 = vld [vmem:[#allocation68_spill] sm:$0xff] }
 0x786   :  { %3622 = vmatprep.subr.mxu1 %v9163_v32  ;;  %v11386_v32 = vld [vmem:[#allocation78_spill] sm:$0xff] }
 0x787   :  { %3623 = vmatpush1.msra.mxu1 %v9170_v54  ;;  %v11387_v54 = vld [vmem:[#allocation89_spill] sm:$0xff] }
 0x788   :  { %3624 = vmatprep.subr.mxu1 %v9177_v9  ;;  %v11388_v9 = vld [vmem:[#allocation99_spill] sm:$0xff] }
 0x789   :  { %3625 = vmatpush1.msra.mxu1 %v9184_v21  ;;  %v3813_v21 = vld [vmem:[%s10271_s3 + $0x2d8] sm:$0xff] }
 0x78a   :  { %3626 = vmatprep.subr.mxu1 %v9191_v62  ;;  %v3812_v62 = vld [vmem:[%s10271_s3 + $0x2d0] sm:$0xff]  ;;  %3914 = vmatprep.subr.mxu0 %v3813_v21  ;;  %v3737_v21 = vld [vmem:[%s10271_s3 + $0x78] sm:$0xff] }
 0x78b   :  { %3627 = vmatpush1.msra.mxu1 %v9198_v18  ;;  %v3815_v18 = vld [vmem:[%s10271_s3 + $0x2e8] sm:$0xff]  ;;  %3915 = vmatpush1.msra.mxu0 %v3812_v62  ;;  %v3729_v62 = vld [vmem:[%s10271_s3 + $0x38] sm:$0xff] }
 0x78c   :  { %3628 = vmatprep.subr.mxu1 %v9205_v63  ;;  %v3807_v63 = vld [vmem:[%s10271_s3 + $0x2a8] sm:$0xff] }
 0x78d   :  { %3629 = vmatpush1.msra.mxu1 %v9212_v44  ;;  %v3814_v44 = vld [vmem:[%s10271_s3 + $0x2e0] sm:$0xff]  ;;  %3916 = vmatprep.subr.mxu0 %v3807_v63  ;;  %v3728_v63 = vld [vmem:[%s10271_s3 + $0x30] sm:$0xff] }
 0x78e   :  { %3630 = vmatprep.subr.mxu1 %v9219_v48  ;;  %v3806_v48 = vld [vmem:[%s10271_s3 + $0x2a0] sm:$0xff] }
 0x78f   :  { %3631 = vmatpush2.msra.mxu1 %v9226_v7  ;;  %v3809_v7 = vld [vmem:[%s10271_s3 + $0x2b8] sm:$0xff]  ;;  %3917 = vmatpush1.msra.mxu0 %v3806_v48  ;;  %v3723_v48 = vld [vmem:[%s10271_s3 + $0x8] sm:$0xff] }
 0x790   :  { %3632 = vmatprep.subr.mxu1 %v9233_v41  ;;  %v3801_v41 = vld [vmem:[%s10271_s3 + $0x278] sm:$0xff] }
 0x791   :  { %3633 = vmatpush2.msra.mxu1 %v9240_v61  ;;  %v3808_v61 = vld [vmem:[%s10271_s3 + $0x2b0] sm:$0xff]  ;;  %3918 = vmatprep.subr.mxu0 %v3801_v41  ;;  %v3722_v41 = vld [vmem:[%s10271_s3] sm:$0xff] }
 0x792   :  { %3634 = vmatprep.subr.mxu1 %v9247_v0  ;;  %v3800_v0 = vld [vmem:[%s10271_s3 + $0x270] sm:$0xff] }
 0x793   :  { %3635 = vmatpush2.msra.mxu1 %v11362_v34  ;;  %3919 = vmatpush1.msra.mxu0 %v3800_v0  ;;  %v3778_v34 = vld [vmem:[%s10271_s3 + $0x1c0] sm:$0xff]  ;;  %v3909_v0 = vld [vmem:[%s10271_s3 + $0x5d8] sm:$0xff] }
 0x794   :  { %3636 = vmatprep.subr.mxu1 %v11363_v20  ;;  %3920 = vmatprep.subr.mxu0 %v3795_v16  ;;  %v3771_v20 = vld [vmem:[%s10271_s3 + $0x188] sm:$0xff]  ;;  %v3908_v16 = vld [vmem:[%s10271_s3 + $0x5d0] sm:$0xff] }
 0x795   :  { %3637 = vmatpush2.msra.mxu1 %v11364_v30  ;;  %3921 = vmatpush1.msra.mxu0 %v3794_v55  ;;  %v3773_v30 = vld [vmem:[%s10271_s3 + $0x198] sm:$0xff]  ;;  %v3910_v55 = vld [vmem:[%s10271_s3 + $0x5e0] sm:$0xff] }
 0x796   :  { %3638 = vmatprep.subr.mxu1 %v11365_v60  ;;  %3922 = vmatprep.subr.mxu0 %v3789_v13  ;;  %v3770_v60 = vld [vmem:[%s10271_s3 + $0x180] sm:$0xff]  ;;  %v3905_v13 = vld [vmem:[%s10271_s3 + $0x5b8] sm:$0xff] }
 0x797   :  { %3639 = vmatpush2.msra.mxu1 %v11366_v27  ;;  %3923 = vmatpush1.msra.mxu0 %v3788_v47  ;;  %v3772_v27 = vld [vmem:[%s10271_s3 + $0x190] sm:$0xff] }
 0x798   :  { %3640 = vmatprep.subr.mxu1 %v11367_v57  ;;  %3924 = vmatprep.subr.mxu0 %v3783_v38  ;;  %v3765_v57 = vld [vmem:[%s10271_s3 + $0x158] sm:$0xff]  ;;  %v3904_v47 = vld [vmem:[%s10271_s3 + $0x5b0] sm:$0xff]  ;;  %v3899_v38 = vld [vmem:[%s10271_s3 + $0x588] sm:$0xff] }
 0x799   :  { %3641 = vmatpush2.msra.mxu1 %v11368_v52  ;;  %3925 = vmatpush1.msra.mxu0 %v3782_v5  ;;  %v3767_v52 = vld [vmem:[%s10271_s3 + $0x168] sm:$0xff]  ;;  %v3898_v5 = vld [vmem:[%s10271_s3 + $0x580] sm:$0xff] }
 0x79a   :  { %3642 = vmatprep.subr.mxu1 %v11369_v24  ;;  %3926 = vmatprep.subr.mxu0 %v3777_v50  ;;  %v3764_v24 = vld [vmem:[%s10271_s3 + $0x150] sm:$0xff]  ;;  %v3893_v50 = vld [vmem:[%s10271_s3 + $0x558] sm:$0xff] }
 0x79b   :  { %3643 = vmatpush2.msra.mxu1 %v11370_v37  ;;  %3927 = vmatpush1.msra.mxu0 %v3776_v39  ;;  %v3766_v37 = vld [vmem:[%s10271_s3 + $0x160] sm:$0xff]  ;;  %v3892_v39 = vld [vmem:[%s10271_s3 + $0x550] sm:$0xff] }
 0x79c   :  { %3644 = vmatprep.subr.mxu1 %v11371_v3  ;;  %3928 = vmatprep.subr.mxu0 %v3771_v20  ;;  %v3759_v3 = vld [vmem:[%s10271_s3 + $0x128] sm:$0xff] }
 0x79d   :  { %3645 = vmatpush2.msra.mxu1 %v11372_v6  ;;  %3929 = vmatpush1.msra.mxu0 %v3770_v60  ;;  %v3761_v6 = vld [vmem:[%s10271_s3 + $0x138] sm:$0xff]  ;;  %v3887_v20 = vld [vmem:[%s10271_s3 + $0x528] sm:$0xff]  ;;  %v3886_v60 = vld [vmem:[%s10271_s3 + $0x520] sm:$0xff] }
 0x79e   :  { %3646 = vmatprep.subr.mxu1 %v11373_v22  ;;  %3930 = vmatprep.subr.mxu0 %v3765_v57  ;;  %v3758_v22 = vld [vmem:[%s10271_s3 + $0x120] sm:$0xff]  ;;  %v3881_v57 = vld [vmem:[%s10271_s3 + $0x4f8] sm:$0xff] }
 0x79f   :  { %3647 = vmatpush2.msra.mxu1 %v11374_v12  ;;  %v3760_v12 = vld [vmem:[%s10271_s3 + $0x130] sm:$0xff]  ;;  %3931 = vmatpush1.msra.mxu0 %v3764_v24 }
 0x7a0   :  { %3648 = vmatprep.subr.mxu1 %v11375_v25  ;;  %v3753_v25 = vld [vmem:[%s10271_s3 + $0xf8] sm:$0xff]  ;;  %3932 = vmatprep.subr.mxu0 %v3759_v3  ;;  %v3880_v24 = vld [vmem:[%s10271_s3 + $0x4f0] sm:$0xff]  ;;  %v3875_v3 = vld [vmem:[%s10271_s3 + $0x4c8] sm:$0xff] }
 0x7a1   :  { %3649 = vmatpush2.msra.mxu1 %v11376_v11  ;;  %3933 = vmatpush1.msra.mxu0 %v3758_v22  ;;  %v3752_v11 = vld [vmem:[%s10271_s3 + $0xf0] sm:$0xff]  ;;  %v3874_v22 = vld [vmem:[%s10271_s3 + $0x4c0] sm:$0xff] }
 0x7a2   :  { %3650 = vmatprep.subr.mxu1 %v11377_v45  ;;  %3934 = vmatprep.subr.mxu0 %v3753_v25  ;;  %v3755_v45 = vld [vmem:[%s10271_s3 + $0x108] sm:$0xff]  ;;  %v3869_v25 = vld [vmem:[%s10271_s3 + $0x498] sm:$0xff] }
 0x7a3   :  { %3651 = vmatpush2.msra.mxu1 %v11378_v4  ;;  %3935 = vmatpush1.msra.mxu0 %v3752_v11  ;;  %v3747_v4 = vld [vmem:[%s10271_s3 + $0xc8] sm:$0xff]  ;;  %v3861_v11 = vld [vmem:[%s10271_s3 + $0x458] sm:$0xff] }
 0x7a4   :  { %3652 = vmatprep.subr.mxu1 %v11379_v35  ;;  %v3754_v35 = vld [vmem:[%s10271_s3 + $0x100] sm:$0xff]  ;;  %3936 = vmatprep.subr.mxu0 %v3747_v4  ;;  %v3860_v4 = vld [vmem:[%s10271_s3 + $0x450] sm:$0xff] }
 0x7a5   :  { %3653 = vmatpush2.msra.mxu1 %v11380_v43  ;;  %v3746_v43 = vld [vmem:[%s10271_s3 + $0xc0] sm:$0xff] }
 0x7a6   :  { %3654 = vmatprep.subr.mxu1 %v11381_v23  ;;  %v3749_v23 = vld [vmem:[%s10271_s3 + $0xd8] sm:$0xff]  ;;  %3937 = vmatpush1.msra.mxu0 %v3746_v43  ;;  %v3855_v43 = vld [vmem:[%s10271_s3 + $0x428] sm:$0xff] }
 0x7a7   :  { %3655 = vmatpush2.msra.mxu1 %v11382_v49  ;;  %v3741_v49 = vld [vmem:[%s10271_s3 + $0x98] sm:$0xff] }
 0x7a8   :  { %3656 = vmatprep.subr.mxu1 %v11383_v51  ;;  %v3748_v51 = vld [vmem:[%s10271_s3 + $0xd0] sm:$0xff]  ;;  %3938 = vmatprep.subr.mxu0 %v3741_v49  ;;  %v3854_v49 = vld [vmem:[%s10271_s3 + $0x420] sm:$0xff] }
 0x7a9   :  { %3657 = vmatpush2.msra.mxu1 %v11384_v14  ;;  %v3740_v14 = vld [vmem:[%s10271_s3 + $0x90] sm:$0xff] }
 0x7aa   :  { %3658 = vmatprep.subr.mxu1 %v11385_v15  ;;  %v3743_v15 = vld [vmem:[%s10271_s3 + $0xa8] sm:$0xff]  ;;  %3939 = vmatpush1.msra.mxu0 %v3740_v14  ;;  %v3849_v14 = vld [vmem:[%s10271_s3 + $0x3f8] sm:$0xff] }
 0x7ab   :  { %3659 = vmatpush2.msra.mxu1 %v11386_v32  ;;  %v3735_v32 = vld [vmem:[%s10271_s3 + $0x68] sm:$0xff] }
 0x7ac   :  { %3660 = vmatprep.subr.mxu1 %v11387_v54  ;;  %v3742_v54 = vld [vmem:[%s10271_s3 + $0xa0] sm:$0xff]  ;;  %3940 = vmatprep.subr.mxu0 %v3735_v32  ;;  %v3848_v32 = vld [vmem:[%s10271_s3 + $0x3f0] sm:$0xff] }
 0x7ad   :  { %3661 = vmatpush2.msra.mxu1 %v11388_v9  ;;  %v3734_v9 = vld [vmem:[%s10271_s3 + $0x60] sm:$0xff] }
 0x7ae   :  { %3663 = vmatmul.mubr.f32.vlgmr.msra.gmra.mxu1 %v9527_v53  ;;  %3985 = vmatprep.subr.mxu1 %v3815_v18  ;;  %v3736_v18 = vld [vmem:[%s10271_s3 + $0x70] sm:$0xff] }
 0x7af   :  { %3986 = vmatpush1.msra.mxu1 %v3814_v44  ;;  %3941 = vmatpush1.msra.mxu0 %v3734_v9  ;;  %v3731_v44 = vld [vmem:[%s10271_s3 + $0x48] sm:$0xff] }
 0x7b0   :  { %3987 = vmatprep.subr.mxu1 %v3809_v7  ;;  %3942 = vmatprep.subr.mxu0 %v3729_v62  ;;  %v3730_v7 = vld [vmem:[%s10271_s3 + $0x40] sm:$0xff]  ;;  %v3843_v9 = vld [vmem:[%s10271_s3 + $0x3c8] sm:$0xff] }
 0x7b1   :  { %3988 = vmatpush1.msra.mxu1 %v3808_v61  ;;  %3943 = vmatpush1.msra.mxu0 %v3728_v63  ;;  %v3725_v61 = vld [vmem:[%s10271_s3 + $0x18] sm:$0xff]  ;;  %v3842_v62 = vld [vmem:[%s10271_s3 + $0x3c0] sm:$0xff] }
 0x7b2   :  { %3989 = vmatprep.subr.mxu1 %v3803_v10  ;;  %3944 = vmatprep.subr.mxu0 %v3723_v48  ;;  %v3724_v10 = vld [vmem:[%s10271_s3 + $0x10] sm:$0xff]  ;;  %v3837_v63 = vld [vmem:[%s10271_s3 + $0x398] sm:$0xff] }
 0x7b3   :  { %3990 = vmatpush1.msra.mxu1 %v3802_v19  ;;  %3945 = vmatpush1.msra.mxu0 %v3722_v41  ;;  %v3911_v19 = vld [vmem:[%s10271_s3 + $0x5e8] sm:$0xff]  ;;  %v3836_v48 = vld [vmem:[%s10271_s3 + $0x390] sm:$0xff] }
 0x7b4   :  { %3991 = vmatprep.subr.mxu1 %v3797_v46  ;;  %3946 = vmatprep.subr.mxu0 %v3909_v0  ;;  %v3903_v46 = vld [vmem:[%s10271_s3 + $0x5a8] sm:$0xff]  ;;  %v3830_v0 = vld [vmem:[%s10271_s3 + $0x360] sm:$0xff] }
 0x7b5   :  { %3992 = vmatpush1.msra.mxu1 %v3796_v58  ;;  %3947 = vmatpush2.msra.mxu0 %v3908_v16  ;;  %v3902_v58 = vld [vmem:[%s10271_s3 + $0x5a0] sm:$0xff]  ;;  %v3831_v41 = vld [vmem:[%s10271_s3 + $0x368] sm:$0xff]  ;;  %v3825_v16 = vld [vmem:[%s10271_s3 + $0x338] sm:$0xff] }
 0x7b6   :  { %3993 = vmatprep.subr.mxu1 %v3791_v31  ;;  %3948 = vmatprep.subr.mxu0 %v3903_v46  ;;  %v3897_v31 = vld [vmem:[%s10271_s3 + $0x578] sm:$0xff]  ;;  %v3824_v46 = vld [vmem:[%s10271_s3 + $0x330] sm:$0xff] }
 0x7b7   :  { %3994 = vmatpush1.msra.mxu1 %v3790_v59  ;;  %3949 = vmatpush2.msra.mxu0 %v3902_v58  ;;  %v3896_v59 = vld [vmem:[%s10271_s3 + $0x570] sm:$0xff]  ;;  %v3819_v58 = vld [vmem:[%s10271_s3 + $0x308] sm:$0xff] }
 0x7b8   :  { %3995 = vmatprep.subr.mxu1 %v3785_v8  ;;  %3950 = vmatprep.subr.mxu0 %v3897_v31  ;;  %v3891_v8 = vld [vmem:[%s10271_s3 + $0x548] sm:$0xff]  ;;  %v3818_v31 = vld [vmem:[%s10271_s3 + $0x300] sm:$0xff] }
 0x7b9   :  { %3996 = vmatpush1.msra.mxu1 %v3784_v40  ;;  %3951 = vmatpush2.msra.mxu0 %v3896_v59  ;;  %v3890_v40 = vld [vmem:[%s10271_s3 + $0x540] sm:$0xff]  ;;  %v3820_v59 = vld [vmem:[%s10271_s3 + $0x310] sm:$0xff] }
 0x7ba   :  { %3997 = vmatprep.subr.mxu1 %v3779_v1  ;;  %3952 = vmatprep.subr.mxu0 %v3891_v8  ;;  %v3885_v1 = vld [vmem:[%s10271_s3 + $0x518] sm:$0xff] }
 0x7bb   :  { %3998 = vmatpush1.msra.mxu1 %v3778_v34  ;;  %3953 = vmatpush2.msra.mxu0 %v3890_v40  ;;  %v3884_v34 = vld [vmem:[%s10271_s3 + $0x510] sm:$0xff] }
 0x7bc   :  { %3999 = vmatprep.subr.mxu1 %v3773_v30  ;;  %3954 = vmatprep.subr.mxu0 %v3885_v1  ;;  %v3879_v30 = vld [vmem:[%s10271_s3 + $0x4e8] sm:$0xff]  ;;  %v11390_v1 = vld [vmem:[#allocation10_spill] sm:$0xff] }
 0x7bd   :  { %4000 = vmatpush1.msra.mxu1 %v3772_v27  ;;  %3955 = vmatpush2.msra.mxu0 %v3884_v34  ;;  %v3878_v27 = vld [vmem:[%s10271_s3 + $0x4e0] sm:$0xff] }
 0x7be   :  { %4001 = vmatprep.subr.mxu1 %v3767_v52  ;;  %3956 = vmatprep.subr.mxu0 %v3879_v30  ;;  %v3873_v52 = vld [vmem:[%s10271_s3 + $0x4b8] sm:$0xff]  ;;  %v11391_v30 = vld [vmem:[#allocation12_spill] sm:$0xff] }
 0x7bf   :  { %4002 = vmatpush1.msra.mxu1 %v3766_v37  ;;  %3957 = vmatpush2.msra.mxu0 %v3878_v27  ;;  %v3872_v37 = vld [vmem:[%s10271_s3 + $0x4b0] sm:$0xff] }
 0x7c0   :  { %4003 = vmatprep.subr.mxu1 %v3761_v6  ;;  %3958 = vmatprep.subr.mxu0 %v3873_v52  ;;  %v3867_v6 = vld [vmem:[%s10271_s3 + $0x488] sm:$0xff] }
 0x7c1   :  { %4004 = vmatpush1.msra.mxu1 %v3760_v12  ;;  %3959 = vmatpush2.msra.mxu0 %v3872_v37  ;;  %v3866_v12 = vld [vmem:[%s10271_s3 + $0x480] sm:$0xff] }
 0x7c2   :  { %4005 = vmatprep.subr.mxu1 %v3755_v45  ;;  %3960 = vmatprep.subr.mxu0 %v3867_v6  ;;  %v3868_v45 = vld [vmem:[%s10271_s3 + $0x490] sm:$0xff] }
 0x7c3   :  { %4006 = vmatpush1.msra.mxu1 %v3754_v35  ;;  %3961 = vmatpush2.msra.mxu0 %v3866_v12  ;;  %v3863_v35 = vld [vmem:[%s10271_s3 + $0x468] sm:$0xff] }
 0x7c4   :  { %4007 = vmatprep.subr.mxu1 %v3749_v23  ;;  %v3862_v23 = vld [vmem:[%s10271_s3 + $0x460] sm:$0xff]  ;;  %3962 = vmatprep.subr.mxu0 %v3861_v11 }
 0x7c5   :  { %4008 = vmatpush1.msra.mxu1 %v3748_v51  ;;  %v3857_v51 = vld [vmem:[%s10271_s3 + $0x438] sm:$0xff]  ;;  %3963 = vmatpush2.msra.mxu0 %v3860_v4 }
 0x7c6   :  { %4009 = vmatprep.subr.mxu1 %v3743_v15  ;;  %v3856_v15 = vld [vmem:[%s10271_s3 + $0x430] sm:$0xff]  ;;  %3964 = vmatprep.subr.mxu0 %v3855_v43 }
 0x7c7   :  { %4010 = vmatpush1.msra.mxu1 %v3742_v54  ;;  %v3851_v54 = vld [vmem:[%s10271_s3 + $0x408] sm:$0xff]  ;;  %3965 = vmatpush2.msra.mxu0 %v3854_v49 }
 0x7c8   :  { %4011 = vmatprep.subr.mxu1 %v3737_v21  ;;  %v3850_v21 = vld [vmem:[%s10271_s3 + $0x400] sm:$0xff]  ;;  %3966 = vmatprep.subr.mxu0 %v3849_v14 }
 0x7c9   :  { %4012 = vmatpush1.msra.mxu1 %v3736_v18  ;;  %v3845_v18 = vld [vmem:[%s10271_s3 + $0x3d8] sm:$0xff]  ;;  %3967 = vmatpush2.msra.mxu0 %v3848_v32 }
 0x7ca   :  { %4013 = vmatprep.subr.mxu1 %v3731_v44  ;;  %v3844_v44 = vld [vmem:[%s10271_s3 + $0x3d0] sm:$0xff]  ;;  %3968 = vmatprep.subr.mxu0 %v3843_v9 }
 0x7cb   :  { %4014 = vmatpush1.msra.mxu1 %v3730_v7  ;;  %v3839_v7 = vld [vmem:[%s10271_s3 + $0x3a8] sm:$0xff]  ;;  %3969 = vmatpush2.msra.mxu0 %v3842_v62 }
 0x7cc   :  { %4015 = vmatprep.subr.mxu1 %v3725_v61  ;;  %v3838_v61 = vld [vmem:[%s10271_s3 + $0x3a0] sm:$0xff]  ;;  %3970 = vmatprep.subr.mxu0 %v3837_v63 }
 0x7cd   :  { %4016 = vmatpush1.msra.mxu1 %v3724_v10  ;;  %v3833_v10 = vld [vmem:[%s10271_s3 + $0x378] sm:$0xff]  ;;  %3971 = vmatpush2.msra.mxu0 %v3836_v48 }
 0x7ce   :  { %4017 = vmatprep.subr.mxu1 %v3911_v19  ;;  %v3832_v19 = vld [vmem:[%s10271_s3 + $0x370] sm:$0xff]  ;;  %3972 = vmatprep.subr.mxu0 %v3831_v41 }
 0x7cf   :  { %4018 = vmatpush2.msra.mxu1 %v3910_v55  ;;  %v3827_v55 = vld [vmem:[%s10271_s3 + $0x348] sm:$0xff]  ;;  %3973 = vmatpush2.msra.mxu0 %v3830_v0  ;;  %v11396_v41 = vld [vmem:[#allocation90_spill] sm:$0xff] }
 0x7d0   :  { %4019 = vmatprep.subr.mxu1 %v3905_v13  ;;  %v3826_v13 = vld [vmem:[%s10271_s3 + $0x340] sm:$0xff]  ;;  %3974 = vmatprep.subr.mxu0 %v3825_v16 }
 0x7d1   :  { %4020 = vmatpush2.msra.mxu1 %v3904_v47  ;;  %v3821_v47 = vld [vmem:[%s10271_s3 + $0x318] sm:$0xff]  ;;  %3975 = vmatpush2.msra.mxu0 %v3824_v46  ;;  %v11397_v46 = vld [vmem:[#allocation100_spill] sm:$0xff] }
 0x7d2   :  { %4021 = vmatprep.subr.mxu1 %v3899_v38  ;;  %3976 = vmatprep.subr.mxu0 %v3819_v58  ;;  %v3817_v38 = vld [vmem:[%s10271_s3 + $0x2f8] sm:$0xff] }
 0x7d3   :  { %4022 = vmatpush2.msra.mxu1 %v3898_v5  ;;  %3977 = vmatpush2.msra.mxu0 %v3818_v31  ;;  %v11389_v5 = vld [vmem:[#allocation114_spill] sm:$0xff] }
 0x7d4   :  { %4023 = vmatprep.subr.mxu1 %v3893_v50  ;;  %4056 = vmatprep.subr.mxu0 %v3817_v38 }
 0x7d5   :  { %4024 = vmatpush2.msra.mxu1 %v3892_v39 }
 0x7d6   :  { %4025 = vmatprep.subr.mxu1 %v3887_v20 }
 0x7d7   :  { %4026 = vmatpush2.msra.mxu1 %v3886_v60 }
 0x7d8   :  { %4027 = vmatprep.subr.mxu1 %v3881_v57 }
 0x7d9   :  { %4028 = vmatpush2.msra.mxu1 %v3880_v24 }
 0x7da   :  { %4029 = vmatprep.subr.mxu1 %v3875_v3  ;;  %v11392_v3 = vld [vmem:[#allocation122_spill] sm:$0xff] }
 0x7db   :  { %4030 = vmatpush2.msra.mxu1 %v3874_v22  ;;  %v11393_v22 = vld [vmem:[#allocation53_spill] sm:$0xff] }
 0x7dc   :  { %4031 = vmatprep.subr.mxu1 %v3869_v25  ;;  %v287_v12 = vadd.f32 %v11393_v22, %v6123_v42  ;;  %v3787_v22 = vld [vmem:[%s10271_s3 + $0x208] sm:$0xff] }
 0x7dd   :  { %4032 = vmatpush2.msra.mxu1 %v3868_v45 }
 0x7de   :  { %4033 = vmatprep.subr.mxu1 %v3863_v35 }
 0x7df   :  { %4034 = vmatpush2.msra.mxu1 %v3862_v23  ;;  %v11394_v23 = vld [vmem:[#allocation108_spill] sm:$0xff] }
 0x7e0   :  { %4035 = vmatprep.subr.mxu1 %v3857_v51  ;;  %v315_v49 = vadd.f32 %v11394_v23, %v6120_v2  ;;  %v3763_v23 = vld [vmem:[%s10271_s3 + $0x148] sm:$0xff] }
 0x7e1   :  { %4036 = vmatpush2.msra.mxu1 %v3856_v15 }
 0x7e2   :  { %4037 = vmatprep.subr.mxu1 %v3851_v54 }
 0x7e3   :  { %4038 = vmatpush2.msra.mxu1 %v3850_v21 }
 0x7e4   :  { %4039 = vmatprep.subr.mxu1 %v3845_v18 }
 0x7e5   :  { %4040 = vmatpush2.msra.mxu1 %v3844_v44  ;;  %v11395_v44 = vld [vmem:[#allocation88_spill] sm:$0xff] }
 0x7e6   :  { %4041 = vmatprep.subr.mxu1 %v3839_v7 }
 0x7e7   :  { %4042 = vmatpush2.msra.mxu1 %v3838_v61  ;;  %v398_v61 = vadd.f32 %v11396_v41, %v5019_v28  ;;  %v3913_v41 = vld [vmem:[%s10271_s3 + $0x5f8] sm:$0xff] }
 0x7e8   :  { %4043 = vmatprep.subr.mxu1 %v3833_v10 }
 0x7e9   :  { %4044 = vmatpush2.msra.mxu1 %v3832_v19 }
 0x7ea   :  { %4045 = vmatprep.subr.mxu1 %v3827_v55  ;;  %v400_v55 = vadd.f32 %v11397_v46, %v5024_v29  ;;  %v3894_v46 = vld [vmem:[%s10271_s3 + $0x560] sm:$0xff] }
 0x7eb   :  { %4046 = vmatpush2.msra.mxu1 %v3826_v13 }
 0x7ec   :  { %4047 = vmatprep.subr.mxu1 %v3821_v47 }
 0x7ed   :  { %4048 = vmatpush2.msra.mxu1 %v3820_v59 }
 0x82e   :  { %v3522_v8 = vpop.f32.mrf.mxu1  ;;  %v3593_v57 = vpop.f32.mrf.mxu0 }
 0x82f   :  { %v3523_v40 = vadd.f32 %v3522_v8, %v11389_v5  ;;  %v3594_v35 = vadd.f32 %v3593_v57, %v10853_v56  ;;  %v3804_v57 = vld [vmem:[%s10271_s3 + $0x290] sm:$0xff] }
 0x830   :  { %v3524_v50 = vpop.f32.mrf.mxu1  ;;  %v3595_v24 = vpop.f32.mrf.mxu0 }
 0x831   :  { %v3677_v39 = vadd.f32 %v3523_v40, %v11390_v1  ;;  %v3525_v20 = vadd.f32 %v3524_v50, %v10977_v17  ;;  %v3596_v6 = vadd.f32 %v3595_v24, %v11392_v3  ;;  %v3798_v24 = vld [vmem:[%s10271_s3 + $0x260] sm:$0xff] }
 0x833   :  { %v4275_v34 = vmul.f32 -1.442695, %v3677_v39  ;;  %v3684_v60 = vadd.f32 %v3525_v20, %v11391_v30  ;;  %v3698_v25 = vadd.f32 %v3596_v6, %v287_v12  ;;  %v3816_v20 = vld [vmem:[%s10271_s3 + $0x2f0] sm:$0xff]  ;;  %v3786_v12 = vld [vmem:[%s10271_s3 + $0x200] sm:$0xff] }
 0x834   :  { %v3792_v6 = vld [vmem:[%s10271_s3 + $0x230] sm:$0xff] }
 0x835   :  { %4411 = vpow2.f32 %v4275_v34  ;;  %v4276_v27 = vmul.f32 -1.442695, %v3684_v60  ;;  %v4277_v45 = vmul.f32 -1.442695, %v3698_v25  ;;  %v4180_v34 = vld [vmem:[%s10274_s5 + $0x8] sm:$0xff]  ;;  %v3810_v60 = vld [vmem:[%s10271_s3 + $0x2c0] sm:$0xff] }
 0x836   :  { %v3781_v25 = vld [vmem:[%s10271_s3 + $0x1d8] sm:$0xff] }
 0x837   :  { %4413 = vpow2.f32 %v4276_v27  ;;  %v3805_v27 = vld [vmem:[%s10271_s3 + $0x298] sm:$0xff] }
 0x842   :  { %v4412_v52 = vpop.eup %4411 }
 0x843   :  { %v3681_v37 = vadd.f32 1.0, %v4412_v52  ;;  %v3799_v52 = vld [vmem:[%s10271_s3 + $0x268] sm:$0xff] }
 0x844   :  { %v4414_v11 = vpop.eup %4413 }
 0x845   :  { %4415 = vrcp.f32 %v3681_v37  ;;  %v3688_v4 = vadd.f32 1.0, %v4414_v11  ;;  %v3793_v37 = vld [vmem:[%s10271_s3 + $0x238] sm:$0xff]  ;;  %v3780_v11 = vld [vmem:[%s10271_s3 + $0x1d0] sm:$0xff] }
 0x846   :  { %4417 = vpow2.f32 %v4277_v45  ;;  %v3775_v45 = vld [vmem:[%s10271_s3 + $0x1a8] sm:$0xff] }
 0x847   :  { %4419 = vrcp.f32 %v3688_v4  ;;  %v3774_v4 = vld [vmem:[%s10271_s3 + $0x1a0] sm:$0xff] }
 0x852   :  { %v4416_v43 = vpop.eup %4415 }
 0x853   :  { %v3691_v51 = vmul.f32 %v4416_v43, %v3594_v35  ;;  %v4418_v15 = vpop.eup %4417  ;;  %v3769_v35 = vld [vmem:[%s10271_s3 + $0x178] sm:$0xff]  ;;  %v3768_v43 = vld [vmem:[%s10271_s3 + $0x170] sm:$0xff] }
 0x854   :  { %v4420_v32 = vpop.eup %4419  ;;  %v3702_v54 = vadd.f32 1.0, %v4418_v15  ;;  %v3751_v15 = vld [vmem:[%s10271_s3 + $0xe8] sm:$0xff] }
 0x855   :  { %v3692_v14 = vadd.f32 %v3691_v51, %v315_v49  ;;  %v3694_v9 = vsub.f32 1.0, %v4420_v32  ;;  %v3696_v18 = vmul.f32 %v4420_v32, %v9527_v53  ;;  %v3762_v49 = vld [vmem:[%s10271_s3 + $0x140] sm:$0xff]  ;;  %v3757_v51 = vld [vmem:[%s10271_s3 + $0x118] sm:$0xff] }
 0x856   :  { %v3750_v32 = vld [vmem:[%s10271_s3 + $0xe0] sm:$0xff] }
 0x857   :  { %4421 = vtanh.f32 %v3692_v14  ;;  %v3756_v14 = vld [vmem:[%s10271_s3 + $0x110] sm:$0xff] }
 0x858   :  { %4423 = vrcp.f32 %v3702_v54  ;;  %v3745_v54 = vld [vmem:[%s10271_s3 + $0xb8] sm:$0xff] }
 0x864   :  { %v4422_v21 = vpop.eup %4421 }
 0x865   :  { %v3695_v62 = vmul.f32 %v4422_v21, %v3694_v9  ;;  %v4424_v53 = vpop.eup %4423  ;;  %v3744_v9 = vld [vmem:[%s10271_s3 + $0xb0] sm:$0xff]  ;;  %v3739_v21 = vld [vmem:[%s10271_s3 + $0x88] sm:$0xff] }
 0x867   :  { %v10017_v63 = vadd.f32 %v3696_v18, %v3695_v62  ;;  %v3738_v62 = vld [vmem:[%s10271_s3 + $0x80] sm:$0xff]  ;;  %v3733_v18 = vld [vmem:[%s10271_s3 + $0x58] sm:$0xff] }
 0x869   :  { %v4201_v48 = vadd.f32 %v10017_v63, %v11395_v44  ;;  %v3732_v44 = vld [vmem:[%s10271_s3 + $0x50] sm:$0xff] }
 0x86b   :  { %4209 = vst [vmem:[%s10274_s5 + $0x30] sm:$0xff] %v4201_v48  ;;  %v3727_v48 = vld [vmem:[%s10271_s3 + $0x28] sm:$0xff] }
 0x86e   :  { %v3664_v7 = vpop.f32.mrf.mxu1 }
 0x86f   :  { %v3665_v0 = vadd.f32 %v3664_v7, %v6138_v26  ;;  %v3726_v7 = vld [vmem:[%s10271_s3 + $0x20] sm:$0xff] }
 0x870   :  { %v3666_v10 = vpop.f32.mrf.mxu1 }
 0x871   :  { %v3705_v16 = vadd.f32 %v3665_v0, %v398_v61  ;;  %v3667_v19 = vadd.f32 %v3666_v10, %v6145_v33  ;;  %v3912_v61 = vld [vmem:[%s10271_s3 + $0x5f0] sm:$0xff]  ;;  %v3907_v0 = vld [vmem:[%s10271_s3 + $0x5c8] sm:$0xff]  ;;  %v3906_v10 = vld [vmem:[%s10271_s3 + $0x5c0] sm:$0xff] }
 0x873   :  { %v4278_v58 = vmul.f32 -1.442695, %v3705_v16  ;;  %v3712_v13 = vmul.f32 %v4424_v53, %v3667_v19  ;;  %v3901_v16 = vld [vmem:[%s10271_s3 + $0x598] sm:$0xff]  ;;  %v3900_v19 = vld [vmem:[%s10271_s3 + $0x590] sm:$0xff]  ;;  %v3895_v53 = vld [vmem:[%s10271_s3 + $0x568] sm:$0xff] }
 0x875   :  { %4425 = vpow2.f32 %v4278_v58  ;;  %v3713_v31 = vadd.f32 %v3712_v13, %v400_v55  ;;  %v3889_v55 = vld [vmem:[%s10271_s3 + $0x538] sm:$0xff]  ;;  %v3888_v58 = vld [vmem:[%s10271_s3 + $0x530] sm:$0xff]  ;;  %v3883_v13 = vld [vmem:[%s10271_s3 + $0x508] sm:$0xff] }
 0x882   :  { %v4426_v47 = vpop.eup %4425 }
 0x883   :  { %v3709_v59 = vadd.f32 1.0, %v4426_v47  ;;  %v3877_v47 = vld [vmem:[%s10271_s3 + $0x4d8] sm:$0xff] }
 0x885   :  { %4427 = vrcp.f32 %v3709_v59  ;;  %v3876_v59 = vld [vmem:[%s10271_s3 + $0x4d0] sm:$0xff] }
 0x886   :  { %4429 = vtanh.f32 %v3713_v31  ;;  %v3882_v31 = vld [vmem:[%s10271_s3 + $0x500] sm:$0xff] }
 0x892   :  { %v4428_v38 = vpop.eup %4427 }
 0x893   :  { %v3715_v8 = vsub.f32 1.0, %v4428_v38  ;;  %v4430_v40 = vpop.eup %4429  ;;  %v3717_v1 = vmul.f32 %v4428_v38, %v9541_v36  ;;  %v3811_v36 = vld [vmem:[%s10271_s3 + $0x2c8] sm:$0xff] }
 0x894   :  { %v3871_v38 = vld [vmem:[%s10271_s3 + $0x4a8] sm:$0xff] }
 0x895   :  { %v3716_v50 = vmul.f32 %v4430_v40, %v3715_v8  ;;  %v3870_v8 = vld [vmem:[%s10271_s3 + $0x4a0] sm:$0xff]  ;;  %v3865_v40 = vld [vmem:[%s10271_s3 + $0x478] sm:$0xff] }
 0x897   :  { %v10031_v39 = vadd.f32 %v3717_v1, %v3716_v50  ;;  %v3864_v50 = vld [vmem:[%s10271_s3 + $0x470] sm:$0xff]  ;;  %v3859_v1 = vld [vmem:[%s10271_s3 + $0x448] sm:$0xff] }
 0x899   :  { %3978 = vmatprep.mubr.f32.mxu0 %v10031_v39  ;;  %v4196_v30 = vadd.f32 %v4180_v34, %v10031_v39  ;;  %4049 = vmatprep.mubr.f32.mxu1 %v10031_v39  ;;  %v3858_v34 = vld [vmem:[%s10271_s3 + $0x440] sm:$0xff] }
 0x89a   :  { %3979 = vmatmul.mubr.f32.vlgmr.msra.gmra.mxu0 %v10017_v63  ;;  %4050 = vmatmul.mubr.f32.vlgmr.msra.gmra.mxu1 %v10017_v63 }
 0x89b   :  { %4204 = vst [vmem:[%s10274_s5 + $0x8] sm:$0xff] %v4196_v30  ;;  %4057 = vmatpush1.msra.mxu0 %v3816_v20  ;;  %4120 = vmatprep.mubr.f32.mxu0 %v10031_v39  ;;  %v3853_v20 = vld [vmem:[%s10271_s3 + $0x418] sm:$0xff]  ;;  %v3852_v30 = vld [vmem:[%s10271_s3 + $0x410] sm:$0xff] }
 0x89c   :  { %4058 = vmatprep.subr.mxu0 %v3811_v36  ;;  %v3847_v36 = vld [vmem:[%s10271_s3 + $0x3e8] sm:$0xff] }
 0x89d   :  { %4059 = vmatpush1.msra.mxu0 %v3810_v60  ;;  %v3846_v60 = vld [vmem:[%s10271_s3 + $0x3e0] sm:$0xff] }
 0x89e   :  { %4060 = vmatprep.subr.mxu0 %v3805_v27  ;;  %v3841_v27 = vld [vmem:[%s10271_s3 + $0x3b8] sm:$0xff] }
 0x89f   :  { %4061 = vmatpush1.msra.mxu0 %v3804_v57  ;;  %v3840_v57 = vld [vmem:[%s10271_s3 + $0x3b0] sm:$0xff] }
 0x8a0   :  { %4062 = vmatprep.subr.mxu0 %v3799_v52  ;;  %v3835_v52 = vld [vmem:[%s10271_s3 + $0x388] sm:$0xff] }
 0x8a1   :  { %4063 = vmatpush1.msra.mxu0 %v3798_v24  ;;  %v3834_v24 = vld [vmem:[%s10271_s3 + $0x380] sm:$0xff] }
 0x8a2   :  { %4064 = vmatprep.subr.mxu0 %v3793_v37  ;;  %v3829_v37 = vld [vmem:[%s10271_s3 + $0x358] sm:$0xff] }
 0x8a3   :  { %4065 = vmatpush1.msra.mxu0 %v3792_v6  ;;  %v3828_v6 = vld [vmem:[%s10271_s3 + $0x350] sm:$0xff] }
 0x8a4   :  { %4066 = vmatprep.subr.mxu0 %v3787_v22  ;;  %v3823_v22 = vld [vmem:[%s10271_s3 + $0x328] sm:$0xff] }
 0x8a5   :  { %4067 = vmatpush1.msra.mxu0 %v3786_v12  ;;  %v3822_v12 = vld [vmem:[%s10271_s3 + $0x320] sm:$0xff] }
 0x8a6   :  { %4068 = vmatprep.subr.mxu0 %v3781_v25 }
 0x8a7   :  { %4069 = vmatpush1.msra.mxu0 %v3780_v11 }
 0x8a8   :  { %4070 = vmatprep.subr.mxu0 %v3775_v45 }
 0x8a9   :  { %4071 = vmatpush1.msra.mxu0 %v3774_v4  ;;  %v11398_v4 = vld [vmem:[#allocation14_spill] sm:$0xff] }
 0x8aa   :  { %4072 = vmatprep.subr.mxu0 %v3769_v35 }
 0x8ab   :  { %4073 = vmatpush1.msra.mxu0 %v3768_v43 }
 0x8ac   :  { %4074 = vmatprep.subr.mxu0 %v3763_v23 }
 0x8ad   :  { %4075 = vmatpush1.msra.mxu0 %v3762_v49  ;;  %v11399_v49 = vld [vmem:[#allocation16_spill] sm:$0xff] }
 0x8ae   :  { %4076 = vmatprep.subr.mxu0 %v3757_v51 }
 0x8af   :  { %4077 = vmatpush1.msra.mxu0 %v3756_v14 }
 0x8b0   :  { %4078 = vmatprep.subr.mxu0 %v3751_v15 }
 0x8b1   :  { %4079 = vmatpush1.msra.mxu0 %v3750_v32 }
 0x8b2   :  { %4080 = vmatprep.subr.mxu0 %v3745_v54 }
 0x8b3   :  { %4081 = vmatpush1.msra.mxu0 %v3744_v9 }
 0x8b4   :  { %4082 = vmatprep.subr.mxu0 %v3739_v21 }
 0x8b5   :  { %4083 = vmatpush1.msra.mxu0 %v3738_v62 }
 0x8b6   :  { %4084 = vmatprep.subr.mxu0 %v3733_v18 }
 0x8b7   :  { %4085 = vmatpush1.msra.mxu0 %v3732_v44 }
 0x8b8   :  { %4086 = vmatprep.subr.mxu0 %v3727_v48 }
 0x8b9   :  { %4087 = vmatpush1.msra.mxu0 %v3726_v7 }
 0x8ba   :  { %4088 = vmatprep.subr.mxu0 %v3913_v41 }
 0x8bb   :  { %4089 = vmatpush2.msra.mxu0 %v3912_v61  ;;  %v11401_v61 = vld [vmem:[#allocation112_spill] sm:$0xff] }
 0x8bc   :  { %4090 = vmatprep.subr.mxu0 %v3907_v0  ;;  %v321_v0 = vadd.f32 %v11401_v61, %v6120_v2 }
 0x8bd   :  { %4091 = vmatpush2.msra.mxu0 %v3906_v10 }
 0x8be   :  { %4092 = vmatprep.subr.mxu0 %v3901_v16 }
 0x8bf   :  { %4093 = vmatpush2.msra.mxu0 %v3900_v19 }
 0x8c0   :  { %4094 = vmatprep.subr.mxu0 %v3895_v53 }
 0x8c1   :  { %4095 = vmatpush2.msra.mxu0 %v3894_v46 }
 0x8c2   :  { %4096 = vmatprep.subr.mxu0 %v3889_v55 }
 0x8c3   :  { %4097 = vmatpush2.msra.mxu0 %v3888_v58 }
 0x8c4   :  { %4098 = vmatprep.subr.mxu0 %v3883_v13 }
 0x8c5   :  { %4099 = vmatpush2.msra.mxu0 %v3882_v31 }
 0x8c6   :  { %4100 = vmatprep.subr.mxu0 %v3877_v47  ;;  %v11403_v47 = vld [vmem:[#allocation69_spill] sm:$0xff] }
 0x8c7   :  { %4101 = vmatpush2.msra.mxu0 %v3876_v59  ;;  %v392_v59 = vadd.f32 %v11403_v47, %v5019_v28 }
 0x8c8   :  { %4102 = vmatprep.subr.mxu0 %v3871_v38 }
 0x8c9   :  { %4103 = vmatpush2.msra.mxu0 %v3870_v8 }
 0x8ca   :  { %4104 = vmatprep.subr.mxu0 %v3865_v40 }
 0x8cb   :  { %4105 = vmatpush2.msra.mxu0 %v3864_v50 }
 0x8cc   :  { %4106 = vmatprep.subr.mxu0 %v3859_v1  ;;  %v11404_v1 = vld [vmem:[#allocation79_spill] sm:$0xff] }
 0x8cd   :  { %4107 = vmatpush2.msra.mxu0 %v3858_v34  ;;  %v394_v34 = vadd.f32 %v11404_v1, %v5024_v29 }
 0x8ce   :  { %4108 = vmatprep.subr.mxu0 %v3853_v20 }
 0x8cf   :  { %4109 = vmatpush2.msra.mxu0 %v3852_v30 }
 0x8d0   :  { %4110 = vmatprep.subr.mxu0 %v3847_v36 }
 0x8d1   :  { %4111 = vmatpush2.msra.mxu0 %v3846_v60 }
 0x8d2   :  { %4112 = vmatprep.subr.mxu0 %v3841_v27 }
 0x8d3   :  { %4113 = vmatpush2.msra.mxu0 %v3840_v57 }
 0x8d4   :  { %4114 = vmatprep.subr.mxu0 %v3835_v52 }
 0x8d5   :  { %4115 = vmatpush2.msra.mxu0 %v3834_v24 }
 0x8d6   :  { %4116 = vmatprep.subr.mxu0 %v3829_v37 }
 0x8d7   :  { %4117 = vmatpush2.msra.mxu0 %v3828_v6 }
 0x8d8   :  { %4118 = vmatprep.subr.mxu0 %v3823_v22 }
 0x8d9   :  { %4119 = vmatpush2.msra.mxu0 %v3822_v12 }
 0x8da   :  { %4121 = vmatmul.mubr.f32.vlgmr.msra.gmra.mxu0 %v10017_v63 }
 0x95a   :  { %v3980_v25 = vpop.f32.mrf.mxu0  ;;  %v4051_v15 = vpop.f32.mrf.mxu1 }
 0x95b   :  { %v3981_v11 = vadd.f32 %v3980_v25, %v11389_v5  ;;  %v11400_v5 = vld [vmem:[#allocation43_spill] sm:$0xff] }
 0x95c   :  { %v3982_v45 = vpop.f32.mrf.mxu0  ;;  %v4053_v54 = vpop.f32.mrf.mxu1  ;;  %v281_v62 = vadd.f32 %v11400_v5, %v6123_v42 }
 0x95d   :  { %v4134_v35 = vadd.f32 %v3981_v11, %v11398_v4  ;;  %v3983_v23 = vadd.f32 %v3982_v45, %v10977_v17  ;;  %v4054_v21 = vadd.f32 %v4053_v54, %v11392_v3  ;;  %v4052_v17 = vadd.f32 %v4051_v15, %v10853_v56  ;;  %v11402_v56 = vld [vmem:[#allocation123_spill] sm:$0xff] }
 0x95f   :  { %v4280_v43 = vmul.f32 -1.442695, %v4134_v35  ;;  %v4141_v51 = vadd.f32 %v3983_v23, %v11399_v49  ;;  %v4155_v18 = vadd.f32 %v4054_v21, %v281_v62 }
 0x961   :  { %4431 = vpow2.f32 %v4280_v43  ;;  %v4281_v14 = vmul.f32 -1.442695, %v4141_v51  ;;  %v4282_v48 = vmul.f32 -1.442695, %v4155_v18 }
 0x963   :  { %4433 = vpow2.f32 %v4281_v14 }
 0x96e   :  { %v4432_v32 = vpop.eup %4431 }
 0x96f   :  { %v4138_v9 = vadd.f32 1.0, %v4432_v32 }
 0x970   :  { %v4434_v44 = vpop.eup %4433 }
 0x971   :  { %4435 = vrcp.f32 %v4138_v9  ;;  %v4145_v7 = vadd.f32 1.0, %v4434_v44 }
 0x972   :  { %4437 = vpow2.f32 %v4282_v48 }
 0x973   :  { %4439 = vrcp.f32 %v4145_v7 }
 0x97e   :  { %v4436_v41 = vpop.eup %4435 }
 0x97f   :  { %v4148_v10 = vmul.f32 %v4436_v41, %v4052_v17  ;;  %v4438_v19 = vpop.eup %4437 }
 0x980   :  { %v4440_v3 = vpop.eup %4439  ;;  %v4159_v53 = vadd.f32 1.0, %v4438_v19 }
 0x981   :  { %v4149_v16 = vadd.f32 %v4148_v10, %v321_v0  ;;  %v4151_v46 = vsub.f32 1.0, %v4440_v3  ;;  %v4153_v58 = vmul.f32 %v4440_v3, %v10017_v63 }
 0x983   :  { %4441 = vtanh.f32 %v4149_v16 }
 0x984   :  { %4443 = vrcp.f32 %v4159_v53 }
 0x990   :  { %v4442_v42 = vpop.eup %4441 }
 0x991   :  { %v4152_v55 = vmul.f32 %v4442_v42, %v4151_v46  ;;  %v4444_v50 = vpop.eup %4443 }
 0x993   :  { %v4154_v13 = vadd.f32 %v4153_v58, %v4152_v55 }
 0x995   :  { %v4202_v31 = vadd.f32 %v4154_v13, %v11402_v56  ;;  %4211 = vst [vmem:[%s10275_s6] sm:$0xff] %v4154_v13 }
 0x997   :  { %4210 = vst [vmem:[%s10274_s5 + $0x38] sm:$0xff] %v4202_v31 }
 0x99a   :  { %v4122_v2 = vpop.f32.mrf.mxu0 }
 0x99b   :  { %v4123_v38 = vadd.f32 %v4122_v2, %v6138_v26 }
 0x99c   :  { %v4124_v8 = vpop.f32.mrf.mxu0 }
 0x99d   :  { %v4162_v63 = vadd.f32 %v4123_v38, %v392_v59  ;;  %v4125_v40 = vadd.f32 %v4124_v8, %v6145_v33  ;;  %v4179_v33 = vld [vmem:[%s10274_s5] sm:$0xff] }
 0x99f   :  { %v4283_v20 = vmul.f32 -1.442695, %v4162_v63  ;;  %v4169_v30 = vmul.f32 %v4444_v50, %v4125_v40 }
 0x9a1   :  { %4445 = vpow2.f32 %v4283_v20  ;;  %v4170_v36 = vadd.f32 %v4169_v30, %v394_v34 }
 0x9ae   :  { %v4446_v60 = vpop.eup %4445 }
 0x9af   :  { %v4166_v27 = vadd.f32 1.0, %v4446_v60 }
 0x9b1   :  { %4447 = vrcp.f32 %v4166_v27 }
 0x9b2   :  { %4449 = vtanh.f32 %v4170_v36 }
 0x9be   :  { %v4448_v57 = vpop.eup %4447 }
 0x9bf   :  { %v4172_v28 = vsub.f32 1.0, %v4448_v57  ;;  %v4450_v52 = vpop.eup %4449  ;;  %v4174_v26 = vmul.f32 %v4448_v57, %v10031_v39 }
 0x9c1   :  { %v4173_v24 = vmul.f32 %v4450_v52, %v4172_v28 }
 0x9c3   :  { %v4175_v37 = vadd.f32 %v4174_v26, %v4173_v24 }
 0x9c5   :  { %v4195_v29 = vadd.f32 %v4179_v33, %v4175_v37  ;;  %4285 = vst [vmem:[%s10275_s6 + $0x8] sm:$0xff] %v4175_v37 }
 0x9c7   :  { %4203 = vst [vmem:[%s10274_s5] sm:$0xff] %v4195_v29 }

</bundles_post_ra>
